<compile_context>
chip_gen: v6e
topology: v6e:2x2x1
jax: 0.10.0
libtpu: 0.0.40
codegen_flags: <defaults>
</compile_context>

<pallas_src>
import functools

import jax
import jax.numpy as jnp
from jax.experimental import pallas as pl
from jax.experimental.pallas import tpu as pltpu

LANE = 128
VMEM_LIMIT_BYTES = 48 * 1024 * 1024  # safe on v5e/v6e (128 MiB) and v7x (64 MiB physical)


def _rup(x, m):
    return (x + m - 1) // m * m


def _pad_last(x, target):
    c = x.shape[-1]
    if c == target:
        return x
    return jnp.pad(x, [(0, 0)] * (x.ndim - 1) + [(0, target - c)])


# ----------------------------- Pallas kernels ------------------------------

def _matmul_bias_kernel(x_ref, w_ref, b_ref, o_ref):
    # (TM, K)bf16 @ (K, N)bf16 -> f32 accumulate, + bias, cast to out dtype.
    o_ref[...] = (
        jnp.dot(x_ref[...], w_ref[...], preferred_element_type=jnp.float32)
        + b_ref[...]
    ).astype(o_ref.dtype)


def matmul_bias(x, w, b, out_dtype=jnp.float32):
    """Y = X @ W + b, row-tiled; X/W bf16, f32 accumulation, lane-dense N."""
    M, K = x.shape
    K2, Nc = w.shape
    assert K == K2
    tm = 512 if M >= 512 else _rup(M, 8)
    Mp = _rup(M, tm)
    if Mp != M:
        x = jnp.pad(x, ((0, Mp - M), (0, 0)))
    out = pl.pallas_call(
        _matmul_bias_kernel,
        out_shape=jax.ShapeDtypeStruct((Mp, Nc), out_dtype),
        grid=(Mp // tm,),
        in_specs=[
            pl.BlockSpec((tm, K), lambda i: (i, 0)),
            pl.BlockSpec((K, Nc), lambda i: (0, 0)),   # resident weight
            pl.BlockSpec((1, Nc), lambda i: (0, 0)),
        ],
        out_specs=pl.BlockSpec((tm, Nc), lambda i: (i, 0)),
        compiler_params=pltpu.CompilerParams(
            dimension_semantics=("parallel",),
            vmem_limit_bytes=VMEM_LIMIT_BYTES,
        ),
    )(x, w, b.reshape(1, Nc))
    return out[:M]


def _conv3d_tap_kernel(x0_ref, x1_ref, x2_ref, w_ref, b_ref,
                       y_ref, s_ref, q_ref, *, H, W):
    """Fused 3x3x3 conv (tap loop, no im2col) + bias + per-slab BN partial stats.

    x{0,1,2}_ref: (Rp, Cin) bf16 padded slabs at D indices d, d+1, d+2, where
                  Rp = (H+2)*W + 2 (H padded by 1, flattened rows padded by 1).
    w_ref:        (27, Cin, Cout) bf16, tap-major (kd, kh, kw).
    y_ref:        (H*W, Cout) f32 conv+bias output for this (n, d) slab.
    s_ref/q_ref:  (1, Cout) f32 per-slab sum / sum-of-squares (BN epilogue fusion).
    """
    HW = H * W
    cout = y_ref.shape[-1]
    wpos = jax.lax.broadcasted_iota(jnp.int32, (HW, 1), 0) % W
    left_ok = wpos != 0          # rows allowed to read w-1
    right_ok = wpos != (W - 1)   # rows allowed to read w+1

    acc = jnp.zeros((HW, cout), jnp.float32)
    xs = (x0_ref, x1_ref, x2_ref)
    for kd in range(3):
        xr = xs[kd]
        for kh in range(3):
            for kw in range(3):
                win = xr[pl.ds(kh * W + kw, HW), :]
                if kw == 0:
                    win = jnp.where(left_ok, win, jnp.zeros_like(win))
                elif kw == 2:
                    win = jnp.where(right_ok, win, jnp.zeros_like(win))
                acc = acc + jnp.dot(win, w_ref[kd * 9 + kh * 3 + kw],
                                    preferred_element_type=jnp.float32)

    y = acc + b_ref[...]
    y_ref[...] = y.astype(y_ref.dtype)
    s_ref[...] = jnp.sum(y, axis=0, keepdims=True)
    q_ref[...] = jnp.sum(y * y, axis=0, keepdims=True)


def conv3x3_bias_stats(xp, w_taps, bias, H, W):
    """xp: (N, D+2, (H+2)*W+2, Cin) bf16;  w_taps: (27, Cin, Cout) bf16;  bias: (Cout,) f32."""
    N, Dp2, Rp, Cin = xp.shape
    D = Dp2 - 2
    Cout = w_taps.shape[-1]
    assert w_taps.shape[1] == Cin and Rp == (H + 2) * W + 2
    HW = H * W
    kernel = functools.partial(_conv3d_tap_kernel, H=H, W=W)
    y, s, q = pl.pallas_call(
        kernel,
        out_shape=(
            jax.ShapeDtypeStruct((N, D, HW, Cout), jnp.float32),
            jax.ShapeDtypeStruct((N, D, 1, Cout), jnp.float32),
            jax.ShapeDtypeStruct((N, D, 1, Cout), jnp.float32),
        ),
        grid=(N, D),
        in_specs=[
            pl.BlockSpec((None, None, Rp, Cin), lambda n, d: (n, d, 0, 0)),
            pl.BlockSpec((None, None, Rp, Cin), lambda n, d: (n, d + 1, 0, 0)),
            pl.BlockSpec((None, None, Rp, Cin), lambda n, d: (n, d + 2, 0, 0)),
            pl.BlockSpec((27, Cin, Cout), lambda n, d: (0, 0, 0)),  # resident weight
            pl.BlockSpec((1, Cout), lambda n, d: (0, 0)),
        ],
        out_specs=(
            pl.BlockSpec((None, None, HW, Cout), lambda n, d: (n, d, 0, 0)),
            pl.BlockSpec((None, None, 1, Cout), lambda n, d: (n, d, 0, 0)),
            pl.BlockSpec((None, None, 1, Cout), lambda n, d: (n, d, 0, 0)),
        ),
        compiler_params=pltpu.CompilerParams(
            dimension_semantics=("parallel", "parallel"),
            vmem_limit_bytes=VMEM_LIMIT_BYTES,
        ),
    )(xp, xp, xp, w_taps, bias.reshape(1, Cout))
    return y, s, q


def _scale_shift_relu_kernel(y_ref, a_ref, b_ref, o_ref):
    o_ref[...] = jnp.maximum(y_ref[...] * a_ref[...] + b_ref[...], 0.0).astype(o_ref.dtype)


def scale_shift_relu(y, scale, shift, out_dtype):
    """Tiled y*scale+shift, ReLU.  y: (N, D, H*W, C) f32."""
    N, D, HW, C = y.shape
    return pl.pallas_call(
        _scale_shift_relu_kernel,
        out_shape=jax.ShapeDtypeStruct((N, D, HW, C), out_dtype),
        grid=(N, D),
        in_specs=[
            pl.BlockSpec((None, None, HW, C), lambda n, d: (n, d, 0, 0)),
            pl.BlockSpec((1, C), lambda n, d: (0, 0)),
            pl.BlockSpec((1, C), lambda n, d: (0, 0)),
        ],
        out_specs=pl.BlockSpec((None, None, HW, C), lambda n, d: (n, d, 0, 0)),
        compiler_params=pltpu.CompilerParams(
            dimension_semantics=("parallel", "parallel"),
            vmem_limit_bytes=VMEM_LIMIT_BYTES,
        ),
    )(y, scale.reshape(1, C), shift.reshape(1, C))


# ------------------------------- glue (JAX) --------------------------------

def pad_for_conv(x_ndhwc):
    """(N, D, H, W, C) -> (N, D+2, (H+2)*W + 2, C): pad D/H by 1, flatten (H+2, W), pad rows by 1."""
    N, D, H, W, C = x_ndhwc.shape
    xp = jnp.pad(x_ndhwc, ((0, 0), (1, 1), (1, 1), (0, 0), (0, 0)))
    xp = xp.reshape(N, D + 2, (H + 2) * W, C)
    return jnp.pad(xp, ((0, 0), (0, 0), (1, 1), (0, 0)))


def bn_scale_shift(s, q, count, gamma, beta, eps=1e-5):
    """Combine per-slab partial stats into per-channel scale/shift (training-mode BN)."""
    s = jnp.sum(s, axis=(0, 1, 2))
    q = jnp.sum(q, axis=(0, 1, 2))
    mean = s / count
    var = jnp.maximum(q / count - mean * mean, 0.0)   # biased variance (torch normalization)
    scale = gamma * jax.lax.rsqrt(var + eps)
    shift = beta - mean * scale
    return scale, shift


def init_upblock_params(key, c1, c2, cout, cmid, k=3, p=2):
    keys = jax.random.split(key, 6)
    s = 0.1
    return {
        # torch ConvTranspose3d weight: (in_ch, out_ch, kd, kh, kw)
        "up_w": jax.random.normal(keys[0], (c1, c1, p, p, p), jnp.float32) * s,
        "up_b": jax.random.normal(keys[1], (c1,), jnp.float32) * s,
        # torch Conv3d weight: (out_ch, in_ch, kd, kh, kw)
        "conv1_w": jax.random.normal(keys[2], (cmid, c1 + c2, k, k, k), jnp.float32) * s,
        "conv1_b": jax.random.normal(keys[3], (cmid,), jnp.float32) * s,
        "bn1_g": jnp.ones((cmid,), jnp.float32),
        "bn1_b": jnp.zeros((cmid,), jnp.float32),
        "conv2_w": jax.random.normal(keys[4], (cout, cmid, k, k, k), jnp.float32) * s,
        "conv2_b": jax.random.normal(keys[5], (cout,), jnp.float32) * s,
        "bn2_g": jnp.ones((cout,), jnp.float32),
        "bn2_b": jnp.zeros((cout,), jnp.float32),
    }


def upblock_forward(params, x1_ncdhw, x2_ncdhw, p=2):
    # TODO(synk): residual=True skip branch of BasicLayers not implemented; UpBlock default is residual=False.
    N, C1, D1, H1, W1 = x1_ncdhw.shape
    _, C2, D, H, W = x2_ncdhw.shape
    assert (D, H, W) == (D1 * p, H1 * p, W1 * p)
    Cmid = params["conv1_b"].shape[0]
    Cout = params["conv2_b"].shape[0]
    C1p, C2p = _rup(C1, LANE), _rup(C2, LANE)
    Cinp = C1p + C2p
    Cmidp, Coutp = _rup(Cmid, LANE), _rup(Cout, LANE)

    # --- ConvTranspose3d(C1, C1, p, p, 0): per-voxel matmul (bf16) + pixel shuffle ---
    x1 = jnp.transpose(x1_ncdhw, (0, 2, 3, 4, 1)).reshape(N * D1 * H1 * W1, C1)
    x1 = _pad_last(x1, C1p).astype(jnp.bfloat16)
    wt = jnp.transpose(params["up_w"], (0, 2, 3, 4, 1))            # (C1, p, p, p, C1)
    wt = jnp.pad(wt, ((0, C1p - C1), (0, 0), (0, 0), (0, 0), (0, C1p - C1)))
    wt = wt.reshape(C1p, p ** 3 * C1p).astype(jnp.bfloat16)
    bt = jnp.tile(_pad_last(params["up_b"], C1p), (p ** 3,))
    y = matmul_bias(x1, wt, bt, out_dtype=jnp.bfloat16)            # (M1, p^3*C1p)
    y = y.reshape(N, D1, H1, W1, p, p, p, C1p)
    y = jnp.transpose(y, (0, 1, 4, 2, 5, 3, 6, 7)).reshape(N, D, H, W, C1p)

    # --- concat along channels (channel-padded layout: [0:C1]=up, [C1p:C1p+C2]=x2) ---
    x2 = _pad_last(jnp.transpose(x2_ncdhw, (0, 2, 3, 4, 1)), C2p).astype(jnp.bfloat16)
    x = jnp.concatenate([y, x2], axis=-1)                          # (N, D, H, W, Cinp)
    # TODO(synk): pixel-shuffle / concat / spatial-pad relayouts still run as XLA copies;
    # they could be folded into the conv kernel's input index_map for another HBM pass saved.

    # --- conv1 (fused tap-loop, bias + BN partial stats in epilogue) -> BN -> ReLU ---
    w1 = jnp.transpose(params["conv1_w"], (2, 3, 4, 1, 0)).reshape(27, C1 + C2, Cmid)
    w1p = jnp.zeros((27, Cinp, Cmidp), jnp.float32)
    w1p = w1p.at[:, :C1, :Cmid].set(w1[:, :C1, :])
    w1p = w1p.at[:, C1p:C1p + C2, :Cmid].set(w1[:, C1:, :])
    b1p = _pad_last(params["conv1_b"], Cmidp)
    h, s1, q1 = conv3x3_bias_stats(pad_for_conv(x), w1p.astype(jnp.bfloat16), b1p, H, W)
    sc1, sh1 = bn_scale_shift(s1, q1, N * D * H * W,
                              _pad_last(params["bn1_g"], Cmidp),
                              _pad_last(params["bn1_b"], Cmidp))
    h = scale_shift_relu(h, sc1, sh1, jnp.bfloat16)                # (N, D, H*W, Cmidp)

    # --- conv2 -> BN -> ReLU ---
    w2 = jnp.transpose(params["conv2_w"], (2, 3, 4, 1, 0)).reshape(27, Cmid, Cout)
    w2p = jnp.zeros((27, Cmidp, Coutp), jnp.float32).at[:, :Cmid, :Cout].set(w2)
    b2p = _pad_last(params["conv2_b"], Coutp)
    hp = pad_for_conv(h.reshape(N, D, H, W, Cmidp))
    g, s2, q2 = conv3x3_bias_stats(hp, w2p.astype(jnp.bfloat16), b2p, H, W)
    sc2, sh2 = bn_scale_shift(s2, q2, N * D * H * W,
                              _pad_last(params["bn2_g"], Coutp),
                              _pad_last(params["bn2_b"], Coutp))
    out = scale_shift_relu(g, sc2, sh2, jnp.float32)               # (N, D, H*W, Coutp)

    out = out.reshape(N, D, H, W, Coutp)[..., :Cout]
    return jnp.transpose(out, (0, 4, 1, 2, 3))                     # back to NCDHW


# --------------------------- pure-JAX reference -----------------------------
# Uses the same precision policy as the kernels (bf16 matmul operands, f32 accumulation,
# f32 elementwise), so the check validates the Pallas implementation tightly.

def reference_forward(params, x1_ncdhw, x2_ncdhw, p=2, eps=1e-5):
    bf = lambda a: a.astype(jnp.bfloat16)
    N, C1, D1, H1, W1 = x1_ncdhw.shape
    x1 = jnp.transpose(x1_ncdhw, (0, 2, 3, 4, 1))
    wt = jnp.transpose(params["up_w"], (0, 2, 3, 4, 1))            # (ci, kd, kh, kw, co)
    up = jnp.einsum("ndhwi,iabco->ndahbwco", bf(x1), bf(wt),
                    preferred_element_type=jnp.float32)
    up = up.reshape(N, D1 * p, H1 * p, W1 * p, C1) + params["up_b"]
    x2 = jnp.transpose(x2_ncdhw, (0, 2, 3, 4, 1))
    x = jnp.concatenate([up, x2], axis=-1)

    def conv_bn_relu(x, w_t, b, g, bb):
        w = jnp.transpose(w_t, (2, 3, 4, 1, 0))                    # DHWIO
        y = jax.lax.conv_general_dilated(
            bf(x), bf(w), window_strides=(1, 1, 1), padding="SAME",
            dimension_numbers=("NDHWC", "DHWIO", "NDHWC"),
            preferred_element_type=jnp.float32) + b
        mean = jnp.mean(y, axis=(0, 1, 2, 3), keepdims=True)
        var = jnp.mean((y - mean) ** 2, axis=(0, 1, 2, 3), keepdims=True)
        y = (y - mean) * jax.lax.rsqrt(var + eps) * g + bb
        return jnp.maximum(y, 0.0)

    y = conv_bn_relu(x, params["conv1_w"], params["conv1_b"],
                     params["bn1_g"], params["bn1_b"])
    y = conv_bn_relu(y, params["conv2_w"], params["conv2_b"],
                     params["bn2_g"], params["bn2_b"])
    return jnp.transpose(y, (0, 4, 1, 2, 3))


# --------------------------------- main -------------------------------------

if __name__ == "__main__":
    key = jax.random.PRNGKey(0)
    k_p, k_x1, k_x2 = jax.random.split(key, 3)

    N, C1, C2, Cmid, Cout = 2, 4, 4, 8, 8
    D1 = H1 = W1 = 4
    pool = 2

    params = init_upblock_params(k_p, C1, C2, Cout, Cmid, k=3, p=pool)
    x1 = jax.random.normal(k_x1, (N, C1, D1, H1, W1), jnp.float32)               # NCDHW
    x2 = jax.random.normal(k_x2, (N, C2, D1 * pool, H1 * pool, W1 * pool), jnp.float32)

    out = jax.jit(upblock_forward)(params, x1, x2)
    out = jax.block_until_ready(out)

    assert out.shape == (N, Cout, D1 * pool, H1 * pool, W1 * pool)

    ref = reference_forward(params, x1, x2)
    max_err = float(jnp.max(jnp.abs(out - ref)))
    assert max_err < 2e-2, f"mismatch vs reference: {max_err}"

    print("KERNEL_OK")
</pallas_src>

<mosaic_0001>
module attributes {stable_mosaic.version = 11 : i64} {
  func.func @_matmul_bias_kernel(%arg0: i32, %arg1: memref<128x128xbf16, #tpu.memory_space<vmem>>, %arg2: memref<128x1024xbf16, #tpu.memory_space<vmem>>, %arg3: memref<1x1024xf32, #tpu.memory_space<vmem>>, %arg4: memref<128x1024xbf16, #tpu.memory_space<vmem>>) attributes {dimension_semantics = [#tpu.dimension_semantics<parallel>], iteration_bounds = array<i64: 1>, scalar_prefetch = 0 : i64, scratch_operands = 0 : i64, tpu.core_type = #tpu.core_type<tc>, window_params = [{transform_indices = @transform_0, window_bounds = array<i64: 128, 128>}, {pipeline_mode = #tpu.pipeline_mode<synchronous>, transform_indices = @transform_1, window_bounds = array<i64: 128, 1024>}, {pipeline_mode = #tpu.pipeline_mode<synchronous>, transform_indices = @transform_2, window_bounds = array<i64: 1, 1024>}, {transform_indices = @transform_3, window_bounds = array<i64: 128, 1024>}]} {
    %c0 = arith.constant 0 : index
    %c0_0 = arith.constant 0 : index
    %0 = vector.load %arg1[%c0, %c0_0] : memref<128x128xbf16, #tpu.memory_space<vmem>>, vector<128x128xbf16>
    %c0_1 = arith.constant 0 : index
    %c0_2 = arith.constant 0 : index
    %1 = vector.load %arg2[%c0_1, %c0_2] : memref<128x1024xbf16, #tpu.memory_space<vmem>>, vector<128x1024xbf16>
    %cst = arith.constant dense<0.000000e+00> : vector<128x1024xf32>
    %2 = tpu.matmul %0, %1, %cst {dimension_numbers = #tpu.dot_dimension_numbers<[1], [0], [0], [1], [0, 0, 1, 1], [], []>} : vector<128x128xbf16>, vector<128x1024xbf16>, vector<128x1024xf32> -> vector<128x1024xf32>
    %c0_3 = arith.constant 0 : index
    %c0_4 = arith.constant 0 : index
    %3 = vector.load %arg3[%c0_3, %c0_4] : memref<1x1024xf32, #tpu.memory_space<vmem>>, vector<1x1024xf32>
    %4 = vector.broadcast %3 : vector<1x1024xf32> to vector<128x1024xf32>
    %5 = arith.addf %2, %4 : vector<128x1024xf32>
    %6 = arith.truncf %5 : vector<128x1024xf32> to vector<128x1024xbf16>
    %c0_5 = arith.constant 0 : index
    %c0_6 = arith.constant 0 : index
    %7 = vector.load %arg4[%c0_5, %c0_6] : memref<128x1024xbf16, #tpu.memory_space<vmem>>, vector<128x1024xbf16>
    tpu.vector_store %arg4[%c0_5, %c0_6], %6 {strides = array<i32>} : memref<128x1024xbf16, #tpu.memory_space<vmem>>, vector<128x1024xbf16>,
    return
  }
  func.func @transform_0(%arg0: i32) -> (i32, i32) {
    %c0_i32 = arith.constant 0 : i32
    %c0_i32_0 = arith.constant 0 : i32
    return %arg0, %c0_i32 : i32, i32
  }
  func.func @transform_1(%arg0: i32) -> (i32, i32) {
    %c0_i32 = arith.constant 0 : i32
    %c0_i32_0 = arith.constant 0 : i32
    %c0_i32_1 = arith.constant 0 : i32
    return %c0_i32, %c0_i32_0 : i32, i32
  }
  func.func @transform_2(%arg0: i32) -> (i32, i32) {
    %c0_i32 = arith.constant 0 : i32
    %c0_i32_0 = arith.constant 0 : i32
    %c0_i32_1 = arith.constant 0 : i32
    return %c0_i32, %c0_i32_0 : i32, i32
  }
  func.func @transform_3(%arg0: i32) -> (i32, i32) {
    %c0_i32 = arith.constant 0 : i32
    %c0_i32_0 = arith.constant 0 : i32
    return %arg0, %c0_i32 : i32, i32
  }
}

module attributes {stable_mosaic.version = 11 : i64} {
  func.func @_conv3d_tap_kernel(%arg0: i32, %arg1: i32, %arg2: memref<1x1x82x256xbf16, #tpu.memory_space<vmem>>, %arg3: memref<1x1x82x256xbf16, #tpu.memory_space<vmem>>, %arg4: memref<1x1x82x256xbf16, #tpu.memory_space<vmem>>, %arg5: memref<27x256x128xbf16, #tpu.memory_space<vmem>>, %arg6: memref<1x128xf32, #tpu.memory_space<vmem>>, %arg7: memref<1x1x64x128xf32, #tpu.memory_space<vmem>>, %arg8: memref<1x1x1x128xf32, #tpu.memory_space<vmem>>, %arg9: memref<1x1x1x128xf32, #tpu.memory_space<vmem>>) attributes {dimension_semantics = [#tpu.dimension_semantics<parallel>, #tpu.dimension_semantics<parallel>], iteration_bounds = array<i64: 2, 8>, scalar_prefetch = 0 : i64, scratch_operands = 0 : i64, tpu.core_type = #tpu.core_type<tc>, window_params = [{transform_indices = @transform_0, window_bounds = array<i64: 1, 1, 82, 256>}, {transform_indices = @transform_1, window_bounds = array<i64: 1, 1, 82, 256>}, {transform_indices = @transform_2, window_bounds = array<i64: 1, 1, 82, 256>}, {pipeline_mode = #tpu.pipeline_mode<synchronous>, transform_indices = @transform_3, window_bounds = array<i64: 27, 256, 128>}, {pipeline_mode = #tpu.pipeline_mode<synchronous>, transform_indices = @transform_4, window_bounds = array<i64: 1, 128>}, {transform_indices = @transform_5, window_bounds = array<i64: 1, 1, 64, 128>}, {transform_indices = @transform_6, window_bounds = array<i64: 1, 1, 1, 128>}, {transform_indices = @transform_7, window_bounds = array<i64: 1, 1, 1, 128>}]} {
    %0 = tpu.iota {dimensions = array<i32: 0>} : vector<64x1xi32>
    %c8_i32 = arith.constant 8 : i32
    %c0_i32 = arith.constant 0 : i32
    %1 = arith.cmpi eq, %c8_i32, %c0_i32 : i32
    %c1_i32 = arith.constant 1 : i32
    %2 = arith.select %1, %c1_i32, %c8_i32 : i32
    %3 = vector.broadcast %2 : i32 to vector<64x1xi32>
    %4 = arith.remsi %0, %3 : vector<64x1xi32>
    %c0_i32_0 = arith.constant 0 : i32
    %5 = vector.broadcast %c0_i32_0 : i32 to vector<64x1xi32>
    %6 = arith.cmpi ne, %4, %5 : vector<64x1xi32>
    %c0_i32_1 = arith.constant 0 : i32
    %7 = vector.broadcast %c0_i32_1 : i32 to vector<64x1xi32>
    %8 = arith.cmpi slt, %4, %7 : vector<64x1xi32>
    %c0_i32_2 = arith.constant 0 : i32
    %9 = arith.cmpi slt, %2, %c0_i32_2 : i32
    %10 = vector.broadcast %9 : i1 to vector<64x1xi1>
    %11 = vector.broadcast %10 : vector<64x1xi1> to vector<64x1xi1>
    %12 = arith.xori %8, %11 : vector<64x1xi1>
    %13 = arith.andi %12, %6 : vector<64x1xi1>
    %14 = vector.broadcast %2 : i32 to vector<64x1xi32>
    %15 = arith.addi %4, %14 : vector<64x1xi32>
    %16 = arith.select %13, %15, %4 : vector<64x1xi1>, vector<64x1xi32>
    %c0_i32_3 = arith.constant 0 : i32
    %17 = vector.broadcast %c0_i32_3 : i32 to vector<64x1xi32>
    %18 = arith.cmpi ne, %16, %17 : vector<64x1xi32>
    %c7_i32 = arith.constant 7 : i32
    %19 = vector.broadcast %c7_i32 : i32 to vector<64x1xi32>
    %20 = arith.cmpi ne, %16, %19 : vector<64x1xi32>
    %cst = arith.constant 0.000000e+00 : f32
    %21 = vector.broadcast %cst : f32 to vector<64x128xf32>
    %c0 = arith.constant 0 : index
    %c0_4 = arith.constant 0 : index
    %c0_5 = arith.constant 0 : index
    %c0_6 = arith.constant 0 : index
    %22 = vector.load %arg2[%c0, %c0_4, %c0_5, %c0_6] : memref<1x1x82x256xbf16, #tpu.memory_space<vmem>>, vector<1x1x64x256xbf16>
    %23 = vector.shape_cast %22 : vector<1x1x64x256xbf16> to vector<64x256xbf16>
    %cst_7 = arith.constant 0.000000e+00 : bf16
    %24 = vector.broadcast %cst_7 : bf16 to vector<64x256xbf16>
    %25 = vector.shape_cast %18 : vector<64x1xi1> to vector<64x1xi1>
    %26 = vector.broadcast %25 : vector<64x1xi1> to vector<64x256xi1>
    %27 = arith.select %26, %23, %24 : vector<64x256xi1>, vector<64x256xbf16>
    %c0_8 = arith.constant 0 : index
    %c0_9 = arith.constant 0 : index
    %c0_10 = arith.constant 0 : index
    %28 = vector.load %arg5[%c0_8, %c0_9, %c0_10] : memref<27x256x128xbf16, #tpu.memory_space<vmem>>, vector<1x256x128xbf16>
    %29 = vector.shape_cast %28 : vector<1x256x128xbf16> to vector<256x128xbf16>
    %cst_11 = arith.constant dense<0.000000e+00> : vector<64x128xf32>
    %30 = tpu.matmul %27, %29, %cst_11 {dimension_numbers = #tpu.dot_dimension_numbers<[1], [0], [0], [1], [0, 0, 1, 1], [], []>} : vector<64x256xbf16>, vector<256x128xbf16>, vector<64x128xf32> -> vector<64x128xf32>
    %31 = arith.addf %21, %30 : vector<64x128xf32>
    %c0_12 = arith.constant 0 : index
    %c0_13 = arith.constant 0 : index
    %c1 = arith.constant 1 : index
    %c0_14 = arith.constant 0 : index
    %32 = vector.load %arg2[%c0_12, %c0_13, %c1, %c0_14] : memref<1x1x82x256xbf16, #tpu.memory_space<vmem>>, vector<1x1x64x256xbf16>
    %33 = vector.shape_cast %32 : vector<1x1x64x256xbf16> to vector<64x256xbf16>
    %c1_15 = arith.constant 1 : index
    %c0_16 = arith.constant 0 : index
    %c0_17 = arith.constant 0 : index
    %34 = vector.load %arg5[%c1_15, %c0_16, %c0_17] : memref<27x256x128xbf16, #tpu.memory_space<vmem>>, vector<1x256x128xbf16>
    %35 = vector.shape_cast %34 : vector<1x256x128xbf16> to vector<256x128xbf16>
    %cst_18 = arith.constant dense<0.000000e+00> : vector<64x128xf32>
    %36 = tpu.matmul %33, %35, %cst_18 {dimension_numbers = #tpu.dot_dimension_numbers<[1], [0], [0], [1], [0, 0, 1, 1], [], []>} : vector<64x256xbf16>, vector<256x128xbf16>, vector<64x128xf32> -> vector<64x128xf32>
    %37 = arith.addf %31, %36 : vector<64x128xf32>
    %c0_19 = arith.constant 0 : index
    %c0_20 = arith.constant 0 : index
    %c2 = arith.constant 2 : index
    %c0_21 = arith.constant 0 : index
    %38 = vector.load %arg2[%c0_19, %c0_20, %c2, %c0_21] : memref<1x1x82x256xbf16, #tpu.memory_space<vmem>>, vector<1x1x64x256xbf16>
    %39 = vector.shape_cast %38 : vector<1x1x64x256xbf16> to vector<64x256xbf16>
    %cst_22 = arith.constant 0.000000e+00 : bf16
    %40 = vector.broadcast %cst_22 : bf16 to vector<64x256xbf16>
    %41 = vector.shape_cast %20 : vector<64x1xi1> to vector<64x1xi1>
    %42 = vector.broadcast %41 : vector<64x1xi1> to vector<64x256xi1>
    %43 = arith.select %42, %39, %40 : vector<64x256xi1>, vector<64x256xbf16>
    %c2_23 = arith.constant 2 : index
    %c0_24 = arith.constant 0 : index
    %c0_25 = arith.constant 0 : index
    %44 = vector.load %arg5[%c2_23, %c0_24, %c0_25] : memref<27x256x128xbf16, #tpu.memory_space<vmem>>, vector<1x256x128xbf16>
    %45 = vector.shape_cast %44 : vector<1x256x128xbf16> to vector<256x128xbf16>
    %cst_26 = arith.constant dense<0.000000e+00> : vector<64x128xf32>
    %46 = tpu.matmul %43, %45, %cst_26 {dimension_numbers = #tpu.dot_dimension_numbers<[1], [0], [0], [1], [0, 0, 1, 1], [], []>} : vector<64x256xbf16>, vector<256x128xbf16>, vector<64x128xf32> -> vector<64x128xf32>
    %47 = arith.addf %37, %46 : vector<64x128xf32>
    %c0_27 = arith.constant 0 : index
    %c0_28 = arith.constant 0 : index
    %c8 = arith.constant 8 : index
    %c0_29 = arith.constant 0 : index
    %48 = vector.load %arg2[%c0_27, %c0_28, %c8, %c0_29] : memref<1x1x82x256xbf16, #tpu.memory_space<vmem>>, vector<1x1x64x256xbf16>
    %49 = vector.shape_cast %48 : vector<1x1x64x256xbf16> to vector<64x256xbf16>
    %cst_30 = arith.constant 0.000000e+00 : bf16
    %50 = vector.broadcast %cst_30 : bf16 to vector<64x256xbf16>
    %51 = vector.shape_cast %18 : vector<64x1xi1> to vector<64x1xi1>
    %52 = vector.broadcast %51 : vector<64x1xi1> to vector<64x256xi1>
    %53 = arith.select %52, %49, %50 : vector<64x256xi1>, vector<64x256xbf16>
    %c3 = arith.constant 3 : index
    %c0_31 = arith.constant 0 : index
    %c0_32 = arith.constant 0 : index
    %54 = vector.load %arg5[%c3, %c0_31, %c0_32] : memref<27x256x128xbf16, #tpu.memory_space<vmem>>, vector<1x256x128xbf16>
    %55 = vector.shape_cast %54 : vector<1x256x128xbf16> to vector<256x128xbf16>
    %cst_33 = arith.constant dense<0.000000e+00> : vector<64x128xf32>
    %56 = tpu.matmul %53, %55, %cst_33 {dimension_numbers = #tpu.dot_dimension_numbers<[1], [0], [0], [1], [0, 0, 1, 1], [], []>} : vector<64x256xbf16>, vector<256x128xbf16>, vector<64x128xf32> -> vector<64x128xf32>
    %57 = arith.addf %47, %56 : vector<64x128xf32>
    %c0_34 = arith.constant 0 : index
    %c0_35 = arith.constant 0 : index
    %c9 = arith.constant 9 : index
    %c0_36 = arith.constant 0 : index
    %58 = vector.load %arg2[%c0_34, %c0_35, %c9, %c0_36] : memref<1x1x82x256xbf16, #tpu.memory_space<vmem>>, vector<1x1x64x256xbf16>
    %59 = vector.shape_cast %58 : vector<1x1x64x256xbf16> to vector<64x256xbf16>
    %c4 = arith.constant 4 : index
    %c0_37 = arith.constant 0 : index
    %c0_38 = arith.constant 0 : index
    %60 = vector.load %arg5[%c4, %c0_37, %c0_38] : memref<27x256x128xbf16, #tpu.memory_space<vmem>>, vector<1x256x128xbf16>
    %61 = vector.shape_cast %60 : vector<1x256x128xbf16> to vector<256x128xbf16>
    %cst_39 = arith.constant dense<0.000000e+00> : vector<64x128xf32>
    %62 = tpu.matmul %59, %61, %cst_39 {dimension_numbers = #tpu.dot_dimension_numbers<[1], [0], [0], [1], [0, 0, 1, 1], [], []>} : vector<64x256xbf16>, vector<256x128xbf16>, vector<64x128xf32> -> vector<64x128xf32>
    %63 = arith.addf %57, %62 : vector<64x128xf32>
    %c0_40 = arith.constant 0 : index
    %c0_41 = arith.constant 0 : index
    %c10 = arith.constant 10 : index
    %c0_42 = arith.constant 0 : index
    %64 = vector.load %arg2[%c0_40, %c0_41, %c10, %c0_42] : memref<1x1x82x256xbf16, #tpu.memory_space<vmem>>, vector<1x1x64x256xbf16>
    %65 = vector.shape_cast %64 : vector<1x1x64x256xbf16> to vector<64x256xbf16>
    %cst_43 = arith.constant 0.000000e+00 : bf16
    %66 = vector.broadcast %cst_43 : bf16 to vector<64x256xbf16>
    %67 = vector.shape_cast %20 : vector<64x1xi1> to vector<64x1xi1>
    %68 = vector.broadcast %67 : vector<64x1xi1> to vector<64x256xi1>
    %69 = arith.select %68, %65, %66 : vector<64x256xi1>, vector<64x256xbf16>
    %c5 = arith.constant 5 : index
    %c0_44 = arith.constant 0 : index
    %c0_45 = arith.constant 0 : index
    %70 = vector.load %arg5[%c5, %c0_44, %c0_45] : memref<27x256x128xbf16, #tpu.memory_space<vmem>>, vector<1x256x128xbf16>
    %71 = vector.shape_cast %70 : vector<1x256x128xbf16> to vector<256x128xbf16>
    %cst_46 = arith.constant dense<0.000000e+00> : vector<64x128xf32>
    %72 = tpu.matmul %69, %71, %cst_46 {dimension_numbers = #tpu.dot_dimension_numbers<[1], [0], [0], [1], [0, 0, 1, 1], [], []>} : vector<64x256xbf16>, vector<256x128xbf16>, vector<64x128xf32> -> vector<64x128xf32>
    %73 = arith.addf %63, %72 : vector<64x128xf32>
    %c0_47 = arith.constant 0 : index
    %c0_48 = arith.constant 0 : index
    %c16 = arith.constant 16 : index
    %c0_49 = arith.constant 0 : index
    %74 = vector.load %arg2[%c0_47, %c0_48, %c16, %c0_49] : memref<1x1x82x256xbf16, #tpu.memory_space<vmem>>, vector<1x1x64x256xbf16>
    %75 = vector.shape_cast %74 : vector<1x1x64x256xbf16> to vector<64x256xbf16>
    %cst_50 = arith.constant 0.000000e+00 : bf16
    %76 = vector.broadcast %cst_50 : bf16 to vector<64x256xbf16>
    %77 = vector.shape_cast %18 : vector<64x1xi1> to vector<64x1xi1>
    %78 = vector.broadcast %77 : vector<64x1xi1> to vector<64x256xi1>
    %79 = arith.select %78, %75, %76 : vector<64x256xi1>, vector<64x256xbf16>
    %c6 = arith.constant 6 : index
    %c0_51 = arith.constant 0 : index
    %c0_52 = arith.constant 0 : index
    %80 = vector.load %arg5[%c6, %c0_51, %c0_52] : memref<27x256x128xbf16, #tpu.memory_space<vmem>>, vector<1x256x128xbf16>
    %81 = vector.shape_cast %80 : vector<1x256x128xbf16> to vector<256x128xbf16>
    %cst_53 = arith.constant dense<0.000000e+00> : vector<64x128xf32>
    %82 = tpu.matmul %79, %81, %cst_53 {dimension_numbers = #tpu.dot_dimension_numbers<[1], [0], [0], [1], [0, 0, 1, 1], [], []>} : vector<64x256xbf16>, vector<256x128xbf16>, vector<64x128xf32> -> vector<64x128xf32>
    %83 = arith.addf %73, %82 : vector<64x128xf32>
    %c0_54 = arith.constant 0 : index
    %c0_55 = arith.constant 0 : index
    %c17 = arith.constant 17 : index
    %c0_56 = arith.constant 0 : index
    %84 = vector.load %arg2[%c0_54, %c0_55, %c17, %c0_56] : memref<1x1x82x256xbf16, #tpu.memory_space<vmem>>, vector<1x1x64x256xbf16>
    %85 = vector.shape_cast %84 : vector<1x1x64x256xbf16> to vector<64x256xbf16>
    %c7 = arith.constant 7 : index
    %c0_57 = arith.constant 0 : index
    %c0_58 = arith.constant 0 : index
    %86 = vector.load %arg5[%c7, %c0_57, %c0_58] : memref<27x256x128xbf16, #tpu.memory_space<vmem>>, vector<1x256x128xbf16>
    %87 = vector.shape_cast %86 : vector<1x256x128xbf16> to vector<256x128xbf16>
    %cst_59 = arith.constant dense<0.000000e+00> : vector<64x128xf32>
    %88 = tpu.matmul %85, %87, %cst_59 {dimension_numbers = #tpu.dot_dimension_numbers<[1], [0], [0], [1], [0, 0, 1, 1], [], []>} : vector<64x256xbf16>, vector<256x128xbf16>, vector<64x128xf32> -> vector<64x128xf32>
    %89 = arith.addf %83, %88 : vector<64x128xf32>
    %c0_60 = arith.constant 0 : index
    %c0_61 = arith.constant 0 : index
    %c18 = arith.constant 18 : index
    %c0_62 = arith.constant 0 : index
    %90 = vector.load %arg2[%c0_60, %c0_61, %c18, %c0_62] : memref<1x1x82x256xbf16, #tpu.memory_space<vmem>>, vector<1x1x64x256xbf16>
    %91 = vector.shape_cast %90 : vector<1x1x64x256xbf16> to vector<64x256xbf16>
    %cst_63 = arith.constant 0.000000e+00 : bf16
    %92 = vector.broadcast %cst_63 : bf16 to vector<64x256xbf16>
    %93 = vector.shape_cast %20 : vector<64x1xi1> to vector<64x1xi1>
    %94 = vector.broadcast %93 : vector<64x1xi1> to vector<64x256xi1>
    %95 = arith.select %94, %91, %92 : vector<64x256xi1>, vector<64x256xbf16>
    %c8_64 = arith.constant 8 : index
    %c0_65 = arith.constant 0 : index
    %c0_66 = arith.constant 0 : index
    %96 = vector.load %arg5[%c8_64, %c0_65, %c0_66] : memref<27x256x128xbf16, #tpu.memory_space<vmem>>, vector<1x256x128xbf16>
    %97 = vector.shape_cast %96 : vector<1x256x128xbf16> to vector<256x128xbf16>
    %cst_67 = arith.constant dense<0.000000e+00> : vector<64x128xf32>
    %98 = tpu.matmul %95, %97, %cst_67 {dimension_numbers = #tpu.dot_dimension_numbers<[1], [0], [0], [1], [0, 0, 1, 1], [], []>} : vector<64x256xbf16>, vector<256x128xbf16>, vector<64x128xf32> -> vector<64x128xf32>
    %99 = arith.addf %89, %98 : vector<64x128xf32>
    %c0_68 = arith.constant 0 : index
    %c0_69 = arith.constant 0 : index
    %c0_70 = arith.constant 0 : index
    %c0_71 = arith.constant 0 : index
    %100 = vector.load %arg3[%c0_68, %c0_69, %c0_70, %c0_71] : memref<1x1x82x256xbf16, #tpu.memory_space<vmem>>, vector<1x1x64x256xbf16>
    %101 = vector.shape_cast %100 : vector<1x1x64x256xbf16> to vector<64x256xbf16>
    %cst_72 = arith.constant 0.000000e+00 : bf16
    %102 = vector.broadcast %cst_72 : bf16 to vector<64x256xbf16>
    %103 = vector.shape_cast %18 : vector<64x1xi1> to vector<64x1xi1>
    %104 = vector.broadcast %103 : vector<64x1xi1> to vector<64x256xi1>
    %105 = arith.select %104, %101, %102 : vector<64x256xi1>, vector<64x256xbf16>
    %c9_73 = arith.constant 9 : index
    %c0_74 = arith.constant 0 : index
    %c0_75 = arith.constant 0 : index
    %106 = vector.load %arg5[%c9_73, %c0_74, %c0_75] : memref<27x256x128xbf16, #tpu.memory_space<vmem>>, vector<1x256x128xbf16>
    %107 = vector.shape_cast %106 : vector<1x256x128xbf16> to vector<256x128xbf16>
    %cst_76 = arith.constant dense<0.000000e+00> : vector<64x128xf32>
    %108 = tpu.matmul %105, %107, %cst_76 {dimension_numbers = #tpu.dot_dimension_numbers<[1], [0], [0], [1], [0, 0, 1, 1], [], []>} : vector<64x256xbf16>, vector<256x128xbf16>, vector<64x128xf32> -> vector<64x128xf32>
    %109 = arith.addf %99, %108 : vector<64x128xf32>
    %c0_77 = arith.constant 0 : index
    %c0_78 = arith.constant 0 : index
    %c1_79 = arith.constant 1 : index
    %c0_80 = arith.constant 0 : index
    %110 = vector.load %arg3[%c0_77, %c0_78, %c1_79, %c0_80] : memref<1x1x82x256xbf16, #tpu.memory_space<vmem>>, vector<1x1x64x256xbf16>
    %111 = vector.shape_cast %110 : vector<1x1x64x256xbf16> to vector<64x256xbf16>
    %c10_81 = arith.constant 10 : index
    %c0_82 = arith.constant 0 : index
    %c0_83 = arith.constant 0 : index
    %112 = vector.load %arg5[%c10_81, %c0_82, %c0_83] : memref<27x256x128xbf16, #tpu.memory_space<vmem>>, vector<1x256x128xbf16>
    %113 = vector.shape_cast %112 : vector<1x256x128xbf16> to vector<256x128xbf16>
    %cst_84 = arith.constant dense<0.000000e+00> : vector<64x128xf32>
    %114 = tpu.matmul %111, %113, %cst_84 {dimension_numbers = #tpu.dot_dimension_numbers<[1], [0], [0], [1], [0, 0, 1, 1], [], []>} : vector<64x256xbf16>, vector<256x128xbf16>, vector<64x128xf32> -> vector<64x128xf32>
    %115 = arith.addf %109, %114 : vector<64x128xf32>
    %c0_85 = arith.constant 0 : index
    %c0_86 = arith.constant 0 : index
    %c2_87 = arith.constant 2 : index
    %c0_88 = arith.constant 0 : index
    %116 = vector.load %arg3[%c0_85, %c0_86, %c2_87, %c0_88] : memref<1x1x82x256xbf16, #tpu.memory_space<vmem>>, vector<1x1x64x256xbf16>
    %117 = vector.shape_cast %116 : vector<1x1x64x256xbf16> to vector<64x256xbf16>
    %cst_89 = arith.constant 0.000000e+00 : bf16
    %118 = vector.broadcast %cst_89 : bf16 to vector<64x256xbf16>
    %119 = vector.shape_cast %20 : vector<64x1xi1> to vector<64x1xi1>
    %120 = vector.broadcast %119 : vector<64x1xi1> to vector<64x256xi1>
    %121 = arith.select %120, %117, %118 : vector<64x256xi1>, vector<64x256xbf16>
    %c11 = arith.constant 11 : index
    %c0_90 = arith.constant 0 : index
    %c0_91 = arith.constant 0 : index
    %122 = vector.load %arg5[%c11, %c0_90, %c0_91] : memref<27x256x128xbf16, #tpu.memory_space<vmem>>, vector<1x256x128xbf16>
    %123 = vector.shape_cast %122 : vector<1x256x128xbf16> to vector<256x128xbf16>
    %cst_92 = arith.constant dense<0.000000e+00> : vector<64x128xf32>
    %124 = tpu.matmul %121, %123, %cst_92 {dimension_numbers = #tpu.dot_dimension_numbers<[1], [0], [0], [1], [0, 0, 1, 1], [], []>} : vector<64x256xbf16>, vector<256x128xbf16>, vector<64x128xf32> -> vector<64x128xf32>
    %125 = arith.addf %115, %124 : vector<64x128xf32>
    %c0_93 = arith.constant 0 : index
    %c0_94 = arith.constant 0 : index
    %c8_95 = arith.constant 8 : index
    %c0_96 = arith.constant 0 : index
    %126 = vector.load %arg3[%c0_93, %c0_94, %c8_95, %c0_96] : memref<1x1x82x256xbf16, #tpu.memory_space<vmem>>, vector<1x1x64x256xbf16>
    %127 = vector.shape_cast %126 : vector<1x1x64x256xbf16> to vector<64x256xbf16>
    %cst_97 = arith.constant 0.000000e+00 : bf16
    %128 = vector.broadcast %cst_97 : bf16 to vector<64x256xbf16>
    %129 = vector.shape_cast %18 : vector<64x1xi1> to vector<64x1xi1>
    %130 = vector.broadcast %129 : vector<64x1xi1> to vector<64x256xi1>
    %131 = arith.select %130, %127, %128 : vector<64x256xi1>, vector<64x256xbf16>
    %c12 = arith.constant 12 : index
    %c0_98 = arith.constant 0 : index
    %c0_99 = arith.constant 0 : index
    %132 = vector.load %arg5[%c12, %c0_98, %c0_99] : memref<27x256x128xbf16, #tpu.memory_space<vmem>>, vector<1x256x128xbf16>
    %133 = vector.shape_cast %132 : vector<1x256x128xbf16> to vector<256x128xbf16>
    %cst_100 = arith.constant dense<0.000000e+00> : vector<64x128xf32>
    %134 = tpu.matmul %131, %133, %cst_100 {dimension_numbers = #tpu.dot_dimension_numbers<[1], [0], [0], [1], [0, 0, 1, 1], [], []>} : vector<64x256xbf16>, vector<256x128xbf16>, vector<64x128xf32> -> vector<64x128xf32>
    %135 = arith.addf %125, %134 : vector<64x128xf32>
    %c0_101 = arith.constant 0 : index
    %c0_102 = arith.constant 0 : index
    %c9_103 = arith.constant 9 : index
    %c0_104 = arith.constant 0 : index
    %136 = vector.load %arg3[%c0_101, %c0_102, %c9_103, %c0_104] : memref<1x1x82x256xbf16, #tpu.memory_space<vmem>>, vector<1x1x64x256xbf16>
    %137 = vector.shape_cast %136 : vector<1x1x64x256xbf16> to vector<64x256xbf16>
    %c13 = arith.constant 13 : index
    %c0_105 = arith.constant 0 : index
    %c0_106 = arith.constant 0 : index
    %138 = vector.load %arg5[%c13, %c0_105, %c0_106] : memref<27x256x128xbf16, #tpu.memory_space<vmem>>, vector<1x256x128xbf16>
    %139 = vector.shape_cast %138 : vector<1x256x128xbf16> to vector<256x128xbf16>
    %cst_107 = arith.constant dense<0.000000e+00> : vector<64x128xf32>
    %140 = tpu.matmul %137, %139, %cst_107 {dimension_numbers = #tpu.dot_dimension_numbers<[1], [0], [0], [1], [0, 0, 1, 1], [], []>} : vector<64x256xbf16>, vector<256x128xbf16>, vector<64x128xf32> -> vector<64x128xf32>
    %141 = arith.addf %135, %140 : vector<64x128xf32>
    %c0_108 = arith.constant 0 : index
    %c0_109 = arith.constant 0 : index
    %c10_110 = arith.constant 10 : index
    %c0_111 = arith.constant 0 : index
    %142 = vector.load %arg3[%c0_108, %c0_109, %c10_110, %c0_111] : memref<1x1x82x256xbf16, #tpu.memory_space<vmem>>, vector<1x1x64x256xbf16>
    %143 = vector.shape_cast %142 : vector<1x1x64x256xbf16> to vector<64x256xbf16>
    %cst_112 = arith.constant 0.000000e+00 : bf16
    %144 = vector.broadcast %cst_112 : bf16 to vector<64x256xbf16>
    %145 = vector.shape_cast %20 : vector<64x1xi1> to vector<64x1xi1>
    %146 = vector.broadcast %145 : vector<64x1xi1> to vector<64x256xi1>
    %147 = arith.select %146, %143, %144 : vector<64x256xi1>, vector<64x256xbf16>
    %c14 = arith.constant 14 : index
    %c0_113 = arith.constant 0 : index
    %c0_114 = arith.constant 0 : index
    %148 = vector.load %arg5[%c14, %c0_113, %c0_114] : memref<27x256x128xbf16, #tpu.memory_space<vmem>>, vector<1x256x128xbf16>
    %149 = vector.shape_cast %148 : vector<1x256x128xbf16> to vector<256x128xbf16>
    %cst_115 = arith.constant dense<0.000000e+00> : vector<64x128xf32>
    %150 = tpu.matmul %147, %149, %cst_115 {dimension_numbers = #tpu.dot_dimension_numbers<[1], [0], [0], [1], [0, 0, 1, 1], [], []>} : vector<64x256xbf16>, vector<256x128xbf16>, vector<64x128xf32> -> vector<64x128xf32>
    %151 = arith.addf %141, %150 : vector<64x128xf32>
    %c0_116 = arith.constant 0 : index
    %c0_117 = arith.constant 0 : index
    %c16_118 = arith.constant 16 : index
    %c0_119 = arith.constant 0 : index
    %152 = vector.load %arg3[%c0_116, %c0_117, %c16_118, %c0_119] : memref<1x1x82x256xbf16, #tpu.memory_space<vmem>>, vector<1x1x64x256xbf16>
    %153 = vector.shape_cast %152 : vector<1x1x64x256xbf16> to vector<64x256xbf16>
    %cst_120 = arith.constant 0.000000e+00 : bf16
    %154 = vector.broadcast %cst_120 : bf16 to vector<64x256xbf16>
    %155 = vector.shape_cast %18 : vector<64x1xi1> to vector<64x1xi1>
    %156 = vector.broadcast %155 : vector<64x1xi1> to vector<64x256xi1>
    %157 = arith.select %156, %153, %154 : vector<64x256xi1>, vector<64x256xbf16>
    %c15 = arith.constant 15 : index
    %c0_121 = arith.constant 0 : index
    %c0_122 = arith.constant 0 : index
    %158 = vector.load %arg5[%c15, %c0_121, %c0_122] : memref<27x256x128xbf16, #tpu.memory_space<vmem>>, vector<1x256x128xbf16>
    %159 = vector.shape_cast %158 : vector<1x256x128xbf16> to vector<256x128xbf16>
    %cst_123 = arith.constant dense<0.000000e+00> : vector<64x128xf32>
    %160 = tpu.matmul %157, %159, %cst_123 {dimension_numbers = #tpu.dot_dimension_numbers<[1], [0], [0], [1], [0, 0, 1, 1], [], []>} : vector<64x256xbf16>, vector<256x128xbf16>, vector<64x128xf32> -> vector<64x128xf32>
    %161 = arith.addf %151, %160 : vector<64x128xf32>
    %c0_124 = arith.constant 0 : index
    %c0_125 = arith.constant 0 : index
    %c17_126 = arith.constant 17 : index
    %c0_127 = arith.constant 0 : index
    %162 = vector.load %arg3[%c0_124, %c0_125, %c17_126, %c0_127] : memref<1x1x82x256xbf16, #tpu.memory_space<vmem>>, vector<1x1x64x256xbf16>
    %163 = vector.shape_cast %162 : vector<1x1x64x256xbf16> to vector<64x256xbf16>
    %c16_128 = arith.constant 16 : index
    %c0_129 = arith.constant 0 : index
    %c0_130 = arith.constant 0 : index
    %164 = vector.load %arg5[%c16_128, %c0_129, %c0_130] : memref<27x256x128xbf16, #tpu.memory_space<vmem>>, vector<1x256x128xbf16>
    %165 = vector.shape_cast %164 : vector<1x256x128xbf16> to vector<256x128xbf16>
    %cst_131 = arith.constant dense<0.000000e+00> : vector<64x128xf32>
    %166 = tpu.matmul %163, %165, %cst_131 {dimension_numbers = #tpu.dot_dimension_numbers<[1], [0], [0], [1], [0, 0, 1, 1], [], []>} : vector<64x256xbf16>, vector<256x128xbf16>, vector<64x128xf32> -> vector<64x128xf32>
    %167 = arith.addf %161, %166 : vector<64x128xf32>
    %c0_132 = arith.constant 0 : index
    %c0_133 = arith.constant 0 : index
    %c18_134 = arith.constant 18 : index
    %c0_135 = arith.constant 0 : index
    %168 = vector.load %arg3[%c0_132, %c0_133, %c18_134, %c0_135] : memref<1x1x82x256xbf16, #tpu.memory_space<vmem>>, vector<1x1x64x256xbf16>
    %169 = vector.shape_cast %168 : vector<1x1x64x256xbf16> to vector<64x256xbf16>
    %cst_136 = arith.constant 0.000000e+00 : bf16
    %170 = vector.broadcast %cst_136 : bf16 to vector<64x256xbf16>
    %171 = vector.shape_cast %20 : vector<64x1xi1> to vector<64x1xi1>
    %172 = vector.broadcast %171 : vector<64x1xi1> to vector<64x256xi1>
    %173 = arith.select %172, %169, %170 : vector<64x256xi1>, vector<64x256xbf16>
    %c17_137 = arith.constant 17 : index
    %c0_138 = arith.constant 0 : index
    %c0_139 = arith.constant 0 : index
    %174 = vector.load %arg5[%c17_137, %c0_138, %c0_139] : memref<27x256x128xbf16, #tpu.memory_space<vmem>>, vector<1x256x128xbf16>
    %175 = vector.shape_cast %174 : vector<1x256x128xbf16> to vector<256x128xbf16>
    %cst_140 = arith.constant dense<0.000000e+00> : vector<64x128xf32>
    %176 = tpu.matmul %173, %175, %cst_140 {dimension_numbers = #tpu.dot_dimension_numbers<[1], [0], [0], [1], [0, 0, 1, 1], [], []>} : vector<64x256xbf16>, vector<256x128xbf16>, vector<64x128xf32> -> vector<64x128xf32>
    %177 = arith.addf %167, %176 : vector<64x128xf32>
    %c0_141 = arith.constant 0 : index
    %c0_142 = arith.constant 0 : index
    %c0_143 = arith.constant 0 : index
    %c0_144 = arith.constant 0 : index
    %178 = vector.load %arg4[%c0_141, %c0_142, %c0_143, %c0_144] : memref<1x1x82x256xbf16, #tpu.memory_space<vmem>>, vector<1x1x64x256xbf16>
    %179 = vector.shape_cast %178 : vector<1x1x64x256xbf16> to vector<64x256xbf16>
    %cst_145 = arith.constant 0.000000e+00 : bf16
    %180 = vector.broadcast %cst_145 : bf16 to vector<64x256xbf16>
    %181 = vector.shape_cast %18 : vector<64x1xi1> to vector<64x1xi1>
    %182 = vector.broadcast %181 : vector<64x1xi1> to vector<64x256xi1>
    %183 = arith.select %182, %179, %180 : vector<64x256xi1>, vector<64x256xbf16>
    %c18_146 = arith.constant 18 : index
    %c0_147 = arith.constant 0 : index
    %c0_148 = arith.constant 0 : index
    %184 = vector.load %arg5[%c18_146, %c0_147, %c0_148] : memref<27x256x128xbf16, #tpu.memory_space<vmem>>, vector<1x256x128xbf16>
    %185 = vector.shape_cast %184 : vector<1x256x128xbf16> to vector<256x128xbf16>
    %cst_149 = arith.constant dense<0.000000e+00> : vector<64x128xf32>
    %186 = tpu.matmul %183, %185, %cst_149 {dimension_numbers = #tpu.dot_dimension_numbers<[1], [0], [0], [1], [0, 0, 1, 1], [], []>} : vector<64x256xbf16>, vector<256x128xbf16>, vector<64x128xf32> -> vector<64x128xf32>
    %187 = arith.addf %177, %186 : vector<64x128xf32>
    %c0_150 = arith.constant 0 : index
    %c0_151 = arith.constant 0 : index
    %c1_152 = arith.constant 1 : index
    %c0_153 = arith.constant 0 : index
    %188 = vector.load %arg4[%c0_150, %c0_151, %c1_152, %c0_153] : memref<1x1x82x256xbf16, #tpu.memory_space<vmem>>, vector<1x1x64x256xbf16>
    %189 = vector.shape_cast %188 : vector<1x1x64x256xbf16> to vector<64x256xbf16>
    %c19 = arith.constant 19 : index
    %c0_154 = arith.constant 0 : index
    %c0_155 = arith.constant 0 : index
    %190 = vector.load %arg5[%c19, %c0_154, %c0_155] : memref<27x256x128xbf16, #tpu.memory_space<vmem>>, vector<1x256x128xbf16>
    %191 = vector.shape_cast %190 : vector<1x256x128xbf16> to vector<256x128xbf16>
    %cst_156 = arith.constant dense<0.000000e+00> : vector<64x128xf32>
    %192 = tpu.matmul %189, %191, %cst_156 {dimension_numbers = #tpu.dot_dimension_numbers<[1], [0], [0], [1], [0, 0, 1, 1], [], []>} : vector<64x256xbf16>, vector<256x128xbf16>, vector<64x128xf32> -> vector<64x128xf32>
    %193 = arith.addf %187, %192 : vector<64x128xf32>
    %c0_157 = arith.constant 0 : index
    %c0_158 = arith.constant 0 : index
    %c2_159 = arith.constant 2 : index
    %c0_160 = arith.constant 0 : index
    %194 = vector.load %arg4[%c0_157, %c0_158, %c2_159, %c0_160] : memref<1x1x82x256xbf16, #tpu.memory_space<vmem>>, vector<1x1x64x256xbf16>
    %195 = vector.shape_cast %194 : vector<1x1x64x256xbf16> to vector<64x256xbf16>
    %cst_161 = arith.constant 0.000000e+00 : bf16
    %196 = vector.broadcast %cst_161 : bf16 to vector<64x256xbf16>
    %197 = vector.shape_cast %20 : vector<64x1xi1> to vector<64x1xi1>
    %198 = vector.broadcast %197 : vector<64x1xi1> to vector<64x256xi1>
    %199 = arith.select %198, %195, %196 : vector<64x256xi1>, vector<64x256xbf16>
    %c20 = arith.constant 20 : index
    %c0_162 = arith.constant 0 : index
    %c0_163 = arith.constant 0 : index
    %200 = vector.load %arg5[%c20, %c0_162, %c0_163] : memref<27x256x128xbf16, #tpu.memory_space<vmem>>, vector<1x256x128xbf16>
    %201 = vector.shape_cast %200 : vector<1x256x128xbf16> to vector<256x128xbf16>
    %cst_164 = arith.constant dense<0.000000e+00> : vector<64x128xf32>
    %202 = tpu.matmul %199, %201, %cst_164 {dimension_numbers = #tpu.dot_dimension_numbers<[1], [0], [0], [1], [0, 0, 1, 1], [], []>} : vector<64x256xbf16>, vector<256x128xbf16>, vector<64x128xf32> -> vector<64x128xf32>
    %203 = arith.addf %193, %202 : vector<64x128xf32>
    %c0_165 = arith.constant 0 : index
    %c0_166 = arith.constant 0 : index
    %c8_167 = arith.constant 8 : index
    %c0_168 = arith.constant 0 : index
    %204 = vector.load %arg4[%c0_165, %c0_166, %c8_167, %c0_168] : memref<1x1x82x256xbf16, #tpu.memory_space<vmem>>, vector<1x1x64x256xbf16>
    %205 = vector.shape_cast %204 : vector<1x1x64x256xbf16> to vector<64x256xbf16>
    %cst_169 = arith.constant 0.000000e+00 : bf16
    %206 = vector.broadcast %cst_169 : bf16 to vector<64x256xbf16>
    %207 = vector.shape_cast %18 : vector<64x1xi1> to vector<64x1xi1>
    %208 = vector.broadcast %207 : vector<64x1xi1> to vector<64x256xi1>
    %209 = arith.select %208, %205, %206 : vector<64x256xi1>, vector<64x256xbf16>
    %c21 = arith.constant 21 : index
    %c0_170 = arith.constant 0 : index
    %c0_171 = arith.constant 0 : index
    %210 = vector.load %arg5[%c21, %c0_170, %c0_171] : memref<27x256x128xbf16, #tpu.memory_space<vmem>>, vector<1x256x128xbf16>
    %211 = vector.shape_cast %210 : vector<1x256x128xbf16> to vector<256x128xbf16>
    %cst_172 = arith.constant dense<0.000000e+00> : vector<64x128xf32>
    %212 = tpu.matmul %209, %211, %cst_172 {dimension_numbers = #tpu.dot_dimension_numbers<[1], [0], [0], [1], [0, 0, 1, 1], [], []>} : vector<64x256xbf16>, vector<256x128xbf16>, vector<64x128xf32> -> vector<64x128xf32>
    %213 = arith.addf %203, %212 : vector<64x128xf32>
    %c0_173 = arith.constant 0 : index
    %c0_174 = arith.constant 0 : index
    %c9_175 = arith.constant 9 : index
    %c0_176 = arith.constant 0 : index
    %214 = vector.load %arg4[%c0_173, %c0_174, %c9_175, %c0_176] : memref<1x1x82x256xbf16, #tpu.memory_space<vmem>>, vector<1x1x64x256xbf16>
    %215 = vector.shape_cast %214 : vector<1x1x64x256xbf16> to vector<64x256xbf16>
    %c22 = arith.constant 22 : index
    %c0_177 = arith.constant 0 : index
    %c0_178 = arith.constant 0 : index
    %216 = vector.load %arg5[%c22, %c0_177, %c0_178] : memref<27x256x128xbf16, #tpu.memory_space<vmem>>, vector<1x256x128xbf16>
    %217 = vector.shape_cast %216 : vector<1x256x128xbf16> to vector<256x128xbf16>
    %cst_179 = arith.constant dense<0.000000e+00> : vector<64x128xf32>
    %218 = tpu.matmul %215, %217, %cst_179 {dimension_numbers = #tpu.dot_dimension_numbers<[1], [0], [0], [1], [0, 0, 1, 1], [], []>} : vector<64x256xbf16>, vector<256x128xbf16>, vector<64x128xf32> -> vector<64x128xf32>
    %219 = arith.addf %213, %218 : vector<64x128xf32>
    %c0_180 = arith.constant 0 : index
    %c0_181 = arith.constant 0 : index
    %c10_182 = arith.constant 10 : index
    %c0_183 = arith.constant 0 : index
    %220 = vector.load %arg4[%c0_180, %c0_181, %c10_182, %c0_183] : memref<1x1x82x256xbf16, #tpu.memory_space<vmem>>, vector<1x1x64x256xbf16>
    %221 = vector.shape_cast %220 : vector<1x1x64x256xbf16> to vector<64x256xbf16>
    %cst_184 = arith.constant 0.000000e+00 : bf16
    %222 = vector.broadcast %cst_184 : bf16 to vector<64x256xbf16>
    %223 = vector.shape_cast %20 : vector<64x1xi1> to vector<64x1xi1>
    %224 = vector.broadcast %223 : vector<64x1xi1> to vector<64x256xi1>
    %225 = arith.select %224, %221, %222 : vector<64x256xi1>, vector<64x256xbf16>
    %c23 = arith.constant 23 : index
    %c0_185 = arith.constant 0 : index
    %c0_186 = arith.constant 0 : index
    %226 = vector.load %arg5[%c23, %c0_185, %c0_186] : memref<27x256x128xbf16, #tpu.memory_space<vmem>>, vector<1x256x128xbf16>
    %227 = vector.shape_cast %226 : vector<1x256x128xbf16> to vector<256x128xbf16>
    %cst_187 = arith.constant dense<0.000000e+00> : vector<64x128xf32>
    %228 = tpu.matmul %225, %227, %cst_187 {dimension_numbers = #tpu.dot_dimension_numbers<[1], [0], [0], [1], [0, 0, 1, 1], [], []>} : vector<64x256xbf16>, vector<256x128xbf16>, vector<64x128xf32> -> vector<64x128xf32>
    %229 = arith.addf %219, %228 : vector<64x128xf32>
    %c0_188 = arith.constant 0 : index
    %c0_189 = arith.constant 0 : index
    %c16_190 = arith.constant 16 : index
    %c0_191 = arith.constant 0 : index
    %230 = vector.load %arg4[%c0_188, %c0_189, %c16_190, %c0_191] : memref<1x1x82x256xbf16, #tpu.memory_space<vmem>>, vector<1x1x64x256xbf16>
    %231 = vector.shape_cast %230 : vector<1x1x64x256xbf16> to vector<64x256xbf16>
    %cst_192 = arith.constant 0.000000e+00 : bf16
    %232 = vector.broadcast %cst_192 : bf16 to vector<64x256xbf16>
    %233 = vector.shape_cast %18 : vector<64x1xi1> to vector<64x1xi1>
    %234 = vector.broadcast %233 : vector<64x1xi1> to vector<64x256xi1>
    %235 = arith.select %234, %231, %232 : vector<64x256xi1>, vector<64x256xbf16>
    %c24 = arith.constant 24 : index
    %c0_193 = arith.constant 0 : index
    %c0_194 = arith.constant 0 : index
    %236 = vector.load %arg5[%c24, %c0_193, %c0_194] : memref<27x256x128xbf16, #tpu.memory_space<vmem>>, vector<1x256x128xbf16>
    %237 = vector.shape_cast %236 : vector<1x256x128xbf16> to vector<256x128xbf16>
    %cst_195 = arith.constant dense<0.000000e+00> : vector<64x128xf32>
    %238 = tpu.matmul %235, %237, %cst_195 {dimension_numbers = #tpu.dot_dimension_numbers<[1], [0], [0], [1], [0, 0, 1, 1], [], []>} : vector<64x256xbf16>, vector<256x128xbf16>, vector<64x128xf32> -> vector<64x128xf32>
    %239 = arith.addf %229, %238 : vector<64x128xf32>
    %c0_196 = arith.constant 0 : index
    %c0_197 = arith.constant 0 : index
    %c17_198 = arith.constant 17 : index
    %c0_199 = arith.constant 0 : index
    %240 = vector.load %arg4[%c0_196, %c0_197, %c17_198, %c0_199] : memref<1x1x82x256xbf16, #tpu.memory_space<vmem>>, vector<1x1x64x256xbf16>
    %241 = vector.shape_cast %240 : vector<1x1x64x256xbf16> to vector<64x256xbf16>
    %c25 = arith.constant 25 : index
    %c0_200 = arith.constant 0 : index
    %c0_201 = arith.constant 0 : index
    %242 = vector.load %arg5[%c25, %c0_200, %c0_201] : memref<27x256x128xbf16, #tpu.memory_space<vmem>>, vector<1x256x128xbf16>
    %243 = vector.shape_cast %242 : vector<1x256x128xbf16> to vector<256x128xbf16>
    %cst_202 = arith.constant dense<0.000000e+00> : vector<64x128xf32>
    %244 = tpu.matmul %241, %243, %cst_202 {dimension_numbers = #tpu.dot_dimension_numbers<[1], [0], [0], [1], [0, 0, 1, 1], [], []>} : vector<64x256xbf16>, vector<256x128xbf16>, vector<64x128xf32> -> vector<64x128xf32>
    %245 = arith.addf %239, %244 : vector<64x128xf32>
    %c0_203 = arith.constant 0 : index
    %c0_204 = arith.constant 0 : index
    %c18_205 = arith.constant 18 : index
    %c0_206 = arith.constant 0 : index
    %246 = vector.load %arg4[%c0_203, %c0_204, %c18_205, %c0_206] : memref<1x1x82x256xbf16, #tpu.memory_space<vmem>>, vector<1x1x64x256xbf16>
    %247 = vector.shape_cast %246 : vector<1x1x64x256xbf16> to vector<64x256xbf16>
    %cst_207 = arith.constant 0.000000e+00 : bf16
    %248 = vector.broadcast %cst_207 : bf16 to vector<64x256xbf16>
    %249 = vector.shape_cast %20 : vector<64x1xi1> to vector<64x1xi1>
    %250 = vector.broadcast %249 : vector<64x1xi1> to vector<64x256xi1>
    %251 = arith.select %250, %247, %248 : vector<64x256xi1>, vector<64x256xbf16>
    %c26 = arith.constant 26 : index
    %c0_208 = arith.constant 0 : index
    %c0_209 = arith.constant 0 : index
    %252 = vector.load %arg5[%c26, %c0_208, %c0_209] : memref<27x256x128xbf16, #tpu.memory_space<vmem>>, vector<1x256x128xbf16>
    %253 = vector.shape_cast %252 : vector<1x256x128xbf16> to vector<256x128xbf16>
    %cst_210 = arith.constant dense<0.000000e+00> : vector<64x128xf32>
    %254 = tpu.matmul %251, %253, %cst_210 {dimension_numbers = #tpu.dot_dimension_numbers<[1], [0], [0], [1], [0, 0, 1, 1], [], []>} : vector<64x256xbf16>, vector<256x128xbf16>, vector<64x128xf32> -> vector<64x128xf32>
    %255 = arith.addf %245, %254 : vector<64x128xf32>
    %c0_211 = arith.constant 0 : index
    %c0_212 = arith.constant 0 : index
    %256 = vector.load %arg6[%c0_211, %c0_212] : memref<1x128xf32, #tpu.memory_space<vmem>>, vector<1x128xf32>
    %257 = vector.broadcast %256 : vector<1x128xf32> to vector<64x128xf32>
    %258 = arith.addf %255, %257 : vector<64x128xf32>
    %c0_213 = arith.constant 0 : index
    %c0_214 = arith.constant 0 : index
    %c0_215 = arith.constant 0 : index
    %c0_216 = arith.constant 0 : index
    %259 = vector.load %arg7[%c0_213, %c0_214, %c0_215, %c0_216] : memref<1x1x64x128xf32, #tpu.memory_space<vmem>>, vector<1x1x64x128xf32>
    %260 = vector.shape_cast %259 : vector<1x1x64x128xf32> to vector<64x128xf32>
    %261 = vector.shape_cast %258 : vector<64x128xf32> to vector<1x1x64x128xf32>
    tpu.vector_store %arg7[%c0_213, %c0_214, %c0_215, %c0_216], %261 {strides = array<i32>} : memref<1x1x64x128xf32, #tpu.memory_space<vmem>>, vector<1x1x64x128xf32>,
    %cst_217 = arith.constant dense<0.000000e+00> : vector<128xf32>
    %262 = vector.multi_reduction <add>, %258, %cst_217 [0] : vector<64x128xf32> to vector<128xf32>
    %263 = vector.shape_cast %262 : vector<128xf32> to vector<1x128xf32>
    %c0_218 = arith.constant 0 : index
    %c0_219 = arith.constant 0 : index
    %c0_220 = arith.constant 0 : index
    %c0_221 = arith.constant 0 : index
    %264 = vector.load %arg8[%c0_218, %c0_219, %c0_220, %c0_221] : memref<1x1x1x128xf32, #tpu.memory_space<vmem>>, vector<1x1x1x128xf32>
    %265 = vector.shape_cast %264 : vector<1x1x1x128xf32> to vector<1x128xf32>
    %266 = vector.shape_cast %263 : vector<1x128xf32> to vector<1x1x1x128xf32>
    tpu.vector_store %arg8[%c0_218, %c0_219, %c0_220, %c0_221], %266 {strides = array<i32>} : memref<1x1x1x128xf32, #tpu.memory_space<vmem>>, vector<1x1x1x128xf32>,
    %267 = arith.mulf %258, %258 : vector<64x128xf32>
    %cst_222 = arith.constant dense<0.000000e+00> : vector<128xf32>
    %268 = vector.multi_reduction <add>, %267, %cst_222 [0] : vector<64x128xf32> to vector<128xf32>
    %269 = vector.shape_cast %268 : vector<128xf32> to vector<1x128xf32>
    %c0_223 = arith.constant 0 : index
    %c0_224 = arith.constant 0 : index
    %c0_225 = arith.constant 0 : index
    %c0_226 = arith.constant 0 : index
    %270 = vector.load %arg9[%c0_223, %c0_224, %c0_225, %c0_226] : memref<1x1x1x128xf32, #tpu.memory_space<vmem>>, vector<1x1x1x128xf32>
    %271 = vector.shape_cast %270 : vector<1x1x1x128xf32> to vector<1x128xf32>
    %272 = vector.shape_cast %269 : vector<1x128xf32> to vector<1x1x1x128xf32>
    tpu.vector_store %arg9[%c0_223, %c0_224, %c0_225, %c0_226], %272 {strides = array<i32>} : memref<1x1x1x128xf32, #tpu.memory_space<vmem>>, vector<1x1x1x128xf32>,
    return
  }
  func.func @transform_0(%arg0: i32, %arg1: i32) -> (i32, i32, i32, i32) {
    %c0_i32 = arith.constant 0 : i32
    %c0_i32_0 = arith.constant 0 : i32
    %c0_i32_1 = arith.constant 0 : i32
    return %arg0, %arg1, %c0_i32, %c0_i32_0 : i32, i32, i32, i32
  }
  func.func @transform_1(%arg0: i32, %arg1: i32) -> (i32, i32, i32, i32) {
    %c1_i32 = arith.constant 1 : i32
    %0 = arith.addi %arg1, %c1_i32 : i32
    %c0_i32 = arith.constant 0 : i32
    %c0_i32_0 = arith.constant 0 : i32
    %c0_i32_1 = arith.constant 0 : i32
    return %arg0, %0, %c0_i32, %c0_i32_0 : i32, i32, i32, i32
  }
  func.func @transform_2(%arg0: i32, %arg1: i32) -> (i32, i32, i32, i32) {
    %c2_i32 = arith.constant 2 : i32
    %0 = arith.addi %arg1, %c2_i32 : i32
    %c0_i32 = arith.constant 0 : i32
    %c0_i32_0 = arith.constant 0 : i32
    %c0_i32_1 = arith.constant 0 : i32
    return %arg0, %0, %c0_i32, %c0_i32_0 : i32, i32, i32, i32
  }
  func.func @transform_3(%arg0: i32, %arg1: i32) -> (i32, i32, i32) {
    %c0_i32 = arith.constant 0 : i32
    %c0_i32_0 = arith.constant 0 : i32
    %c0_i32_1 = arith.constant 0 : i32
    %c0_i32_2 = arith.constant 0 : i32
    return %c0_i32, %c0_i32_0, %c0_i32_1 : i32, i32, i32
  }
  func.func @transform_4(%arg0: i32, %arg1: i32) -> (i32, i32) {
    %c0_i32 = arith.constant 0 : i32
    %c0_i32_0 = arith.constant 0 : i32
    %c0_i32_1 = arith.constant 0 : i32
    return %c0_i32, %c0_i32_0 : i32, i32
  }
  func.func @transform_5(%arg0: i32, %arg1: i32) -> (i32, i32, i32, i32) {
    %c0_i32 = arith.constant 0 : i32
    %c0_i32_0 = arith.constant 0 : i32
    %c0_i32_1 = arith.constant 0 : i32
    return %arg0, %arg1, %c0_i32, %c0_i32_0 : i32, i32, i32, i32
  }
  func.func @transform_6(%arg0: i32, %arg1: i32) -> (i32, i32, i32, i32) {
    %c0_i32 = arith.constant 0 : i32
    %c0_i32_0 = arith.constant 0 : i32
    %c0_i32_1 = arith.constant 0 : i32
    return %arg0, %arg1, %c0_i32, %c0_i32_0 : i32, i32, i32, i32
  }
  func.func @transform_7(%arg0: i32, %arg1: i32) -> (i32, i32, i32, i32) {
    %c0_i32 = arith.constant 0 : i32
    %c0_i32_0 = arith.constant 0 : i32
    %c0_i32_1 = arith.constant 0 : i32
    return %arg0, %arg1, %c0_i32, %c0_i32_0 : i32, i32, i32, i32
  }
}

module attributes {stable_mosaic.version = 11 : i64} {
  func.func @_scale_shift_relu_kernel(%arg0: i32, %arg1: i32, %arg2: memref<1x1x64x128xf32, #tpu.memory_space<vmem>>, %arg3: memref<1x128xf32, #tpu.memory_space<vmem>>, %arg4: memref<1x128xf32, #tpu.memory_space<vmem>>, %arg5: memref<1x1x64x128xbf16, #tpu.memory_space<vmem>>) attributes {dimension_semantics = [#tpu.dimension_semantics<parallel>, #tpu.dimension_semantics<parallel>], iteration_bounds = array<i64: 2, 8>, scalar_prefetch = 0 : i64, scratch_operands = 0 : i64, tpu.core_type = #tpu.core_type<tc>, window_params = [{transform_indices = @transform_0, window_bounds = array<i64: 1, 1, 64, 128>}, {pipeline_mode = #tpu.pipeline_mode<synchronous>, transform_indices = @transform_1, window_bounds = array<i64: 1, 128>}, {pipeline_mode = #tpu.pipeline_mode<synchronous>, transform_indices = @transform_2, window_bounds = array<i64: 1, 128>}, {transform_indices = @transform_3, window_bounds = array<i64: 1, 1, 64, 128>}]} {
    %c0 = arith.constant 0 : index
    %c0_0 = arith.constant 0 : index
    %c0_1 = arith.constant 0 : index
    %c0_2 = arith.constant 0 : index
    %0 = vector.load %arg2[%c0, %c0_0, %c0_1, %c0_2] : memref<1x1x64x128xf32, #tpu.memory_space<vmem>>, vector<1x1x64x128xf32>
    %1 = vector.shape_cast %0 : vector<1x1x64x128xf32> to vector<64x128xf32>
    %c0_3 = arith.constant 0 : index
    %c0_4 = arith.constant 0 : index
    %2 = vector.load %arg3[%c0_3, %c0_4] : memref<1x128xf32, #tpu.memory_space<vmem>>, vector<1x128xf32>
    %3 = vector.broadcast %2 : vector<1x128xf32> to vector<64x128xf32>
    %4 = arith.mulf %1, %3 : vector<64x128xf32>
    %c0_5 = arith.constant 0 : index
    %c0_6 = arith.constant 0 : index
    %5 = vector.load %arg4[%c0_5, %c0_6] : memref<1x128xf32, #tpu.memory_space<vmem>>, vector<1x128xf32>
    %6 = vector.broadcast %5 : vector<1x128xf32> to vector<64x128xf32>
    %7 = arith.addf %4, %6 : vector<64x128xf32>
    %cst = arith.constant 0.000000e+00 : f32
    %8 = vector.broadcast %cst : f32 to vector<64x128xf32>
    %9 = arith.maximumf %7, %8 : vector<64x128xf32>
    %10 = arith.truncf %9 : vector<64x128xf32> to vector<64x128xbf16>
    %c0_7 = arith.constant 0 : index
    %c0_8 = arith.constant 0 : index
    %c0_9 = arith.constant 0 : index
    %c0_10 = arith.constant 0 : index
    %11 = vector.load %arg5[%c0_7, %c0_8, %c0_9, %c0_10] : memref<1x1x64x128xbf16, #tpu.memory_space<vmem>>, vector<1x1x64x128xbf16>
    %12 = vector.shape_cast %11 : vector<1x1x64x128xbf16> to vector<64x128xbf16>
    %13 = vector.shape_cast %10 : vector<64x128xbf16> to vector<1x1x64x128xbf16>
    tpu.vector_store %arg5[%c0_7, %c0_8, %c0_9, %c0_10], %13 {strides = array<i32>} : memref<1x1x64x128xbf16, #tpu.memory_space<vmem>>, vector<1x1x64x128xbf16>,
    return
  }
  func.func @transform_0(%arg0: i32, %arg1: i32) -> (i32, i32, i32, i32) {
    %c0_i32 = arith.constant 0 : i32
    %c0_i32_0 = arith.constant 0 : i32
    %c0_i32_1 = arith.constant 0 : i32
    return %arg0, %arg1, %c0_i32, %c0_i32_0 : i32, i32, i32, i32
  }
  func.func @transform_1(%arg0: i32, %arg1: i32) -> (i32, i32) {
    %c0_i32 = arith.constant 0 : i32
    %c0_i32_0 = arith.constant 0 : i32
    %c0_i32_1 = arith.constant 0 : i32
    return %c0_i32, %c0_i32_0 : i32, i32
  }
  func.func @transform_2(%arg0: i32, %arg1: i32) -> (i32, i32) {
    %c0_i32 = arith.constant 0 : i32
    %c0_i32_0 = arith.constant 0 : i32
    %c0_i32_1 = arith.constant 0 : i32
    return %c0_i32, %c0_i32_0 : i32, i32
  }
  func.func @transform_3(%arg0: i32, %arg1: i32) -> (i32, i32, i32, i32) {
    %c0_i32 = arith.constant 0 : i32
    %c0_i32_0 = arith.constant 0 : i32
    %c0_i32_1 = arith.constant 0 : i32
    return %arg0, %arg1, %c0_i32, %c0_i32_0 : i32, i32, i32, i32
  }
}

module attributes {stable_mosaic.version = 11 : i64} {
  func.func @_scale_shift_relu_kernel(%arg0: i32, %arg1: i32, %arg2: memref<1x1x64x128xf32, #tpu.memory_space<vmem>>, %arg3: memref<1x128xf32, #tpu.memory_space<vmem>>, %arg4: memref<1x128xf32, #tpu.memory_space<vmem>>, %arg5: memref<1x1x64x128xf32, #tpu.memory_space<vmem>>) attributes {dimension_semantics = [#tpu.dimension_semantics<parallel>, #tpu.dimension_semantics<parallel>], iteration_bounds = array<i64: 2, 8>, scalar_prefetch = 0 : i64, scratch_operands = 0 : i64, tpu.core_type = #tpu.core_type<tc>, window_params = [{transform_indices = @transform_0, window_bounds = array<i64: 1, 1, 64, 128>}, {pipeline_mode = #tpu.pipeline_mode<synchronous>, transform_indices = @transform_1, window_bounds = array<i64: 1, 128>}, {pipeline_mode = #tpu.pipeline_mode<synchronous>, transform_indices = @transform_2, window_bounds = array<i64: 1, 128>}, {transform_indices = @transform_3, window_bounds = array<i64: 1, 1, 64, 128>}]} {
    %c0 = arith.constant 0 : index
    %c0_0 = arith.constant 0 : index
    %c0_1 = arith.constant 0 : index
    %c0_2 = arith.constant 0 : index
    %0 = vector.load %arg2[%c0, %c0_0, %c0_1, %c0_2] : memref<1x1x64x128xf32, #tpu.memory_space<vmem>>, vector<1x1x64x128xf32>
    %1 = vector.shape_cast %0 : vector<1x1x64x128xf32> to vector<64x128xf32>
    %c0_3 = arith.constant 0 : index
    %c0_4 = arith.constant 0 : index
    %2 = vector.load %arg3[%c0_3, %c0_4] : memref<1x128xf32, #tpu.memory_space<vmem>>, vector<1x128xf32>
    %3 = vector.broadcast %2 : vector<1x128xf32> to vector<64x128xf32>
    %4 = arith.mulf %1, %3 : vector<64x128xf32>
    %c0_5 = arith.constant 0 : index
    %c0_6 = arith.constant 0 : index
    %5 = vector.load %arg4[%c0_5, %c0_6] : memref<1x128xf32, #tpu.memory_space<vmem>>, vector<1x128xf32>
    %6 = vector.broadcast %5 : vector<1x128xf32> to vector<64x128xf32>
    %7 = arith.addf %4, %6 : vector<64x128xf32>
    %cst = arith.constant 0.000000e+00 : f32
    %8 = vector.broadcast %cst : f32 to vector<64x128xf32>
    %9 = arith.maximumf %7, %8 : vector<64x128xf32>
    %c0_7 = arith.constant 0 : index
    %c0_8 = arith.constant 0 : index
    %c0_9 = arith.constant 0 : index
    %c0_10 = arith.constant 0 : index
    %10 = vector.load %arg5[%c0_7, %c0_8, %c0_9, %c0_10] : memref<1x1x64x128xf32, #tpu.memory_space<vmem>>, vector<1x1x64x128xf32>
    %11 = vector.shape_cast %10 : vector<1x1x64x128xf32> to vector<64x128xf32>
    %12 = vector.shape_cast %9 : vector<64x128xf32> to vector<1x1x64x128xf32>
    tpu.vector_store %arg5[%c0_7, %c0_8, %c0_9, %c0_10], %12 {strides = array<i32>} : memref<1x1x64x128xf32, #tpu.memory_space<vmem>>, vector<1x1x64x128xf32>,
    return
  }
  func.func @transform_0(%arg0: i32, %arg1: i32) -> (i32, i32, i32, i32) {
    %c0_i32 = arith.constant 0 : i32
    %c0_i32_0 = arith.constant 0 : i32
    %c0_i32_1 = arith.constant 0 : i32
    return %arg0, %arg1, %c0_i32, %c0_i32_0 : i32, i32, i32, i32
  }
  func.func @transform_1(%arg0: i32, %arg1: i32) -> (i32, i32) {
    %c0_i32 = arith.constant 0 : i32
    %c0_i32_0 = arith.constant 0 : i32
    %c0_i32_1 = arith.constant 0 : i32
    return %c0_i32, %c0_i32_0 : i32, i32
  }
  func.func @transform_2(%arg0: i32, %arg1: i32) -> (i32, i32) {
    %c0_i32 = arith.constant 0 : i32
    %c0_i32_0 = arith.constant 0 : i32
    %c0_i32_1 = arith.constant 0 : i32
    return %c0_i32, %c0_i32_0 : i32, i32
  }
  func.func @transform_3(%arg0: i32, %arg1: i32) -> (i32, i32, i32, i32) {
    %c0_i32 = arith.constant 0 : i32
    %c0_i32_0 = arith.constant 0 : i32
    %c0_i32_1 = arith.constant 0 : i32
    return %arg0, %arg1, %c0_i32, %c0_i32_0 : i32, i32, i32, i32
  }
}

module attributes {stable_mosaic.version = 11 : i64} {
  func.func @_conv3d_tap_kernel(%arg0: i32, %arg1: i32, %arg2: memref<1x1x82x128xbf16, #tpu.memory_space<vmem>>, %arg3: memref<1x1x82x128xbf16, #tpu.memory_space<vmem>>, %arg4: memref<1x1x82x128xbf16, #tpu.memory_space<vmem>>, %arg5: memref<27x128x128xbf16, #tpu.memory_space<vmem>>, %arg6: memref<1x128xf32, #tpu.memory_space<vmem>>, %arg7: memref<1x1x64x128xf32, #tpu.memory_space<vmem>>, %arg8: memref<1x1x1x128xf32, #tpu.memory_space<vmem>>, %arg9: memref<1x1x1x128xf32, #tpu.memory_space<vmem>>) attributes {dimension_semantics = [#tpu.dimension_semantics<parallel>, #tpu.dimension_semantics<parallel>], iteration_bounds = array<i64: 2, 8>, scalar_prefetch = 0 : i64, scratch_operands = 0 : i64, tpu.core_type = #tpu.core_type<tc>, window_params = [{transform_indices = @transform_0, window_bounds = array<i64: 1, 1, 82, 128>}, {transform_indices = @transform_1, window_bounds = array<i64: 1, 1, 82, 128>}, {transform_indices = @transform_2, window_bounds = array<i64: 1, 1, 82, 128>}, {pipeline_mode = #tpu.pipeline_mode<synchronous>, transform_indices = @transform_3, window_bounds = array<i64: 27, 128, 128>}, {pipeline_mode = #tpu.pipeline_mode<synchronous>, transform_indices = @transform_4, window_bounds = array<i64: 1, 128>}, {transform_indices = @transform_5, window_bounds = array<i64: 1, 1, 64, 128>}, {transform_indices = @transform_6, window_bounds = array<i64: 1, 1, 1, 128>}, {transform_indices = @transform_7, window_bounds = array<i64: 1, 1, 1, 128>}]} {
    %0 = tpu.iota {dimensions = array<i32: 0>} : vector<64x1xi32>
    %c8_i32 = arith.constant 8 : i32
    %c0_i32 = arith.constant 0 : i32
    %1 = arith.cmpi eq, %c8_i32, %c0_i32 : i32
    %c1_i32 = arith.constant 1 : i32
    %2 = arith.select %1, %c1_i32, %c8_i32 : i32
    %3 = vector.broadcast %2 : i32 to vector<64x1xi32>
    %4 = arith.remsi %0, %3 : vector<64x1xi32>
    %c0_i32_0 = arith.constant 0 : i32
    %5 = vector.broadcast %c0_i32_0 : i32 to vector<64x1xi32>
    %6 = arith.cmpi ne, %4, %5 : vector<64x1xi32>
    %c0_i32_1 = arith.constant 0 : i32
    %7 = vector.broadcast %c0_i32_1 : i32 to vector<64x1xi32>
    %8 = arith.cmpi slt, %4, %7 : vector<64x1xi32>
    %c0_i32_2 = arith.constant 0 : i32
    %9 = arith.cmpi slt, %2, %c0_i32_2 : i32
    %10 = vector.broadcast %9 : i1 to vector<64x1xi1>
    %11 = vector.broadcast %10 : vector<64x1xi1> to vector<64x1xi1>
    %12 = arith.xori %8, %11 : vector<64x1xi1>
    %13 = arith.andi %12, %6 : vector<64x1xi1>
    %14 = vector.broadcast %2 : i32 to vector<64x1xi32>
    %15 = arith.addi %4, %14 : vector<64x1xi32>
    %16 = arith.select %13, %15, %4 : vector<64x1xi1>, vector<64x1xi32>
    %c0_i32_3 = arith.constant 0 : i32
    %17 = vector.broadcast %c0_i32_3 : i32 to vector<64x1xi32>
    %18 = arith.cmpi ne, %16, %17 : vector<64x1xi32>
    %c7_i32 = arith.constant 7 : i32
    %19 = vector.broadcast %c7_i32 : i32 to vector<64x1xi32>
    %20 = arith.cmpi ne, %16, %19 : vector<64x1xi32>
    %cst = arith.constant 0.000000e+00 : f32
    %21 = vector.broadcast %cst : f32 to vector<64x128xf32>
    %c0 = arith.constant 0 : index
    %c0_4 = arith.constant 0 : index
    %c0_5 = arith.constant 0 : index
    %c0_6 = arith.constant 0 : index
    %22 = vector.load %arg2[%c0, %c0_4, %c0_5, %c0_6] : memref<1x1x82x128xbf16, #tpu.memory_space<vmem>>, vector<1x1x64x128xbf16>
    %23 = vector.shape_cast %22 : vector<1x1x64x128xbf16> to vector<64x128xbf16>
    %cst_7 = arith.constant 0.000000e+00 : bf16
    %24 = vector.broadcast %cst_7 : bf16 to vector<64x128xbf16>
    %25 = vector.shape_cast %18 : vector<64x1xi1> to vector<64x1xi1>
    %26 = vector.broadcast %25 : vector<64x1xi1> to vector<64x128xi1>
    %27 = arith.select %26, %23, %24 : vector<64x128xi1>, vector<64x128xbf16>
    %c0_8 = arith.constant 0 : index
    %c0_9 = arith.constant 0 : index
    %c0_10 = arith.constant 0 : index
    %28 = vector.load %arg5[%c0_8, %c0_9, %c0_10] : memref<27x128x128xbf16, #tpu.memory_space<vmem>>, vector<1x128x128xbf16>
    %29 = vector.shape_cast %28 : vector<1x128x128xbf16> to vector<128x128xbf16>
    %cst_11 = arith.constant dense<0.000000e+00> : vector<64x128xf32>
    %30 = tpu.matmul %27, %29, %cst_11 {dimension_numbers = #tpu.dot_dimension_numbers<[1], [0], [0], [1], [0, 0, 1, 1], [], []>} : vector<64x128xbf16>, vector<128x128xbf16>, vector<64x128xf32> -> vector<64x128xf32>
    %31 = arith.addf %21, %30 : vector<64x128xf32>
    %c0_12 = arith.constant 0 : index
    %c0_13 = arith.constant 0 : index
    %c1 = arith.constant 1 : index
    %c0_14 = arith.constant 0 : index
    %32 = vector.load %arg2[%c0_12, %c0_13, %c1, %c0_14] : memref<1x1x82x128xbf16, #tpu.memory_space<vmem>>, vector<1x1x64x128xbf16>
    %33 = vector.shape_cast %32 : vector<1x1x64x128xbf16> to vector<64x128xbf16>
    %c1_15 = arith.constant 1 : index
    %c0_16 = arith.constant 0 : index
    %c0_17 = arith.constant 0 : index
    %34 = vector.load %arg5[%c1_15, %c0_16, %c0_17] : memref<27x128x128xbf16, #tpu.memory_space<vmem>>, vector<1x128x128xbf16>
    %35 = vector.shape_cast %34 : vector<1x128x128xbf16> to vector<128x128xbf16>
    %cst_18 = arith.constant dense<0.000000e+00> : vector<64x128xf32>
    %36 = tpu.matmul %33, %35, %cst_18 {dimension_numbers = #tpu.dot_dimension_numbers<[1], [0], [0], [1], [0, 0, 1, 1], [], []>} : vector<64x128xbf16>, vector<128x128xbf16>, vector<64x128xf32> -> vector<64x128xf32>
    %37 = arith.addf %31, %36 : vector<64x128xf32>
    %c0_19 = arith.constant 0 : index
    %c0_20 = arith.constant 0 : index
    %c2 = arith.constant 2 : index
    %c0_21 = arith.constant 0 : index
    %38 = vector.load %arg2[%c0_19, %c0_20, %c2, %c0_21] : memref<1x1x82x128xbf16, #tpu.memory_space<vmem>>, vector<1x1x64x128xbf16>
    %39 = vector.shape_cast %38 : vector<1x1x64x128xbf16> to vector<64x128xbf16>
    %cst_22 = arith.constant 0.000000e+00 : bf16
    %40 = vector.broadcast %cst_22 : bf16 to vector<64x128xbf16>
    %41 = vector.shape_cast %20 : vector<64x1xi1> to vector<64x1xi1>
    %42 = vector.broadcast %41 : vector<64x1xi1> to vector<64x128xi1>
    %43 = arith.select %42, %39, %40 : vector<64x128xi1>, vector<64x128xbf16>
    %c2_23 = arith.constant 2 : index
    %c0_24 = arith.constant 0 : index
    %c0_25 = arith.constant 0 : index
    %44 = vector.load %arg5[%c2_23, %c0_24, %c0_25] : memref<27x128x128xbf16, #tpu.memory_space<vmem>>, vector<1x128x128xbf16>
    %45 = vector.shape_cast %44 : vector<1x128x128xbf16> to vector<128x128xbf16>
    %cst_26 = arith.constant dense<0.000000e+00> : vector<64x128xf32>
    %46 = tpu.matmul %43, %45, %cst_26 {dimension_numbers = #tpu.dot_dimension_numbers<[1], [0], [0], [1], [0, 0, 1, 1], [], []>} : vector<64x128xbf16>, vector<128x128xbf16>, vector<64x128xf32> -> vector<64x128xf32>
    %47 = arith.addf %37, %46 : vector<64x128xf32>
    %c0_27 = arith.constant 0 : index
    %c0_28 = arith.constant 0 : index
    %c8 = arith.constant 8 : index
    %c0_29 = arith.constant 0 : index
    %48 = vector.load %arg2[%c0_27, %c0_28, %c8, %c0_29] : memref<1x1x82x128xbf16, #tpu.memory_space<vmem>>, vector<1x1x64x128xbf16>
    %49 = vector.shape_cast %48 : vector<1x1x64x128xbf16> to vector<64x128xbf16>
    %cst_30 = arith.constant 0.000000e+00 : bf16
    %50 = vector.broadcast %cst_30 : bf16 to vector<64x128xbf16>
    %51 = vector.shape_cast %18 : vector<64x1xi1> to vector<64x1xi1>
    %52 = vector.broadcast %51 : vector<64x1xi1> to vector<64x128xi1>
    %53 = arith.select %52, %49, %50 : vector<64x128xi1>, vector<64x128xbf16>
    %c3 = arith.constant 3 : index
    %c0_31 = arith.constant 0 : index
    %c0_32 = arith.constant 0 : index
    %54 = vector.load %arg5[%c3, %c0_31, %c0_32] : memref<27x128x128xbf16, #tpu.memory_space<vmem>>, vector<1x128x128xbf16>
    %55 = vector.shape_cast %54 : vector<1x128x128xbf16> to vector<128x128xbf16>
    %cst_33 = arith.constant dense<0.000000e+00> : vector<64x128xf32>
    %56 = tpu.matmul %53, %55, %cst_33 {dimension_numbers = #tpu.dot_dimension_numbers<[1], [0], [0], [1], [0, 0, 1, 1], [], []>} : vector<64x128xbf16>, vector<128x128xbf16>, vector<64x128xf32> -> vector<64x128xf32>
    %57 = arith.addf %47, %56 : vector<64x128xf32>
    %c0_34 = arith.constant 0 : index
    %c0_35 = arith.constant 0 : index
    %c9 = arith.constant 9 : index
    %c0_36 = arith.constant 0 : index
    %58 = vector.load %arg2[%c0_34, %c0_35, %c9, %c0_36] : memref<1x1x82x128xbf16, #tpu.memory_space<vmem>>, vector<1x1x64x128xbf16>
    %59 = vector.shape_cast %58 : vector<1x1x64x128xbf16> to vector<64x128xbf16>
    %c4 = arith.constant 4 : index
    %c0_37 = arith.constant 0 : index
    %c0_38 = arith.constant 0 : index
    %60 = vector.load %arg5[%c4, %c0_37, %c0_38] : memref<27x128x128xbf16, #tpu.memory_space<vmem>>, vector<1x128x128xbf16>
    %61 = vector.shape_cast %60 : vector<1x128x128xbf16> to vector<128x128xbf16>
    %cst_39 = arith.constant dense<0.000000e+00> : vector<64x128xf32>
    %62 = tpu.matmul %59, %61, %cst_39 {dimension_numbers = #tpu.dot_dimension_numbers<[1], [0], [0], [1], [0, 0, 1, 1], [], []>} : vector<64x128xbf16>, vector<128x128xbf16>, vector<64x128xf32> -> vector<64x128xf32>
    %63 = arith.addf %57, %62 : vector<64x128xf32>
    %c0_40 = arith.constant 0 : index
    %c0_41 = arith.constant 0 : index
    %c10 = arith.constant 10 : index
    %c0_42 = arith.constant 0 : index
    %64 = vector.load %arg2[%c0_40, %c0_41, %c10, %c0_42] : memref<1x1x82x128xbf16, #tpu.memory_space<vmem>>, vector<1x1x64x128xbf16>
    %65 = vector.shape_cast %64 : vector<1x1x64x128xbf16> to vector<64x128xbf16>
    %cst_43 = arith.constant 0.000000e+00 : bf16
    %66 = vector.broadcast %cst_43 : bf16 to vector<64x128xbf16>
    %67 = vector.shape_cast %20 : vector<64x1xi1> to vector<64x1xi1>
    %68 = vector.broadcast %67 : vector<64x1xi1> to vector<64x128xi1>
    %69 = arith.select %68, %65, %66 : vector<64x128xi1>, vector<64x128xbf16>
    %c5 = arith.constant 5 : index
    %c0_44 = arith.constant 0 : index
    %c0_45 = arith.constant 0 : index
    %70 = vector.load %arg5[%c5, %c0_44, %c0_45] : memref<27x128x128xbf16, #tpu.memory_space<vmem>>, vector<1x128x128xbf16>
    %71 = vector.shape_cast %70 : vector<1x128x128xbf16> to vector<128x128xbf16>
    %cst_46 = arith.constant dense<0.000000e+00> : vector<64x128xf32>
    %72 = tpu.matmul %69, %71, %cst_46 {dimension_numbers = #tpu.dot_dimension_numbers<[1], [0], [0], [1], [0, 0, 1, 1], [], []>} : vector<64x128xbf16>, vector<128x128xbf16>, vector<64x128xf32> -> vector<64x128xf32>
    %73 = arith.addf %63, %72 : vector<64x128xf32>
    %c0_47 = arith.constant 0 : index
    %c0_48 = arith.constant 0 : index
    %c16 = arith.constant 16 : index
    %c0_49 = arith.constant 0 : index
    %74 = vector.load %arg2[%c0_47, %c0_48, %c16, %c0_49] : memref<1x1x82x128xbf16, #tpu.memory_space<vmem>>, vector<1x1x64x128xbf16>
    %75 = vector.shape_cast %74 : vector<1x1x64x128xbf16> to vector<64x128xbf16>
    %cst_50 = arith.constant 0.000000e+00 : bf16
    %76 = vector.broadcast %cst_50 : bf16 to vector<64x128xbf16>
    %77 = vector.shape_cast %18 : vector<64x1xi1> to vector<64x1xi1>
    %78 = vector.broadcast %77 : vector<64x1xi1> to vector<64x128xi1>
    %79 = arith.select %78, %75, %76 : vector<64x128xi1>, vector<64x128xbf16>
    %c6 = arith.constant 6 : index
    %c0_51 = arith.constant 0 : index
    %c0_52 = arith.constant 0 : index
    %80 = vector.load %arg5[%c6, %c0_51, %c0_52] : memref<27x128x128xbf16, #tpu.memory_space<vmem>>, vector<1x128x128xbf16>
    %81 = vector.shape_cast %80 : vector<1x128x128xbf16> to vector<128x128xbf16>
    %cst_53 = arith.constant dense<0.000000e+00> : vector<64x128xf32>
    %82 = tpu.matmul %79, %81, %cst_53 {dimension_numbers = #tpu.dot_dimension_numbers<[1], [0], [0], [1], [0, 0, 1, 1], [], []>} : vector<64x128xbf16>, vector<128x128xbf16>, vector<64x128xf32> -> vector<64x128xf32>
    %83 = arith.addf %73, %82 : vector<64x128xf32>
    %c0_54 = arith.constant 0 : index
    %c0_55 = arith.constant 0 : index
    %c17 = arith.constant 17 : index
    %c0_56 = arith.constant 0 : index
    %84 = vector.load %arg2[%c0_54, %c0_55, %c17, %c0_56] : memref<1x1x82x128xbf16, #tpu.memory_space<vmem>>, vector<1x1x64x128xbf16>
    %85 = vector.shape_cast %84 : vector<1x1x64x128xbf16> to vector<64x128xbf16>
    %c7 = arith.constant 7 : index
    %c0_57 = arith.constant 0 : index
    %c0_58 = arith.constant 0 : index
    %86 = vector.load %arg5[%c7, %c0_57, %c0_58] : memref<27x128x128xbf16, #tpu.memory_space<vmem>>, vector<1x128x128xbf16>
    %87 = vector.shape_cast %86 : vector<1x128x128xbf16> to vector<128x128xbf16>
    %cst_59 = arith.constant dense<0.000000e+00> : vector<64x128xf32>
    %88 = tpu.matmul %85, %87, %cst_59 {dimension_numbers = #tpu.dot_dimension_numbers<[1], [0], [0], [1], [0, 0, 1, 1], [], []>} : vector<64x128xbf16>, vector<128x128xbf16>, vector<64x128xf32> -> vector<64x128xf32>
    %89 = arith.addf %83, %88 : vector<64x128xf32>
    %c0_60 = arith.constant 0 : index
    %c0_61 = arith.constant 0 : index
    %c18 = arith.constant 18 : index
    %c0_62 = arith.constant 0 : index
    %90 = vector.load %arg2[%c0_60, %c0_61, %c18, %c0_62] : memref<1x1x82x128xbf16, #tpu.memory_space<vmem>>, vector<1x1x64x128xbf16>
    %91 = vector.shape_cast %90 : vector<1x1x64x128xbf16> to vector<64x128xbf16>
    %cst_63 = arith.constant 0.000000e+00 : bf16
    %92 = vector.broadcast %cst_63 : bf16 to vector<64x128xbf16>
    %93 = vector.shape_cast %20 : vector<64x1xi1> to vector<64x1xi1>
    %94 = vector.broadcast %93 : vector<64x1xi1> to vector<64x128xi1>
    %95 = arith.select %94, %91, %92 : vector<64x128xi1>, vector<64x128xbf16>
    %c8_64 = arith.constant 8 : index
    %c0_65 = arith.constant 0 : index
    %c0_66 = arith.constant 0 : index
    %96 = vector.load %arg5[%c8_64, %c0_65, %c0_66] : memref<27x128x128xbf16, #tpu.memory_space<vmem>>, vector<1x128x128xbf16>
    %97 = vector.shape_cast %96 : vector<1x128x128xbf16> to vector<128x128xbf16>
    %cst_67 = arith.constant dense<0.000000e+00> : vector<64x128xf32>
    %98 = tpu.matmul %95, %97, %cst_67 {dimension_numbers = #tpu.dot_dimension_numbers<[1], [0], [0], [1], [0, 0, 1, 1], [], []>} : vector<64x128xbf16>, vector<128x128xbf16>, vector<64x128xf32> -> vector<64x128xf32>
    %99 = arith.addf %89, %98 : vector<64x128xf32>
    %c0_68 = arith.constant 0 : index
    %c0_69 = arith.constant 0 : index
    %c0_70 = arith.constant 0 : index
    %c0_71 = arith.constant 0 : index
    %100 = vector.load %arg3[%c0_68, %c0_69, %c0_70, %c0_71] : memref<1x1x82x128xbf16, #tpu.memory_space<vmem>>, vector<1x1x64x128xbf16>
    %101 = vector.shape_cast %100 : vector<1x1x64x128xbf16> to vector<64x128xbf16>
    %cst_72 = arith.constant 0.000000e+00 : bf16
    %102 = vector.broadcast %cst_72 : bf16 to vector<64x128xbf16>
    %103 = vector.shape_cast %18 : vector<64x1xi1> to vector<64x1xi1>
    %104 = vector.broadcast %103 : vector<64x1xi1> to vector<64x128xi1>
    %105 = arith.select %104, %101, %102 : vector<64x128xi1>, vector<64x128xbf16>
    %c9_73 = arith.constant 9 : index
    %c0_74 = arith.constant 0 : index
    %c0_75 = arith.constant 0 : index
    %106 = vector.load %arg5[%c9_73, %c0_74, %c0_75] : memref<27x128x128xbf16, #tpu.memory_space<vmem>>, vector<1x128x128xbf16>
    %107 = vector.shape_cast %106 : vector<1x128x128xbf16> to vector<128x128xbf16>
    %cst_76 = arith.constant dense<0.000000e+00> : vector<64x128xf32>
    %108 = tpu.matmul %105, %107, %cst_76 {dimension_numbers = #tpu.dot_dimension_numbers<[1], [0], [0], [1], [0, 0, 1, 1], [], []>} : vector<64x128xbf16>, vector<128x128xbf16>, vector<64x128xf32> -> vector<64x128xf32>
    %109 = arith.addf %99, %108 : vector<64x128xf32>
    %c0_77 = arith.constant 0 : index
    %c0_78 = arith.constant 0 : index
    %c1_79 = arith.constant 1 : index
    %c0_80 = arith.constant 0 : index
    %110 = vector.load %arg3[%c0_77, %c0_78, %c1_79, %c0_80] : memref<1x1x82x128xbf16, #tpu.memory_space<vmem>>, vector<1x1x64x128xbf16>
    %111 = vector.shape_cast %110 : vector<1x1x64x128xbf16> to vector<64x128xbf16>
    %c10_81 = arith.constant 10 : index
    %c0_82 = arith.constant 0 : index
    %c0_83 = arith.constant 0 : index
    %112 = vector.load %arg5[%c10_81, %c0_82, %c0_83] : memref<27x128x128xbf16, #tpu.memory_space<vmem>>, vector<1x128x128xbf16>
    %113 = vector.shape_cast %112 : vector<1x128x128xbf16> to vector<128x128xbf16>
    %cst_84 = arith.constant dense<0.000000e+00> : vector<64x128xf32>
    %114 = tpu.matmul %111, %113, %cst_84 {dimension_numbers = #tpu.dot_dimension_numbers<[1], [0], [0], [1], [0, 0, 1, 1], [], []>} : vector<64x128xbf16>, vector<128x128xbf16>, vector<64x128xf32> -> vector<64x128xf32>
    %115 = arith.addf %109, %114 : vector<64x128xf32>
    %c0_85 = arith.constant 0 : index
    %c0_86 = arith.constant 0 : index
    %c2_87 = arith.constant 2 : index
    %c0_88 = arith.constant 0 : index
    %116 = vector.load %arg3[%c0_85, %c0_86, %c2_87, %c0_88] : memref<1x1x82x128xbf16, #tpu.memory_space<vmem>>, vector<1x1x64x128xbf16>
    %117 = vector.shape_cast %116 : vector<1x1x64x128xbf16> to vector<64x128xbf16>
    %cst_89 = arith.constant 0.000000e+00 : bf16
    %118 = vector.broadcast %cst_89 : bf16 to vector<64x128xbf16>
    %119 = vector.shape_cast %20 : vector<64x1xi1> to vector<64x1xi1>
    %120 = vector.broadcast %119 : vector<64x1xi1> to vector<64x128xi1>
    %121 = arith.select %120, %117, %118 : vector<64x128xi1>, vector<64x128xbf16>
    %c11 = arith.constant 11 : index
    %c0_90 = arith.constant 0 : index
    %c0_91 = arith.constant 0 : index
    %122 = vector.load %arg5[%c11, %c0_90, %c0_91] : memref<27x128x128xbf16, #tpu.memory_space<vmem>>, vector<1x128x128xbf16>
    %123 = vector.shape_cast %122 : vector<1x128x128xbf16> to vector<128x128xbf16>
    %cst_92 = arith.constant dense<0.000000e+00> : vector<64x128xf32>
    %124 = tpu.matmul %121, %123, %cst_92 {dimension_numbers = #tpu.dot_dimension_numbers<[1], [0], [0], [1], [0, 0, 1, 1], [], []>} : vector<64x128xbf16>, vector<128x128xbf16>, vector<64x128xf32> -> vector<64x128xf32>
    %125 = arith.addf %115, %124 : vector<64x128xf32>
    %c0_93 = arith.constant 0 : index
    %c0_94 = arith.constant 0 : index
    %c8_95 = arith.constant 8 : index
    %c0_96 = arith.constant 0 : index
    %126 = vector.load %arg3[%c0_93, %c0_94, %c8_95, %c0_96] : memref<1x1x82x128xbf16, #tpu.memory_space<vmem>>, vector<1x1x64x128xbf16>
    %127 = vector.shape_cast %126 : vector<1x1x64x128xbf16> to vector<64x128xbf16>
    %cst_97 = arith.constant 0.000000e+00 : bf16
    %128 = vector.broadcast %cst_97 : bf16 to vector<64x128xbf16>
    %129 = vector.shape_cast %18 : vector<64x1xi1> to vector<64x1xi1>
    %130 = vector.broadcast %129 : vector<64x1xi1> to vector<64x128xi1>
    %131 = arith.select %130, %127, %128 : vector<64x128xi1>, vector<64x128xbf16>
    %c12 = arith.constant 12 : index
    %c0_98 = arith.constant 0 : index
    %c0_99 = arith.constant 0 : index
    %132 = vector.load %arg5[%c12, %c0_98, %c0_99] : memref<27x128x128xbf16, #tpu.memory_space<vmem>>, vector<1x128x128xbf16>
    %133 = vector.shape_cast %132 : vector<1x128x128xbf16> to vector<128x128xbf16>
    %cst_100 = arith.constant dense<0.000000e+00> : vector<64x128xf32>
    %134 = tpu.matmul %131, %133, %cst_100 {dimension_numbers = #tpu.dot_dimension_numbers<[1], [0], [0], [1], [0, 0, 1, 1], [], []>} : vector<64x128xbf16>, vector<128x128xbf16>, vector<64x128xf32> -> vector<64x128xf32>
    %135 = arith.addf %125, %134 : vector<64x128xf32>
    %c0_101 = arith.constant 0 : index
    %c0_102 = arith.constant 0 : index
    %c9_103 = arith.constant 9 : index
    %c0_104 = arith.constant 0 : index
    %136 = vector.load %arg3[%c0_101, %c0_102, %c9_103, %c0_104] : memref<1x1x82x128xbf16, #tpu.memory_space<vmem>>, vector<1x1x64x128xbf16>
    %137 = vector.shape_cast %136 : vector<1x1x64x128xbf16> to vector<64x128xbf16>
    %c13 = arith.constant 13 : index
    %c0_105 = arith.constant 0 : index
    %c0_106 = arith.constant 0 : index
    %138 = vector.load %arg5[%c13, %c0_105, %c0_106] : memref<27x128x128xbf16, #tpu.memory_space<vmem>>, vector<1x128x128xbf16>
    %139 = vector.shape_cast %138 : vector<1x128x128xbf16> to vector<128x128xbf16>
    %cst_107 = arith.constant dense<0.000000e+00> : vector<64x128xf32>
    %140 = tpu.matmul %137, %139, %cst_107 {dimension_numbers = #tpu.dot_dimension_numbers<[1], [0], [0], [1], [0, 0, 1, 1], [], []>} : vector<64x128xbf16>, vector<128x128xbf16>, vector<64x128xf32> -> vector<64x128xf32>
    %141 = arith.addf %135, %140 : vector<64x128xf32>
    %c0_108 = arith.constant 0 : index
    %c0_109 = arith.constant 0 : index
    %c10_110 = arith.constant 10 : index
    %c0_111 = arith.constant 0 : index
    %142 = vector.load %arg3[%c0_108, %c0_109, %c10_110, %c0_111] : memref<1x1x82x128xbf16, #tpu.memory_space<vmem>>, vector<1x1x64x128xbf16>
    %143 = vector.shape_cast %142 : vector<1x1x64x128xbf16> to vector<64x128xbf16>
    %cst_112 = arith.constant 0.000000e+00 : bf16
    %144 = vector.broadcast %cst_112 : bf16 to vector<64x128xbf16>
    %145 = vector.shape_cast %20 : vector<64x1xi1> to vector<64x1xi1>
    %146 = vector.broadcast %145 : vector<64x1xi1> to vector<64x128xi1>
    %147 = arith.select %146, %143, %144 : vector<64x128xi1>, vector<64x128xbf16>
    %c14 = arith.constant 14 : index
    %c0_113 = arith.constant 0 : index
    %c0_114 = arith.constant 0 : index
    %148 = vector.load %arg5[%c14, %c0_113, %c0_114] : memref<27x128x128xbf16, #tpu.memory_space<vmem>>, vector<1x128x128xbf16>
    %149 = vector.shape_cast %148 : vector<1x128x128xbf16> to vector<128x128xbf16>
    %cst_115 = arith.constant dense<0.000000e+00> : vector<64x128xf32>
    %150 = tpu.matmul %147, %149, %cst_115 {dimension_numbers = #tpu.dot_dimension_numbers<[1], [0], [0], [1], [0, 0, 1, 1], [], []>} : vector<64x128xbf16>, vector<128x128xbf16>, vector<64x128xf32> -> vector<64x128xf32>
    %151 = arith.addf %141, %150 : vector<64x128xf32>
    %c0_116 = arith.constant 0 : index
    %c0_117 = arith.constant 0 : index
    %c16_118 = arith.constant 16 : index
    %c0_119 = arith.constant 0 : index
    %152 = vector.load %arg3[%c0_116, %c0_117, %c16_118, %c0_119] : memref<1x1x82x128xbf16, #tpu.memory_space<vmem>>, vector<1x1x64x128xbf16>
    %153 = vector.shape_cast %152 : vector<1x1x64x128xbf16> to vector<64x128xbf16>
    %cst_120 = arith.constant 0.000000e+00 : bf16
    %154 = vector.broadcast %cst_120 : bf16 to vector<64x128xbf16>
    %155 = vector.shape_cast %18 : vector<64x1xi1> to vector<64x1xi1>
    %156 = vector.broadcast %155 : vector<64x1xi1> to vector<64x128xi1>
    %157 = arith.select %156, %153, %154 : vector<64x128xi1>, vector<64x128xbf16>
    %c15 = arith.constant 15 : index
    %c0_121 = arith.constant 0 : index
    %c0_122 = arith.constant 0 : index
    %158 = vector.load %arg5[%c15, %c0_121, %c0_122] : memref<27x128x128xbf16, #tpu.memory_space<vmem>>, vector<1x128x128xbf16>
    %159 = vector.shape_cast %158 : vector<1x128x128xbf16> to vector<128x128xbf16>
    %cst_123 = arith.constant dense<0.000000e+00> : vector<64x128xf32>
    %160 = tpu.matmul %157, %159, %cst_123 {dimension_numbers = #tpu.dot_dimension_numbers<[1], [0], [0], [1], [0, 0, 1, 1], [], []>} : vector<64x128xbf16>, vector<128x128xbf16>, vector<64x128xf32> -> vector<64x128xf32>
    %161 = arith.addf %151, %160 : vector<64x128xf32>
    %c0_124 = arith.constant 0 : index
    %c0_125 = arith.constant 0 : index
    %c17_126 = arith.constant 17 : index
    %c0_127 = arith.constant 0 : index
    %162 = vector.load %arg3[%c0_124, %c0_125, %c17_126, %c0_127] : memref<1x1x82x128xbf16, #tpu.memory_space<vmem>>, vector<1x1x64x128xbf16>
    %163 = vector.shape_cast %162 : vector<1x1x64x128xbf16> to vector<64x128xbf16>
    %c16_128 = arith.constant 16 : index
    %c0_129 = arith.constant 0 : index
    %c0_130 = arith.constant 0 : index
    %164 = vector.load %arg5[%c16_128, %c0_129, %c0_130] : memref<27x128x128xbf16, #tpu.memory_space<vmem>>, vector<1x128x128xbf16>
    %165 = vector.shape_cast %164 : vector<1x128x128xbf16> to vector<128x128xbf16>
    %cst_131 = arith.constant dense<0.000000e+00> : vector<64x128xf32>
    %166 = tpu.matmul %163, %165, %cst_131 {dimension_numbers = #tpu.dot_dimension_numbers<[1], [0], [0], [1], [0, 0, 1, 1], [], []>} : vector<64x128xbf16>, vector<128x128xbf16>, vector<64x128xf32> -> vector<64x128xf32>
    %167 = arith.addf %161, %166 : vector<64x128xf32>
    %c0_132 = arith.constant 0 : index
    %c0_133 = arith.constant 0 : index
    %c18_134 = arith.constant 18 : index
    %c0_135 = arith.constant 0 : index
    %168 = vector.load %arg3[%c0_132, %c0_133, %c18_134, %c0_135] : memref<1x1x82x128xbf16, #tpu.memory_space<vmem>>, vector<1x1x64x128xbf16>
    %169 = vector.shape_cast %168 : vector<1x1x64x128xbf16> to vector<64x128xbf16>
    %cst_136 = arith.constant 0.000000e+00 : bf16
    %170 = vector.broadcast %cst_136 : bf16 to vector<64x128xbf16>
    %171 = vector.shape_cast %20 : vector<64x1xi1> to vector<64x1xi1>
    %172 = vector.broadcast %171 : vector<64x1xi1> to vector<64x128xi1>
    %173 = arith.select %172, %169, %170 : vector<64x128xi1>, vector<64x128xbf16>
    %c17_137 = arith.constant 17 : index
    %c0_138 = arith.constant 0 : index
    %c0_139 = arith.constant 0 : index
    %174 = vector.load %arg5[%c17_137, %c0_138, %c0_139] : memref<27x128x128xbf16, #tpu.memory_space<vmem>>, vector<1x128x128xbf16>
    %175 = vector.shape_cast %174 : vector<1x128x128xbf16> to vector<128x128xbf16>
    %cst_140 = arith.constant dense<0.000000e+00> : vector<64x128xf32>
    %176 = tpu.matmul %173, %175, %cst_140 {dimension_numbers = #tpu.dot_dimension_numbers<[1], [0], [0], [1], [0, 0, 1, 1], [], []>} : vector<64x128xbf16>, vector<128x128xbf16>, vector<64x128xf32> -> vector<64x128xf32>
    %177 = arith.addf %167, %176 : vector<64x128xf32>
    %c0_141 = arith.constant 0 : index
    %c0_142 = arith.constant 0 : index
    %c0_143 = arith.constant 0 : index
    %c0_144 = arith.constant 0 : index
    %178 = vector.load %arg4[%c0_141, %c0_142, %c0_143, %c0_144] : memref<1x1x82x128xbf16, #tpu.memory_space<vmem>>, vector<1x1x64x128xbf16>
    %179 = vector.shape_cast %178 : vector<1x1x64x128xbf16> to vector<64x128xbf16>
    %cst_145 = arith.constant 0.000000e+00 : bf16
    %180 = vector.broadcast %cst_145 : bf16 to vector<64x128xbf16>
    %181 = vector.shape_cast %18 : vector<64x1xi1> to vector<64x1xi1>
    %182 = vector.broadcast %181 : vector<64x1xi1> to vector<64x128xi1>
    %183 = arith.select %182, %179, %180 : vector<64x128xi1>, vector<64x128xbf16>
    %c18_146 = arith.constant 18 : index
    %c0_147 = arith.constant 0 : index
    %c0_148 = arith.constant 0 : index
    %184 = vector.load %arg5[%c18_146, %c0_147, %c0_148] : memref<27x128x128xbf16, #tpu.memory_space<vmem>>, vector<1x128x128xbf16>
    %185 = vector.shape_cast %184 : vector<1x128x128xbf16> to vector<128x128xbf16>
    %cst_149 = arith.constant dense<0.000000e+00> : vector<64x128xf32>
    %186 = tpu.matmul %183, %185, %cst_149 {dimension_numbers = #tpu.dot_dimension_numbers<[1], [0], [0], [1], [0, 0, 1, 1], [], []>} : vector<64x128xbf16>, vector<128x128xbf16>, vector<64x128xf32> -> vector<64x128xf32>
    %187 = arith.addf %177, %186 : vector<64x128xf32>
    %c0_150 = arith.constant 0 : index
    %c0_151 = arith.constant 0 : index
    %c1_152 = arith.constant 1 : index
    %c0_153 = arith.constant 0 : index
    %188 = vector.load %arg4[%c0_150, %c0_151, %c1_152, %c0_153] : memref<1x1x82x128xbf16, #tpu.memory_space<vmem>>, vector<1x1x64x128xbf16>
    %189 = vector.shape_cast %188 : vector<1x1x64x128xbf16> to vector<64x128xbf16>
    %c19 = arith.constant 19 : index
    %c0_154 = arith.constant 0 : index
    %c0_155 = arith.constant 0 : index
    %190 = vector.load %arg5[%c19, %c0_154, %c0_155] : memref<27x128x128xbf16, #tpu.memory_space<vmem>>, vector<1x128x128xbf16>
    %191 = vector.shape_cast %190 : vector<1x128x128xbf16> to vector<128x128xbf16>
    %cst_156 = arith.constant dense<0.000000e+00> : vector<64x128xf32>
    %192 = tpu.matmul %189, %191, %cst_156 {dimension_numbers = #tpu.dot_dimension_numbers<[1], [0], [0], [1], [0, 0, 1, 1], [], []>} : vector<64x128xbf16>, vector<128x128xbf16>, vector<64x128xf32> -> vector<64x128xf32>
    %193 = arith.addf %187, %192 : vector<64x128xf32>
    %c0_157 = arith.constant 0 : index
    %c0_158 = arith.constant 0 : index
    %c2_159 = arith.constant 2 : index
    %c0_160 = arith.constant 0 : index
    %194 = vector.load %arg4[%c0_157, %c0_158, %c2_159, %c0_160] : memref<1x1x82x128xbf16, #tpu.memory_space<vmem>>, vector<1x1x64x128xbf16>
    %195 = vector.shape_cast %194 : vector<1x1x64x128xbf16> to vector<64x128xbf16>
    %cst_161 = arith.constant 0.000000e+00 : bf16
    %196 = vector.broadcast %cst_161 : bf16 to vector<64x128xbf16>
    %197 = vector.shape_cast %20 : vector<64x1xi1> to vector<64x1xi1>
    %198 = vector.broadcast %197 : vector<64x1xi1> to vector<64x128xi1>
    %199 = arith.select %198, %195, %196 : vector<64x128xi1>, vector<64x128xbf16>
    %c20 = arith.constant 20 : index
    %c0_162 = arith.constant 0 : index
    %c0_163 = arith.constant 0 : index
    %200 = vector.load %arg5[%c20, %c0_162, %c0_163] : memref<27x128x128xbf16, #tpu.memory_space<vmem>>, vector<1x128x128xbf16>
    %201 = vector.shape_cast %200 : vector<1x128x128xbf16> to vector<128x128xbf16>
    %cst_164 = arith.constant dense<0.000000e+00> : vector<64x128xf32>
    %202 = tpu.matmul %199, %201, %cst_164 {dimension_numbers = #tpu.dot_dimension_numbers<[1], [0], [0], [1], [0, 0, 1, 1], [], []>} : vector<64x128xbf16>, vector<128x128xbf16>, vector<64x128xf32> -> vector<64x128xf32>
    %203 = arith.addf %193, %202 : vector<64x128xf32>
    %c0_165 = arith.constant 0 : index
    %c0_166 = arith.constant 0 : index
    %c8_167 = arith.constant 8 : index
    %c0_168 = arith.constant 0 : index
    %204 = vector.load %arg4[%c0_165, %c0_166, %c8_167, %c0_168] : memref<1x1x82x128xbf16, #tpu.memory_space<vmem>>, vector<1x1x64x128xbf16>
    %205 = vector.shape_cast %204 : vector<1x1x64x128xbf16> to vector<64x128xbf16>
    %cst_169 = arith.constant 0.000000e+00 : bf16
    %206 = vector.broadcast %cst_169 : bf16 to vector<64x128xbf16>
    %207 = vector.shape_cast %18 : vector<64x1xi1> to vector<64x1xi1>
    %208 = vector.broadcast %207 : vector<64x1xi1> to vector<64x128xi1>
    %209 = arith.select %208, %205, %206 : vector<64x128xi1>, vector<64x128xbf16>
    %c21 = arith.constant 21 : index
    %c0_170 = arith.constant 0 : index
    %c0_171 = arith.constant 0 : index
    %210 = vector.load %arg5[%c21, %c0_170, %c0_171] : memref<27x128x128xbf16, #tpu.memory_space<vmem>>, vector<1x128x128xbf16>
    %211 = vector.shape_cast %210 : vector<1x128x128xbf16> to vector<128x128xbf16>
    %cst_172 = arith.constant dense<0.000000e+00> : vector<64x128xf32>
    %212 = tpu.matmul %209, %211, %cst_172 {dimension_numbers = #tpu.dot_dimension_numbers<[1], [0], [0], [1], [0, 0, 1, 1], [], []>} : vector<64x128xbf16>, vector<128x128xbf16>, vector<64x128xf32> -> vector<64x128xf32>
    %213 = arith.addf %203, %212 : vector<64x128xf32>
    %c0_173 = arith.constant 0 : index
    %c0_174 = arith.constant 0 : index
    %c9_175 = arith.constant 9 : index
    %c0_176 = arith.constant 0 : index
    %214 = vector.load %arg4[%c0_173, %c0_174, %c9_175, %c0_176] : memref<1x1x82x128xbf16, #tpu.memory_space<vmem>>, vector<1x1x64x128xbf16>
    %215 = vector.shape_cast %214 : vector<1x1x64x128xbf16> to vector<64x128xbf16>
    %c22 = arith.constant 22 : index
    %c0_177 = arith.constant 0 : index
    %c0_178 = arith.constant 0 : index
    %216 = vector.load %arg5[%c22, %c0_177, %c0_178] : memref<27x128x128xbf16, #tpu.memory_space<vmem>>, vector<1x128x128xbf16>
    %217 = vector.shape_cast %216 : vector<1x128x128xbf16> to vector<128x128xbf16>
    %cst_179 = arith.constant dense<0.000000e+00> : vector<64x128xf32>
    %218 = tpu.matmul %215, %217, %cst_179 {dimension_numbers = #tpu.dot_dimension_numbers<[1], [0], [0], [1], [0, 0, 1, 1], [], []>} : vector<64x128xbf16>, vector<128x128xbf16>, vector<64x128xf32> -> vector<64x128xf32>
    %219 = arith.addf %213, %218 : vector<64x128xf32>
    %c0_180 = arith.constant 0 : index
    %c0_181 = arith.constant 0 : index
    %c10_182 = arith.constant 10 : index
    %c0_183 = arith.constant 0 : index
    %220 = vector.load %arg4[%c0_180, %c0_181, %c10_182, %c0_183] : memref<1x1x82x128xbf16, #tpu.memory_space<vmem>>, vector<1x1x64x128xbf16>
    %221 = vector.shape_cast %220 : vector<1x1x64x128xbf16> to vector<64x128xbf16>
    %cst_184 = arith.constant 0.000000e+00 : bf16
    %222 = vector.broadcast %cst_184 : bf16 to vector<64x128xbf16>
    %223 = vector.shape_cast %20 : vector<64x1xi1> to vector<64x1xi1>
    %224 = vector.broadcast %223 : vector<64x1xi1> to vector<64x128xi1>
    %225 = arith.select %224, %221, %222 : vector<64x128xi1>, vector<64x128xbf16>
    %c23 = arith.constant 23 : index
    %c0_185 = arith.constant 0 : index
    %c0_186 = arith.constant 0 : index
    %226 = vector.load %arg5[%c23, %c0_185, %c0_186] : memref<27x128x128xbf16, #tpu.memory_space<vmem>>, vector<1x128x128xbf16>
    %227 = vector.shape_cast %226 : vector<1x128x128xbf16> to vector<128x128xbf16>
    %cst_187 = arith.constant dense<0.000000e+00> : vector<64x128xf32>
    %228 = tpu.matmul %225, %227, %cst_187 {dimension_numbers = #tpu.dot_dimension_numbers<[1], [0], [0], [1], [0, 0, 1, 1], [], []>} : vector<64x128xbf16>, vector<128x128xbf16>, vector<64x128xf32> -> vector<64x128xf32>
    %229 = arith.addf %219, %228 : vector<64x128xf32>
    %c0_188 = arith.constant 0 : index
    %c0_189 = arith.constant 0 : index
    %c16_190 = arith.constant 16 : index
    %c0_191 = arith.constant 0 : index
    %230 = vector.load %arg4[%c0_188, %c0_189, %c16_190, %c0_191] : memref<1x1x82x128xbf16, #tpu.memory_space<vmem>>, vector<1x1x64x128xbf16>
    %231 = vector.shape_cast %230 : vector<1x1x64x128xbf16> to vector<64x128xbf16>
    %cst_192 = arith.constant 0.000000e+00 : bf16
    %232 = vector.broadcast %cst_192 : bf16 to vector<64x128xbf16>
    %233 = vector.shape_cast %18 : vector<64x1xi1> to vector<64x1xi1>
    %234 = vector.broadcast %233 : vector<64x1xi1> to vector<64x128xi1>
    %235 = arith.select %234, %231, %232 : vector<64x128xi1>, vector<64x128xbf16>
    %c24 = arith.constant 24 : index
    %c0_193 = arith.constant 0 : index
    %c0_194 = arith.constant 0 : index
    %236 = vector.load %arg5[%c24, %c0_193, %c0_194] : memref<27x128x128xbf16, #tpu.memory_space<vmem>>, vector<1x128x128xbf16>
    %237 = vector.shape_cast %236 : vector<1x128x128xbf16> to vector<128x128xbf16>
    %cst_195 = arith.constant dense<0.000000e+00> : vector<64x128xf32>
    %238 = tpu.matmul %235, %237, %cst_195 {dimension_numbers = #tpu.dot_dimension_numbers<[1], [0], [0], [1], [0, 0, 1, 1], [], []>} : vector<64x128xbf16>, vector<128x128xbf16>, vector<64x128xf32> -> vector<64x128xf32>
    %239 = arith.addf %229, %238 : vector<64x128xf32>
    %c0_196 = arith.constant 0 : index
    %c0_197 = arith.constant 0 : index
    %c17_198 = arith.constant 17 : index
    %c0_199 = arith.constant 0 : index
    %240 = vector.load %arg4[%c0_196, %c0_197, %c17_198, %c0_199] : memref<1x1x82x128xbf16, #tpu.memory_space<vmem>>, vector<1x1x64x128xbf16>
    %241 = vector.shape_cast %240 : vector<1x1x64x128xbf16> to vector<64x128xbf16>
    %c25 = arith.constant 25 : index
    %c0_200 = arith.constant 0 : index
    %c0_201 = arith.constant 0 : index
    %242 = vector.load %arg5[%c25, %c0_200, %c0_201] : memref<27x128x128xbf16, #tpu.memory_space<vmem>>, vector<1x128x128xbf16>
    %243 = vector.shape_cast %242 : vector<1x128x128xbf16> to vector<128x128xbf16>
    %cst_202 = arith.constant dense<0.000000e+00> : vector<64x128xf32>
    %244 = tpu.matmul %241, %243, %cst_202 {dimension_numbers = #tpu.dot_dimension_numbers<[1], [0], [0], [1], [0, 0, 1, 1], [], []>} : vector<64x128xbf16>, vector<128x128xbf16>, vector<64x128xf32> -> vector<64x128xf32>
    %245 = arith.addf %239, %244 : vector<64x128xf32>
    %c0_203 = arith.constant 0 : index
    %c0_204 = arith.constant 0 : index
    %c18_205 = arith.constant 18 : index
    %c0_206 = arith.constant 0 : index
    %246 = vector.load %arg4[%c0_203, %c0_204, %c18_205, %c0_206] : memref<1x1x82x128xbf16, #tpu.memory_space<vmem>>, vector<1x1x64x128xbf16>
    %247 = vector.shape_cast %246 : vector<1x1x64x128xbf16> to vector<64x128xbf16>
    %cst_207 = arith.constant 0.000000e+00 : bf16
    %248 = vector.broadcast %cst_207 : bf16 to vector<64x128xbf16>
    %249 = vector.shape_cast %20 : vector<64x1xi1> to vector<64x1xi1>
    %250 = vector.broadcast %249 : vector<64x1xi1> to vector<64x128xi1>
    %251 = arith.select %250, %247, %248 : vector<64x128xi1>, vector<64x128xbf16>
    %c26 = arith.constant 26 : index
    %c0_208 = arith.constant 0 : index
    %c0_209 = arith.constant 0 : index
    %252 = vector.load %arg5[%c26, %c0_208, %c0_209] : memref<27x128x128xbf16, #tpu.memory_space<vmem>>, vector<1x128x128xbf16>
    %253 = vector.shape_cast %252 : vector<1x128x128xbf16> to vector<128x128xbf16>
    %cst_210 = arith.constant dense<0.000000e+00> : vector<64x128xf32>
    %254 = tpu.matmul %251, %253, %cst_210 {dimension_numbers = #tpu.dot_dimension_numbers<[1], [0], [0], [1], [0, 0, 1, 1], [], []>} : vector<64x128xbf16>, vector<128x128xbf16>, vector<64x128xf32> -> vector<64x128xf32>
    %255 = arith.addf %245, %254 : vector<64x128xf32>
    %c0_211 = arith.constant 0 : index
    %c0_212 = arith.constant 0 : index
    %256 = vector.load %arg6[%c0_211, %c0_212] : memref<1x128xf32, #tpu.memory_space<vmem>>, vector<1x128xf32>
    %257 = vector.broadcast %256 : vector<1x128xf32> to vector<64x128xf32>
    %258 = arith.addf %255, %257 : vector<64x128xf32>
    %c0_213 = arith.constant 0 : index
    %c0_214 = arith.constant 0 : index
    %c0_215 = arith.constant 0 : index
    %c0_216 = arith.constant 0 : index
    %259 = vector.load %arg7[%c0_213, %c0_214, %c0_215, %c0_216] : memref<1x1x64x128xf32, #tpu.memory_space<vmem>>, vector<1x1x64x128xf32>
    %260 = vector.shape_cast %259 : vector<1x1x64x128xf32> to vector<64x128xf32>
    %261 = vector.shape_cast %258 : vector<64x128xf32> to vector<1x1x64x128xf32>
    tpu.vector_store %arg7[%c0_213, %c0_214, %c0_215, %c0_216], %261 {strides = array<i32>} : memref<1x1x64x128xf32, #tpu.memory_space<vmem>>, vector<1x1x64x128xf32>,
    %cst_217 = arith.constant dense<0.000000e+00> : vector<128xf32>
    %262 = vector.multi_reduction <add>, %258, %cst_217 [0] : vector<64x128xf32> to vector<128xf32>
    %263 = vector.shape_cast %262 : vector<128xf32> to vector<1x128xf32>
    %c0_218 = arith.constant 0 : index
    %c0_219 = arith.constant 0 : index
    %c0_220 = arith.constant 0 : index
    %c0_221 = arith.constant 0 : index
    %264 = vector.load %arg8[%c0_218, %c0_219, %c0_220, %c0_221] : memref<1x1x1x128xf32, #tpu.memory_space<vmem>>, vector<1x1x1x128xf32>
    %265 = vector.shape_cast %264 : vector<1x1x1x128xf32> to vector<1x128xf32>
    %266 = vector.shape_cast %263 : vector<1x128xf32> to vector<1x1x1x128xf32>
    tpu.vector_store %arg8[%c0_218, %c0_219, %c0_220, %c0_221], %266 {strides = array<i32>} : memref<1x1x1x128xf32, #tpu.memory_space<vmem>>, vector<1x1x1x128xf32>,
    %267 = arith.mulf %258, %258 : vector<64x128xf32>
    %cst_222 = arith.constant dense<0.000000e+00> : vector<128xf32>
    %268 = vector.multi_reduction <add>, %267, %cst_222 [0] : vector<64x128xf32> to vector<128xf32>
    %269 = vector.shape_cast %268 : vector<128xf32> to vector<1x128xf32>
    %c0_223 = arith.constant 0 : index
    %c0_224 = arith.constant 0 : index
    %c0_225 = arith.constant 0 : index
    %c0_226 = arith.constant 0 : index
    %270 = vector.load %arg9[%c0_223, %c0_224, %c0_225, %c0_226] : memref<1x1x1x128xf32, #tpu.memory_space<vmem>>, vector<1x1x1x128xf32>
    %271 = vector.shape_cast %270 : vector<1x1x1x128xf32> to vector<1x128xf32>
    %272 = vector.shape_cast %269 : vector<1x128xf32> to vector<1x1x1x128xf32>
    tpu.vector_store %arg9[%c0_223, %c0_224, %c0_225, %c0_226], %272 {strides = array<i32>} : memref<1x1x1x128xf32, #tpu.memory_space<vmem>>, vector<1x1x1x128xf32>,
    return
  }
  func.func @transform_0(%arg0: i32, %arg1: i32) -> (i32, i32, i32, i32) {
    %c0_i32 = arith.constant 0 : i32
    %c0_i32_0 = arith.constant 0 : i32
    %c0_i32_1 = arith.constant 0 : i32
    return %arg0, %arg1, %c0_i32, %c0_i32_0 : i32, i32, i32, i32
  }
  func.func @transform_1(%arg0: i32, %arg1: i32) -> (i32, i32, i32, i32) {
    %c1_i32 = arith.constant 1 : i32
    %0 = arith.addi %arg1, %c1_i32 : i32
    %c0_i32 = arith.constant 0 : i32
    %c0_i32_0 = arith.constant 0 : i32
    %c0_i32_1 = arith.constant 0 : i32
    return %arg0, %0, %c0_i32, %c0_i32_0 : i32, i32, i32, i32
  }
  func.func @transform_2(%arg0: i32, %arg1: i32) -> (i32, i32, i32, i32) {
    %c2_i32 = arith.constant 2 : i32
    %0 = arith.addi %arg1, %c2_i32 : i32
    %c0_i32 = arith.constant 0 : i32
    %c0_i32_0 = arith.constant 0 : i32
    %c0_i32_1 = arith.constant 0 : i32
    return %arg0, %0, %c0_i32, %c0_i32_0 : i32, i32, i32, i32
  }
  func.func @transform_3(%arg0: i32, %arg1: i32) -> (i32, i32, i32) {
    %c0_i32 = arith.constant 0 : i32
    %c0_i32_0 = arith.constant 0 : i32
    %c0_i32_1 = arith.constant 0 : i32
    %c0_i32_2 = arith.constant 0 : i32
    return %c0_i32, %c0_i32_0, %c0_i32_1 : i32, i32, i32
  }
  func.func @transform_4(%arg0: i32, %arg1: i32) -> (i32, i32) {
    %c0_i32 = arith.constant 0 : i32
    %c0_i32_0 = arith.constant 0 : i32
    %c0_i32_1 = arith.constant 0 : i32
    return %c0_i32, %c0_i32_0 : i32, i32
  }
  func.func @transform_5(%arg0: i32, %arg1: i32) -> (i32, i32, i32, i32) {
    %c0_i32 = arith.constant 0 : i32
    %c0_i32_0 = arith.constant 0 : i32
    %c0_i32_1 = arith.constant 0 : i32
    return %arg0, %arg1, %c0_i32, %c0_i32_0 : i32, i32, i32, i32
  }
  func.func @transform_6(%arg0: i32, %arg1: i32) -> (i32, i32, i32, i32) {
    %c0_i32 = arith.constant 0 : i32
    %c0_i32_0 = arith.constant 0 : i32
    %c0_i32_1 = arith.constant 0 : i32
    return %arg0, %arg1, %c0_i32, %c0_i32_0 : i32, i32, i32, i32
  }
  func.func @transform_7(%arg0: i32, %arg1: i32) -> (i32, i32, i32, i32) {
    %c0_i32 = arith.constant 0 : i32
    %c0_i32_0 = arith.constant 0 : i32
    %c0_i32_1 = arith.constant 0 : i32
    return %arg0, %arg1, %c0_i32, %c0_i32_0 : i32, i32, i32, i32
  }
}

</mosaic_0001>

<bundles_post_ra>
// kernel: tile.8
= control target key start
LH: loop header
LB: loop body
LE: loop exit
PB: predicated region body
PF: predicated region fallthrough
CT: control target
= control target key end

     0   :  { %s22_s0 = inlined_call_operand.vmem [shape: f32[128], index: 0, kind: input, shape index: {}]   ;;  %s23_s1 = inlined_call_operand.vmem [shape: f32[8,128], index: 1, kind: output, shape index: {}]  }
   0x1   :  { %v4_v0 = vld [vmem:[%s22_s0] ss:$0 sm:$0xff] }
   0x2   :  { %5 = vst [vmem:[%s23_s1] sm:$0xff] %v4_v0 }

// kernel: upblock_forward.5
= control target key start
LH: loop header
LB: loop body
LE: loop exit
PB: predicated region body
PF: predicated region fallthrough
CT: control target
= control target key end

     0   :  { %v1618_v3 = vmov 0   ;;  %s2264_s1 = inlined_call_operand.vmem [shape: bf16[128,1024], index: 1, kind: input, shape index: {}]   ;;  %s2265_s0 = inlined_call_operand.vmem [shape: bf16[128,128], index: 0, kind: input, shape index: {}]   ;;  %s2266_s2 = inlined_call_operand.vmem [shape: f32[1,1024], index: 2, kind: input, shape index: {}]   ;;  %s2267_s3 = inlined_call_operand.vmem [shape: bf16[128,1024], index: 3, kind: output, shape index: {}]  }
   0x1   :  { %v87_v0 = vld [vmem:[%s2264_s1 + $0x1c0] sm:$0xff]  ;;  %v88_v2 = vld [vmem:[%s2264_s1 + $0x1c8] sm:$0xff]  ;;  %537 = vmatprep.mubr.bf16.mxu0 %v1618_v3  ;;  %650 = vmatprep.mubr.bf16.mxu1 %v1618_v3  ;;  %v89_v63 = vld [vmem:[%s2264_s1 + $0x1d0] sm:$0xff] }
   0x2   :  { %v91_v1 = vld [vmem:[%s2264_s1 + $0x1e0] sm:$0xff]  ;;  %v92_v5 = vld [vmem:[%s2264_s1 + $0x1e8] sm:$0xff] }
   0x3   :  { %v1474_v4 = vcombine.high %v87_v0, %v91_v1  ;;  %v1473_v6 = vcombine.low %v87_v0, %v91_v1  ;;  %v79_v7 = vld [vmem:[%s2264_s1 + $0x180] sm:$0xff]  ;;  %v1476_v9 = vcombine.high %v88_v2, %v92_v5  ;;  %v1475_v10 = vcombine.low %v88_v2, %v92_v5  ;;  %v80_v12 = vld [vmem:[%s2264_s1 + $0x188] sm:$0xff]  ;;  %v93_v0 = vld [vmem:[%s2264_s1 + $0x1f0] sm:$0xff] }
   0x4   :  { %v83_v8 = vld [vmem:[%s2264_s1 + $0x1a0] sm:$0xff]  ;;  %v84_v13 = vld [vmem:[%s2264_s1 + $0x1a8] sm:$0xff]  ;;  %v90_v1 = vld [vmem:[%s2264_s1 + $0x1d8] sm:$0xff] }
   0x5   :  { %v1466_v11 = vcombine.high %v79_v7, %v83_v8  ;;  %v71_v14 = vld [vmem:[%s2264_s1 + $0x140] sm:$0xff]  ;;  %505 = vmatprep.subr.bf16.mxu0 %v1474_v4  ;;  %v1468_v15 = vcombine.high %v80_v12, %v84_v13  ;;  %v72_v17 = vld [vmem:[%s2264_s1 + $0x148] sm:$0xff]  ;;  %618 = vmatprep.subr.bf16.mxu1 %v1476_v9  ;;  %v1465_v19 = vcombine.low %v79_v7, %v83_v8  ;;  %v94_v2 = vld [vmem:[%s2264_s1 + $0x1f8] sm:$0xff] }
   0x6   :  { %v75_v16 = vld [vmem:[%s2264_s1 + $0x160] sm:$0xff]  ;;  %v76_v18 = vld [vmem:[%s2264_s1 + $0x168] sm:$0xff]  ;;  %506 = vmatpush1.bf16.msra.mxu0 %v1473_v6  ;;  %619 = vmatpush1.bf16.msra.mxu1 %v1475_v10  ;;  %v1467_v20 = vcombine.low %v80_v12, %v84_v13  ;;  %v1478_v6 = vcombine.high %v89_v63, %v93_v0  ;;  %v1480_v7 = vcombine.high %v90_v1, %v94_v2  ;;  %v81_v9 = vld [vmem:[%s2264_s1 + $0x190] sm:$0xff] }
   0x7   :  { %507 = vmatprep.subr.bf16.mxu0 %v1466_v11  ;;  %v1458_v21 = vcombine.high %v71_v14, %v75_v16  ;;  %620 = vmatprep.subr.bf16.mxu1 %v1468_v15  ;;  %v1460_v22 = vcombine.high %v72_v17, %v76_v18  ;;  %v63_v23 = vld [vmem:[%s2264_s1 + $0x100] sm:$0xff]  ;;  %v64_v25 = vld [vmem:[%s2264_s1 + $0x108] sm:$0xff]  ;;  %v1457_v27 = vcombine.low %v71_v14, %v75_v16  ;;  %v85_v10 = vld [vmem:[%s2264_s1 + $0x1b0] sm:$0xff] }
   0x8   :  { %v67_v24 = vld [vmem:[%s2264_s1 + $0x120] sm:$0xff]  ;;  %v68_v26 = vld [vmem:[%s2264_s1 + $0x128] sm:$0xff]  ;;  %v1459_v28 = vcombine.low %v72_v17, %v76_v18  ;;  %v1477_v11 = vcombine.low %v89_v63, %v93_v0  ;;  %v82_v12 = vld [vmem:[%s2264_s1 + $0x198] sm:$0xff]  ;;  %v1479_v14 = vcombine.low %v90_v1, %v94_v2  ;;  %v1470_v15 = vcombine.high %v81_v9, %v85_v10 }
   0x9   :  { %v1450_v29 = vcombine.high %v63_v23, %v67_v24  ;;  %v1452_v30 = vcombine.high %v64_v25, %v68_v26  ;;  %v55_v31 = vld [vmem:[%s2264_s1 + $0xc0] sm:$0xff]  ;;  %v56_v33 = vld [vmem:[%s2264_s1 + $0xc8] sm:$0xff]  ;;  %v1449_v35 = vcombine.low %v63_v23, %v67_v24  ;;  %v1451_v36 = vcombine.low %v64_v25, %v68_v26  ;;  %v86_v13 = vld [vmem:[%s2264_s1 + $0x1b8] sm:$0xff] }
   0xa   :  { %508 = vmatpush1.bf16.msra.mxu0 %v1465_v19  ;;  %621 = vmatpush1.bf16.msra.mxu1 %v1467_v20  ;;  %v59_v32 = vld [vmem:[%s2264_s1 + $0xe0] sm:$0xff]  ;;  %v60_v34 = vld [vmem:[%s2264_s1 + $0xe8] sm:$0xff]  ;;  %v73_v16 = vld [vmem:[%s2264_s1 + $0x150] sm:$0xff]  ;;  %v1472_v18 = vcombine.high %v82_v12, %v86_v13 }
   0xb   :  { %509 = vmatprep.subr.bf16.mxu0 %v1458_v21  ;;  %622 = vmatprep.subr.bf16.mxu1 %v1460_v22  ;;  %v1442_v37 = vcombine.high %v55_v31, %v59_v32  ;;  %v1444_v38 = vcombine.high %v56_v33, %v60_v34  ;;  %v47_v39 = vld [vmem:[%s2264_s1 + $0x80] sm:$0xff]  ;;  %v48_v41 = vld [vmem:[%s2264_s1 + $0x88] sm:$0xff]  ;;  %v1441_v43 = vcombine.low %v55_v31, %v59_v32  ;;  %v77_v17 = vld [vmem:[%s2264_s1 + $0x170] sm:$0xff] }
   0xc   :  { %v51_v40 = vld [vmem:[%s2264_s1 + $0xa0] sm:$0xff]  ;;  %v52_v42 = vld [vmem:[%s2264_s1 + $0xa8] sm:$0xff]  ;;  %v1443_v44 = vcombine.low %v56_v33, %v60_v34  ;;  %v74_v19 = vld [vmem:[%s2264_s1 + $0x158] sm:$0xff]  ;;  %v1469_v21 = vcombine.low %v81_v9, %v85_v10  ;;  %v1471_v22 = vcombine.low %v82_v12, %v86_v13  ;;  %v1462_v23 = vcombine.high %v73_v16, %v77_v17 }
   0xd   :  { %v1434_v45 = vcombine.high %v47_v39, %v51_v40  ;;  %v1436_v46 = vcombine.high %v48_v41, %v52_v42  ;;  %v39_v47 = vld [vmem:[%s2264_s1 + $0x40] sm:$0xff]  ;;  %v40_v49 = vld [vmem:[%s2264_s1 + $0x48] sm:$0xff]  ;;  %v1433_v51 = vcombine.low %v47_v39, %v51_v40  ;;  %v1435_v52 = vcombine.low %v48_v41, %v52_v42  ;;  %v78_v20 = vld [vmem:[%s2264_s1 + $0x178] sm:$0xff] }
   0xe   :  { %510 = vmatpush1.bf16.msra.mxu0 %v1457_v27  ;;  %623 = vmatpush1.bf16.msra.mxu1 %v1459_v28  ;;  %v43_v48 = vld [vmem:[%s2264_s1 + $0x60] sm:$0xff]  ;;  %v44_v50 = vld [vmem:[%s2264_s1 + $0x68] sm:$0xff]  ;;  %v1464_v24 = vcombine.high %v74_v19, %v78_v20  ;;  %v65_v26 = vld [vmem:[%s2264_s1 + $0x110] sm:$0xff]  ;;  %v1463_v31 = vcombine.low %v74_v19, %v78_v20 }
   0xf   :  { %511 = vmatprep.subr.bf16.mxu0 %v1450_v29  ;;  %624 = vmatprep.subr.bf16.mxu1 %v1452_v30  ;;  %v1426_v53 = vcombine.high %v39_v47, %v43_v48  ;;  %v31_v54 = vld [vmem:[%s2264_s1] sm:$0xff]  ;;  %v1428_v55 = vcombine.high %v40_v49, %v44_v50  ;;  %v32_v57 = vld [vmem:[%s2264_s1 + $0x8] sm:$0xff]  ;;  %v1425_v59 = vcombine.low %v39_v47, %v43_v48  ;;  %v69_v27 = vld [vmem:[%s2264_s1 + $0x130] sm:$0xff] }
  0x10   :  { %v35_v56 = vld [vmem:[%s2264_s1 + $0x20] sm:$0xff]  ;;  %v36_v58 = vld [vmem:[%s2264_s1 + $0x28] sm:$0xff]  ;;  %v1427_v60 = vcombine.low %v40_v49, %v44_v50  ;;  %v66_v28 = vld [vmem:[%s2264_s1 + $0x118] sm:$0xff]  ;;  %v1461_v30 = vcombine.low %v73_v16, %v77_v17  ;;  %v1454_v32 = vcombine.high %v65_v26, %v69_v27 }
  0x11   :  { %v1418_v61 = vcombine.high %v31_v54, %v35_v56  ;;  %v1420_v62 = vcombine.high %v32_v57, %v36_v58  ;;  %v1417_v4 = vcombine.low %v31_v54, %v35_v56  ;;  %v1419_v5 = vcombine.low %v32_v57, %v36_v58  ;;  %v1752_v8 = vld [vmem:[%s2265_s0] sm:$0xff]   ;;  %v1785_v25 = vld [vmem:[%s2265_s0 + $0x8] sm:$0xff]   ;;  %v70_v29 = vld [vmem:[%s2264_s1 + $0x138] sm:$0xff] }
  0x12   :  { %512 = vmatpush1.bf16.msra.mxu0 %v1449_v35  ;;  %625 = vmatpush1.bf16.msra.mxu1 %v1451_v36  ;;  %v1456_v33 = vcombine.high %v66_v28, %v70_v29  ;;  %v57_v34 = vld [vmem:[%s2264_s1 + $0xd0] sm:$0xff]  ;;  %v58_v36 = vld [vmem:[%s2264_s1 + $0xd8] sm:$0xff]  ;;  %v1455_v39 = vcombine.low %v66_v28, %v70_v29  ;;  %v1615_v9 = vld [vmem:[%s2265_s0 + $0x28] sm:$0xff]  }
  0x13   :  { %513 = vmatprep.subr.bf16.mxu0 %v1442_v37  ;;  %626 = vmatprep.subr.bf16.mxu1 %v1444_v38  ;;  %v61_v35 = vld [vmem:[%s2264_s1 + $0xf0] sm:$0xff]  ;;  %v62_v37 = vld [vmem:[%s2264_s1 + $0xf8] sm:$0xff]  ;;  %v1453_v38 = vcombine.low %v65_v26, %v69_v27 }
  0x14   :  { %v1446_v40 = vcombine.high %v57_v34, %v61_v35  ;;  %v1818_v41 = vld [vmem:[%s2265_s0 + $0x10] sm:$0xff]   ;;  %v1448_v42 = vcombine.high %v58_v36, %v62_v37  ;;  %v1445_v47 = vcombine.low %v57_v34, %v61_v35  ;;  %v1447_v48 = vcombine.low %v58_v36, %v62_v37  ;;  %v46_v54 = vld [vmem:[%s2264_s1 + $0x78] sm:$0xff] }
  0x15   :  { %v1613_v58 = vld [vmem:[%s2265_s0 + $0x18] sm:$0xff]   ;;  %v1616_v10 = vld [vmem:[%s2265_s0 + $0x30] sm:$0xff]  }
  0x16   :  { %514 = vmatpush1.bf16.msra.mxu0 %v1441_v43  ;;  %627 = vmatpush1.bf16.msra.mxu1 %v1443_v44  ;;  %v49_v43 = vld [vmem:[%s2264_s1 + $0x90] sm:$0xff]  ;;  %v38_v63 = vld [vmem:[%s2264_s1 + $0x38] sm:$0xff] }
  0x17   :  { %515 = vmatprep.subr.bf16.mxu0 %v1434_v45  ;;  %628 = vmatprep.subr.bf16.mxu1 %v1436_v46  ;;  %v53_v44 = vld [vmem:[%s2264_s1 + $0xb0] sm:$0xff]  ;;  %v50_v45 = vld [vmem:[%s2264_s1 + $0x98] sm:$0xff] }
  0x18   :  { %v54_v46 = vld [vmem:[%s2264_s1 + $0xb8] sm:$0xff]  ;;  %v1438_v49 = vcombine.high %v49_v43, %v53_v44 }
  0x19   :  { %v1440_v50 = vcombine.high %v50_v45, %v54_v46  ;;  %v1439_v56 = vcombine.low %v50_v45, %v54_v46 }
  0x1a   :  { %516 = vmatpush1.bf16.msra.mxu0 %v1433_v51  ;;  %629 = vmatpush1.bf16.msra.mxu1 %v1435_v52  ;;  %v41_v51 = vld [vmem:[%s2264_s1 + $0x50] sm:$0xff] }
  0x1b   :  { %517 = vmatprep.subr.bf16.mxu0 %v1426_v53  ;;  %630 = vmatprep.subr.bf16.mxu1 %v1428_v55  ;;  %v45_v52 = vld [vmem:[%s2264_s1 + $0x70] sm:$0xff]  ;;  %v42_v53 = vld [vmem:[%s2264_s1 + $0x58] sm:$0xff]  ;;  %v1437_v55 = vcombine.low %v49_v43, %v53_v44 }
  0x1c   :  { %v1430_v57 = vcombine.high %v41_v51, %v45_v52  ;;  %v1429_v0 = vcombine.low %v41_v51, %v45_v52  ;;  %v1431_v1 = vcombine.low %v42_v53, %v46_v54 }
  0x1e   :  { %518 = vmatpush1.bf16.msra.mxu0 %v1425_v59  ;;  %631 = vmatpush1.bf16.msra.mxu1 %v1427_v60  ;;  %v1432_v59 = vcombine.high %v42_v53, %v46_v54  ;;  %v33_v60 = vld [vmem:[%s2264_s1 + $0x10] sm:$0xff] }
  0x1f   :  { %519 = vmatprep.subr.bf16.mxu0 %v1418_v61  ;;  %632 = vmatprep.subr.bf16.mxu1 %v1420_v62  ;;  %v37_v61 = vld [vmem:[%s2264_s1 + $0x30] sm:$0xff]  ;;  %v34_v62 = vld [vmem:[%s2264_s1 + $0x18] sm:$0xff] }
  0x20   :  { %v1422_v2 = vcombine.high %v33_v60, %v37_v61 }
  0x22   :  { %520 = vmatpush1.bf16.msra.mxu0 %v1417_v4  ;;  %633 = vmatpush1.bf16.msra.mxu1 %v1419_v5  ;;  %v1424_v4 = vcombine.high %v34_v62, %v38_v63  ;;  %v1421_v5 = vcombine.low %v33_v60, %v37_v61 }
  0x23   :  { %731 = vmatprep.subr.bf16.mxu0 %v1478_v6  ;;  %844 = vmatprep.subr.bf16.mxu1 %v1480_v7  ;;  %v1423_v6 = vcombine.low %v34_v62, %v38_v63  ;;  %v1614_v7 = vld [vmem:[%s2265_s0 + $0x20] sm:$0xff]  }
  0x25   :  { %538 = vmatmul.mubr.bf16.vlgmr.msra.gmra.mxu0 %v1752_v8  ;;  %651 = vmatmul.mubr.bf16.vlgmr.msra.gmra.mxu1 %v1752_v8 }
  0x26   :  { %732 = vmatpush1.bf16.msra.mxu0 %v1477_v11  ;;  %845 = vmatpush1.bf16.msra.mxu1 %v1479_v14  ;;  %v1617_v11 = vld [vmem:[%s2265_s0 + $0x38] sm:$0xff]  }
  0x27   :  { %547 = vmatprep.mubr.bf16.mxu0 %v1618_v3  ;;  %660 = vmatprep.mubr.bf16.mxu1 %v1618_v3 }
  0x28   :  { %733 = vmatprep.subr.bf16.mxu0 %v1470_v15  ;;  %846 = vmatprep.subr.bf16.mxu1 %v1472_v18  ;;  %v1912_v15 = vld [vmem:[%s2266_s2] sm:$0xff] }
  0x2a   :  { %734 = vmatpush1.bf16.msra.mxu0 %v1469_v21  ;;  %847 = vmatpush1.bf16.msra.mxu1 %v1471_v22 }
  0x2b   :  { %735 = vmatprep.subr.bf16.mxu0 %v1462_v23  ;;  %848 = vmatprep.subr.bf16.mxu1 %v1464_v24 }
  0x2d   :  { %548 = vmatmul.mubr.bf16.gmra.mxu0 %v1785_v25  ;;  %661 = vmatmul.mubr.bf16.gmra.mxu1 %v1785_v25 }
  0x2e   :  { %557 = vmatprep.mubr.bf16.mxu0 %v1618_v3  ;;  %670 = vmatprep.mubr.bf16.mxu1 %v1618_v3 }
  0x2f   :  { %736 = vmatpush1.bf16.msra.mxu0 %v1461_v30  ;;  %849 = vmatpush1.bf16.msra.mxu1 %v1463_v31 }
  0x30   :  { %737 = vmatprep.subr.bf16.mxu0 %v1454_v32  ;;  %850 = vmatprep.subr.bf16.mxu1 %v1456_v33 }
  0x33   :  { %738 = vmatpush1.bf16.msra.mxu0 %v1453_v38  ;;  %851 = vmatpush1.bf16.msra.mxu1 %v1455_v39 }
  0x34   :  { %739 = vmatprep.subr.bf16.mxu0 %v1446_v40  ;;  %852 = vmatprep.subr.bf16.mxu1 %v1448_v42 }
  0x35   :  { %558 = vmatmul.mubr.bf16.gmra.mxu0 %v1818_v41  ;;  %671 = vmatmul.mubr.bf16.gmra.mxu1 %v1818_v41 }
  0x36   :  { %567 = vmatprep.mubr.bf16.mxu0 %v1618_v3  ;;  %680 = vmatprep.mubr.bf16.mxu1 %v1618_v3 }
  0x37   :  { %740 = vmatpush1.bf16.msra.mxu0 %v1445_v47  ;;  %853 = vmatpush1.bf16.msra.mxu1 %v1447_v48 }
  0x38   :  { %741 = vmatprep.subr.bf16.mxu0 %v1438_v49  ;;  %854 = vmatprep.subr.bf16.mxu1 %v1440_v50 }
  0x3b   :  { %742 = vmatpush1.bf16.msra.mxu0 %v1437_v55  ;;  %855 = vmatpush1.bf16.msra.mxu1 %v1439_v56 }
  0x3c   :  { %743 = vmatprep.subr.bf16.mxu0 %v1430_v57  ;;  %856 = vmatprep.subr.bf16.mxu1 %v1432_v59 }
  0x3d   :  { %568 = vmatmul.mubr.bf16.gmra.mxu0 %v1613_v58  ;;  %681 = vmatmul.mubr.bf16.gmra.mxu1 %v1613_v58 }
  0x3e   :  { %577 = vmatprep.mubr.bf16.mxu0 %v1618_v3  ;;  %690 = vmatprep.mubr.bf16.mxu1 %v1618_v3 }
  0x3f   :  { %744 = vmatpush1.bf16.msra.mxu0 %v1429_v0  ;;  %857 = vmatpush1.bf16.msra.mxu1 %v1431_v1 }
  0x40   :  { %745 = vmatprep.subr.bf16.mxu0 %v1422_v2  ;;  %858 = vmatprep.subr.bf16.mxu1 %v1424_v4 }
  0x43   :  { %746 = vmatpush1.bf16.msra.mxu0 %v1421_v5  ;;  %859 = vmatpush1.bf16.msra.mxu1 %v1423_v6 }
  0x45   :  { %578 = vmatmul.mubr.bf16.gmra.mxu0 %v1614_v7  ;;  %691 = vmatmul.mubr.bf16.gmra.mxu1 %v1614_v7 }
  0x46   :  { %587 = vmatprep.mubr.bf16.mxu0 %v1618_v3  ;;  %700 = vmatprep.mubr.bf16.mxu1 %v1618_v3 }
  0x4d   :  { %588 = vmatmul.mubr.bf16.gmra.mxu0 %v1615_v9  ;;  %701 = vmatmul.mubr.bf16.gmra.mxu1 %v1615_v9 }
  0x4e   :  { %597 = vmatprep.mubr.bf16.mxu0 %v1618_v3  ;;  %710 = vmatprep.mubr.bf16.mxu1 %v1618_v3 }
  0x55   :  { %598 = vmatmul.mubr.bf16.gmra.mxu0 %v1616_v10  ;;  %711 = vmatmul.mubr.bf16.gmra.mxu1 %v1616_v10 }
  0x56   :  { %607 = vmatprep.mubr.bf16.mxu0 %v1618_v3  ;;  %720 = vmatprep.mubr.bf16.mxu1 %v1618_v3 }
  0x5d   :  { %608 = vmatmul.mubr.bf16.gmra.mxu0 %v1617_v11  ;;  %721 = vmatmul.mubr.bf16.gmra.mxu1 %v1617_v11 }
  0x5e   :  { %763 = vmatprep.mubr.bf16.mxu0 %v1618_v3  ;;  %876 = vmatprep.mubr.bf16.mxu1 %v1618_v3 }
  0x65   :  { %764 = vmatmul.mubr.bf16.vlgmr.msra.gmra.mxu0 %v1752_v8  ;;  %877 = vmatmul.mubr.bf16.vlgmr.msra.gmra.mxu1 %v1752_v8  ;;  %v97_v8 = vlaneseq }
  0x66   :  { %773 = vmatprep.mubr.bf16.mxu0 %v1618_v3  ;;  %886 = vmatprep.mubr.bf16.mxu1 %v1618_v3 }
  0x67   :  { %v1905_v12 = vshrl.u32 %v97_v8, 7 }
  0x69   :  { %v99_v13 = vsub.s32 0, %v1905_v12  ;;  %v103_v14 = vsub.s32 1, %v1905_v12  ;;  %v107_v16 = vsub.s32 2, %v1905_v12  ;;  %v111_v17 = vsub.s32 3, %v1905_v12 }
  0x6b   :  { %v1920_v18 = vrot.slane %v1912_v15, %v103_v14  ;;  %v1923_v20 = vrot.slane %v1912_v15, %v107_v16  ;;  %v1926_v21 = vrot.slane %v1912_v15, %v111_v17 }
  0x6d   :  { %774 = vmatmul.mubr.bf16.gmra.mxu0 %v1785_v25  ;;  %887 = vmatmul.mubr.bf16.gmra.mxu1 %v1785_v25 }
  0x6e   :  { %783 = vmatprep.mubr.bf16.mxu0 %v1618_v3  ;;  %896 = vmatprep.mubr.bf16.mxu1 %v1618_v3 }
  0x75   :  { %784 = vmatmul.mubr.bf16.gmra.mxu0 %v1818_v41  ;;  %897 = vmatmul.mubr.bf16.gmra.mxu1 %v1818_v41 }
  0x76   :  { %793 = vmatprep.mubr.bf16.mxu0 %v1618_v3  ;;  %906 = vmatprep.mubr.bf16.mxu1 %v1618_v3 }
  0x7d   :  { %794 = vmatmul.mubr.bf16.gmra.mxu0 %v1613_v58  ;;  %907 = vmatmul.mubr.bf16.gmra.mxu1 %v1613_v58 }
  0x7e   :  { %803 = vmatprep.mubr.bf16.mxu0 %v1618_v3  ;;  %916 = vmatprep.mubr.bf16.mxu1 %v1618_v3 }
  0x85   :  { %804 = vmatmul.mubr.bf16.gmra.mxu0 %v1614_v7  ;;  %917 = vmatmul.mubr.bf16.gmra.mxu1 %v1614_v7 }
  0x86   :  { %813 = vmatprep.mubr.bf16.mxu0 %v1618_v3  ;;  %926 = vmatprep.mubr.bf16.mxu1 %v1618_v3 }
  0x8d   :  { %814 = vmatmul.mubr.bf16.gmra.mxu0 %v1615_v9  ;;  %927 = vmatmul.mubr.bf16.gmra.mxu1 %v1615_v9 }
  0x8e   :  { %823 = vmatprep.mubr.bf16.mxu0 %v1618_v3  ;;  %936 = vmatprep.mubr.bf16.mxu1 %v1618_v3 }
  0x95   :  { %824 = vmatmul.mubr.bf16.gmra.mxu0 %v1616_v10  ;;  %937 = vmatmul.mubr.bf16.gmra.mxu1 %v1616_v10 }
  0x96   :  { %833 = vmatprep.mubr.bf16.mxu0 %v1618_v3  ;;  %946 = vmatprep.mubr.bf16.mxu1 %v1618_v3  ;;  %v1917_v3 = vrot.slane %v1912_v15, %v99_v13 }
  0x9d   :  { %834 = vmatmul.mubr.bf16.gmra.mxu0 %v1617_v11  ;;  %947 = vmatmul.mubr.bf16.gmra.mxu1 %v1617_v11 }
  0xe5   :  { %v539_v19 = vpop.f32.mrf.mxu0  ;;  %v652_v22 = vpop.f32.mrf.mxu1 }
  0xe6   :  { %v540_v24 = vadd.f32 %v539_v19, %v1917_v3  ;;  %v653_v27 = vadd.f32 %v652_v22, %v1923_v20 }
  0xe7   :  { %v541_v23 = vpop.f32.mrf.mxu0  ;;  %v654_v26 = vpop.f32.mrf.mxu1 }
  0xe8   :  { %v542_v25 = vadd.f32 %v541_v23, %v1920_v18  ;;  %v655_v28 = vadd.f32 %v654_v26, %v1926_v21 }
  0xe9   :  { %v543_v29 = vpop.f32.mrf.mxu0  ;;  %v656_v31 = vpop.f32.mrf.mxu1 }
  0xea   :  { %v1545_v30 = vpack.c.bf16 %v542_v25, %v540_v24  ;;  %v1546_v32 = vpack.c.bf16 %v655_v28, %v653_v27  ;;  %v544_v34 = vadd.f32 %v543_v29, %v1917_v3  ;;  %v657_v37 = vadd.f32 %v656_v31, %v1923_v20 }
  0xeb   :  { %v545_v33 = vpop.f32.mrf.mxu0  ;;  %v658_v36 = vpop.f32.mrf.mxu1 }
  0xec   :  { %1341 = vst [vmem:[%s2267_s3] sm:$0xff] %v1545_v30  ;;  %v546_v35 = vadd.f32 %v545_v33, %v1920_v18  ;;  %1342 = vst [vmem:[%s2267_s3 + $0x8] sm:$0xff] %v1546_v32  ;;  %v659_v38 = vadd.f32 %v658_v36, %v1926_v21 }
  0xed   :  { %v549_v39 = vpop.f32.mrf.mxu0  ;;  %v662_v41 = vpop.f32.mrf.mxu1 }
  0xee   :  { %v1549_v40 = vpack.c.bf16 %v546_v35, %v544_v34  ;;  %v1550_v42 = vpack.c.bf16 %v659_v38, %v657_v37  ;;  %v550_v44 = vadd.f32 %v549_v39, %v1917_v3  ;;  %v663_v47 = vadd.f32 %v662_v41, %v1923_v20 }
  0xef   :  { %v551_v43 = vpop.f32.mrf.mxu0  ;;  %v664_v46 = vpop.f32.mrf.mxu1 }
  0xf0   :  { %1345 = vst [vmem:[%s2267_s3 + $0x20] sm:$0xff] %v1549_v40  ;;  %v552_v45 = vadd.f32 %v551_v43, %v1920_v18  ;;  %1346 = vst [vmem:[%s2267_s3 + $0x28] sm:$0xff] %v1550_v42  ;;  %v665_v48 = vadd.f32 %v664_v46, %v1926_v21 }
  0xf1   :  { %v553_v49 = vpop.f32.mrf.mxu0  ;;  %v666_v51 = vpop.f32.mrf.mxu1 }
  0xf2   :  { %v1553_v50 = vpack.c.bf16 %v552_v45, %v550_v44  ;;  %v1554_v52 = vpack.c.bf16 %v665_v48, %v663_v47  ;;  %v554_v54 = vadd.f32 %v553_v49, %v1917_v3  ;;  %v667_v57 = vadd.f32 %v666_v51, %v1923_v20 }
  0xf3   :  { %v555_v53 = vpop.f32.mrf.mxu0  ;;  %v668_v56 = vpop.f32.mrf.mxu1 }
  0xf4   :  { %1349 = vst [vmem:[%s2267_s3 + $0x40] sm:$0xff] %v1553_v50  ;;  %v556_v55 = vadd.f32 %v555_v53, %v1920_v18  ;;  %1350 = vst [vmem:[%s2267_s3 + $0x48] sm:$0xff] %v1554_v52  ;;  %v669_v58 = vadd.f32 %v668_v56, %v1926_v21 }
  0xf5   :  { %v559_v59 = vpop.f32.mrf.mxu0  ;;  %v672_v61 = vpop.f32.mrf.mxu1 }
  0xf6   :  { %v1557_v60 = vpack.c.bf16 %v556_v55, %v554_v54  ;;  %v1558_v62 = vpack.c.bf16 %v669_v58, %v667_v57  ;;  %v560_v0 = vadd.f32 %v559_v59, %v1917_v3  ;;  %v673_v4 = vadd.f32 %v672_v61, %v1923_v20 }
  0xf7   :  { %v561_v63 = vpop.f32.mrf.mxu0  ;;  %v674_v2 = vpop.f32.mrf.mxu1 }
  0xf8   :  { %1353 = vst [vmem:[%s2267_s3 + $0x60] sm:$0xff] %v1557_v60  ;;  %v562_v1 = vadd.f32 %v561_v63, %v1920_v18  ;;  %1354 = vst [vmem:[%s2267_s3 + $0x68] sm:$0xff] %v1558_v62  ;;  %v675_v5 = vadd.f32 %v674_v2, %v1926_v21 }
  0xf9   :  { %v563_v6 = vpop.f32.mrf.mxu0  ;;  %v676_v9 = vpop.f32.mrf.mxu1 }
  0xfa   :  { %v1561_v7 = vpack.c.bf16 %v562_v1, %v560_v0  ;;  %v1562_v10 = vpack.c.bf16 %v675_v5, %v673_v4  ;;  %v564_v8 = vadd.f32 %v563_v6, %v1917_v3  ;;  %v677_v16 = vadd.f32 %v676_v9, %v1923_v20 }
  0xfb   :  { %v565_v11 = vpop.f32.mrf.mxu0  ;;  %v678_v14 = vpop.f32.mrf.mxu1 }
  0xfc   :  { %1357 = vst [vmem:[%s2267_s3 + $0x80] sm:$0xff] %v1561_v7  ;;  %v566_v13 = vadd.f32 %v565_v11, %v1920_v18  ;;  %1358 = vst [vmem:[%s2267_s3 + $0x88] sm:$0xff] %v1562_v10  ;;  %v679_v17 = vadd.f32 %v678_v14, %v1926_v21 }
  0xfd   :  { %v569_v19 = vpop.f32.mrf.mxu0  ;;  %v682_v23 = vpop.f32.mrf.mxu1 }
  0xfe   :  { %v1565_v22 = vpack.c.bf16 %v566_v13, %v564_v8  ;;  %v1566_v24 = vpack.c.bf16 %v679_v17, %v677_v16  ;;  %v570_v26 = vadd.f32 %v569_v19, %v1917_v3  ;;  %v683_v29 = vadd.f32 %v682_v23, %v1923_v20 }
  0xff   :  { %v571_v25 = vpop.f32.mrf.mxu0  ;;  %v684_v28 = vpop.f32.mrf.mxu1 }
 0x100   :  { %1361 = vst [vmem:[%s2267_s3 + $0xa0] sm:$0xff] %v1565_v22  ;;  %v572_v27 = vadd.f32 %v571_v25, %v1920_v18  ;;  %1362 = vst [vmem:[%s2267_s3 + $0xa8] sm:$0xff] %v1566_v24  ;;  %v685_v30 = vadd.f32 %v684_v28, %v1926_v21 }
 0x101   :  { %v573_v31 = vpop.f32.mrf.mxu0  ;;  %v686_v33 = vpop.f32.mrf.mxu1 }
 0x102   :  { %v1569_v32 = vpack.c.bf16 %v572_v27, %v570_v26  ;;  %v1570_v34 = vpack.c.bf16 %v685_v30, %v683_v29  ;;  %v574_v36 = vadd.f32 %v573_v31, %v1917_v3  ;;  %v687_v39 = vadd.f32 %v686_v33, %v1923_v20 }
 0x103   :  { %v575_v35 = vpop.f32.mrf.mxu0  ;;  %v688_v38 = vpop.f32.mrf.mxu1 }
 0x104   :  { %1365 = vst [vmem:[%s2267_s3 + $0xc0] sm:$0xff] %v1569_v32  ;;  %v576_v37 = vadd.f32 %v575_v35, %v1920_v18  ;;  %1366 = vst [vmem:[%s2267_s3 + $0xc8] sm:$0xff] %v1570_v34  ;;  %v689_v40 = vadd.f32 %v688_v38, %v1926_v21 }
 0x105   :  { %v579_v41 = vpop.f32.mrf.mxu0  ;;  %v692_v43 = vpop.f32.mrf.mxu1 }
 0x106   :  { %v1573_v42 = vpack.c.bf16 %v576_v37, %v574_v36  ;;  %v1574_v44 = vpack.c.bf16 %v689_v40, %v687_v39  ;;  %v580_v46 = vadd.f32 %v579_v41, %v1917_v3  ;;  %v693_v49 = vadd.f32 %v692_v43, %v1923_v20 }
 0x107   :  { %v581_v45 = vpop.f32.mrf.mxu0  ;;  %v694_v48 = vpop.f32.mrf.mxu1 }
 0x108   :  { %1369 = vst [vmem:[%s2267_s3 + $0xe0] sm:$0xff] %v1573_v42  ;;  %v582_v47 = vadd.f32 %v581_v45, %v1920_v18  ;;  %1370 = vst [vmem:[%s2267_s3 + $0xe8] sm:$0xff] %v1574_v44  ;;  %v695_v50 = vadd.f32 %v694_v48, %v1926_v21 }
 0x109   :  { %v583_v51 = vpop.f32.mrf.mxu0  ;;  %v696_v53 = vpop.f32.mrf.mxu1 }
 0x10a   :  { %v1577_v52 = vpack.c.bf16 %v582_v47, %v580_v46  ;;  %v1578_v54 = vpack.c.bf16 %v695_v50, %v693_v49  ;;  %v584_v56 = vadd.f32 %v583_v51, %v1917_v3  ;;  %v697_v59 = vadd.f32 %v696_v53, %v1923_v20 }
 0x10b   :  { %v585_v55 = vpop.f32.mrf.mxu0  ;;  %v698_v58 = vpop.f32.mrf.mxu1  ;;  %v115_v51 = vsub.s32 4, %v1905_v12 }
 0x10c   :  { %1373 = vst [vmem:[%s2267_s3 + $0x100] sm:$0xff] %v1577_v52  ;;  %v586_v57 = vadd.f32 %v585_v55, %v1920_v18  ;;  %1374 = vst [vmem:[%s2267_s3 + $0x108] sm:$0xff] %v1578_v54  ;;  %v699_v60 = vadd.f32 %v698_v58, %v1926_v21  ;;  %v119_v52 = vsub.s32 5, %v1905_v12 }
 0x10d   :  { %v589_v61 = vpop.f32.mrf.mxu0  ;;  %v702_v63 = vpop.f32.mrf.mxu1 }
 0x10e   :  { %v1581_v62 = vpack.c.bf16 %v586_v57, %v584_v56  ;;  %v1582_v0 = vpack.c.bf16 %v699_v60, %v697_v59  ;;  %v590_v2 = vadd.f32 %v589_v61, %v1917_v3  ;;  %v703_v6 = vadd.f32 %v702_v63, %v1923_v20 }
 0x10f   :  { %v591_v1 = vpop.f32.mrf.mxu0  ;;  %v704_v5 = vpop.f32.mrf.mxu1  ;;  %v123_v56 = vsub.s32 6, %v1905_v12  ;;  %v127_v57 = vsub.s32 7, %v1905_v12 }
 0x110   :  { %1377 = vst [vmem:[%s2267_s3 + $0x120] sm:$0xff] %v1581_v62  ;;  %v592_v4 = vadd.f32 %v591_v1, %v1920_v18  ;;  %1378 = vst [vmem:[%s2267_s3 + $0x128] sm:$0xff] %v1582_v0  ;;  %v705_v7 = vadd.f32 %v704_v5, %v1926_v21  ;;  %v2082_v1 = vrot.slane %v1912_v15, %v115_v51 }
 0x111   :  { %v593_v9 = vpop.f32.mrf.mxu0  ;;  %v706_v11 = vpop.f32.mrf.mxu1 }
 0x112   :  { %v1585_v10 = vpack.c.bf16 %v592_v4, %v590_v2  ;;  %v1586_v8 = vpack.c.bf16 %v705_v7, %v703_v6  ;;  %v594_v14 = vadd.f32 %v593_v9, %v1917_v3  ;;  %v707_v19 = vadd.f32 %v706_v11, %v1923_v20 }
 0x113   :  { %v595_v13 = vpop.f32.mrf.mxu0  ;;  %v708_v17 = vpop.f32.mrf.mxu1  ;;  %v2085_v2 = vrot.slane %v1912_v15, %v119_v52 }
 0x114   :  { %1381 = vst [vmem:[%s2267_s3 + $0x140] sm:$0xff] %v1585_v10  ;;  %v596_v16 = vadd.f32 %v595_v13, %v1920_v18  ;;  %1382 = vst [vmem:[%s2267_s3 + $0x148] sm:$0xff] %v1586_v8  ;;  %v709_v22 = vadd.f32 %v708_v17, %v1926_v21 }
 0x115   :  { %v599_v23 = vpop.f32.mrf.mxu0  ;;  %v712_v25 = vpop.f32.mrf.mxu1 }
 0x116   :  { %v1589_v24 = vpack.c.bf16 %v596_v16, %v594_v14  ;;  %v1590_v26 = vpack.c.bf16 %v709_v22, %v707_v19  ;;  %v600_v28 = vadd.f32 %v599_v23, %v1917_v3  ;;  %v713_v31 = vadd.f32 %v712_v25, %v1923_v20 }
 0x117   :  { %v601_v27 = vpop.f32.mrf.mxu0  ;;  %v714_v30 = vpop.f32.mrf.mxu1 }
 0x118   :  { %1385 = vst [vmem:[%s2267_s3 + $0x160] sm:$0xff] %v1589_v24  ;;  %v602_v29 = vadd.f32 %v601_v27, %v1920_v18  ;;  %1386 = vst [vmem:[%s2267_s3 + $0x168] sm:$0xff] %v1590_v26  ;;  %v715_v32 = vadd.f32 %v714_v30, %v1926_v21 }
 0x119   :  { %v603_v33 = vpop.f32.mrf.mxu0  ;;  %v716_v35 = vpop.f32.mrf.mxu1 }
 0x11a   :  { %v1593_v34 = vpack.c.bf16 %v602_v29, %v600_v28  ;;  %v1594_v36 = vpack.c.bf16 %v715_v32, %v713_v31  ;;  %v604_v38 = vadd.f32 %v603_v33, %v1917_v3  ;;  %v717_v41 = vadd.f32 %v716_v35, %v1923_v20 }
 0x11b   :  { %v605_v37 = vpop.f32.mrf.mxu0  ;;  %v718_v40 = vpop.f32.mrf.mxu1 }
 0x11c   :  { %1389 = vst [vmem:[%s2267_s3 + $0x180] sm:$0xff] %v1593_v34  ;;  %v606_v39 = vadd.f32 %v605_v37, %v1920_v18  ;;  %1390 = vst [vmem:[%s2267_s3 + $0x188] sm:$0xff] %v1594_v36  ;;  %v719_v42 = vadd.f32 %v718_v40, %v1926_v21 }
 0x11d   :  { %v609_v43 = vpop.f32.mrf.mxu0  ;;  %v722_v45 = vpop.f32.mrf.mxu1 }
 0x11e   :  { %v1597_v44 = vpack.c.bf16 %v606_v39, %v604_v38  ;;  %v1598_v46 = vpack.c.bf16 %v719_v42, %v717_v41  ;;  %v610_v48 = vadd.f32 %v609_v43, %v1917_v3  ;;  %v723_v53 = vadd.f32 %v722_v45, %v1923_v20 }
 0x11f   :  { %v611_v47 = vpop.f32.mrf.mxu0  ;;  %v724_v50 = vpop.f32.mrf.mxu1 }
 0x120   :  { %1393 = vst [vmem:[%s2267_s3 + $0x1a0] sm:$0xff] %v1597_v44  ;;  %v612_v49 = vadd.f32 %v611_v47, %v1920_v18  ;;  %1394 = vst [vmem:[%s2267_s3 + $0x1a8] sm:$0xff] %v1598_v46  ;;  %v725_v54 = vadd.f32 %v724_v50, %v1926_v21 }
 0x121   :  { %v613_v55 = vpop.f32.mrf.mxu0  ;;  %v726_v59 = vpop.f32.mrf.mxu1 }
 0x122   :  { %v1601_v58 = vpack.c.bf16 %v612_v49, %v610_v48  ;;  %v1602_v60 = vpack.c.bf16 %v725_v54, %v723_v53  ;;  %v614_v62 = vadd.f32 %v613_v55, %v1917_v3  ;;  %v727_v12 = vadd.f32 %v726_v59, %v1923_v20 }
 0x123   :  { %v615_v61 = vpop.f32.mrf.mxu0  ;;  %v728_v0 = vpop.f32.mrf.mxu1  ;;  %v2093_v3 = vrot.slane %v1912_v15, %v123_v56 }
 0x124   :  { %1397 = vst [vmem:[%s2267_s3 + $0x1c0] sm:$0xff] %v1601_v58  ;;  %v616_v63 = vadd.f32 %v615_v61, %v1920_v18  ;;  %1398 = vst [vmem:[%s2267_s3 + $0x1c8] sm:$0xff] %v1602_v60  ;;  %v729_v4 = vadd.f32 %v728_v0, %v1926_v21  ;;  %v2096_v18 = vrot.slane %v1912_v15, %v127_v57 }
 0x125   :  { %v765_v5 = vpop.f32.mrf.mxu0  ;;  %v878_v7 = vpop.f32.mrf.mxu1 }
 0x126   :  { %v1605_v6 = vpack.c.bf16 %v616_v63, %v614_v62  ;;  %v1606_v9 = vpack.c.bf16 %v729_v4, %v727_v12  ;;  %v766_v11 = vadd.f32 %v765_v5, %v2082_v1  ;;  %v879_v15 = vadd.f32 %v878_v7, %v2093_v3 }
 0x127   :  { %v767_v10 = vpop.f32.mrf.mxu0  ;;  %v880_v21 = vpop.f32.mrf.mxu1 }
 0x128   :  { %1401 = vst [vmem:[%s2267_s3 + $0x1e0] sm:$0xff] %v1605_v6  ;;  %v768_v20 = vadd.f32 %v767_v10, %v2085_v2  ;;  %1402 = vst [vmem:[%s2267_s3 + $0x1e8] sm:$0xff] %v1606_v9  ;;  %v881_v8 = vadd.f32 %v880_v21, %v2096_v18 }
 0x129   :  { %v769_v13 = vpop.f32.mrf.mxu0  ;;  %v882_v16 = vpop.f32.mrf.mxu1 }
 0x12a   :  { %v1547_v14 = vpack.c.bf16 %v768_v20, %v766_v11  ;;  %v1548_v17 = vpack.c.bf16 %v881_v8, %v879_v15  ;;  %v770_v22 = vadd.f32 %v769_v13, %v2082_v1  ;;  %v883_v25 = vadd.f32 %v882_v16, %v2093_v3 }
 0x12b   :  { %v771_v19 = vpop.f32.mrf.mxu0  ;;  %v884_v24 = vpop.f32.mrf.mxu1 }
 0x12c   :  { %1343 = vst [vmem:[%s2267_s3 + $0x10] sm:$0xff] %v1547_v14  ;;  %v772_v23 = vadd.f32 %v771_v19, %v2085_v2  ;;  %1344 = vst [vmem:[%s2267_s3 + $0x18] sm:$0xff] %v1548_v17  ;;  %v885_v26 = vadd.f32 %v884_v24, %v2096_v18 }
 0x12d   :  { %v775_v27 = vpop.f32.mrf.mxu0  ;;  %v888_v29 = vpop.f32.mrf.mxu1 }
 0x12e   :  { %v1551_v28 = vpack.c.bf16 %v772_v23, %v770_v22  ;;  %v1552_v30 = vpack.c.bf16 %v885_v26, %v883_v25  ;;  %v776_v32 = vadd.f32 %v775_v27, %v2082_v1  ;;  %v889_v35 = vadd.f32 %v888_v29, %v2093_v3 }
 0x12f   :  { %v777_v31 = vpop.f32.mrf.mxu0  ;;  %v890_v34 = vpop.f32.mrf.mxu1 }
 0x130   :  { %1347 = vst [vmem:[%s2267_s3 + $0x30] sm:$0xff] %v1551_v28  ;;  %v778_v33 = vadd.f32 %v777_v31, %v2085_v2  ;;  %1348 = vst [vmem:[%s2267_s3 + $0x38] sm:$0xff] %v1552_v30  ;;  %v891_v36 = vadd.f32 %v890_v34, %v2096_v18 }
 0x131   :  { %v779_v37 = vpop.f32.mrf.mxu0  ;;  %v892_v39 = vpop.f32.mrf.mxu1 }
 0x132   :  { %v1555_v38 = vpack.c.bf16 %v778_v33, %v776_v32  ;;  %v1556_v40 = vpack.c.bf16 %v891_v36, %v889_v35  ;;  %v780_v42 = vadd.f32 %v779_v37, %v2082_v1  ;;  %v893_v45 = vadd.f32 %v892_v39, %v2093_v3 }
 0x133   :  { %v781_v41 = vpop.f32.mrf.mxu0  ;;  %v894_v44 = vpop.f32.mrf.mxu1 }
 0x134   :  { %1351 = vst [vmem:[%s2267_s3 + $0x50] sm:$0xff] %v1555_v38  ;;  %v782_v43 = vadd.f32 %v781_v41, %v2085_v2  ;;  %1352 = vst [vmem:[%s2267_s3 + $0x58] sm:$0xff] %v1556_v40  ;;  %v895_v46 = vadd.f32 %v894_v44, %v2096_v18 }
 0x135   :  { %v785_v47 = vpop.f32.mrf.mxu0  ;;  %v898_v49 = vpop.f32.mrf.mxu1 }
 0x136   :  { %v1559_v48 = vpack.c.bf16 %v782_v43, %v780_v42  ;;  %v1560_v50 = vpack.c.bf16 %v895_v46, %v893_v45  ;;  %v786_v52 = vadd.f32 %v785_v47, %v2082_v1  ;;  %v899_v55 = vadd.f32 %v898_v49, %v2093_v3 }
 0x137   :  { %v787_v51 = vpop.f32.mrf.mxu0  ;;  %v900_v54 = vpop.f32.mrf.mxu1 }
 0x138   :  { %1355 = vst [vmem:[%s2267_s3 + $0x70] sm:$0xff] %v1559_v48  ;;  %v788_v53 = vadd.f32 %v787_v51, %v2085_v2  ;;  %1356 = vst [vmem:[%s2267_s3 + $0x78] sm:$0xff] %v1560_v50  ;;  %v901_v56 = vadd.f32 %v900_v54, %v2096_v18 }
 0x139   :  { %v789_v57 = vpop.f32.mrf.mxu0  ;;  %v902_v59 = vpop.f32.mrf.mxu1 }
 0x13a   :  { %v1563_v58 = vpack.c.bf16 %v788_v53, %v786_v52  ;;  %v1564_v60 = vpack.c.bf16 %v901_v56, %v899_v55  ;;  %v790_v62 = vadd.f32 %v789_v57, %v2082_v1  ;;  %v903_v12 = vadd.f32 %v902_v59, %v2093_v3 }
 0x13b   :  { %v791_v61 = vpop.f32.mrf.mxu0  ;;  %v904_v0 = vpop.f32.mrf.mxu1 }
 0x13c   :  { %1359 = vst [vmem:[%s2267_s3 + $0x90] sm:$0xff] %v1563_v58  ;;  %v792_v63 = vadd.f32 %v791_v61, %v2085_v2  ;;  %1360 = vst [vmem:[%s2267_s3 + $0x98] sm:$0xff] %v1564_v60  ;;  %v905_v4 = vadd.f32 %v904_v0, %v2096_v18 }
 0x13d   :  { %v795_v5 = vpop.f32.mrf.mxu0  ;;  %v908_v7 = vpop.f32.mrf.mxu1 }
 0x13e   :  { %v1567_v6 = vpack.c.bf16 %v792_v63, %v790_v62  ;;  %v1568_v9 = vpack.c.bf16 %v905_v4, %v903_v12  ;;  %v796_v11 = vadd.f32 %v795_v5, %v2082_v1  ;;  %v909_v15 = vadd.f32 %v908_v7, %v2093_v3 }
 0x13f   :  { %v797_v10 = vpop.f32.mrf.mxu0  ;;  %v910_v21 = vpop.f32.mrf.mxu1 }
 0x140   :  { %1363 = vst [vmem:[%s2267_s3 + $0xb0] sm:$0xff] %v1567_v6  ;;  %v798_v20 = vadd.f32 %v797_v10, %v2085_v2  ;;  %1364 = vst [vmem:[%s2267_s3 + $0xb8] sm:$0xff] %v1568_v9  ;;  %v911_v8 = vadd.f32 %v910_v21, %v2096_v18 }
 0x141   :  { %v799_v13 = vpop.f32.mrf.mxu0  ;;  %v912_v16 = vpop.f32.mrf.mxu1 }
 0x142   :  { %v1571_v14 = vpack.c.bf16 %v798_v20, %v796_v11  ;;  %v1572_v17 = vpack.c.bf16 %v911_v8, %v909_v15  ;;  %v800_v22 = vadd.f32 %v799_v13, %v2082_v1  ;;  %v913_v25 = vadd.f32 %v912_v16, %v2093_v3 }
 0x143   :  { %v801_v19 = vpop.f32.mrf.mxu0  ;;  %v914_v24 = vpop.f32.mrf.mxu1 }
 0x144   :  { %1367 = vst [vmem:[%s2267_s3 + $0xd0] sm:$0xff] %v1571_v14  ;;  %v802_v23 = vadd.f32 %v801_v19, %v2085_v2  ;;  %1368 = vst [vmem:[%s2267_s3 + $0xd8] sm:$0xff] %v1572_v17  ;;  %v915_v26 = vadd.f32 %v914_v24, %v2096_v18 }
 0x145   :  { %v805_v27 = vpop.f32.mrf.mxu0  ;;  %v918_v29 = vpop.f32.mrf.mxu1 }
 0x146   :  { %v1575_v28 = vpack.c.bf16 %v802_v23, %v800_v22  ;;  %v1576_v30 = vpack.c.bf16 %v915_v26, %v913_v25  ;;  %v806_v32 = vadd.f32 %v805_v27, %v2082_v1  ;;  %v919_v35 = vadd.f32 %v918_v29, %v2093_v3 }
 0x147   :  { %v807_v31 = vpop.f32.mrf.mxu0  ;;  %v920_v34 = vpop.f32.mrf.mxu1 }
 0x148   :  { %1371 = vst [vmem:[%s2267_s3 + $0xf0] sm:$0xff] %v1575_v28  ;;  %v808_v33 = vadd.f32 %v807_v31, %v2085_v2  ;;  %1372 = vst [vmem:[%s2267_s3 + $0xf8] sm:$0xff] %v1576_v30  ;;  %v921_v36 = vadd.f32 %v920_v34, %v2096_v18 }
 0x149   :  { %v809_v37 = vpop.f32.mrf.mxu0  ;;  %v922_v39 = vpop.f32.mrf.mxu1 }
 0x14a   :  { %v1579_v38 = vpack.c.bf16 %v808_v33, %v806_v32  ;;  %v1580_v40 = vpack.c.bf16 %v921_v36, %v919_v35  ;;  %v810_v42 = vadd.f32 %v809_v37, %v2082_v1  ;;  %v923_v45 = vadd.f32 %v922_v39, %v2093_v3 }
 0x14b   :  { %v811_v41 = vpop.f32.mrf.mxu0  ;;  %v924_v44 = vpop.f32.mrf.mxu1 }
 0x14c   :  { %1375 = vst [vmem:[%s2267_s3 + $0x110] sm:$0xff] %v1579_v38  ;;  %v812_v43 = vadd.f32 %v811_v41, %v2085_v2  ;;  %1376 = vst [vmem:[%s2267_s3 + $0x118] sm:$0xff] %v1580_v40  ;;  %v925_v46 = vadd.f32 %v924_v44, %v2096_v18 }
 0x14d   :  { %v815_v47 = vpop.f32.mrf.mxu0  ;;  %v928_v49 = vpop.f32.mrf.mxu1 }
 0x14e   :  { %v1583_v48 = vpack.c.bf16 %v812_v43, %v810_v42  ;;  %v1584_v50 = vpack.c.bf16 %v925_v46, %v923_v45  ;;  %v816_v52 = vadd.f32 %v815_v47, %v2082_v1  ;;  %v929_v55 = vadd.f32 %v928_v49, %v2093_v3 }
 0x14f   :  { %v817_v51 = vpop.f32.mrf.mxu0  ;;  %v930_v54 = vpop.f32.mrf.mxu1 }
 0x150   :  { %1379 = vst [vmem:[%s2267_s3 + $0x130] sm:$0xff] %v1583_v48  ;;  %v818_v53 = vadd.f32 %v817_v51, %v2085_v2  ;;  %1380 = vst [vmem:[%s2267_s3 + $0x138] sm:$0xff] %v1584_v50  ;;  %v931_v56 = vadd.f32 %v930_v54, %v2096_v18 }
 0x151   :  { %v819_v57 = vpop.f32.mrf.mxu0  ;;  %v932_v59 = vpop.f32.mrf.mxu1 }
 0x152   :  { %v1587_v58 = vpack.c.bf16 %v818_v53, %v816_v52  ;;  %v1588_v60 = vpack.c.bf16 %v931_v56, %v929_v55  ;;  %v820_v62 = vadd.f32 %v819_v57, %v2082_v1  ;;  %v933_v12 = vadd.f32 %v932_v59, %v2093_v3 }
 0x153   :  { %v821_v61 = vpop.f32.mrf.mxu0  ;;  %v934_v0 = vpop.f32.mrf.mxu1 }
 0x154   :  { %1383 = vst [vmem:[%s2267_s3 + $0x150] sm:$0xff] %v1587_v58  ;;  %v822_v63 = vadd.f32 %v821_v61, %v2085_v2  ;;  %1384 = vst [vmem:[%s2267_s3 + $0x158] sm:$0xff] %v1588_v60  ;;  %v935_v4 = vadd.f32 %v934_v0, %v2096_v18 }
 0x155   :  { %v825_v5 = vpop.f32.mrf.mxu0  ;;  %v938_v7 = vpop.f32.mrf.mxu1 }
 0x156   :  { %v1591_v6 = vpack.c.bf16 %v822_v63, %v820_v62  ;;  %v1592_v9 = vpack.c.bf16 %v935_v4, %v933_v12  ;;  %v826_v11 = vadd.f32 %v825_v5, %v2082_v1  ;;  %v939_v15 = vadd.f32 %v938_v7, %v2093_v3 }
 0x157   :  { %v827_v10 = vpop.f32.mrf.mxu0  ;;  %v940_v21 = vpop.f32.mrf.mxu1 }
 0x158   :  { %1387 = vst [vmem:[%s2267_s3 + $0x170] sm:$0xff] %v1591_v6  ;;  %v828_v20 = vadd.f32 %v827_v10, %v2085_v2  ;;  %1388 = vst [vmem:[%s2267_s3 + $0x178] sm:$0xff] %v1592_v9  ;;  %v941_v8 = vadd.f32 %v940_v21, %v2096_v18 }
 0x159   :  { %v829_v13 = vpop.f32.mrf.mxu0  ;;  %v942_v16 = vpop.f32.mrf.mxu1 }
 0x15a   :  { %v1595_v14 = vpack.c.bf16 %v828_v20, %v826_v11  ;;  %v1596_v17 = vpack.c.bf16 %v941_v8, %v939_v15  ;;  %v830_v22 = vadd.f32 %v829_v13, %v2082_v1  ;;  %v943_v25 = vadd.f32 %v942_v16, %v2093_v3 }
 0x15b   :  { %v831_v19 = vpop.f32.mrf.mxu0  ;;  %v944_v24 = vpop.f32.mrf.mxu1 }
 0x15c   :  { %1391 = vst [vmem:[%s2267_s3 + $0x190] sm:$0xff] %v1595_v14  ;;  %v832_v23 = vadd.f32 %v831_v19, %v2085_v2  ;;  %1392 = vst [vmem:[%s2267_s3 + $0x198] sm:$0xff] %v1596_v17  ;;  %v945_v26 = vadd.f32 %v944_v24, %v2096_v18 }
 0x15d   :  { %v835_v27 = vpop.f32.mrf.mxu0  ;;  %v948_v29 = vpop.f32.mrf.mxu1 }
 0x15e   :  { %v1599_v28 = vpack.c.bf16 %v832_v23, %v830_v22  ;;  %v1600_v30 = vpack.c.bf16 %v945_v26, %v943_v25  ;;  %v836_v32 = vadd.f32 %v835_v27, %v2082_v1  ;;  %v949_v35 = vadd.f32 %v948_v29, %v2093_v3 }
 0x15f   :  { %v837_v31 = vpop.f32.mrf.mxu0  ;;  %v950_v34 = vpop.f32.mrf.mxu1 }
 0x160   :  { %1395 = vst [vmem:[%s2267_s3 + $0x1b0] sm:$0xff] %v1599_v28  ;;  %v838_v33 = vadd.f32 %v837_v31, %v2085_v2  ;;  %1396 = vst [vmem:[%s2267_s3 + $0x1b8] sm:$0xff] %v1600_v30  ;;  %v951_v36 = vadd.f32 %v950_v34, %v2096_v18 }
 0x161   :  { %v839_v37 = vpop.f32.mrf.mxu0  ;;  %v952_v39 = vpop.f32.mrf.mxu1 }
 0x162   :  { %v1603_v38 = vpack.c.bf16 %v838_v33, %v836_v32  ;;  %v1604_v40 = vpack.c.bf16 %v951_v36, %v949_v35  ;;  %v840_v42 = vadd.f32 %v839_v37, %v2082_v1  ;;  %v953_v45 = vadd.f32 %v952_v39, %v2093_v3 }
 0x163   :  { %v841_v41 = vpop.f32.mrf.mxu0  ;;  %v954_v44 = vpop.f32.mrf.mxu1 }
 0x164   :  { %1399 = vst [vmem:[%s2267_s3 + $0x1d0] sm:$0xff] %v1603_v38  ;;  %v842_v43 = vadd.f32 %v841_v41, %v2085_v2  ;;  %1400 = vst [vmem:[%s2267_s3 + $0x1d8] sm:$0xff] %v1604_v40  ;;  %v955_v46 = vadd.f32 %v954_v44, %v2096_v18 }
 0x166   :  { %v1607_v47 = vpack.c.bf16 %v842_v43, %v840_v42  ;;  %v1608_v48 = vpack.c.bf16 %v955_v46, %v953_v45 }
 0x168   :  { %1403 = vst [vmem:[%s2267_s3 + $0x1f0] sm:$0xff] %v1607_v47  ;;  %1404 = vst [vmem:[%s2267_s3 + $0x1f8] sm:$0xff] %v1608_v48 }

// kernel: upblock_forward.7
= control target key start
LH: loop header
LB: loop body
LE: loop exit
PB: predicated region body
PF: predicated region fallthrough
CT: control target
= control target key end

     0   :  { %s542_s12 = smov 0   ;;  %s544_s13 = smov 0   ;;  %s603_s0 = inlined_call_operand.vmem [shape: f32[2,8,64,128], index: 0, kind: input, shape index: {}]   ;;  %s604_s1 = inlined_call_operand.vmem [shape: f32[1,128], index: 1, kind: input, shape index: {}]   ;;  %s605_s2 = inlined_call_operand.vmem [shape: f32[1,128], index: 2, kind: input, shape index: {}]   ;;  %s606_s3 = inlined_call_operand.vmem [shape: bf16[2,8,64,128], index: 3, kind: output, shape index: {}]  }
   0x1   :  { %s546_s14 = smov 0   ;;  %s548_s15 = smov 0  }
   0x2   :  { %s550_s16 = smov 0  }
   0x3 LB: > { %s22_s17 = sadd.s32 1, %s512_s14  ;;  %s25_s18 = sadd.s32 1, %s516_s15  ;;  %s520_s16 = sphi %s550_s16, %s13_s16   ;;  %s516_s15 = sphi %s548_s15, %s610_s15   ;;  %s512_s14 = sphi %s546_s14, %s609_s14   ;;  %s508_s13 = sphi %s544_s13, %s608_s13   ;;  %s504_s12 = sphi %s542_s12, %s607_s12  }
   0x4   : > { %p23_p0 = scmp.ge.s32.totalorder %s22_s17, 8  ;;  %p392_p1 = scmp.ge.s32.totalorder %s520_s16, 1 }
   0x5   : > { %p157_p2 = scmp.lt.s32.totalorder %s520_s16, 17 }
   0x6   : > { %s612_s17 = smov (%p23_p0, %s22_s17), 0  ;;  %s614_s18 = smov (!%p23_p0, %s25_s18), %s516_s15 }
   0x7   : > { %p158_p3 = pnand %p392_p1, %p157_p2  ;;  %p27_p4 = scmp.ge.s32.totalorder %s614_s18, 2 }
   0x8   : > { %p189_p5 = scmp.lt.s32.totalorder (!%p158_p3), %s508_s13, 1  ;;  %p191_p6 = scmp.lt.s32.totalorder (!%p158_p3), %s504_s12, 7 }
   0x9   : > { %s616_s18 = smov (%p27_p4, %s614_s18), 0  ;;  %161 = sbr.rel (%p158_p3) target bundleno = 32 (0x20), region = 32 }
   0xe   : > { %s618_s13 = smov (!%p189_p5, %s508_s13), 1  ;;  %s620_s12 = smov (!%p191_p6, %s504_s12), 7  ;;  %v399_v0 = vld [vmem:[%s604_s1] ss:$0 sm:$0xff] }
   0xf   : > { %s394_s19 = sshll.u32 %s618_s13, 6  ;;  %s393_s20 = sshll.u32 %s620_s12, 3  ;;  %v400_v1 = vld [vmem:[%s605_s2] ss:$0 sm:$0xff] }
  0x10   : > { %s572_s21 = sadd.s32 %s394_s19, %s393_s20 }
  0x11   : > { %s395_s22 = sshll.u32 %s572_s21, 3  ;;  %s398_s30 = sshll.u32 %s572_s21, 2 }
  0x12   : > { %s197_s27 = scalar_lea.vmem %s603_s0, %s395_s22  ;;  %s206_s6 = scalar_lea.vmem %s606_s3, %s398_s30 }
  0x13   : > { %v207_v2 = vld [vmem:[%s197_s27] sm:$0xff]  ;;  %v208_v3 = vld [vmem:[%s197_s27 + $0x8] sm:$0xff]  ;;  %v209_v4 = vld [vmem:[%s197_s27 + $0x10] sm:$0xff] }
  0x14   : > { %v222_v5 = vmul.f32 %v399_v0, %v207_v2  ;;  %v223_v6 = vmul.f32 %v399_v0, %v208_v3  ;;  %v210_v7 = vld [vmem:[%s197_s27 + $0x18] sm:$0xff]  ;;  %v224_v8 = vmul.f32 %v399_v0, %v209_v4  ;;  %v211_v9 = vld [vmem:[%s197_s27 + $0x20] sm:$0xff]  ;;  %v212_v10 = vld [vmem:[%s197_s27 + $0x28] sm:$0xff] }
  0x15   : > { %v225_v11 = vmul.f32 %v399_v0, %v210_v7  ;;  %v226_v12 = vmul.f32 %v399_v0, %v211_v9  ;;  %v227_v13 = vmul.f32 %v399_v0, %v212_v10  ;;  %v213_v14 = vld [vmem:[%s197_s27 + $0x30] sm:$0xff]  ;;  %v214_v15 = vld [vmem:[%s197_s27 + $0x38] sm:$0xff] }
  0x16   : > { %v237_v16 = vadd.f32 %v400_v1, %v222_v5  ;;  %v238_v17 = vadd.f32 %v400_v1, %v223_v6  ;;  %v239_v18 = vadd.f32 %v400_v1, %v224_v8  ;;  %v228_v19 = vmul.f32 %v399_v0, %v213_v14 }
  0x17   : > { %v240_v20 = vadd.f32 %v400_v1, %v225_v11  ;;  %v241_v21 = vadd.f32 %v400_v1, %v226_v12  ;;  %v242_v22 = vadd.f32 %v400_v1, %v227_v13  ;;  %v229_v23 = vmul.f32 %v399_v0, %v214_v15 }
  0x18   : > { %v245_v24 = vmax.f32 %v237_v16, 0.0  ;;  %v246_v25 = vmax.f32 %v238_v17, 0.0  ;;  %v247_v26 = vmax.f32 %v239_v18, 0.0  ;;  %v243_v27 = vadd.f32 %v400_v1, %v228_v19 }
  0x19   : > { %v248_v28 = vmax.f32 %v240_v20, 0.0  ;;  %v249_v29 = vmax.f32 %v241_v21, 0.0  ;;  %v250_v30 = vmax.f32 %v242_v22, 0.0  ;;  %v244_v31 = vadd.f32 %v400_v1, %v229_v23 }
  0x1a   : > { %v422_v32 = vpack.c.bf16 %v246_v25, %v245_v24  ;;  %v251_v33 = vmax.f32 %v243_v27, 0.0 }
  0x1b   : > { %v427_v34 = vpack.c.bf16 %v248_v28, %v247_v26  ;;  %v432_v35 = vpack.c.bf16 %v250_v30, %v249_v29  ;;  %v252_v36 = vmax.f32 %v244_v31, 0.0 }
  0x1c   : > { %423 = vst [vmem:[%s206_s6] sm:$0xff] %v422_v32  }
  0x1d   : > { %439 = vst [vmem:[%s206_s6 + $0x8] sm:$0xff] %v427_v34   ;;  %440 = vst [vmem:[%s206_s6 + $0x10] sm:$0xff] %v432_v35   ;;  %v437_v37 = vpack.c.bf16 %v252_v36, %v251_v33 }
  0x1f   : > { %441 = vst [vmem:[%s206_s6 + $0x18] sm:$0xff] %v437_v37  }
  0x20 PF: > { %s13_s16 = sadd.s32 1, %s520_s16   ;;  %s607_s12 = smov %s512_s14 }
  0x21   : > { %p10_p7 = scmp.ge.s32.totalorder %s13_s16, 18   ;;  %s608_s13 = smov %s516_s15 }
  0x22   : > { %s609_s14 = smov %s612_s17  ;;  %s610_s15 = smov %s616_s18 }
  0x23   :  { %12 = sbr.rel (!%p10_p7) target bundleno = 3 (0x3), region = 62 }

// kernel: upblock_forward.9
= control target key start
LH: loop header
LB: loop body
LE: loop exit
PB: predicated region body
PF: predicated region fallthrough
CT: control target
= control target key end

     0   :  { %s471_s12 = smov 0   ;;  %s473_s13 = smov 0   ;;  %s528_s0 = inlined_call_operand.vmem [shape: f32[2,8,64,128], index: 0, kind: input, shape index: {}]   ;;  %s529_s1 = inlined_call_operand.vmem [shape: f32[1,128], index: 1, kind: input, shape index: {}]   ;;  %s530_s2 = inlined_call_operand.vmem [shape: f32[1,128], index: 2, kind: input, shape index: {}]   ;;  %s531_s3 = inlined_call_operand.vmem [shape: f32[2,8,64,128], index: 3, kind: output, shape index: {}]  }
   0x1   :  { %s475_s14 = smov 0   ;;  %s477_s15 = smov 0  }
   0x2   :  { %s479_s16 = smov 0  }
   0x3 LB: > { %s22_s17 = sadd.s32 1, %s441_s14  ;;  %s25_s18 = sadd.s32 1, %s445_s15  ;;  %s449_s16 = sphi %s479_s16, %s13_s16   ;;  %s445_s15 = sphi %s477_s15, %s535_s15   ;;  %s441_s14 = sphi %s475_s14, %s534_s14   ;;  %s437_s13 = sphi %s473_s13, %s533_s13   ;;  %s433_s12 = sphi %s471_s12, %s532_s12  }
   0x4   : > { %p23_p0 = scmp.ge.s32.totalorder %s22_s17, 8  ;;  %p360_p1 = scmp.ge.s32.totalorder %s449_s16, 1 }
   0x5   : > { %p157_p2 = scmp.lt.s32.totalorder %s449_s16, 17 }
   0x6   : > { %s537_s17 = smov (%p23_p0, %s22_s17), 0  ;;  %s539_s18 = smov (!%p23_p0, %s25_s18), %s445_s15 }
   0x7   : > { %p158_p3 = pnand %p360_p1, %p157_p2  ;;  %p27_p4 = scmp.ge.s32.totalorder %s539_s18, 2 }
   0x8   : > { %p189_p5 = scmp.lt.s32.totalorder (!%p158_p3), %s437_s13, 1  ;;  %p191_p6 = scmp.lt.s32.totalorder (!%p158_p3), %s433_s12, 7 }
   0x9   : > { %s541_s18 = smov (%p27_p4, %s539_s18), 0  ;;  %161 = sbr.rel (%p158_p3) target bundleno = 30 (0x1e), region = 32 }
   0xe   : > { %s543_s13 = smov (!%p189_p5, %s437_s13), 1  ;;  %s545_s12 = smov (!%p191_p6, %s433_s12), 7  ;;  %v367_v0 = vld [vmem:[%s529_s1] ss:$0 sm:$0xff] }
   0xf   : > { %s362_s19 = sshll.u32 %s543_s13, 6  ;;  %s361_s20 = sshll.u32 %s545_s12, 3  ;;  %v368_v1 = vld [vmem:[%s530_s2] ss:$0 sm:$0xff] }
  0x10   : > { %s195_s21 = sadd.s32 %s362_s19, %s361_s20 }
  0x11   : > { %s363_s22 = sshll.u32 %s195_s21, 3 }
  0x12   : > { %s197_s27 = scalar_lea.vmem %s528_s0, %s363_s22  ;;  %s206_s5 = scalar_lea.vmem %s531_s3, %s363_s22 }
  0x13   : > { %v207_v2 = vld [vmem:[%s197_s27] sm:$0xff]  ;;  %v208_v3 = vld [vmem:[%s197_s27 + $0x8] sm:$0xff]  ;;  %v209_v4 = vld [vmem:[%s197_s27 + $0x10] sm:$0xff] }
  0x14   : > { %v222_v5 = vmul.f32 %v367_v0, %v207_v2  ;;  %v223_v6 = vmul.f32 %v367_v0, %v208_v3  ;;  %v224_v7 = vmul.f32 %v367_v0, %v209_v4  ;;  %v210_v8 = vld [vmem:[%s197_s27 + $0x18] sm:$0xff]  ;;  %v211_v9 = vld [vmem:[%s197_s27 + $0x20] sm:$0xff]  ;;  %v212_v10 = vld [vmem:[%s197_s27 + $0x28] sm:$0xff] }
  0x15   : > { %v225_v11 = vmul.f32 %v367_v0, %v210_v8  ;;  %v226_v12 = vmul.f32 %v367_v0, %v211_v9  ;;  %v227_v13 = vmul.f32 %v367_v0, %v212_v10  ;;  %v213_v14 = vld [vmem:[%s197_s27 + $0x30] sm:$0xff]  ;;  %v214_v15 = vld [vmem:[%s197_s27 + $0x38] sm:$0xff] }
  0x16   : > { %v237_v16 = vadd.f32 %v368_v1, %v222_v5  ;;  %v238_v17 = vadd.f32 %v368_v1, %v223_v6  ;;  %v239_v18 = vadd.f32 %v368_v1, %v224_v7  ;;  %v228_v19 = vmul.f32 %v367_v0, %v213_v14 }
  0x17   : > { %v240_v20 = vadd.f32 %v368_v1, %v225_v11  ;;  %v241_v21 = vadd.f32 %v368_v1, %v226_v12  ;;  %v242_v22 = vadd.f32 %v368_v1, %v227_v13  ;;  %v229_v23 = vmul.f32 %v367_v0, %v214_v15 }
  0x18   : > { %v245_v24 = vmax.f32 %v237_v16, 0.0  ;;  %v246_v25 = vmax.f32 %v238_v17, 0.0  ;;  %v247_v26 = vmax.f32 %v239_v18, 0.0  ;;  %v243_v27 = vadd.f32 %v368_v1, %v228_v19 }
  0x19   : > { %v248_v28 = vmax.f32 %v240_v20, 0.0  ;;  %v249_v29 = vmax.f32 %v241_v21, 0.0  ;;  %v250_v30 = vmax.f32 %v242_v22, 0.0  ;;  %v244_v31 = vadd.f32 %v368_v1, %v229_v23 }
  0x1a   : > { %253 = vst [vmem:[%s206_s5] sm:$0xff] %v245_v24  ;;  %254 = vst [vmem:[%s206_s5 + $0x8] sm:$0xff] %v246_v25  ;;  %v251_v32 = vmax.f32 %v243_v27, 0.0 }
  0x1b   : > { %255 = vst [vmem:[%s206_s5 + $0x10] sm:$0xff] %v247_v26  ;;  %256 = vst [vmem:[%s206_s5 + $0x18] sm:$0xff] %v248_v28  ;;  %v252_v33 = vmax.f32 %v244_v31, 0.0 }
  0x1c   : > { %257 = vst [vmem:[%s206_s5 + $0x20] sm:$0xff] %v249_v29  ;;  %258 = vst [vmem:[%s206_s5 + $0x28] sm:$0xff] %v250_v30 }
  0x1d   : > { %259 = vst [vmem:[%s206_s5 + $0x30] sm:$0xff] %v251_v32  ;;  %260 = vst [vmem:[%s206_s5 + $0x38] sm:$0xff] %v252_v33 }
  0x1e PF: > { %s13_s16 = sadd.s32 1, %s449_s16   ;;  %s532_s12 = smov %s441_s14 }
  0x1f   : > { %p10_p7 = scmp.ge.s32.totalorder %s13_s16, 18   ;;  %s533_s13 = smov %s445_s15 }
  0x20   : > { %s534_s14 = smov %s537_s17  ;;  %s535_s15 = smov %s541_s18 }
  0x21   :  { %12 = sbr.rel (!%p10_p7) target bundleno = 3 (0x3), region = 62 }

// kernel: upblock_forward.8
= control target key start
LH: loop header
LB: loop body
LE: loop exit
PB: predicated region body
PF: predicated region fallthrough
CT: control target
= control target key end

     0   :  { %s8159_s24 = smov 0   ;;  %s8161_s25 = smov 0   ;;  %s10402_s0 = inlined_call_operand.vmem [shape: bf16[2,10,82,128], index: 0, kind: input, shape index: {}, may-alias: {0,1,2}]   ;;  %s10403_s1 = inlined_call_operand.vmem [shape: bf16[2,10,82,128], index: 1, kind: input, shape index: {}, may-alias: {0,1,2}]   ;;  %s10404_s2 = inlined_call_operand.vmem [shape: bf16[2,10,82,128], index: 2, kind: input, shape index: {}, may-alias: {0,1,2}]   ;;  %s10405_s3 = inlined_call_operand.vmem [shape: bf16[27,128,128], index: 3, kind: input, shape index: {}]   ;;  %s10406_s4 = inlined_call_operand.vmem [shape: f32[1,128], index: 4, kind: input, shape index: {}]   ;;  %s10407_s5 = inlined_call_operand.vmem [shape: f32[2,8,64,128], index: 5, kind: output, shape index: {0}]   ;;  %s10408_s6 = inlined_call_operand.vmem [shape: f32[2,8,1,128], index: 6, kind: output, shape index: {1}]   ;;  %s10409_s7 = inlined_call_operand.vmem [shape: f32[2,8,1,128], index: 7, kind: output, shape index: {2}]  }
   0x1   :  { %s8163_s26 = smov 0   ;;  %s8165_s27 = smov 0  }
   0x2   :  { %s8167_s28 = smov 0  }
   0x3 LB: > { %s27_s29 = sadd.s32 1, %s8108_s26  ;;  %s30_s30 = sadd.s32 1, %s8112_s27  ;;  %s8116_s28 = sphi %s8167_s28, %s18_s28   ;;  %s8112_s27 = sphi %s8165_s27, %s10563_s27   ;;  %s8108_s26 = sphi %s8163_s26, %s10562_s26   ;;  %s8104_s25 = sphi %s8161_s25, %s10561_s25   ;;  %s8100_s24 = sphi %s8159_s24, %s10560_s24  }
   0x4   : > { %p28_p0 = scmp.ge.s32.totalorder %s27_s29, 8  ;;  %p6014_p1 = scmp.ge.s32.totalorder %s8116_s28, 1 }
   0x5   : > { %p306_p2 = scmp.lt.s32.totalorder %s8116_s28, 17 }
   0x6   : > { %s10565_s29 = smov (%p28_p0, %s27_s29), 0  ;;  %s10567_s30 = smov (!%p28_p0, %s30_s30), %s8112_s27 }
   0x7   : > { %p307_p3 = pnand %p6014_p1, %p306_p2  ;;  %p32_p4 = scmp.ge.s32.totalorder %s10567_s30, 2 }
   0x9   : > { %s10569_s30 = smov (%p32_p4, %s10567_s30), 0  ;;  %310 = sbr.rel (%p307_p3) target bundleno = 695 (0x2b7), region = 40 }
   0xe   : > { %v7817_v0 = vld [vmem:[%s10405_s3 + $0x78] sm:$0xff]   ;;  %p380_p5 = scmp.lt.s32.totalorder %s8104_s25, 1  ;;  %p382_p6 = scmp.lt.s32.totalorder %s8100_s24, 9  ;;  %v7819_v2 = vld [vmem:[%s10405_s3 + $0x70] sm:$0xff]   ;;  %v7821_v4 = vld [vmem:[%s10405_s3 + $0x68] sm:$0xff]   ;;  %v437_v8 = vlaneseq  ;;  %v8118_v47 = vmov 0  }
   0xf   : > { %v7818_v1 = vld [vmem:[%s10405_s3 + $0x38] sm:$0xff]   ;;  %7108 = vmatprep.subr.bf16.mxu0 %v7817_v0  ;;  %v7820_v3 = vld [vmem:[%s10405_s3 + $0x30] sm:$0xff]   ;;  %v7822_v5 = vld [vmem:[%s10405_s3 + $0x28] sm:$0xff]   ;;  %vm10410_vm0 = vsmask.f32 7424  ;;  %p413_p9 = scmp.lt.s32.totalorder %s8100_s24, 7 }
  0x10   : > { %s10571_s25 = smov (!%p380_p5, %s8104_s25), 1  ;;  %7132 = vmatprep.subr.bf16.mxu1 %v7818_v1  ;;  %7109 = vmatpush3.bf16.msra.mxu0 %v7817_v0  ;;  %v7823_v6 = vld [vmem:[%s10405_s3 + $0x60] sm:$0xff]   ;;  %v7825_v9 = vld [vmem:[%s10405_s3 + $0x58] sm:$0xff]   ;;  %v8234_v11 = vshrl.u32 %v437_v8, 7  ;;  %v7827_v12 = vld [vmem:[%s10405_s3 + $0x50] sm:$0xff]  }
  0x11   : > { %s383_s16 = scalar_select %p382_p6, %s8100_s24, 9  ;;  %7133 = vmatpush3.bf16.msra.mxu1 %v7818_v1  ;;  %7110 = vmatprep.subr.bf16.mxu0 %v7819_v2  ;;  %v7824_v7 = vld [vmem:[%s10405_s3 + $0x20] sm:$0xff]   ;;  %v7826_v10 = vld [vmem:[%s10405_s3 + $0x18] sm:$0xff]   ;;  %v7828_v16 = vld [vmem:[%s10405_s3 + $0x10] sm:$0xff]  }
  0x12   : > { %s8211_s19 = smul.u32 110, %s10571_s25  ;;  %7134 = vmatprep.subr.bf16.mxu1 %v7820_v3  ;;  %v439_v15 = vadd.s32 8, %v8234_v11  ;;  %v7829_v20 = vld [vmem:[%s10405_s3 + $0x48] sm:$0xff]   ;;  %v450_v22 = vand.u32 7, %v8234_v11  ;;  %v440_v28 = vadd.s32 16, %v8234_v11  ;;  %v441_v40 = vadd.s32 24, %v8234_v11 }
  0x13   : > { %s7772_s22 = smul.u32 11, %s383_s16  ;;  %v7830_v31 = vld [vmem:[%s10405_s3 + $0x8] sm:$0xff]   ;;  %v7831_v45 = vld [vmem:[%s10405_s3 + $0x40] sm:$0xff]   ;;  %v7836_v62 = vld [vmem:[%s10405_s3 + $0xb8] sm:$0xff]   ;;  %v442_v8 = vadd.s32 32, %v8234_v11 }
  0x14   : > { %7111 = vmatpush3.bf16.msra.mxu0 %v7819_v2  ;;  %v457_v23 = vand.u32 7, %v439_v15  ;;  %vm542_vm1 = vcmp.ne.s32.totalorder %v450_v22, 0  ;;  %vm8267_vm3 = vcmp.ne.s32.totalorder %v450_v22, 7  ;;  %v464_v41 = vand.u32 7, %v440_v28  ;;  %v7832_v51 = vld [vmem:[%s10405_s3] sm:$0xff]   ;;  %v7837_v0 = vld [vmem:[%s10405_s3 + $0xf8] sm:$0xff]  }
  0x15   : > { %s386_s23 = sadd.s32 %s8211_s19, %s7772_s22  ;;  %7135 = vmatpush3.bf16.msra.mxu1 %v7820_v3  ;;  %7112 = vmatprep.subr.bf16.mxu0 %v7821_v4  ;;  %vm8278_vm5 = vmpackc.low %vm542_vm1, %vm542_vm1  ;;  %v471_v50 = vand.u32 7, %v441_v40  ;;  %v7840_v15 = vld [vmem:[%s10405_s3 + $0xa8] sm:$0xff]   ;;  %v478_v22 = vand.u32 7, %v442_v8  ;;  %v8055_v34 = vld [vmem:[%s10405_s3 + $0x620] sm:$0xff]   ;;  %s6021_s22 = sshll.u32 %s10571_s25, 3 }
  0x16   : > { %7136 = vmatprep.subr.bf16.mxu1 %v7822_v5  ;;  %s6015_s12 = sshll.u32 %s386_s23, 2  ;;  %vm543_vm2 = vcmp.ne.s32.totalorder %v457_v23, 0  ;;  %vm8274_vm4 = vcmp.ne.s32.totalorder %v457_v23, 7  ;;  %vm963_vm7 = vmpackc.low %vm8267_vm3, %vm8267_vm3  ;;  %vm544_vm9 = vcmp.ne.s32.totalorder %v464_v41, 0  ;;  %vm8318_vm11 = vcmp.ne.s32.totalorder %v464_v41, 7  ;;  %s389_s23 = sadd.s32 1, %s8100_s24 }
  0x17   : > { %s8232_s20 = scalar_lea.vmem %s10402_s0, %s6015_s12  ;;  %vm8286_vm6 = vmpackc.low %vm543_vm2, %vm543_vm2  ;;  %v8307_v48 = vsel %vm963_vm7, 65537, %v8118_v47  ;;  %vm545_vm10 = vcmp.ne.s32.totalorder %v471_v50, 0  ;;  %vm8326_vm13 = vcmp.ne.s32.totalorder %v471_v50, 7  ;;  %vm546_vm2 = vcmp.ne.s32.totalorder %v478_v22, 0  ;;  %p392_p7 = scmp.lt.s32.totalorder %s389_s23, 9  ;;  %v8067_v58 = vld [vmem:[%s10405_s3 + $0x6b8] sm:$0xff]  }
  0x18   : > { %7113 = vmatpush3.bf16.msra.mxu0 %v7821_v4  ;;  %v558_v13 = vld [vmem:[%s8232_s20] sm:$0xf]  ;;  %v8241_v14 = vld [vmem:[%s8232_s20 + $0x4] sm:$0xf]  ;;  %v8248_v17 = vld [vmem:[%s8232_s20 + $0x8] sm:$0xf] }
  0x19   : > { %7137 = vmatpush3.bf16.msra.mxu1 %v7822_v5  ;;  %7114 = vmatprep.subr.bf16.mxu0 %v7823_v6  ;;  %v8251_v18 = vld [vmem:[%s8232_s20 + $0xc] sm:$0xf]  ;;  %v6039_v19 = vcombine.low %v558_v13, %v8241_v14  ;;  %v8261_v24 = vld [vmem:[%s8232_s20 + $0x10] sm:$0xf]  ;;  %v8264_v27 = vld [vmem:[%s8232_s20 + $0x14] sm:$0xf] }
  0x1a   : > { %7138 = vmatprep.subr.bf16.mxu1 %v7824_v7  ;;  %v6040_v21 = vcombine.low %v8248_v17, %v8251_v18  ;;  %v8284_v35 = vcombine.low %v8261_v24, %v8264_v27  ;;  %v590_v39 = vsel %vm8278_vm5, %v558_v13, 0  ;;  %v591_v43 = vsel %vm8286_vm6, %v8241_v14, 0  ;;  %vm964_vm8 = vmpackc.low %vm8274_vm4, %vm8274_vm4  ;;  %v7838_v4 = vld [vmem:[%s10405_s3 + $0xb0] sm:$0xff]   ;;  %s10573_s23 = smov (!%p392_p7, %s389_s23), 9 }
  0x1b   : > { %v657_v25 = vshrl.u32 %v6039_v19, 16  ;;  %v659_v26 = vshll.u32 %v6039_v19, 16  ;;  %v6052_v46 = vcombine.low %v590_v39, %v591_v43  ;;  %v8314_v53 = vsel %vm964_vm8, 65537, %v8118_v47  ;;  %vm8322_vm12 = vmpackc.low %vm544_vm9, %vm544_vm9  ;;  %v8384_v19 = vld [vmem:[%s8232_s20 + $0x1c] sm:$0xf]  ;;  %s7774_s18 = smul.u32 11, %s10573_s23 }
  0x1c   : > { %7115 = vmatpush3.bf16.msra.mxu0 %v7823_v6  ;;  %v664_v29 = vshll.u32 %v6040_v21, 16  ;;  %v668_v36 = vshrl.u32 %v6040_v21, 16  ;;  %v672_v44 = vshll.u32 %v8284_v35, 16  ;;  %v982_v54 = vrot.slane %v8307_v48, 7  ;;  %vm8330_vm14 = vmpackc.low %vm545_vm10, %vm545_vm10  ;;  %v7839_v6 = vld [vmem:[%s10405_s3 + $0xf0] sm:$0xff]  }
  0x1d   : > { %7139 = vmatpush3.bf16.msra.mxu1 %v7824_v7  ;;  %7116 = vmatprep.subr.bf16.mxu0 %v7825_v9  ;;  %v661_v32 = vrot.slane %v659_v26, 1  ;;  %v984_v56 = vrot.slane %v8314_v53, 7  ;;  %v592_v61 = vsel %vm8322_vm12, %v8248_v17, 0  ;;  %v593_v63 = vsel %vm8330_vm14, %v8251_v18, 0  ;;  %vm965_vm15 = vmpackc.low %vm8318_vm11, %vm8318_vm11  ;;  %s8818_s13 = sadd.s32 %s7774_s18, %s8211_s19 }
  0x1e   : > { %7140 = vmatprep.subr.bf16.mxu1 %v7826_v10  ;;  %v666_v37 = vrot.slane %v664_v29, 1  ;;  %v674_v55 = vrot.slane %v672_v44, 1  ;;  %7148 = vmatprep.mubr.bf16.mxu1 %v6052_v46  ;;  %v8351_v1 = vrot.slane %v982_v54, 4  ;;  %v6053_v5 = vcombine.low %v592_v61, %v593_v63  ;;  %vm966_vm1 = vmpackc.low %vm8326_vm13, %vm8326_vm13  ;;  %s6016_s14 = sshll.u32 %s8818_s13, 2  ;;  %s400_s13 = sadd.s32 2, %s8100_s24 }
  0x1f   : > { %v662_v42 = vor.u32 %v661_v32, %v657_v25  ;;  %v8355_v2 = vrot.slane %v984_v56, 4  ;;  %v676_v7 = vshrl.u32 %v8284_v35, 16  ;;  %v8375_v13 = vsel %vm966_vm1, 65537, %v8118_v47  ;;  %v8392_v25 = vld [vmem:[%s8232_s20 + $0x20] sm:$0x1]  ;;  %vm8409_vm8 = vmpackc.low %vm546_vm2, %vm546_vm2  ;;  %s8882_s12 = scalar_lea.vmem %s10403_s1, %s6016_s14  ;;  %p9344_p8 = scmp.lt.s32.totalorder %s400_s13, 9 }
  0x20   : > { %7117 = vmatpush3.bf16.msra.mxu0 %v7825_v9  ;;  %v670_v49 = vor.u32 %v668_v36, %v666_v37  ;;  %v443_v9 = vadd.s32 40, %v8234_v11  ;;  %v445_v26 = vadd.s32 56, %v8234_v11  ;;  %v6043_v30 = vcombine.low %v8392_v25, %v8392_v25  ;;  %s10577_s24 = smov (!%p413_p9, %s8100_s24), 7 }
  0x21   : > { %7141 = vmatpush3.bf16.msra.mxu1 %v7826_v10  ;;  %7118 = vmatprep.subr.bf16.mxu0 %v7827_v12  ;;  %v667_v52 = vsel %vm10410_vm0, %v662_v42, %v666_v37  ;;  %v8371_v10 = vsel %vm965_vm15, 65537, %v8118_v47  ;;  %v678_v29 = vor.u32 %v676_v7, %v674_v55  ;;  %vm8398_vm4 = vcmp.ne.s32.totalorder %v478_v22, 7  ;;  %s10575_s13 = smov (!%p9344_p8, %s400_s13), 9  ;;  %s6018_s15 = sshll.u32 %s10577_s24, 3 }
  0x22   : > { %7142 = vmatprep.subr.bf16.mxu1 %v7828_v16  ;;  %7124 = vmatprep.mubr.bf16.mxu0 %v667_v52  ;;  %v675_v3 = vsel %vm10410_vm0, %v670_v49, %v674_v55  ;;  %v485_v23 = vand.u32 7, %v443_v9  ;;  %v987_v28 = vrot.slane %v8371_v10, 7  ;;  %v688_v39 = vshll.u32 %v6043_v30, 16  ;;  %vm967_vm11 = vmpackc.low %vm8398_vm4, %vm8398_vm4  ;;  %v7843_v52 = vld [vmem:[%s10405_s3 + $0xe0] sm:$0xff]   ;;  %s7775_s11 = smul.u32 11, %s10575_s13  ;;  %s6019_s13 = sshll.u32 %s10571_s25, 6 }
  0x23   : > { %v499_v40 = vand.u32 7, %v445_v26  ;;  %v990_v41 = vrot.slane %v8375_v13, 7  ;;  %v594_v44 = vsel %vm8409_vm8, %v8261_v24, 0  ;;  %v975_v59 = vsel %vm967_vm11, 65537, %v8118_v47  ;;  %v7845_v13 = vld [vmem:[%s10405_s3 + $0xd8] sm:$0xff]   ;;  %s417_s14 = sadd.s32 %s6019_s13, %s6018_s15  ;;  %s425_s8 = sadd.s32 %s6021_s22, %s10577_s24 }
  0x24   : > { %7119 = vmatpush3.bf16.msra.mxu0 %v7827_v12  ;;  %v444_v12 = vadd.s32 48, %v8234_v11  ;;  %vm547_vm3 = vcmp.ne.s32.totalorder %v485_v23, 0  ;;  %v7842_v11 = vld [vmem:[%s10405_s3 + $0xa0] sm:$0xff]   ;;  %vm8405_vm7 = vcmp.ne.s32.totalorder %v485_v23, 7  ;;  %v690_v49 = vrot.slane %v688_v39, 1  ;;  %s9411_s16 = sadd.s32 %s7775_s11, %s8211_s19  ;;  %s6020_s19 = sshll.u32 %s417_s14, 3 }
  0x25   : > { %7143 = vmatpush3.bf16.msra.mxu1 %v7828_v16  ;;  %7120 = vmatprep.subr.bf16.mxu0 %v7829_v20  ;;  %v8381_v16 = vld [vmem:[%s8232_s20 + $0x18] sm:$0xf]  ;;  %vm8414_vm9 = vmpackc.low %vm547_vm3, %vm547_vm3  ;;  %vm8431_vm13 = vcmp.ne.s32.totalorder %v499_v40, 0  ;;  %vm8453_vm2 = vcmp.ne.s32.totalorder %v499_v40, 7  ;;  %v992_v8 = vrot.slane %v990_v41, 4  ;;  %vm980_vm11 = vcmask 1044484   ;;  %s426_s11 = scalar_lea.vmem %s10408_s6, %s425_s8  ;;  %s433_s15 = scalar_lea.vmem %s10409_s7, %s425_s8 }
  0x26   : > { %7144 = vmatprep.subr.bf16.mxu1 %v7830_v31  ;;  %v6042_v21 = vcombine.low %v8381_v16, %v8384_v19  ;;  %v595_v46 = vsel %vm8414_vm9, %v8264_v27, 0  ;;  %vm968_vm1 = vmpackc.low %vm8405_vm7, %vm8405_vm7  ;;  %vm979_vm7 = vcmask 1040384   ;;  %v946_v30 = vld [vmem:[%s8232_s20] sm:$0xe]  ;;  %v1200_v40 = vsel %vm8286_vm6, %v8248_v17, 0  ;;  %s6017_s21 = sshll.u32 %s9411_s16, 2 }
  0x27   : > { %v6054_v57 = vcombine.low %v594_v44, %v595_v46  ;;  %v8451_v63 = vsel %vm968_vm1, 65537, %v8118_v47  ;;  %vm8468_vm4 = vmpackc.low %vm8431_vm13, %vm8431_vm13  ;;  %s9468_s17 = scalar_lea.vmem %s10404_s2, %s6017_s21  ;;  %s10367_s21 = scalar_lea.vmem %s10407_s5, %s6020_s19 }
  0x28   : > { %7121 = vmatpush3.bf16.msra.mxu0 %v7829_v20  ;;  %v7841_v20 = vld [vmem:[%s10405_s3 + $0xe8] sm:$0xff]   ;;  %v680_v32 = vshll.u32 %v6042_v21, 16  ;;  %v684_v37 = vshrl.u32 %v6042_v21, 16  ;;  %v996_v9 = vrot.slane %v8451_v63, 7  ;;  %vm970_vm13 = vmpackc.low %vm8453_vm2, %vm8453_vm2  ;;  %v989_v21 = vrot.slane %v987_v28, 4 }
  0x29   : > { %7145 = vmatpush3.bf16.msra.mxu1 %v7830_v31  ;;  %7122 = vmatprep.subr.bf16.mxu0 %v7831_v45  ;;  %v492_v31 = vand.u32 7, %v444_v12  ;;  %v597_v12 = vsel %vm8468_vm4, %v8384_v19, 0  ;;  %v978_v26 = vsel %vm970_vm13, 65537, %v8118_v47  ;;  %vm8500_vm1 = vmor %vm979_vm7, %vm980_vm11  ;;  %vm1063_vm13 = vcmask 1046528  }
  0x2a   : > { %7146 = vmatprep.subr.bf16.mxu1 %v7832_v51  ;;  %v682_v42 = vrot.slane %v680_v32, 1  ;;  %v1199_v32 = vsel %vm8278_vm5, %v8241_v14, 0  ;;  %v1002_v48 = vrot.slane %v978_v26, 7  ;;  %v8522_v33 = vsel %vm8500_vm1, %v8355_v2, %v987_v28  ;;  %v1198_v26 = vld [vmem:[%s8232_s20 + $0x20] sm:$0xf] }
  0x2b   : > { %vm8421_vm10 = vcmp.ne.s32.totalorder %v492_v31, 0  ;;  %vm8435_vm15 = vcmp.ne.s32.totalorder %v492_v31, 7  ;;  %vm10414_vm7 = vcmp.ne.s16.totalorder %v8522_v33, 0  ;;  %v6109_v46 = vcombine.low %v1199_v32, %v1200_v40 }
  0x2c   : > { %7123 = vmatpush3.bf16.msra.mxu0 %v7831_v45  ;;  %v683_v55 = vsel %vm10410_vm0, %v678_v29, %v682_v42  ;;  %v686_v61 = vor.u32 %v684_v37, %v682_v42  ;;  %vm8460_vm3 = vmpackc.low %vm8421_vm10, %vm8421_vm10  ;;  %v1016_v2 = vsel %vm10414_vm7, %v8248_v17, 0  ;;  %v998_v50 = vrot.slane %v996_v9, 4 }
  0x2d   : > { %7147 = vmatpush3.bf16.msra.mxu1 %v7832_v51  ;;  %7156 = vmatprep.subr.bf16.mxu0 %v7836_v62  ;;  %v596_v7 = vsel %vm8460_vm3, %v8381_v16, 0  ;;  %vm969_vm10 = vmpackc.low %vm8435_vm15, %vm8435_vm15  ;;  %vm8493_vm15 = vcmp.ne.s16.totalorder %v982_v54, 0  ;;  %v7848_v54 = vld [vmem:[%s10405_s3 + $0x90] sm:$0xff]   ;;  %v1206_v32 = vsel %vm8468_vm4, %v1198_v26, 0 }
  0x2e   : > { %7180 = vmatprep.subr.bf16.mxu1 %v7837_v0  ;;  %v1014_v53 = vsel %vm8493_vm15, %v946_v30, 0 }
  0x2f   : > { %7125 = vmatmul.mubr.bf16.vlgmr.msra.gmra.mxu0 %v675_v3  ;;  %v1201_v3 = vsel %vm8322_vm12, %v8251_v18, 0 }
  0x30   : > { %7149 = vmatmul.mubr.bf16.vlgmr.msra.gmra.mxu1 %v6053_v5  ;;  %7157 = vmatpush3.bf16.msra.mxu0 %v7836_v62  ;;  %v7844_v62 = vld [vmem:[%s10405_s3 + $0x98] sm:$0xff]   ;;  %v691_v5 = vsel %vm10410_vm0, %v686_v61, %v690_v49  ;;  %v7851_v49 = vld [vmem:[%s10405_s3 + $0xc8] sm:$0xff]   ;;  %v7852_v61 = vld [vmem:[%s10405_s3 + $0x80] sm:$0xff]  }
  0x31   : > { %7181 = vmatpush3.bf16.msra.mxu1 %v7837_v0  ;;  %7158 = vmatprep.subr.bf16.mxu0 %v7838_v4  ;;  %v993_v0 = vrot.slane %v975_v59, 7 }
  0x32   : > { %7182 = vmatprep.subr.bf16.mxu1 %v7839_v6  ;;  %7128 = vmatprep.mubr.bf16.mxu0 %v683_v55 }
  0x33   : > { %7152 = vmatprep.mubr.bf16.mxu1 %v6054_v57  ;;  %v995_v23 = vrot.slane %v993_v0, 4  ;;  %v8547_v28 = vsel %vm8500_vm1, %v992_v8, %v993_v0  ;;  %v1202_v8 = vsel %vm8330_vm14, %v8261_v24, 0 }
  0x34   : > { %7159 = vmatpush3.bf16.msra.mxu0 %v7838_v4  ;;  %vm10412_vm11 = vcmp.ne.s16.totalorder %v8547_v28, 0  ;;  %v8070_v4 = vld [vmem:[%s10405_s3 + $0x6a8] sm:$0xff]  }
  0x35   : > { %7183 = vmatpush3.bf16.msra.mxu1 %v7839_v6  ;;  %7160 = vmatprep.subr.bf16.mxu0 %v7840_v15  ;;  %v8551_v39 = vsel %vm8500_vm1, %v995_v23, %v996_v9  ;;  %v7854_v9 = vld [vmem:[%s10405_s3 + $0x138] sm:$0xff]   ;;  %v1204_v23 = vsel %vm8414_vm9, %v8381_v16, 0 }
  0x36   : > { %7184 = vmatprep.subr.bf16.mxu1 %v7841_v20  ;;  %vm10411_vm0 = vcmp.ne.s16.totalorder %v8551_v39, 0 }
  0x37   : > { %7129 = vmatmul.mubr.bf16.gmra.mxu0 %v691_v5  ;;  %v1019_v45 = vsel %vm10411_vm0, %v8264_v27, 0 }
  0x38   : > { %7161 = vmatpush3.bf16.msra.mxu0 %v7840_v15  ;;  %v6055_v15 = vcombine.low %v596_v7, %v597_v12 }
  0x39   : > { %7185 = vmatpush3.bf16.msra.mxu1 %v7841_v20  ;;  %7162 = vmatprep.subr.bf16.mxu0 %v7842_v11  ;;  %v977_v20 = vsel %vm969_vm10, 65537, %v8118_v47  ;;  %v8515_v47 = vsel %vm8500_vm1, %v8351_v1, %v984_v56  ;;  %v7849_v56 = vld [vmem:[%s10405_s3 + $0xd0] sm:$0xff]  }
  0x3a   : > { %7186 = vmatprep.subr.bf16.mxu1 %v7843_v52  ;;  %v999_v29 = vrot.slane %v977_v20, 7  ;;  %7153 = vmatmul.mubr.bf16.gmra.mxu1 %v6055_v15  ;;  %vm10415_vm2 = vcmp.ne.s16.totalorder %v8515_v47, 0 }
  0x3b   : > { %v1015_v1 = vsel %vm10415_vm2, %v8241_v14, 0  ;;  %v1018_v14 = vsel %vm10412_vm11, %v8261_v24, 0  ;;  %7196 = vmatprep.mubr.bf16.mxu1 %v6109_v46  ;;  %v7856_v24 = vld [vmem:[%s10405_s3 + $0x130] sm:$0xff]  }
  0x3c   : > { %7163 = vmatpush3.bf16.msra.mxu0 %v7842_v11  ;;  %v8526_v11 = vsel %vm8500_vm1, %v989_v21, %v990_v41  ;;  %v6080_v35 = vcombine.low %v1014_v53, %v1015_v1  ;;  %v7850_v41 = vld [vmem:[%s10405_s3 + $0x88] sm:$0xff]   ;;  %v1001_v17 = vrot.slane %v999_v29, 4  ;;  %v6082_v55 = vcombine.low %v1018_v14, %v1019_v45  ;;  %v8642_v1 = vld [vmem:[%s8232_s20 + $0x10] sm:$0xf] }
  0x3d   : > { %7187 = vmatpush3.bf16.msra.mxu1 %v7843_v52  ;;  %7164 = vmatprep.subr.bf16.mxu0 %v7844_v62  ;;  %vm10413_vm10 = vcmp.ne.s16.totalorder %v8526_v11, 0  ;;  %v8571_v52 = vrot.slane %v1002_v48, 4  ;;  %v8575_v57 = vsel %vm8500_vm1, %v998_v50, %v999_v29  ;;  %v7857_v29 = vld [vmem:[%s10405_s3 + $0x170] sm:$0xff]   ;;  %v7858_v53 = vld [vmem:[%s10405_s3 + $0x128] sm:$0xff]  }
  0x3e   : > { %7188 = vmatprep.subr.bf16.mxu1 %v7845_v13  ;;  %v1017_v10 = vsel %vm10413_vm10, %v8251_v18, 0  ;;  %v1064_v42 = vrot.slane %v6080_v35, 1  ;;  %v8579_v59 = vsel %vm8500_vm1, %v1001_v17, %v1002_v48  ;;  %vm1011_vm0 = vcmp.ne.s16.totalorder %v8575_v57, 0  ;;  %v7855_v18 = vld [vmem:[%s10405_s3 + $0x178] sm:$0xff]   ;;  %v1369_v48 = vld [vmem:[%s8232_s20 + $0x4] sm:$0xf] }
  0x3f   : > { %v6081_v37 = vcombine.low %v1016_v2, %v1017_v10  ;;  %vm1012_vm11 = vcmp.ne.s16.totalorder %v8579_v59, 0  ;;  %v1020_v63 = vsel %vm1011_vm0, %v8381_v16, 0  ;;  %vm10416_vm1 = vcmp.ne.s16.totalorder %v8571_v52, 0  ;;  %v7859_v2 = vld [vmem:[%s10405_s3 + $0x168] sm:$0xff]   ;;  %v1579_v35 = vld [vmem:[%s8232_s20 + $0x4] sm:$0xe] }
  0x40   : > { %7165 = vmatpush3.bf16.msra.mxu0 %v7844_v62  ;;  %v7853_v62 = vld [vmem:[%s10405_s3 + $0xc0] sm:$0xff]   ;;  %v1021_v0 = vsel %vm1012_vm11, %v8384_v19, 0  ;;  %v1067_v7 = vrot.slane %v6082_v55, 1  ;;  %v1022_v12 = vsel %vm10416_vm1, %v8392_v25, 0  ;;  %v1203_v25 = vsel %vm8409_vm8, %v8264_v27, 0 }
  0x41   : > { %7189 = vmatpush3.bf16.msra.mxu1 %v7845_v13  ;;  %7166 = vmatprep.subr.bf16.mxu0 %v7848_v54  ;;  %v1065_v44 = vrot.slane %v6081_v37, 1  ;;  %v6083_v5 = vcombine.low %v1020_v63, %v1021_v0  ;;  %v6110_v13 = vcombine.low %v1201_v3, %v1202_v8  ;;  %v6084_v21 = vcombine.low %v1022_v12, %v1022_v12  ;;  %v7860_v17 = vld [vmem:[%s10405_s3 + $0x120] sm:$0xff]  }
  0x42   : > { %7190 = vmatprep.subr.bf16.mxu1 %v7849_v56  ;;  %v6111_v31 = vcombine.low %v1203_v25, %v1204_v23  ;;  %v1205_v27 = vsel %vm8460_vm3, %v8384_v19, 0  ;;  %v8704_v25 = vld [vmem:[%s8232_s20 + $0x20] sm:$0xf]  ;;  %v7867_v23 = vld [vmem:[%s10405_s3 + $0x148] sm:$0xff]  }
  0x43   : > { %v1066_v51 = vsel %vm1063_vm13, %v1064_v42, %v1065_v44  ;;  %v1069_v15 = vrot.slane %v6083_v5, 1  ;;  %v1068_v20 = vsel %vm1063_vm13, %v1065_v44, %v1067_v7  ;;  %v1071_v16 = vrot.slane %v6084_v21, 1  ;;  %v7862_v5 = vld [vmem:[%s10405_s3 + $0x118] sm:$0xff]   ;;  %v7866_v21 = vld [vmem:[%s10405_s3 + $0x108] sm:$0xff]  }
  0x44   : > { %7167 = vmatpush3.bf16.msra.mxu0 %v7848_v54  ;;  %7172 = vmatprep.mubr.bf16.mxu0 %v1066_v51  ;;  %v8633_v54 = vld [vmem:[%s8232_s20 + $0x8] sm:$0xf]  ;;  %v6112_v40 = vcombine.low %v1205_v27, %v1206_v32  ;;  %v1580_v44 = vsel %vm8493_vm15, %v1579_v35, 0  ;;  %v1377_v32 = vld [vmem:[%s8232_s20 + $0x24] sm:$0x1] }
  0x45   : > { %7191 = vmatpush3.bf16.msra.mxu1 %v7849_v56  ;;  %7168 = vmatprep.subr.bf16.mxu0 %v7850_v41  ;;  %v1070_v30 = vsel %vm1063_vm13, %v1067_v7, %v1069_v15  ;;  %v8639_v56 = vld [vmem:[%s8232_s20 + $0xc] sm:$0xf]  ;;  %v6137_v19 = vcombine.low %v1369_v48, %v8633_v54  ;;  %v1581_v37 = vsel %vm10415_vm2, %v8633_v54, 0  ;;  %v1072_v45 = vsel %vm1063_vm13, %v1069_v15, %v1071_v16  ;;  %v7863_v7 = vld [vmem:[%s10405_s3 + $0x158] sm:$0xff]   ;;  %v7865_v15 = vld [vmem:[%s10405_s3 + $0x150] sm:$0xff]  }
  0x46   : > { %7192 = vmatprep.subr.bf16.mxu1 %v7851_v49  ;;  %v8650_v10 = vcombine.low %v8639_v56, %v8642_v1  ;;  %v1582_v14 = vsel %vm10414_vm7, %v8639_v56, 0  ;;  %v6166_v50 = vcombine.low %v1580_v44, %v1581_v37  ;;  %vm10459_vm7 = vcmp.ne.s16.totalorder %v8551_v39, 0  ;;  %v1934_v35 = vld [vmem:[%s8232_s20 + $0x8] sm:$0xf] }
  0x47   : > { %v1421_v42 = vshll.u32 %v6137_v19, 16 }
  0x48   : > { %7169 = vmatpush3.bf16.msra.mxu0 %v7850_v41  ;;  %v1419_v41 = vshrl.u32 %v6137_v19, 16  ;;  %v1426_v46 = vshll.u32 %v8650_v10, 16  ;;  %v1629_v63 = vrot.slane %v6166_v50, 1  ;;  %v1430_v27 = vshrl.u32 %v8650_v10, 16  ;;  %v7873_v50 = vld [vmem:[%s10405_s3 + $0x1b8] sm:$0xff]  }
  0x49   : > { %7193 = vmatpush3.bf16.msra.mxu1 %v7851_v49  ;;  %7170 = vmatprep.subr.bf16.mxu0 %v7852_v61  ;;  %v1583_v49 = vsel %vm10413_vm10, %v8642_v1, 0  ;;  %v1423_v51 = vrot.slane %v1421_v42, 1  ;;  %vm10457_vm10 = vsmask.f32 7424  ;;  %v1587_v19 = vsel %vm1012_vm11, %v8704_v25, 0 }
  0x4a   : > { %7194 = vmatprep.subr.bf16.mxu1 %v7853_v62  ;;  %v6167_v55 = vcombine.low %v1582_v14, %v1583_v49  ;;  %v8736_v42 = vld [vmem:[%s8232_s20 + $0x10] sm:$0xf] }
  0x4b   : > { %v1424_v0 = vor.u32 %v1423_v51, %v1419_v41  ;;  %v8733_v41 = vld [vmem:[%s8232_s20 + $0xc] sm:$0xf]  ;;  %v7874_v51 = vld [vmem:[%s10405_s3 + $0x1f8] sm:$0xff]  }
  0x4c   : > { %7171 = vmatpush3.bf16.msra.mxu0 %v7852_v61  ;;  %v7861_v61 = vld [vmem:[%s10405_s3 + $0x160] sm:$0xff]   ;;  %v8672_v3 = vrot.slane %v6167_v55, 1  ;;  %v6223_v49 = vcombine.low %v1934_v35, %v8733_v41  ;;  %v1588_v55 = vsel %vm10416_vm1, %v1377_v32, 0 }
  0x4d   : > { %7195 = vmatpush3.bf16.msra.mxu1 %v7853_v62  ;;  %7204 = vmatprep.subr.bf16.mxu0 %v7854_v9  ;;  %v1428_v62 = vrot.slane %v1426_v46, 1  ;;  %v8739_v46 = vld [vmem:[%s8232_s20 + $0x14] sm:$0xf] }
  0x4e   : > { %7228 = vmatprep.subr.bf16.mxu1 %v7855_v18  ;;  %v1631_v12 = vsel %vm1063_vm13, %v1629_v63, %v8672_v3 }
  0x4f   : > { %7173 = vmatmul.mubr.bf16.vlgmr.msra.gmra.mxu0 %v1068_v20  ;;  %v1429_v8 = vsel %vm10457_vm10, %v1424_v0, %v1428_v62  ;;  %v8698_v20 = vld [vmem:[%s8232_s20 + $0x1c] sm:$0xf]  ;;  %vm10458_vm10 = vcmp.ne.s16.totalorder %v8547_v28, 0  ;;  %v1432_v44 = vor.u32 %v1430_v27, %v1428_v62  ;;  %v8752_v0 = vcombine.low %v8736_v42, %v8739_v46 }
  0x50   : > { %7197 = vmatmul.mubr.bf16.vlgmr.msra.gmra.mxu1 %v6110_v13  ;;  %7205 = vmatpush3.bf16.msra.mxu0 %v7854_v9  ;;  %v8682_v9 = vld [vmem:[%s8232_s20 + $0x14] sm:$0xf]  ;;  %v6140_v16 = vcombine.low %v8698_v20, %v8704_v25 }
  0x51   : > { %7229 = vmatpush3.bf16.msra.mxu1 %v7855_v18  ;;  %7206 = vmatprep.subr.bf16.mxu0 %v7856_v24  ;;  %v8687_v18 = vld [vmem:[%s8232_s20 + $0x18] sm:$0xf]  ;;  %v7864_v13 = vld [vmem:[%s10405_s3 + $0x110] sm:$0xff]  }
  0x52   : > { %7230 = vmatprep.subr.bf16.mxu1 %v7857_v29  ;;  %7176 = vmatprep.mubr.bf16.mxu0 %v1070_v30  ;;  %v1585_v30 = vsel %vm10459_vm7, %v8687_v18, 0  ;;  %v1442_v14 = vshll.u32 %v6140_v16, 16  ;;  %vm10460_vm7 = vsmask.f32 7424 }
  0x53   : > { %7200 = vmatprep.mubr.bf16.mxu1 %v6111_v31  ;;  %v7868_v31 = vld [vmem:[%s10405_s3 + $0x100] sm:$0xff]  }
  0x54   : > { %7207 = vmatpush3.bf16.msra.mxu0 %v7856_v24  ;;  %v6139_v24 = vcombine.low %v8682_v9, %v8687_v18  ;;  %v1444_v62 = vrot.slane %v1442_v14, 1  ;;  %v7881_v14 = vld [vmem:[%s10405_s3 + $0x1a0] sm:$0xff]  }
  0x55   : > { %7231 = vmatpush3.bf16.msra.mxu1 %v7857_v29  ;;  %7208 = vmatprep.subr.bf16.mxu0 %v7858_v53  ;;  %v1584_v29 = vsel %vm10458_vm10, %v8682_v9, 0  ;;  %vm10461_vm10 = vmmov %vm10460_vm7 }
  0x56   : > { %7232 = vmatprep.subr.bf16.mxu1 %v7859_v2  ;;  %v1434_v26 = vshll.u32 %v6139_v24, 16  ;;  %v6168_v48 = vcombine.low %v1584_v29, %v1585_v30  ;;  %v1438_v37 = vshrl.u32 %v6139_v24, 16  ;;  %v7875_v24 = vld [vmem:[%s10405_s3 + $0x1b0] sm:$0xff]   ;;  %v1991_v29 = vshll.u32 %v8752_v0, 16 }
  0x57   : > { %7177 = vmatmul.mubr.bf16.gmra.mxu0 %v1072_v45 }
  0x58   : > { %7209 = vmatpush3.bf16.msra.mxu0 %v7858_v53  ;;  %7201 = vmatmul.mubr.bf16.gmra.mxu1 %v6112_v40  ;;  %v1586_v53 = vsel %vm1011_vm0, %v8698_v20, 0  ;;  %v1436_v10 = vrot.slane %v1434_v26, 1  ;;  %v6141_v40 = vcombine.low %v1377_v32, %v1377_v32 }
  0x59   : > { %7233 = vmatpush3.bf16.msra.mxu1 %v7859_v2  ;;  %7210 = vmatprep.subr.bf16.mxu0 %v7860_v17  ;;  %v7869_v2 = vld [vmem:[%s10405_s3 + $0x140] sm:$0xff]   ;;  %v6169_v45 = vcombine.low %v1586_v53, %v1587_v19  ;;  %v1764_v53 = vsel %vm8278_vm5, %v8633_v54, 0  ;;  %v1765_v19 = vsel %vm8286_vm6, %v8639_v56, 0 }
  0x5a   : > { %7234 = vmatprep.subr.bf16.mxu1 %v7861_v61  ;;  %7220 = vmatprep.mubr.bf16.mxu0 %v1429_v8  ;;  %v1450_v63 = vshll.u32 %v6141_v40, 16  ;;  %v7882_v54 = vld [vmem:[%s10405_s3 + $0x1e0] sm:$0xff]   ;;  %v6195_v56 = vcombine.low %v1764_v53, %v1765_v19 }
  0x5b   : > { %7244 = vmatprep.mubr.bf16.mxu1 %v1631_v12  ;;  %v1634_v8 = vrot.slane %v6169_v45, 1  ;;  %v1986_v12 = vshll.u32 %v6223_v49, 16  ;;  %v7884_v45 = vld [vmem:[%s10405_s3 + $0x1d8] sm:$0xff]  }
  0x5c   : > { %7211 = vmatpush3.bf16.msra.mxu0 %v7860_v17  ;;  %v1632_v17 = vrot.slane %v6168_v48, 1  ;;  %v1452_v26 = vrot.slane %v1450_v63, 1  ;;  %v7880_v48 = vld [vmem:[%s10405_s3 + $0x1e8] sm:$0xff]   ;;  %v8821_v63 = vld [vmem:[%s8232_s20 + $0x20] sm:$0xf] }
  0x5d   : > { %7235 = vmatpush3.bf16.msra.mxu1 %v7861_v61  ;;  %7212 = vmatprep.subr.bf16.mxu0 %v7862_v5  ;;  %v1440_v61 = vor.u32 %v1438_v37, %v1436_v10  ;;  %v1988_v27 = vrot.slane %v1986_v12, 1  ;;  %v1766_v12 = vsel %vm8322_vm12, %v8642_v1, 0  ;;  %v1768_v1 = vsel %vm8409_vm8, %v8687_v18, 0 }
  0x5e   : > { %7236 = vmatprep.subr.bf16.mxu1 %v7863_v7  ;;  %v1635_v30 = vsel %vm1063_vm13, %v1632_v17, %v1634_v8 }
  0x60   : > { %7213 = vmatpush3.bf16.msra.mxu0 %v7862_v5  ;;  %v1437_v5 = vsel %vm10460_vm7, %v1432_v44, %v1436_v10  ;;  %v7883_v44 = vld [vmem:[%s10405_s3 + $0x198] sm:$0xff]  }
  0x61   : > { %7237 = vmatpush3.bf16.msra.mxu1 %v7863_v7  ;;  %7214 = vmatprep.subr.bf16.mxu0 %v7864_v13  ;;  %v1446_v7 = vshrl.u32 %v6140_v16, 16  ;;  %v7879_v16 = vld [vmem:[%s10405_s3 + $0x1a8] sm:$0xff]  }
  0x62   : > { %7238 = vmatprep.subr.bf16.mxu1 %v7865_v15 }
  0x64   : > { %7215 = vmatpush3.bf16.msra.mxu0 %v7864_v13  ;;  %v1633_v13 = vsel %vm1063_vm13, %v8672_v3, %v1632_v17  ;;  %v1448_v3 = vor.u32 %v1446_v7, %v1444_v62  ;;  %v7885_v17 = vld [vmem:[%s10405_s3 + $0x190] sm:$0xff]  }
  0x65   : > { %7239 = vmatpush3.bf16.msra.mxu1 %v7865_v15  ;;  %7216 = vmatprep.subr.bf16.mxu0 %v7866_v21  ;;  %v6170_v15 = vcombine.low %v1588_v55, %v1588_v55  ;;  %v7887_v55 = vld [vmem:[%s10405_s3 + $0x188] sm:$0xff]  }
  0x66   : > { %7240 = vmatprep.subr.bf16.mxu1 %v7867_v23  ;;  %v1453_v10 = vsel %vm10460_vm7, %v1448_v3, %v1452_v26  ;;  %v7893_v26 = vld [vmem:[%s10405_s3 + $0x238] sm:$0xff]  }
  0x67   : > { %v1636_v32 = vrot.slane %v6170_v15, 1  ;;  %v7890_v15 = vld [vmem:[%s10405_s3 + $0x1c0] sm:$0xff]  }
  0x68   : > { %7217 = vmatpush3.bf16.msra.mxu0 %v7866_v21  ;;  %v7876_v21 = vld [vmem:[%s10405_s3 + $0x1f0] sm:$0xff]  }
  0x69   : > { %7241 = vmatpush3.bf16.msra.mxu1 %v7867_v23  ;;  %7218 = vmatprep.subr.bf16.mxu0 %v7868_v31  ;;  %v1445_v23 = vsel %vm10461_vm10, %v1440_v61, %v1444_v62  ;;  %v1637_v37 = vsel %vm1063_vm13, %v1634_v8, %v1636_v32  ;;  %vm10462_vm10 = vmmov %vm10460_vm7  ;;  %v7888_v62 = vld [vmem:[%s10405_s3 + $0x1c8] sm:$0xff]   ;;  %v7889_v8 = vld [vmem:[%s10405_s3 + $0x180] sm:$0xff]   ;;  %vm10463_vm7 = vcmp.ne.s16.totalorder %v8522_v33, 0 }
  0x6a   : > { %7242 = vmatprep.subr.bf16.mxu1 %v7869_v2  ;;  %v7896_v32 = vld [vmem:[%s10405_s3 + $0x230] sm:$0xff]   ;;  %v2147_v53 = vsel %vm10463_vm7, %v8736_v42, 0 }
  0x6b   : > { %v7897_v42 = vld [vmem:[%s10405_s3 + $0x270] sm:$0xff]  }
  0x6c   : > { %7219 = vmatpush3.bf16.msra.mxu0 %v7868_v31  ;;  %v1984_v31 = vshrl.u32 %v6223_v49, 16  ;;  %v8798_v49 = vld [vmem:[%s8232_s20 + $0x18] sm:$0xf] }
  0x6d   : > { %7243 = vmatpush3.bf16.msra.mxu1 %v7869_v2  ;;  %7252 = vmatprep.subr.bf16.mxu0 %v7873_v50  ;;  %v8779_v2 = vrot.slane %v1991_v29, 1 }
  0x6e   : > { %7276 = vmatprep.subr.bf16.mxu1 %v7874_v51  ;;  %v1989_v35 = vor.u32 %v1988_v27, %v1984_v31  ;;  %v7894_v31 = vld [vmem:[%s10405_s3 + $0x278] sm:$0xff]   ;;  %v2146_v27 = vsel %vm10415_vm2, %v8733_v41, 0  ;;  %vm10465_vm2 = vsmask.f32 7424 }
  0x6f   : > { %7221 = vmatmul.mubr.bf16.vlgmr.msra.gmra.mxu0 %v1437_v5  ;;  %v8824_v5 = vld [vmem:[%s8232_s20 + $0x24] sm:$0xf]  ;;  %vm10466_vm7 = vmmov %vm10465_vm2 }
  0x70   : > { %7245 = vmatmul.mubr.bf16.vlgmr.msra.gmra.mxu1 %v1633_v13  ;;  %7253 = vmatpush3.bf16.msra.mxu0 %v7873_v50  ;;  %v1994_v40 = vsel %vm10462_vm10, %v1989_v35, %v8779_v2  ;;  %v8801_v50 = vld [vmem:[%s8232_s20 + $0x1c] sm:$0xf]  ;;  %v1767_v13 = vsel %vm8330_vm14, %v8682_v9, 0  ;;  %v1769_v9 = vsel %vm8414_vm9, %v8698_v20, 0  ;;  %v2144_v20 = vld [vmem:[%s8232_s20 + $0x8] sm:$0xe] }
  0x71   : > { %7277 = vmatpush3.bf16.msra.mxu1 %v7874_v51  ;;  %7254 = vmatprep.subr.bf16.mxu0 %v7875_v24  ;;  %v7886_v51 = vld [vmem:[%s10405_s3 + $0x1d0] sm:$0xff]   ;;  %v6225_v61 = vcombine.low %v8798_v49, %v8801_v50  ;;  %vm10464_vm10 = vcmp.ne.s16.totalorder %v8526_v11, 0  ;;  %v2145_v41 = vsel %vm8493_vm15, %v2144_v20, 0 }
  0x72   : > { %7278 = vmatprep.subr.bf16.mxu1 %v7876_v21  ;;  %7224 = vmatprep.mubr.bf16.mxu0 %v1445_v23  ;;  %v8849_v23 = vld [vmem:[%s8232_s20 + $0x28] sm:$0x1]  ;;  %v2148_v19 = vsel %vm10464_vm10, %v8739_v46, 0  ;;  %v6197_v46 = vcombine.low %v1768_v1, %v1769_v9  ;;  %v7903_v1 = vld [vmem:[%s10405_s3 + $0x260] sm:$0xff]   ;;  %vm10467_vm10 = vcmp.ne.s16.totalorder %v8547_v28, 0 }
  0x73   : > { %7248 = vmatprep.mubr.bf16.mxu1 %v1635_v30  ;;  %v1999_v7 = vshll.u32 %v6225_v61, 16  ;;  %v2003_v3 = vshrl.u32 %v6225_v61, 16  ;;  %v6227_v30 = vcombine.low %v8849_v23, %v8849_v23  ;;  %v2328_v61 = vld [vmem:[%s8882_s12] sm:$0xf] }
  0x74   : > { %7255 = vmatpush3.bf16.msra.mxu0 %v7875_v24  ;;  %v6226_v24 = vcombine.low %v8821_v63, %v8824_v5 }
  0x75   : > { %7279 = vmatpush3.bf16.msra.mxu1 %v7876_v21  ;;  %7256 = vmatprep.subr.bf16.mxu0 %v7879_v16  ;;  %v1995_v21 = vshrl.u32 %v8752_v0, 16  ;;  %v2001_v29 = vrot.slane %v1999_v7, 1 }
  0x76   : > { %7280 = vmatprep.subr.bf16.mxu1 %v7880_v48  ;;  %v2007_v0 = vshll.u32 %v6226_v24, 16 }
  0x77   : > { %7225 = vmatmul.mubr.bf16.gmra.mxu0 %v1453_v10  ;;  %v1997_v18 = vor.u32 %v1995_v21, %v8779_v2  ;;  %v2005_v2 = vor.u32 %v2003_v3, %v2001_v29  ;;  %v7902_v21 = vld [vmem:[%s10405_s3 + $0x220] sm:$0xff]   ;;  %v7905_v3 = vld [vmem:[%s10405_s3 + $0x258] sm:$0xff]  }
  0x78   : > { %7257 = vmatpush3.bf16.msra.mxu0 %v7879_v16  ;;  %7249 = vmatmul.mubr.bf16.gmra.mxu1 %v1637_v37  ;;  %v6196_v16 = vcombine.low %v1766_v12, %v1767_v13  ;;  %v2009_v10 = vrot.slane %v2007_v0, 1  ;;  %v2011_v37 = vshrl.u32 %v6226_v24, 16  ;;  %v2336_v13 = vsel %vm8278_vm5, %v2328_v61, 0  ;;  %v7906_v0 = vld [vmem:[%s10405_s3 + $0x210] sm:$0xff]  }
  0x79   : > { %7281 = vmatpush3.bf16.msra.mxu1 %v7880_v48  ;;  %7258 = vmatprep.subr.bf16.mxu0 %v7881_v14  ;;  %v1763_v48 = vld [vmem:[%s8232_s20 + $0x24] sm:$0xf]  ;;  %v2002_v35 = vsel %vm10465_vm2, %v1997_v18, %v2001_v29  ;;  %v7904_v29 = vld [vmem:[%s10405_s3 + $0x218] sm:$0xff]   ;;  %v7907_v18 = vld [vmem:[%s10405_s3 + $0x250] sm:$0xff]  }
  0x7a   : > { %7282 = vmatprep.subr.bf16.mxu1 %v7882_v54  ;;  %7268 = vmatprep.mubr.bf16.mxu0 %v6195_v56  ;;  %v6253_v56 = vcombine.low %v2147_v53, %v2148_v19  ;;  %v2506_v53 = vld [vmem:[%s8882_s12] sm:$0xf]  ;;  %v8950_v19 = vld [vmem:[%s8882_s12 + $0x4] sm:$0xf] }
  0x7b   : > { %7292 = vmatprep.mubr.bf16.mxu1 %v1994_v40  ;;  %v1770_v40 = vsel %vm8460_vm3, %v8704_v25, 0  ;;  %v7899_v25 = vld [vmem:[%s10405_s3 + $0x268] sm:$0xff]  }
  0x7c   : > { %7259 = vmatpush3.bf16.msra.mxu0 %v7881_v14  ;;  %v2015_v14 = vshll.u32 %v6227_v30, 16  ;;  %v8901_v12 = vrot.slane %v6253_v56, 1  ;;  %v2149_v30 = vsel %vm10467_vm10, %v8798_v49, 0  ;;  %v2152_v49 = vsel %vm1012_vm11, %v8824_v5, 0  ;;  %v2332_v56 = vld [vmem:[%s8882_s12 + $0x10] sm:$0xf] }
  0x7d   : > { %7283 = vmatpush3.bf16.msra.mxu1 %v7882_v54  ;;  %7260 = vmatprep.subr.bf16.mxu0 %v7883_v44  ;;  %v6252_v54 = vcombine.low %v2145_v41, %v2146_v27  ;;  %v7909_v27 = vld [vmem:[%s10405_s3 + $0x248] sm:$0xff]   ;;  %vm10470_vm10 = vcmp.ne.s16.totalorder %v8522_v33, 0 }
  0x7e   : > { %7284 = vmatprep.subr.bf16.mxu1 %v7884_v45 }
  0x80   : > { %7261 = vmatpush3.bf16.msra.mxu0 %v7883_v44  ;;  %v1771_v44 = vsel %vm8468_vm4, %v1763_v48, 0  ;;  %v2331_v48 = vld [vmem:[%s8882_s12 + $0xc] sm:$0xf] }
  0x81   : > { %7285 = vmatpush3.bf16.msra.mxu1 %v7884_v45  ;;  %7262 = vmatprep.subr.bf16.mxu0 %v7885_v17  ;;  %v2010_v45 = vsel %vm10465_vm2, %v2005_v2, %v2009_v10  ;;  %v6198_v7 = vcombine.low %v1770_v40, %v1771_v44  ;;  %vm10468_vm2 = vcmp.ne.s16.totalorder %v8551_v39, 0  ;;  %v7911_v2 = vld [vmem:[%s10405_s3 + $0x240] sm:$0xff]   ;;  %v2339_v41 = vsel %vm8330_vm14, %v2331_v48, 0  ;;  %v2333_v40 = vld [vmem:[%s8882_s12 + $0x14] sm:$0xf] }
  0x82   : > { %7286 = vmatprep.subr.bf16.mxu1 %v7886_v51  ;;  %v2150_v20 = vsel %vm10468_vm2, %v8801_v50, 0  ;;  %v2716_v44 = vld [vmem:[%s8882_s12] sm:$0xe]  ;;  %vm10471_vm2 = vcmp.ne.s16.totalorder %v8526_v11, 0 }
  0x83   : > { %v6254_v50 = vcombine.low %v2149_v30, %v2150_v20  ;;  %v7916_v20 = vld [vmem:[%s10405_s3 + $0x2a8] sm:$0xff]  }
  0x84   : > { %7263 = vmatpush3.bf16.msra.mxu0 %v7885_v17  ;;  %v7898_v17 = vld [vmem:[%s10405_s3 + $0x228] sm:$0xff]  }
  0x85   : > { %7287 = vmatpush3.bf16.msra.mxu1 %v7886_v51  ;;  %7264 = vmatprep.subr.bf16.mxu0 %v7887_v55  ;;  %v2013_v51 = vor.u32 %v2011_v37, %v2009_v10  ;;  %v2197_v5 = vrot.slane %v6254_v50, 1  ;;  %v2153_v37 = vsel %vm10416_vm1, %v8849_v23, 0  ;;  %v7917_v50 = vld [vmem:[%s10405_s3 + $0x2e8] sm:$0xff]  }
  0x86   : > { %7288 = vmatprep.subr.bf16.mxu1 %v7888_v62  ;;  %v6256_v61 = vcombine.low %v2153_v37, %v2153_v37 }
  0x87   : > { %v2198_v23 = vsel %vm1063_vm13, %v8901_v12, %v2197_v5 }
  0x88   : > { %7265 = vmatpush3.bf16.msra.mxu0 %v7887_v55  ;;  %v2017_v55 = vrot.slane %v2015_v14, 1  ;;  %v7912_v14 = vld [vmem:[%s10405_s3 + $0x2b8] sm:$0xff]   ;;  %v2201_v30 = vrot.slane %v6256_v61, 1 }
  0x89   : > { %7289 = vmatpush3.bf16.msra.mxu1 %v7888_v62  ;;  %7266 = vmatprep.subr.bf16.mxu0 %v7889_v8  ;;  %v2329_v62 = vld [vmem:[%s8882_s12 + $0x4] sm:$0xf]  ;;  %v9067_v61 = vld [vmem:[%s8882_s12 + $0x1c] sm:$0xf] }
  0x8a   : > { %7290 = vmatprep.subr.bf16.mxu1 %v7890_v15  ;;  %v2337_v24 = vsel %vm8286_vm6, %v2329_v62, 0 }
  0x8c   : > { %7267 = vmatpush3.bf16.msra.mxu0 %v7889_v8  ;;  %v2194_v8 = vrot.slane %v6252_v54, 1  ;;  %v8973_v54 = vld [vmem:[%s8882_s12 + $0xc] sm:$0xf] }
  0x8d   : > { %7291 = vmatpush3.bf16.msra.mxu1 %v7890_v15  ;;  %7300 = vmatprep.subr.bf16.mxu0 %v7893_v26  ;;  %v2018_v15 = vsel %vm10466_vm7, %v2013_v51, %v2017_v55  ;;  %v7914_v55 = vld [vmem:[%s10405_s3 + $0x2b0] sm:$0xff]   ;;  %vm10469_vm7 = vcmp.ne.s16.totalorder %v8515_v47, 0 }
  0x8e   : > { %7324 = vmatprep.subr.bf16.mxu1 %v7894_v31  ;;  %v2196_v9 = vsel %vm1063_vm13, %v2194_v8, %v8901_v12  ;;  %v2340_v8 = vsel %vm8409_vm8, %v2332_v56, 0  ;;  %v2341_v12 = vsel %vm8414_vm9, %v2333_v40, 0  ;;  %v9044_v56 = vld [vmem:[%s8882_s12 + $0x10] sm:$0xf]  ;;  %v9047_v40 = vld [vmem:[%s8882_s12 + $0x14] sm:$0xf] }
  0x8f   : > { %7269 = vmatmul.mubr.bf16.vlgmr.msra.gmra.mxu0 %v6196_v16  ;;  %v2151_v16 = vsel %vm1011_vm0, %v8821_v63, 0  ;;  %v7910_v63 = vld [vmem:[%s10405_s3 + $0x200] sm:$0xff]  }
  0x90   : > { %7293 = vmatmul.mubr.bf16.vlgmr.msra.gmra.mxu1 %v2002_v35  ;;  %7301 = vmatpush3.bf16.msra.mxu0 %v7893_v26  ;;  %v6281_v26 = vcombine.low %v2336_v13, %v2337_v24  ;;  %v6255_v35 = vcombine.low %v2151_v16, %v2152_v49  ;;  %v2334_v13 = vld [vmem:[%s8882_s12 + $0x18] sm:$0xf]  ;;  %v2717_v24 = vsel %vm8493_vm15, %v2716_v44, 0  ;;  %v7922_v44 = vld [vmem:[%s10405_s3 + $0x290] sm:$0xff]  }
  0x91   : > { %7325 = vmatpush3.bf16.msra.mxu1 %v7894_v31  ;;  %7302 = vmatprep.subr.bf16.mxu0 %v7896_v32  ;;  %v7908_v31 = vld [vmem:[%s10405_s3 + $0x208] sm:$0xff]   ;;  %v2342_v16 = vsel %vm8460_vm3, %v2334_v13, 0  ;;  %v2514_v13 = vld [vmem:[%s8882_s12 + $0x20] sm:$0x1] }
  0x92   : > { %7326 = vmatprep.subr.bf16.mxu1 %v7897_v42  ;;  %7272 = vmatprep.mubr.bf16.mxu0 %v6197_v46  ;;  %v6309_v46 = vcombine.low %v2506_v53, %v8950_v19 }
  0x93   : > { %7296 = vmatprep.mubr.bf16.mxu1 %v2010_v45  ;;  %v7913_v45 = vld [vmem:[%s10405_s3 + $0x2f8] sm:$0xff]  }
  0x94   : > { %7303 = vmatpush3.bf16.msra.mxu0 %v7896_v32  ;;  %v2330_v32 = vld [vmem:[%s8882_s12 + $0x8] sm:$0xf] }
  0x95   : > { %7327 = vmatpush3.bf16.msra.mxu1 %v7897_v42  ;;  %7304 = vmatprep.subr.bf16.mxu0 %v7898_v17  ;;  %v2338_v10 = vsel %vm8322_vm12, %v2330_v32, 0  ;;  %v8969_v42 = vld [vmem:[%s8882_s12 + $0x8] sm:$0xf] }
  0x96   : > { %7328 = vmatprep.subr.bf16.mxu1 %v7899_v25  ;;  %v6282_v51 = vcombine.low %v2338_v10, %v2339_v41  ;;  %v8988_v62 = vcombine.low %v8969_v42, %v8973_v54  ;;  %v7918_v10 = vld [vmem:[%s10405_s3 + $0x2a0] sm:$0xff]  }
  0x97   : > { %7273 = vmatmul.mubr.bf16.gmra.mxu0 %v6198_v7  ;;  %v7915_v7 = vld [vmem:[%s10405_s3 + $0x2f0] sm:$0xff]   ;;  %v7919_v41 = vld [vmem:[%s10405_s3 + $0x2e0] sm:$0xff]  }
  0x98   : > { %7305 = vmatpush3.bf16.msra.mxu0 %v7898_v17  ;;  %7297 = vmatmul.mubr.bf16.gmra.mxu1 %v2018_v15  ;;  %v2199_v17 = vrot.slane %v6255_v35, 1  ;;  %v2718_v15 = vsel %vm10469_vm7, %v8950_v19, 0  ;;  %vm10472_vm7 = vsmask.f32 7424 }
  0x99   : > { %7329 = vmatpush3.bf16.msra.mxu1 %v7899_v25  ;;  %7306 = vmatprep.subr.bf16.mxu0 %v7902_v21  ;;  %v2558_v25 = vshll.u32 %v6309_v46, 16 }
  0x9a   : > { %7330 = vmatprep.subr.bf16.mxu1 %v7903_v1  ;;  %7316 = vmatprep.mubr.bf16.mxu0 %v2196_v9  ;;  %v2200_v9 = vsel %vm1063_vm13, %v2197_v5, %v2199_v17  ;;  %v2202_v53 = vsel %vm1063_vm13, %v2199_v17, %v2201_v30 }
  0x9b   : > { %7340 = vmatprep.mubr.bf16.mxu1 %v6281_v26  ;;  %v2335_v26 = vld [vmem:[%s8882_s12 + $0x1c] sm:$0xf] }
  0x9c   : > { %7307 = vmatpush3.bf16.msra.mxu0 %v7902_v21  ;;  %v2719_v21 = vsel %vm10470_vm10, %v8969_v42, 0  ;;  %v2343_v49 = vsel %vm8468_vm4, %v2335_v26, 0  ;;  %vm10473_vm10 = vcmp.ne.s16.totalorder %v8547_v28, 0  ;;  %v7927_v26 = vld [vmem:[%s10405_s3 + $0x2c0] sm:$0xff]  }
  0x9d   : > { %7331 = vmatpush3.bf16.msra.mxu1 %v7903_v1  ;;  %7308 = vmatprep.subr.bf16.mxu0 %v7904_v29  ;;  %v2720_v1 = vsel %vm10471_vm2, %v8973_v54, 0  ;;  %v2721_v17 = vsel %vm10473_vm10, %v9044_v56, 0  ;;  %vm10474_vm2 = vcmp.ne.s16.totalorder %v8551_v39, 0  ;;  %vm10475_vm10 = vmmov %vm10472_vm7 }
  0x9e   : > { %7332 = vmatprep.subr.bf16.mxu1 %v7905_v3 }
  0xa0   : > { %7309 = vmatpush3.bf16.msra.mxu0 %v7904_v29  ;;  %v6283_v29 = vcombine.low %v2340_v8, %v2341_v12  ;;  %v2567_v8 = vshrl.u32 %v8988_v62, 16 }
  0xa1   : > { %7333 = vmatpush3.bf16.msra.mxu1 %v7905_v3  ;;  %7310 = vmatprep.subr.bf16.mxu0 %v7906_v0  ;;  %v2556_v3 = vshrl.u32 %v6309_v46, 16  ;;  %v7921_v46 = vld [vmem:[%s10405_s3 + $0x2d8] sm:$0xff]  }
  0xa2   : > { %7334 = vmatprep.subr.bf16.mxu1 %v7907_v18 }
  0xa4   : > { %7311 = vmatpush3.bf16.msra.mxu0 %v7906_v0  ;;  %v2560_v0 = vrot.slane %v2558_v25, 1  ;;  %v7924_v25 = vld [vmem:[%s10405_s3 + $0x288] sm:$0xff]  }
  0xa5   : > { %7335 = vmatpush3.bf16.msra.mxu1 %v7907_v18  ;;  %7312 = vmatprep.subr.bf16.mxu0 %v7908_v31  ;;  %v2563_v18 = vshll.u32 %v8988_v62, 16  ;;  %v3071_v62 = vld [vmem:[%s8882_s12 + $0x4] sm:$0xf] }
  0xa6   : > { %7336 = vmatprep.subr.bf16.mxu1 %v7909_v27  ;;  %v2561_v32 = vor.u32 %v2560_v0, %v2556_v3 }
  0xa7   : > { %v9022_v48 = vrot.slane %v2563_v18, 1  ;;  %v7931_v18 = vld [vmem:[%s10405_s3 + $0x338] sm:$0xff]  }
  0xa8   : > { %7313 = vmatpush3.bf16.msra.mxu0 %v7908_v31  ;;  %v6338_v31 = vcombine.low %v2717_v24, %v2718_v15  ;;  %v2724_v15 = vsel %vm1012_vm11, %v9067_v61, 0 }
  0xa9   : > { %7337 = vmatpush3.bf16.msra.mxu1 %v7909_v27  ;;  %7314 = vmatprep.subr.bf16.mxu0 %v7910_v63  ;;  %v6339_v27 = vcombine.low %v2719_v21, %v2720_v1  ;;  %v2566_v35 = vsel %vm10472_vm7, %v2561_v32, %v9022_v48  ;;  %v7926_v21 = vld [vmem:[%s10405_s3 + $0x280] sm:$0xff]  }
  0xaa   : > { %7338 = vmatprep.subr.bf16.mxu1 %v7911_v2  ;;  %v2766_v5 = vrot.slane %v6338_v31, 1  ;;  %v6313_v31 = vcombine.low %v2514_v13, %v2514_v13 }
  0xac   : > { %7315 = vmatpush3.bf16.msra.mxu0 %v7910_v63  ;;  %v6284_v63 = vcombine.low %v2342_v16, %v2343_v49  ;;  %v7932_v16 = vld [vmem:[%s10405_s3 + $0x378] sm:$0xff]  }
  0xad   : > { %7339 = vmatpush3.bf16.msra.mxu1 %v7911_v2  ;;  %7348 = vmatprep.subr.bf16.mxu0 %v7912_v14  ;;  %v9025_v2 = vrot.slane %v6339_v27, 1  ;;  %v2569_v27 = vor.u32 %v2567_v8, %v9022_v48 }
  0xae   : > { %7372 = vmatprep.subr.bf16.mxu1 %v7913_v45 }
  0xaf   : > { %7317 = vmatmul.mubr.bf16.vlgmr.msra.gmra.mxu0 %v2198_v23  ;;  %v2768_v37 = vsel %vm1063_vm13, %v2766_v5, %v9025_v2  ;;  %v6311_v23 = vcombine.low %v9044_v56, %v9047_v40  ;;  %v2725_v5 = vsel %vm10416_vm1, %v2514_v13, 0  ;;  %vm10481_vm1 = vsmask.f32 7424 }
  0xb0   : > { %7341 = vmatmul.mubr.bf16.vlgmr.msra.gmra.mxu1 %v6282_v51  ;;  %7349 = vmatpush3.bf16.msra.mxu0 %v7912_v14  ;;  %v7920_v14 = vld [vmem:[%s10405_s3 + $0x298] sm:$0xff]   ;;  %v2722_v51 = vsel %vm10474_vm2, %v9047_v40, 0  ;;  %vm10476_vm2 = vmmov %vm10472_vm7 }
  0xb1   : > { %7373 = vmatpush3.bf16.msra.mxu1 %v7913_v45  ;;  %7350 = vmatprep.subr.bf16.mxu0 %v7914_v55  ;;  %v7923_v45 = vld [vmem:[%s10405_s3 + $0x2d0] sm:$0xff]   ;;  %v2571_v12 = vshll.u32 %v6311_v23, 16  ;;  %v6340_v1 = vcombine.low %v2721_v17, %v2722_v51  ;;  %v2575_v0 = vshrl.u32 %v6311_v23, 16 }
  0xb2   : > { %7374 = vmatprep.subr.bf16.mxu1 %v7915_v7  ;;  %7320 = vmatprep.mubr.bf16.mxu0 %v2200_v9  ;;  %v7933_v23 = vld [vmem:[%s10405_s3 + $0x330] sm:$0xff]  }
  0xb3   : > { %7344 = vmatprep.mubr.bf16.mxu1 %v6283_v29  ;;  %v9093_v29 = vld [vmem:[%s8882_s12 + $0x8] sm:$0xf]  ;;  %v2573_v3 = vrot.slane %v2571_v12, 1  ;;  %v2769_v30 = vrot.slane %v6340_v1, 1  ;;  %v7934_v17 = vld [vmem:[%s10405_s3 + $0x370] sm:$0xff]   ;;  %v2901_v1 = vsel %vm8278_vm5, %v8950_v19, 0 }
  0xb4   : > { %7351 = vmatpush3.bf16.msra.mxu0 %v7914_v55  ;;  %v9064_v55 = vld [vmem:[%s8882_s12 + $0x18] sm:$0xf]  ;;  %v6395_v32 = vcombine.low %v3071_v62, %v9093_v29  ;;  %v7940_v19 = vld [vmem:[%s10405_s3 + $0x360] sm:$0xff]  }
  0xb5   : > { %7375 = vmatpush3.bf16.msra.mxu1 %v7915_v7  ;;  %7352 = vmatprep.subr.bf16.mxu0 %v7916_v20  ;;  %v7925_v7 = vld [vmem:[%s10405_s3 + $0x2c8] sm:$0xff]   ;;  %v2723_v24 = vsel %vm1011_vm0, %v9064_v55, 0  ;;  %v6312_v9 = vcombine.low %v9064_v55, %v9067_v61 }
  0xb6   : > { %7376 = vmatprep.subr.bf16.mxu1 %v7917_v50  ;;  %v6341_v49 = vcombine.low %v2723_v24, %v2724_v15  ;;  %v7937_v24 = vld [vmem:[%s10405_s3 + $0x328] sm:$0xff]  }
  0xb7   : > { %7321 = vmatmul.mubr.bf16.gmra.mxu0 %v2202_v53  ;;  %v9107_v53 = vld [vmem:[%s8882_s12 + $0x10] sm:$0xf] }
  0xb8   : > { %7353 = vmatpush3.bf16.msra.mxu0 %v7916_v20  ;;  %7345 = vmatmul.mubr.bf16.gmra.mxu1 %v6284_v63  ;;  %v2579_v20 = vshll.u32 %v6312_v9, 16  ;;  %v2583_v63 = vshrl.u32 %v6312_v9, 16  ;;  %v2902_v9 = vsel %vm8286_vm6, %v8969_v42, 0 }
  0xb9   : > { %7377 = vmatpush3.bf16.msra.mxu1 %v7917_v50  ;;  %7354 = vmatprep.subr.bf16.mxu0 %v7918_v10  ;;  %v9103_v50 = vld [vmem:[%s8882_s12 + $0xc] sm:$0xf] }
  0xba   : > { %7378 = vmatprep.subr.bf16.mxu1 %v7919_v41  ;;  %7364 = vmatprep.mubr.bf16.mxu0 %v2566_v35  ;;  %v2581_v48 = vrot.slane %v2579_v20, 1  ;;  %v2574_v35 = vsel %vm10472_vm7, %v2569_v27, %v2573_v3  ;;  %vm10477_vm7 = vmmov %vm10476_vm2  ;;  %v7941_v20 = vld [vmem:[%s10405_s3 + $0x318] sm:$0xff]   ;;  %v7943_v27 = vld [vmem:[%s10405_s3 + $0x310] sm:$0xff]  }
  0xbb   : > { %7388 = vmatprep.mubr.bf16.mxu1 %v2768_v37  ;;  %v2771_v37 = vrot.slane %v6341_v49, 1  ;;  %v9161_v49 = vld [vmem:[%s8882_s12 + $0x14] sm:$0xf] }
  0xbc   : > { %7355 = vmatpush3.bf16.msra.mxu0 %v7918_v10  ;;  %v2577_v10 = vor.u32 %v2575_v0, %v2573_v3 }
  0xbd   : > { %7379 = vmatpush3.bf16.msra.mxu1 %v7919_v41  ;;  %7356 = vmatprep.subr.bf16.mxu0 %v7920_v14  ;;  %v2587_v41 = vshll.u32 %v6313_v31, 16  ;;  %v2772_v8 = vsel %vm1063_vm13, %v2769_v30, %v2771_v37  ;;  %v7942_v31 = vld [vmem:[%s10405_s3 + $0x358] sm:$0xff]  }
  0xbe   : > { %7380 = vmatprep.subr.bf16.mxu1 %v7921_v46  ;;  %v2582_v51 = vsel %vm10475_vm10, %v2577_v10, %v2581_v48  ;;  %vm10478_vm10 = vcmp.ne.s16.totalorder %v8515_v47, 0 }
  0xc0   : > { %7357 = vmatpush3.bf16.msra.mxu0 %v7920_v14  ;;  %v9114_v14 = vcombine.low %v9103_v50, %v9107_v53 }
  0xc1   : > { %7381 = vmatpush3.bf16.msra.mxu1 %v7921_v46  ;;  %7358 = vmatprep.subr.bf16.mxu0 %v7922_v44  ;;  %v3123_v46 = vshll.u32 %v6395_v32, 16 }
  0xc2   : > { %7382 = vmatprep.subr.bf16.mxu1 %v7923_v45  ;;  %v3128_v13 = vshll.u32 %v9114_v14, 16 }
  0xc3   : > { %v3125_v12 = vrot.slane %v3123_v46, 1  ;;  %v7948_v46 = vld [vmem:[%s10405_s3 + $0x340] sm:$0xff]  }
  0xc4   : > { %7359 = vmatpush3.bf16.msra.mxu0 %v7922_v44  ;;  %v2770_v44 = vsel %vm1063_vm13, %v9025_v2, %v2769_v30  ;;  %v3121_v2 = vshrl.u32 %v6395_v32, 16  ;;  %v3130_v3 = vrot.slane %v3128_v13, 1  ;;  %v6367_v30 = vcombine.low %v2901_v1, %v2902_v9  ;;  %v9164_v32 = vld [vmem:[%s8882_s12 + $0x18] sm:$0xf] }
  0xc5   : > { %7383 = vmatpush3.bf16.msra.mxu1 %v7923_v45  ;;  %7360 = vmatprep.subr.bf16.mxu0 %v7924_v25  ;;  %v6342_v45 = vcombine.low %v2725_v5, %v2725_v5  ;;  %v9170_v5 = vld [vmem:[%s8882_s12 + $0x1c] sm:$0xf]  ;;  %v6397_v10 = vcombine.low %v9161_v49, %v9164_v32  ;;  %v3283_v9 = vsel %vm10478_vm10, %v9093_v29, 0  ;;  %vm10482_vm10 = vmmov %vm10481_vm1 }
  0xc6   : > { %7384 = vmatprep.subr.bf16.mxu1 %v7925_v7 }
  0xc7   : > { %v2773_v15 = vrot.slane %v6342_v45, 1  ;;  %v3136_v45 = vshll.u32 %v6397_v10, 16 }
  0xc8   : > { %7361 = vmatpush3.bf16.msra.mxu0 %v7924_v25  ;;  %v2585_v25 = vor.u32 %v2583_v63, %v2581_v48  ;;  %v7945_v63 = vld [vmem:[%s10405_s3 + $0x308] sm:$0xff]   ;;  %v9175_v48 = vld [vmem:[%s8882_s12 + $0x20] sm:$0xf] }
  0xc9   : > { %7385 = vmatpush3.bf16.msra.mxu1 %v7925_v7  ;;  %7362 = vmatprep.subr.bf16.mxu0 %v7926_v21  ;;  %v2589_v7 = vrot.slane %v2587_v41, 1  ;;  %v2774_v0 = vsel %vm1063_vm13, %v2771_v37, %v2773_v15  ;;  %v7946_v41 = vld [vmem:[%s10405_s3 + $0x348] sm:$0xff]   ;;  %v7947_v37 = vld [vmem:[%s10405_s3 + $0x300] sm:$0xff]   ;;  %v2905_v15 = vsel %vm8409_vm8, %v9047_v40, 0 }
  0xca   : > { %7386 = vmatprep.subr.bf16.mxu1 %v7927_v26 }
  0xcb   : > { %v2590_v62 = vsel %vm10476_vm2, %v2585_v25, %v2589_v7  ;;  %v3140_v25 = vshrl.u32 %v6397_v10, 16  ;;  %vm10479_vm2 = vcmp.ne.s16.totalorder %v8522_v33, 0 }
  0xcc   : > { %7363 = vmatpush3.bf16.msra.mxu0 %v7926_v21  ;;  %v7938_v21 = vld [vmem:[%s10405_s3 + $0x368] sm:$0xff]  }
  0xcd   : > { %7387 = vmatpush3.bf16.msra.mxu1 %v7927_v26  ;;  %7396 = vmatprep.subr.bf16.mxu0 %v7931_v18  ;;  %v3126_v26 = vor.u32 %v3125_v12, %v3121_v2  ;;  %v3281_v12 = vld [vmem:[%s8882_s12 + $0x4] sm:$0xe] }
  0xce   : > { %7420 = vmatprep.subr.bf16.mxu1 %v7932_v16 }
  0xcf   : > { %7365 = vmatmul.mubr.bf16.vlgmr.msra.gmra.mxu0 %v2574_v35  ;;  %v3131_v42 = vsel %vm10477_vm7, %v3126_v26, %v3130_v3  ;;  %v6398_v35 = vcombine.low %v9170_v5, %v9175_v48  ;;  %vm10480_vm7 = vcmp.ne.s16.totalorder %v8526_v11, 0 }
  0xd0   : > { %7389 = vmatmul.mubr.bf16.vlgmr.msra.gmra.mxu1 %v2770_v44  ;;  %7397 = vmatpush3.bf16.msra.mxu0 %v7931_v18  ;;  %v7939_v18 = vld [vmem:[%s10405_s3 + $0x320] sm:$0xff]   ;;  %v2903_v44 = vsel %vm8322_vm12, %v8973_v54, 0  ;;  %v7951_v54 = vld [vmem:[%s10405_s3 + $0x3b8] sm:$0xff]   ;;  %v3285_v40 = vsel %vm10480_vm7, %v9107_v53, 0  ;;  %vm10484_vm7 = vcmp.ne.s16.totalorder %v8551_v39, 0 }
  0xd1   : > { %7421 = vmatpush3.bf16.msra.mxu1 %v7932_v16  ;;  %7398 = vmatprep.subr.bf16.mxu0 %v7933_v23  ;;  %v7944_v16 = vld [vmem:[%s10405_s3 + $0x350] sm:$0xff]   ;;  %v3144_v7 = vshll.u32 %v6398_v35, 16 }
  0xd2   : > { %7422 = vmatprep.subr.bf16.mxu1 %v7934_v17  ;;  %7368 = vmatprep.mubr.bf16.mxu0 %v2582_v51  ;;  %v2904_v51 = vsel %vm8330_vm14, %v9044_v56, 0  ;;  %v7952_v56 = vld [vmem:[%s10405_s3 + $0x3f8] sm:$0xff]  }
  0xd3   : > { %7392 = vmatprep.mubr.bf16.mxu1 %v2772_v8  ;;  %v6368_v13 = vcombine.low %v2903_v44, %v2904_v51  ;;  %v3146_v26 = vrot.slane %v3144_v7, 1 }
  0xd4   : > { %7399 = vmatpush3.bf16.msra.mxu0 %v7933_v23  ;;  %v3132_v23 = vshrl.u32 %v9114_v14, 16  ;;  %v3138_v14 = vrot.slane %v3136_v45, 1 }
  0xd5   : > { %7423 = vmatpush3.bf16.msra.mxu1 %v7934_v17  ;;  %7400 = vmatprep.subr.bf16.mxu0 %v7937_v24  ;;  %v9193_v17 = vld [vmem:[%s8882_s12 + $0x24] sm:$0x1] }
  0xd6   : > { %7424 = vmatprep.subr.bf16.mxu1 %v7938_v21  ;;  %v3134_v8 = vor.u32 %v3132_v23, %v3130_v3  ;;  %v6399_v2 = vcombine.low %v9193_v17, %v9193_v17  ;;  %v3142_v1 = vor.u32 %v3140_v25, %v3138_v14  ;;  %v3282_v3 = vsel %vm8493_vm15, %v3281_v12, 0 }
  0xd7   : > { %7369 = vmatmul.mubr.bf16.gmra.mxu0 %v2590_v62  ;;  %v2900_v62 = vld [vmem:[%s8882_s12 + $0x20] sm:$0xf]  ;;  %v3467_v12 = vsel %vm8286_vm6, %v9103_v50, 0 }
  0xd8   : > { %7401 = vmatpush3.bf16.msra.mxu0 %v7937_v24  ;;  %7393 = vmatmul.mubr.bf16.gmra.mxu1 %v2774_v0  ;;  %v7954_v24 = vld [vmem:[%s10405_s3 + $0x3b0] sm:$0xff]   ;;  %v3284_v0 = vsel %vm10479_vm2, %v9103_v50, 0  ;;  %v2908_v10 = vsel %vm8468_vm4, %v2900_v62, 0  ;;  %v7962_v62 = vld [vmem:[%s10405_s3 + $0x398] sm:$0xff]   ;;  %vm10483_vm2 = vcmp.ne.s16.totalorder %v8547_v28, 0 }
  0xd9   : > { %7425 = vmatpush3.bf16.msra.mxu1 %v7938_v21  ;;  %7402 = vmatprep.subr.bf16.mxu0 %v7939_v18  ;;  %v2906_v21 = vsel %vm8414_vm9, %v9064_v55, 0  ;;  %v3139_v55 = vsel %vm10481_vm1, %v3134_v8, %v3138_v14 }
  0xda   : > { %7426 = vmatprep.subr.bf16.mxu1 %v7940_v19  ;;  %7412 = vmatprep.mubr.bf16.mxu0 %v6367_v30  ;;  %v7955_v30 = vld [vmem:[%s10405_s3 + $0x3f0] sm:$0xff]  }
  0xdb   : > { %7436 = vmatprep.mubr.bf16.mxu1 %v3131_v42  ;;  %v6369_v42 = vcombine.low %v2905_v15, %v2906_v21  ;;  %v7960_v21 = vld [vmem:[%s10405_s3 + $0x3a0] sm:$0xff]  }
  0xdc   : > { %7403 = vmatpush3.bf16.msra.mxu0 %v7939_v18  ;;  %v3148_v18 = vshrl.u32 %v6398_v35, 16 }
  0xdd   : > { %7427 = vmatpush3.bf16.msra.mxu1 %v7940_v19  ;;  %7404 = vmatprep.subr.bf16.mxu0 %v7941_v20  ;;  %v3152_v19 = vshll.u32 %v6399_v2, 16  ;;  %v3466_v2 = vsel %vm8278_vm5, %v9093_v29, 0  ;;  %v7961_v29 = vld [vmem:[%s10405_s3 + $0x3e0] sm:$0xff]  }
  0xde   : > { %7428 = vmatprep.subr.bf16.mxu1 %v7942_v31  ;;  %v3150_v44 = vor.u32 %v3148_v18, %v3146_v26 }
  0xdf   : > { %v3154_v23 = vrot.slane %v3152_v19, 1  ;;  %v7965_v19 = vld [vmem:[%s10405_s3 + $0x3d0] sm:$0xff]  }
  0xe0   : > { %7405 = vmatpush3.bf16.msra.mxu0 %v7941_v20 }
  0xe1   : > { %7429 = vmatpush3.bf16.msra.mxu1 %v7942_v31  ;;  %7406 = vmatprep.subr.bf16.mxu0 %v7943_v27  ;;  %v6424_v31 = vcombine.low %v3282_v3, %v3283_v9  ;;  %v3155_v15 = vsel %vm10482_vm10, %v3150_v44, %v3154_v23  ;;  %v6453_v9 = vcombine.low %v3466_v2, %v3467_v12  ;;  %v3288_v23 = vsel %vm1011_vm0, %v9170_v5, 0 }
  0xe2   : > { %7430 = vmatprep.subr.bf16.mxu1 %v7944_v16  ;;  %v3468_v12 = vsel %vm8322_vm12, %v9107_v53, 0  ;;  %v7971_v53 = vld [vmem:[%s10405_s3 + $0x478] sm:$0xff]   ;;  %vm10487_vm10 = vcmp.ne.s16.totalorder %v8515_v47, 0 }
  0xe3   : > { %v3331_v8 = vrot.slane %v6424_v31, 1  ;;  %v3287_v31 = vsel %vm10484_vm7, %v9164_v32, 0  ;;  %vm10489_vm7 = vcmp.ne.s16.totalorder %v8526_v11, 0 }
  0xe4   : > { %7407 = vmatpush3.bf16.msra.mxu0 %v7943_v27  ;;  %v6425_v27 = vcombine.low %v3284_v0, %v3285_v40  ;;  %v7964_v40 = vld [vmem:[%s10405_s3 + $0x390] sm:$0xff]  }
  0xe5   : > { %7431 = vmatpush3.bf16.msra.mxu1 %v7944_v16  ;;  %7408 = vmatprep.subr.bf16.mxu0 %v7945_v63 }
  0xe6   : > { %7432 = vmatprep.subr.bf16.mxu1 %v7946_v41 }
  0xe8   : > { %7409 = vmatpush3.bf16.msra.mxu0 %v7945_v63  ;;  %v2907_v63 = vsel %vm8460_vm3, %v9067_v61, 0  ;;  %v7957_v61 = vld [vmem:[%s10405_s3 + $0x3e8] sm:$0xff]  }
  0xe9   : > { %7433 = vmatpush3.bf16.msra.mxu1 %v7946_v41  ;;  %7410 = vmatprep.subr.bf16.mxu0 %v7947_v37  ;;  %v3147_v41 = vsel %vm10481_vm1, %v3142_v1, %v3146_v26  ;;  %v6370_v7 = vcombine.low %v2907_v63, %v2908_v10  ;;  %v7963_v26 = vld [vmem:[%s10405_s3 + $0x3d8] sm:$0xff]   ;;  %vm10485_vm1 = vcmp.ne.s16.totalorder %v8571_v52, 0 }
  0xea   : > { %7434 = vmatprep.subr.bf16.mxu1 %v7948_v46 }
  0xec   : > { %7411 = vmatpush3.bf16.msra.mxu0 %v7947_v37 }
  0xed   : > { %7435 = vmatpush3.bf16.msra.mxu1 %v7948_v46  ;;  %7444 = vmatprep.subr.bf16.mxu0 %v7951_v54  ;;  %v7956_v46 = vld [vmem:[%s10405_s3 + $0x3a8] sm:$0xff]  }
  0xee   : > { %7468 = vmatprep.subr.bf16.mxu1 %v7952_v56 }
  0xef   : > { %v7126_v20 = vpop.f32.mrf.mxu0  ;;  %7413 = vmatmul.mubr.bf16.vlgmr.msra.gmra.mxu0 %v6368_v13 }
  0xf0   : > { %v7150_v16 = vpop.f32.mrf.mxu1  ;;  %7437 = vmatmul.mubr.bf16.vlgmr.msra.gmra.mxu1 %v3139_v55  ;;  %7445 = vmatpush3.bf16.msra.mxu0 %v7951_v54  ;;  %v9248_v54 = vrot.slane %v6425_v27, 1 }
  0xf1   : > { %v9238_v35 = vadd.f32 %v7150_v16, %v7126_v20  ;;  %7469 = vmatpush3.bf16.msra.mxu1 %v7952_v56  ;;  %v778_v37 = vpop.f32.mrf.mxu0  ;;  %7446 = vmatprep.subr.bf16.mxu0 %v7954_v24  ;;  %v3286_v20 = vsel %vm10483_vm2, %v9161_v49, 0  ;;  %vm10488_vm2 = vcmp.ne.s16.totalorder %v8522_v33, 0 }
  0xf2   : > { %v915_v45 = vpop.f32.mrf.mxu1  ;;  %7470 = vmatprep.subr.bf16.mxu1 %v7955_v30  ;;  %7416 = vmatprep.mubr.bf16.mxu0 %v6369_v42  ;;  %v3333_v50 = vsel %vm1063_vm13, %v3331_v8, %v9248_v54  ;;  %v3637_v8 = vld [vmem:[%s8882_s12 + $0xc] sm:$0xf] }
  0xf3   : > { %v9246_v51 = vadd.f32 %v915_v45, %v778_v37  ;;  %v7127_v25 = vpop.f32.mrf.mxu0  ;;  %7440 = vmatprep.mubr.bf16.mxu1 %v3147_v41  ;;  %v7966_v41 = vld [vmem:[%s10405_s3 + $0x388] sm:$0xff]   ;;  %v3289_v45 = vsel %vm1012_vm11, %v9175_v48, 0 }
  0xf4   : > { %v7151_v14 = vpop.f32.mrf.mxu1  ;;  %7447 = vmatpush3.bf16.msra.mxu0 %v7954_v24  ;;  %v7967_v37 = vld [vmem:[%s10405_s3 + $0x3c8] sm:$0xff]  }
  0xf5   : > { %v9256_v13 = vadd.f32 %v7151_v14, %v7127_v25  ;;  %7471 = vmatpush3.bf16.msra.mxu1 %v7955_v30  ;;  %v781_v56 = vpop.f32.mrf.mxu0  ;;  %7448 = vmatprep.subr.bf16.mxu0 %v7956_v46  ;;  %v7969_v14 = vld [vmem:[%s10405_s3 + $0x3c0] sm:$0xff]  }
  0xf6   : > { %v918_v24 = vpop.f32.mrf.mxu1  ;;  %7472 = vmatprep.subr.bf16.mxu1 %v7957_v61 }
  0xf7   : > { %v9265_v1 = vadd.f32 %v918_v24, %v781_v56  ;;  %7417 = vmatmul.mubr.bf16.gmra.mxu0 %v6370_v7  ;;  %v7130_v3 = vpop.f32.mrf.mxu0  ;;  %v7968_v7 = vld [vmem:[%s10405_s3 + $0x380] sm:$0xff]   ;;  %v3469_v56 = vsel %vm8330_vm14, %v9161_v49, 0  ;;  %v6427_v24 = vcombine.low %v3288_v23, %v3289_v45  ;;  %v3470_v49 = vsel %vm8409_vm8, %v9164_v32, 0 }
  0xf8   : > { %7449 = vmatpush3.bf16.msra.mxu0 %v7956_v46  ;;  %7441 = vmatmul.mubr.bf16.gmra.mxu1 %v3155_v15  ;;  %v6426_v46 = vcombine.low %v3286_v20, %v3287_v31  ;;  %v3290_v15 = vsel %vm10485_vm1, %v9193_v17, 0  ;;  %v3471_v17 = vsel %vm8414_vm9, %v9170_v5, 0  ;;  %v7972_v5 = vld [vmem:[%s10405_s3 + $0x430] sm:$0xff]   ;;  %vm10490_vm1 = vsmask.f32 7424 }
  0xf9   : > { %7473 = vmatpush3.bf16.msra.mxu1 %v7957_v61  ;;  %7450 = vmatprep.subr.bf16.mxu0 %v7960_v21  ;;  %v794_v55 = vpop.f32.mrf.mxu0  ;;  %v3636_v61 = vld [vmem:[%s8882_s12 + $0x8] sm:$0xf]  ;;  %v7973_v31 = vld [vmem:[%s10405_s3 + $0x470] sm:$0xff]  }
  0xfa   : > { %7474 = vmatprep.subr.bf16.mxu1 %v7961_v29  ;;  %7460 = vmatprep.mubr.bf16.mxu0 %v3333_v50  ;;  %v7154_v0 = vpop.f32.mrf.mxu1  ;;  %v3334_v2 = vrot.slane %v6426_v46, 1  ;;  %v6481_v50 = vcombine.low %v3636_v61, %v3637_v8 }
  0xfb   : > { %7484 = vmatprep.mubr.bf16.mxu1 %v6453_v9  ;;  %v9278_v18 = vadd.f32 %v7154_v0, %v7130_v3  ;;  %v7131_v42 = vpop.f32.mrf.mxu0  ;;  %v3639_v9 = vld [vmem:[%s8882_s12 + $0x14] sm:$0xf]  ;;  %v3336_v3 = vrot.slane %v6427_v24, 1 }
  0xfc   : > { %7451 = vmatpush3.bf16.msra.mxu0 %v7960_v21  ;;  %v931_v30 = vpop.f32.mrf.mxu1  ;;  %v7970_v21 = vld [vmem:[%s10405_s3 + $0x438] sm:$0xff]   ;;  %v3335_v32 = vsel %vm1063_vm13, %v9248_v54, %v3334_v2  ;;  %v3850_v54 = vsel %vm10489_vm7, %v3639_v9, 0  ;;  %vm10493_vm7 = vcmp.ne.s16.totalorder %v8571_v52, 0 }
  0xfd   : > { %7475 = vmatpush3.bf16.msra.mxu1 %v7961_v29  ;;  %7452 = vmatprep.subr.bf16.mxu0 %v7962_v62  ;;  %v9289_v27 = vadd.f32 %v931_v30, %v794_v55  ;;  %v797_v63 = vpop.f32.mrf.mxu0  ;;  %v3638_v29 = vld [vmem:[%s8882_s12 + $0x10] sm:$0xf]  ;;  %v6454_v55 = vcombine.low %v3468_v12, %v3469_v56  ;;  %v3337_v46 = vsel %vm1063_vm13, %v3334_v2, %v3336_v3  ;;  %v7974_v12 = vld [vmem:[%s10405_s3 + $0x428] sm:$0xff]  }
  0xfe   : > { %7476 = vmatprep.subr.bf16.mxu1 %v7963_v26  ;;  %v7155_v16 = vpop.f32.mrf.mxu1  ;;  %v9340_v0 = vcombine.low %v3638_v29, %v3639_v9  ;;  %v3849_v20 = vsel %vm10488_vm2, %v3638_v29, 0  ;;  %vm10492_vm2 = vcmp.ne.s16.totalorder %v8551_v39, 0 }
  0xff   : > { %v9292_v10 = vadd.f32 %v7155_v16, %v7131_v42  ;;  %v3848_v42 = vsel %vm10487_vm10, %v3637_v8, 0  ;;  %vm10491_vm10 = vcmp.ne.s16.totalorder %v8547_v28, 0 }
 0x100   : > { %7453 = vmatpush3.bf16.msra.mxu0 %v7962_v62  ;;  %v934_v44 = vpop.f32.mrf.mxu1  ;;  %v6428_v62 = vcombine.low %v3290_v15, %v3290_v15  ;;  %v3693_v45 = vshll.u32 %v9340_v0, 16 }
 0x101   : > { %7477 = vmatpush3.bf16.msra.mxu1 %v7963_v26  ;;  %7454 = vmatprep.subr.bf16.mxu0 %v7964_v40  ;;  %v9307_v25 = vadd.f32 %v934_v44, %v797_v63  ;;  %v3846_v26 = vld [vmem:[%s8882_s12 + $0x8] sm:$0xe]  ;;  %v6455_v63 = vcombine.low %v3470_v49, %v3471_v17  ;;  %v3686_v44 = vshrl.u32 %v6481_v50, 16 }
 0x102   : > { %7478 = vmatprep.subr.bf16.mxu1 %v7965_v19  ;;  %v3847_v30 = vsel %vm8493_vm15, %v3846_v26, 0  ;;  %v3338_v16 = vrot.slane %v6428_v62, 1  ;;  %v9389_v9 = vrot.slane %v3693_v45, 1 }
 0x103   : > { %v6510_v8 = vcombine.low %v3847_v30, %v3848_v42  ;;  %v3641_v30 = vld [vmem:[%s8882_s12 + $0x1c] sm:$0xf] }
 0x104   : > { %7455 = vmatpush3.bf16.msra.mxu0 %v7964_v40  ;;  %v3688_v40 = vshll.u32 %v6481_v50, 16  ;;  %v3339_v29 = vsel %vm1063_vm13, %v3336_v3, %v3338_v16 }
 0x105   : > { %7479 = vmatpush3.bf16.msra.mxu1 %v7965_v19  ;;  %7456 = vmatprep.subr.bf16.mxu0 %v7966_v41  ;;  %v3465_v19 = vld [vmem:[%s8882_s12 + $0x24] sm:$0xf]  ;;  %v3896_v62 = vrot.slane %v6510_v8, 1  ;;  %v7981_v8 = vld [vmem:[%s10405_s3 + $0x450] sm:$0xff]  }
 0x106   : > { %7480 = vmatprep.subr.bf16.mxu1 %v7967_v37  ;;  %v3690_v23 = vrot.slane %v3688_v40, 1  ;;  %v7976_v40 = vld [vmem:[%s10405_s3 + $0x420] sm:$0xff]  }
 0x108   : > { %7457 = vmatpush3.bf16.msra.mxu0 %v7966_v41  ;;  %v3472_v41 = vsel %vm8460_vm3, %v9175_v48, 0  ;;  %v3473_v48 = vsel %vm8468_vm4, %v3465_v19, 0 }
 0x109   : > { %7481 = vmatpush3.bf16.msra.mxu1 %v7967_v37  ;;  %7458 = vmatprep.subr.bf16.mxu0 %v7968_v7  ;;  %v6456_v50 = vcombine.low %v3472_v41, %v3473_v48  ;;  %v7978_v41 = vld [vmem:[%s10405_s3 + $0x418] sm:$0xff]  }
 0x10a   : > { %7482 = vmatprep.subr.bf16.mxu1 %v7969_v14 }
 0x10c   : > { %7459 = vmatpush3.bf16.msra.mxu0 %v7968_v7 }
 0x10d   : > { %7483 = vmatpush3.bf16.msra.mxu1 %v7969_v14  ;;  %7492 = vmatprep.subr.bf16.mxu0 %v7970_v21  ;;  %v6511_v14 = vcombine.low %v3849_v20, %v3850_v54 }
 0x10e   : > { %7516 = vmatprep.subr.bf16.mxu1 %v7971_v53 }
 0x10f   : > { %v7174_v37 = vpop.f32.mrf.mxu0  ;;  %7461 = vmatmul.mubr.bf16.vlgmr.msra.gmra.mxu0 %v3335_v32  ;;  %v9395_v26 = vrot.slane %v6511_v14, 1  ;;  %v3640_v32 = vld [vmem:[%s8882_s12 + $0x18] sm:$0xf] }
 0x110   : > { %v1192_v61 = vadd.f32 %v7174_v37, %v9238_v35  ;;  %7485 = vmatmul.mubr.bf16.vlgmr.msra.gmra.mxu1 %v6454_v55  ;;  %7493 = vmatpush3.bf16.msra.mxu0 %v7970_v21  ;;  %v7198_v7 = vpop.f32.mrf.mxu1  ;;  %v7975_v21 = vld [vmem:[%s10405_s3 + $0x468] sm:$0xff]   ;;  %v9421_v37 = vcombine.low %v3640_v32, %v3641_v30 }
 0x111   : > { %7517 = vmatpush3.bf16.msra.mxu1 %v7971_v53  ;;  %v1159_v2 = vpop.f32.mrf.mxu0  ;;  %7494 = vmatprep.subr.bf16.mxu0 %v7972_v5  ;;  %v3691_v53 = vor.u32 %v3690_v23, %v3686_v44  ;;  %v7979_v23 = vld [vmem:[%s10405_s3 + $0x458] sm:$0xff]  }
 0x112   : > { %v1190_v56 = vadd.f32 %v1159_v2, %v9246_v51  ;;  %v9383_v15 = vadd.f32 %v7198_v7, %v1192_v61  ;;  %v1330_v35 = vpop.f32.mrf.mxu1  ;;  %7518 = vmatprep.subr.bf16.mxu1 %v7973_v31  ;;  %7464 = vmatprep.mubr.bf16.mxu0 %v3337_v46  ;;  %v7980_v61 = vld [vmem:[%s10405_s3 + $0x410] sm:$0xff]   ;;  %v3697_v2 = vshrl.u32 %v9340_v0, 16  ;;  %v7982_v0 = vld [vmem:[%s10405_s3 + $0x408] sm:$0xff]  }
 0x113   : > { %v7175_v24 = vpop.f32.mrf.mxu0  ;;  %7488 = vmatprep.mubr.bf16.mxu1 %v6455_v63  ;;  %v3696_v20 = vsel %vm10490_vm1, %v3691_v53, %v9389_v9 }
 0x114   : > { %v1193_v51 = vadd.f32 %v7175_v24, %v9256_v13  ;;  %v9393_v49 = vadd.f32 %v1330_v35, %v1190_v56  ;;  %7495 = vmatpush3.bf16.msra.mxu0 %v7972_v5  ;;  %v7199_v17 = vpop.f32.mrf.mxu1  ;;  %v7977_v13 = vld [vmem:[%s10405_s3 + $0x460] sm:$0xff]   ;;  %v3852_v24 = vsel %vm10492_vm2, %v3641_v30, 0  ;;  %vm10495_vm2 = vmmov %vm10490_vm1 }
 0x115   : > { %7519 = vmatpush3.bf16.msra.mxu1 %v7973_v31  ;;  %v1162_v3 = vpop.f32.mrf.mxu0  ;;  %7496 = vmatprep.subr.bf16.mxu0 %v7974_v12 }
 0x116   : > { %v1191_v55 = vadd.f32 %v1162_v3, %v9265_v1  ;;  %v9405_v5 = vadd.f32 %v7199_v17, %v1193_v51  ;;  %v1333_v19 = vpop.f32.mrf.mxu1  ;;  %7520 = vmatprep.subr.bf16.mxu1 %v7975_v21  ;;  %v3898_v1 = vsel %vm1063_vm13, %v3896_v62, %v9395_v26  ;;  %v3644_v51 = vld [vmem:[%s8882_s12 + $0x28] sm:$0x1]  ;;  %v7984_v3 = vld [vmem:[%s10405_s3 + $0x400] sm:$0xff]  }
 0x117   : > { %v7178_v42 = vpop.f32.mrf.mxu0  ;;  %7465 = vmatmul.mubr.bf16.gmra.mxu0 %v3339_v29  ;;  %v3642_v29 = vld [vmem:[%s8882_s12 + $0x20] sm:$0xf]  ;;  %v6485_v30 = vcombine.low %v3644_v51, %v3644_v51 }
 0x118   : > { %v1196_v54 = vadd.f32 %v7178_v42, %v9278_v18  ;;  %v9414_v31 = vadd.f32 %v1333_v19, %v1191_v55  ;;  %7497 = vmatpush3.bf16.msra.mxu0 %v7974_v12  ;;  %v7202_v16 = vpop.f32.mrf.mxu1  ;;  %7489 = vmatmul.mubr.bf16.gmra.mxu1 %v6456_v50  ;;  %v3701_v12 = vshll.u32 %v9421_v37, 16  ;;  %v3643_v50 = vld [vmem:[%s8882_s12 + $0x24] sm:$0xf]  ;;  %v3853_v17 = vsel %vm1011_vm0, %v3642_v29, 0 }
 0x119   : > { %7521 = vmatpush3.bf16.msra.mxu1 %v7975_v21  ;;  %v1175_v63 = vpop.f32.mrf.mxu0  ;;  %7498 = vmatprep.subr.bf16.mxu0 %v7976_v40  ;;  %v3851_v21 = vsel %vm10491_vm10, %v3640_v32, 0  ;;  %v3854_v62 = vsel %vm1012_vm11, %v3643_v50, 0  ;;  %v4208_v32 = vld [vmem:[%s9468_s17] sm:$0xf]  ;;  %v9475_v55 = vld [vmem:[%s9468_s17 + $0x4] sm:$0xf]  ;;  %vm10494_vm10 = vmmov %vm10490_vm1 }
 0x11a   : > { %v1194_v18 = vadd.f32 %v1175_v63, %v9289_v27  ;;  %v9424_v46 = vadd.f32 %v7202_v16, %v1196_v54  ;;  %v1346_v44 = vpop.f32.mrf.mxu1  ;;  %7522 = vmatprep.subr.bf16.mxu1 %v7977_v13  ;;  %7508 = vmatprep.mubr.bf16.mxu0 %v3696_v20  ;;  %v7985_v19 = vld [vmem:[%s10405_s3 + $0x440] sm:$0xff]   ;;  %v3703_v42 = vrot.slane %v3701_v12, 1  ;;  %v3705_v20 = vshrl.u32 %v9421_v37, 16  ;;  %v7990_v37 = vld [vmem:[%s10405_s3 + $0x4f8] sm:$0xff]  }
 0x11b   : > { %v7179_v45 = vpop.f32.mrf.mxu0  ;;  %7532 = vmatprep.mubr.bf16.mxu1 %v3898_v1  ;;  %v6513_v16 = vcombine.low %v3853_v17, %v3854_v62  ;;  %v3699_v1 = vor.u32 %v3697_v2, %v9389_v9  ;;  %v6567_v63 = vcombine.low %v4208_v32, %v9475_v55  ;;  %v3717_v9 = vshll.u32 %v6485_v30, 16  ;;  %v7995_v30 = vld [vmem:[%s10405_s3 + $0x4a8] sm:$0xff]  }
 0x11c   : > { %v1197_v7 = vadd.f32 %v7179_v45, %v9292_v10  ;;  %v9434_v27 = vadd.f32 %v1346_v44, %v1194_v18  ;;  %7499 = vmatpush3.bf16.msra.mxu0 %v7976_v40  ;;  %v7203_v48 = vpop.f32.mrf.mxu1  ;;  %v6484_v40 = vcombine.low %v3642_v29, %v3643_v50  ;;  %v9487_v44 = vld [vmem:[%s9468_s17 + $0x8] sm:$0xf] }
 0x11d   : > { %7523 = vmatpush3.bf16.msra.mxu1 %v7977_v13  ;;  %v1178_v14 = vpop.f32.mrf.mxu0  ;;  %7500 = vmatprep.subr.bf16.mxu0 %v7978_v41  ;;  %v6512_v13 = vcombine.low %v3851_v21, %v3852_v24  ;;  %v4260_v12 = vshll.u32 %v6567_v63, 16  ;;  %v7992_v24 = vld [vmem:[%s10405_s3 + $0x4f0] sm:$0xff]  }
 0x11e   : > { %v1195_v10 = vadd.f32 %v1178_v14, %v9307_v25  ;;  %v9442_v56 = vadd.f32 %v7203_v48, %v1197_v7  ;;  %v1349_v35 = vpop.f32.mrf.mxu1  ;;  %7524 = vmatprep.subr.bf16.mxu1 %v7979_v23  ;;  %v7983_v25 = vld [vmem:[%s10405_s3 + $0x448] sm:$0xff]   ;;  %v3709_v54 = vshll.u32 %v6484_v40, 16  ;;  %v3713_v45 = vshrl.u32 %v6484_v40, 16 }
 0x11f   : > { %v3899_v18 = vrot.slane %v6512_v13, 1  ;;  %v3707_v7 = vor.u32 %v3705_v20, %v3703_v42  ;;  %v3704_v14 = vsel %vm10490_vm1, %v3699_v1, %v3703_v42  ;;  %v4258_v40 = vshrl.u32 %v6567_v63, 16 }
 0x120   : > { %v9453_v53 = vadd.f32 %v1349_v35, %v1195_v10  ;;  %7501 = vmatpush3.bf16.msra.mxu0 %v7978_v41  ;;  %v7989_v41 = vld [vmem:[%s10405_s3 + $0x4b8] sm:$0xff]   ;;  %v3711_v48 = vrot.slane %v3709_v54, 1  ;;  %v7991_v35 = vld [vmem:[%s10405_s3 + $0x4b0] sm:$0xff]   ;;  %v4262_v13 = vrot.slane %v4260_v12, 1 }
 0x121   : > { %7525 = vmatpush3.bf16.msra.mxu1 %v7979_v23  ;;  %7502 = vmatprep.subr.bf16.mxu0 %v7980_v61  ;;  %v9490_v23 = vld [vmem:[%s9468_s17 + $0xc] sm:$0xf]  ;;  %v3900_v10 = vsel %vm1063_vm13, %v9395_v26, %v3899_v18  ;;  %v4030_v26 = vld [vmem:[%s9468_s17] sm:$0xf] }
 0x122   : > { %7526 = vmatprep.subr.bf16.mxu1 %v7981_v8  ;;  %v9500_v2 = vcombine.low %v9487_v44, %v9490_v23  ;;  %v3715_v50 = vor.u32 %v3713_v45, %v3711_v48 }
 0x124   : > { %7503 = vmatpush3.bf16.msra.mxu0 %v7980_v61  ;;  %v3855_v61 = vsel %vm10493_vm7, %v3644_v51, 0  ;;  %v4265_v32 = vshll.u32 %v9500_v2, 16  ;;  %vm10496_vm7 = vmmov %vm10490_vm1  ;;  %vm10497_vm1 = vcmp.ne.s16.totalorder %v8515_v47, 0 }
 0x125   : > { %7527 = vmatpush3.bf16.msra.mxu1 %v7981_v8  ;;  %7504 = vmatprep.subr.bf16.mxu0 %v7982_v0  ;;  %v3901_v8 = vrot.slane %v6513_v16, 1  ;;  %v6514_v21 = vcombine.low %v3855_v61, %v3855_v61  ;;  %v7996_v16 = vld [vmem:[%s10405_s3 + $0x4e8] sm:$0xff]  }
 0x126   : > { %7528 = vmatprep.subr.bf16.mxu1 %v7983_v25  ;;  %v9533_v61 = vrot.slane %v4265_v32, 1  ;;  %v8001_v32 = vld [vmem:[%s10405_s3 + $0x490] sm:$0xff]  }
 0x127   : > { %v3902_v51 = vsel %vm1063_vm13, %v3899_v18, %v3901_v8  ;;  %v3903_v42 = vrot.slane %v6514_v21, 1 }
 0x128   : > { %7505 = vmatpush3.bf16.msra.mxu0 %v7982_v0  ;;  %v3712_v0 = vsel %vm10494_vm10, %v3707_v7, %v3711_v48  ;;  %vm10498_vm10 = vcmp.ne.s16.totalorder %v8522_v33, 0 }
 0x129   : > { %7529 = vmatpush3.bf16.msra.mxu1 %v7983_v25  ;;  %7506 = vmatprep.subr.bf16.mxu0 %v7984_v3  ;;  %v3719_v25 = vrot.slane %v3717_v9, 1  ;;  %v4263_v9 = vor.u32 %v4262_v13, %v4258_v40  ;;  %v3904_v48 = vsel %vm1063_vm13, %v3901_v8, %v3903_v42 }
 0x12a   : > { %7530 = vmatprep.subr.bf16.mxu1 %v7985_v19 }
 0x12b   : > { %v3720_v63 = vsel %vm10495_vm2, %v3715_v50, %v3719_v25  ;;  %v7999_v25 = vld [vmem:[%s10405_s3 + $0x498] sm:$0xff]   ;;  %vm10499_vm2 = vcmp.ne.s16.totalorder %v8526_v11, 0 }
 0x12c   : > { %7507 = vmatpush3.bf16.msra.mxu0 %v7984_v3  ;;  %v4031_v3 = vld [vmem:[%s9468_s17 + $0x4] sm:$0xf] }
 0x12d   : > { %7531 = vmatpush3.bf16.msra.mxu1 %v7985_v19  ;;  %7540 = vmatprep.subr.bf16.mxu0 %v7989_v41  ;;  %v4039_v18 = vsel %vm8286_vm6, %v4031_v3, 0 }
 0x12e   : > { %7564 = vmatprep.subr.bf16.mxu1 %v7990_v37 }
 0x12f   : > { %v7222_v29 = vpop.f32.mrf.mxu0  ;;  %7509 = vmatmul.mubr.bf16.vlgmr.msra.gmra.mxu0 %v3704_v14  ;;  %v7997_v14 = vld [vmem:[%s10405_s3 + $0x4a0] sm:$0xff]  }
 0x130   : > { %v1573_v17 = vadd.f32 %v7222_v29, %v9383_v15  ;;  %7533 = vmatmul.mubr.bf16.vlgmr.msra.gmra.mxu1 %v3900_v10  ;;  %7541 = vmatpush3.bf16.msra.mxu0 %v7989_v41  ;;  %v7246_v62 = vpop.f32.mrf.mxu1  ;;  %v4038_v41 = vsel %vm8278_vm5, %v4030_v26, 0 }
 0x131   : > { %7565 = vmatpush3.bf16.msra.mxu1 %v7990_v37  ;;  %v1540_v19 = vpop.f32.mrf.mxu0  ;;  %7542 = vmatprep.subr.bf16.mxu0 %v7991_v35  ;;  %v6539_v21 = vcombine.low %v4038_v41, %v4039_v18  ;;  %v9588_v41 = vld [vmem:[%s9468_s17 + $0x1c] sm:$0xf]  ;;  %v8004_v18 = vld [vmem:[%s10405_s3 + $0x4c8] sm:$0xff]  }
 0x132   : > { %v1571_v20 = vadd.f32 %v1540_v19, %v9393_v49  ;;  %v9520_v54 = vadd.f32 %v7246_v62, %v1573_v17  ;;  %v1724_v15 = vpop.f32.mrf.mxu1  ;;  %7566 = vmatprep.subr.bf16.mxu1 %v7992_v24  ;;  %7512 = vmatprep.mubr.bf16.mxu0 %v3712_v0  ;;  %v8000_v17 = vld [vmem:[%s10405_s3 + $0x4d8] sm:$0xff]  }
 0x133   : > { %v7223_v1 = vpop.f32.mrf.mxu0  ;;  %7536 = vmatprep.mubr.bf16.mxu1 %v3902_v51 }
 0x134   : > { %v1574_v49 = vadd.f32 %v7223_v1, %v9405_v5  ;;  %v9531_v37 = vadd.f32 %v1724_v15, %v1571_v20  ;;  %7543 = vmatpush3.bf16.msra.mxu0 %v7991_v35  ;;  %v7247_v45 = vpop.f32.mrf.mxu1  ;;  %v7998_v35 = vld [vmem:[%s10405_s3 + $0x4e0] sm:$0xff]   ;;  %v9572_v20 = vld [vmem:[%s9468_s17 + $0x10] sm:$0xf]  ;;  %v9575_v15 = vld [vmem:[%s9468_s17 + $0x14] sm:$0xf] }
 0x135   : > { %7567 = vmatpush3.bf16.msra.mxu1 %v7992_v24  ;;  %v1543_v7 = vpop.f32.mrf.mxu0  ;;  %7544 = vmatprep.subr.bf16.mxu0 %v7995_v30  ;;  %v6569_v1 = vcombine.low %v9572_v20, %v9575_v15 }
 0x136   : > { %v1572_v12 = vadd.f32 %v1543_v7, %v9414_v31  ;;  %v9540_v10 = vadd.f32 %v7247_v45, %v1574_v49  ;;  %v1727_v5 = vpop.f32.mrf.mxu1  ;;  %7568 = vmatprep.subr.bf16.mxu1 %v7996_v16  ;;  %v4268_v31 = vsel %vm10496_vm7, %v4263_v9, %v9533_v61  ;;  %v4032_v49 = vld [vmem:[%s9468_s17 + $0x8] sm:$0xf]  ;;  %v4033_v45 = vld [vmem:[%s9468_s17 + $0xc] sm:$0xf]  ;;  %v8005_v7 = vld [vmem:[%s10405_s3 + $0x480] sm:$0xff]  }
 0x137   : > { %v7226_v24 = vpop.f32.mrf.mxu0  ;;  %7513 = vmatmul.mubr.bf16.gmra.mxu0 %v3720_v63  ;;  %v9585_v63 = vld [vmem:[%s9468_s17 + $0x18] sm:$0xf] }
 0x138   : > { %v1577_v29 = vadd.f32 %v7226_v24, %v9424_v46  ;;  %v9546_v8 = vadd.f32 %v1727_v5, %v1572_v12  ;;  %7545 = vmatpush3.bf16.msra.mxu0 %v7995_v30  ;;  %v7250_v0 = vpop.f32.mrf.mxu1  ;;  %7537 = vmatmul.mubr.bf16.gmra.mxu1 %v3904_v48  ;;  %v6570_v9 = vcombine.low %v9585_v63, %v9588_v41  ;;  %v4269_v48 = vshrl.u32 %v9500_v2, 16  ;;  %v8006_v12 = vld [vmem:[%s10405_s3 + $0x4c0] sm:$0xff]  }
 0x139   : > { %7569 = vmatpush3.bf16.msra.mxu1 %v7996_v16  ;;  %v1556_v50 = vpop.f32.mrf.mxu0  ;;  %7546 = vmatprep.subr.bf16.mxu0 %v7997_v14  ;;  %v9605_v5 = vld [vmem:[%s9468_s17 + $0x20] sm:$0x1]  ;;  %v4277_v24 = vshrl.u32 %v6569_v1, 16 }
 0x13a   : > { %v1575_v51 = vadd.f32 %v1556_v50, %v9434_v27  ;;  %v9554_v26 = vadd.f32 %v7250_v0, %v1577_v29  ;;  %v1740_v46 = vpop.f32.mrf.mxu1  ;;  %7570 = vmatprep.subr.bf16.mxu1 %v7998_v35  ;;  %7556 = vmatprep.mubr.bf16.mxu0 %v6539_v21  ;;  %v4041_v21 = vsel %vm8330_vm14, %v4033_v45, 0  ;;  %v4034_v29 = vld [vmem:[%s9468_s17 + $0x10] sm:$0xf]  ;;  %v4035_v0 = vld [vmem:[%s9468_s17 + $0x14] sm:$0xf]  ;;  %v4281_v2 = vshll.u32 %v6570_v9, 16 }
 0x13b   : > { %v7227_v62 = vpop.f32.mrf.mxu0  ;;  %7580 = vmatprep.mubr.bf16.mxu1 %v4268_v31  ;;  %v4271_v31 = vor.u32 %v4269_v48, %v9533_v61  ;;  %v8009_v50 = vld [vmem:[%s10405_s3 + $0x538] sm:$0xff]   ;;  %v4042_v61 = vsel %vm8409_vm8, %v4034_v29, 0  ;;  %v4285_v45 = vshrl.u32 %v6570_v9, 16  ;;  %v8013_v48 = vld [vmem:[%s10405_s3 + $0x570] sm:$0xff]  }
 0x13c   : > { %v1578_v3 = vadd.f32 %v7227_v62, %v9442_v56  ;;  %v9560_v40 = vadd.f32 %v1740_v46, %v1575_v51  ;;  %7547 = vmatpush3.bf16.msra.mxu0 %v7997_v14  ;;  %v7251_v13 = vpop.f32.mrf.mxu1  ;;  %v8002_v56 = vld [vmem:[%s10405_s3 + $0x4d0] sm:$0xff]   ;;  %v4273_v14 = vshll.u32 %v6569_v1, 16  ;;  %v6571_v51 = vcombine.low %v9605_v5, %v9605_v5  ;;  %v4418_v46 = vld [vmem:[%s9468_s17] sm:$0xe]  ;;  %v8010_v62 = vld [vmem:[%s10405_s3 + $0x578] sm:$0xff]  }
 0x13d   : > { %7571 = vmatpush3.bf16.msra.mxu1 %v7998_v35  ;;  %v1559_v27 = vpop.f32.mrf.mxu0  ;;  %7548 = vmatprep.subr.bf16.mxu0 %v7999_v25  ;;  %v4040_v35 = vsel %vm8322_vm12, %v4032_v49, 0  ;;  %v4037_v49 = vld [vmem:[%s9468_s17 + $0x1c] sm:$0xf] }
 0x13e   : > { %v1576_v19 = vadd.f32 %v1559_v27, %v9453_v53  ;;  %v9566_v30 = vadd.f32 %v7251_v13, %v1578_v3  ;;  %v1743_v42 = vpop.f32.mrf.mxu1  ;;  %7572 = vmatprep.subr.bf16.mxu1 %v8000_v17  ;;  %v8003_v53 = vld [vmem:[%s10405_s3 + $0x488] sm:$0xff]   ;;  %v4043_v3 = vsel %vm8414_vm9, %v4035_v0, 0  ;;  %v4420_v27 = vsel %vm10497_vm1, %v9475_v55, 0  ;;  %vm10500_vm1 = vmmov %vm10496_vm7 }
 0x13f   : > { %v4045_v9 = vsel %vm8468_vm4, %v4037_v49, 0 }
 0x140   : > { %v9577_v16 = vadd.f32 %v1743_v42, %v1576_v19  ;;  %7549 = vmatpush3.bf16.msra.mxu0 %v7999_v25  ;;  %v4275_v25 = vrot.slane %v4273_v14, 1  ;;  %v4283_v19 = vrot.slane %v4281_v2, 1  ;;  %v4419_v42 = vsel %vm8493_vm15, %v4418_v46, 0 }
 0x141   : > { %7573 = vmatpush3.bf16.msra.mxu1 %v8000_v17  ;;  %7550 = vmatprep.subr.bf16.mxu0 %v8001_v32  ;;  %v6540_v17 = vcombine.low %v4040_v35, %v4041_v21  ;;  %v6541_v14 = vcombine.low %v4042_v61, %v4043_v3  ;;  %v6596_v21 = vcombine.low %v4419_v42, %v4420_v27  ;;  %v8015_v61 = vld [vmem:[%s10405_s3 + $0x568] sm:$0xff]  }
 0x142   : > { %7574 = vmatprep.subr.bf16.mxu1 %v8002_v56  ;;  %v4279_v13 = vor.u32 %v4277_v24, %v4275_v25  ;;  %v4276_v1 = vsel %vm10496_vm7, %v4271_v31, %v4275_v25  ;;  %v8014_v25 = vld [vmem:[%s10405_s3 + $0x528] sm:$0xff]   ;;  %vm10503_vm7 = vcmp.ne.s16.totalorder %v8551_v39, 0 }
 0x144   : > { %7551 = vmatpush3.bf16.msra.mxu0 %v8001_v32  ;;  %v8012_v32 = vld [vmem:[%s10405_s3 + $0x530] sm:$0xff]   ;;  %v4284_v2 = vsel %vm10500_vm1, %v4279_v13, %v4283_v19  ;;  %v4468_v13 = vrot.slane %v6596_v21, 1 }
 0x145   : > { %7575 = vmatpush3.bf16.msra.mxu1 %v8002_v56  ;;  %7552 = vmatprep.subr.bf16.mxu0 %v8003_v53  ;;  %v4421_v56 = vsel %vm10498_vm10, %v9487_v44, 0  ;;  %vm10501_vm10 = vmmov %vm10500_vm1  ;;  %vm10504_vm1 = vcmp.ne.s16.totalorder %v8571_v52, 0 }
 0x146   : > { %7576 = vmatprep.subr.bf16.mxu1 %v8004_v18 }
 0x148   : > { %7553 = vmatpush3.bf16.msra.mxu0 %v8003_v53  ;;  %v4422_v53 = vsel %vm10499_vm2, %v9490_v23, 0  ;;  %vm10502_vm2 = vcmp.ne.s16.totalorder %v8547_v28, 0 }
 0x149   : > { %7577 = vmatpush3.bf16.msra.mxu1 %v8004_v18  ;;  %7554 = vmatprep.subr.bf16.mxu0 %v8005_v7  ;;  %v4036_v18 = vld [vmem:[%s9468_s17 + $0x18] sm:$0xf]  ;;  %v6597_v24 = vcombine.low %v4421_v56, %v4422_v53  ;;  %v4603_v56 = vsel %vm8278_vm5, %v9475_v55, 0  ;;  %v4604_v53 = vsel %vm8286_vm6, %v9487_v44, 0  ;;  %v8019_v55 = vld [vmem:[%s10405_s3 + $0x560] sm:$0xff]  }
 0x14a   : > { %7578 = vmatprep.subr.bf16.mxu1 %v8006_v12  ;;  %v4044_v0 = vsel %vm8460_vm3, %v4036_v18, 0 }
 0x14b   : > { %v6542_v3 = vcombine.low %v4044_v0, %v4045_v9  ;;  %v9662_v27 = vrot.slane %v6597_v24, 1  ;;  %v8020_v24 = vld [vmem:[%s10405_s3 + $0x518] sm:$0xff]  }
 0x14c   : > { %7555 = vmatpush3.bf16.msra.mxu0 %v8005_v7  ;;  %v4289_v7 = vshll.u32 %v6571_v51, 16  ;;  %v4287_v51 = vor.u32 %v4285_v45, %v4283_v19 }
 0x14d   : > { %7579 = vmatpush3.bf16.msra.mxu1 %v8006_v12  ;;  %7588 = vmatprep.subr.bf16.mxu0 %v8009_v50 }
 0x14e   : > { %7612 = vmatprep.subr.bf16.mxu1 %v8010_v62 }
 0x14f   : > { %v7270_v35 = vpop.f32.mrf.mxu0  ;;  %7557 = vmatmul.mubr.bf16.vlgmr.msra.gmra.mxu0 %v6540_v17 }
 0x150   : > { %v1928_v29 = vadd.f32 %v7270_v35, %v9520_v54  ;;  %7581 = vmatmul.mubr.bf16.vlgmr.msra.gmra.mxu1 %v4276_v1  ;;  %7589 = vmatpush3.bf16.msra.mxu0 %v8009_v50  ;;  %v7294_v12 = vpop.f32.mrf.mxu1  ;;  %v4291_v54 = vrot.slane %v4289_v7, 1  ;;  %v4470_v7 = vsel %vm1063_vm13, %v4468_v13, %v9662_v27  ;;  %v8025_v13 = vld [vmem:[%s10405_s3 + $0x548] sm:$0xff]  }
 0x151   : > { %7613 = vmatpush3.bf16.msra.mxu1 %v8010_v62  ;;  %v1895_v31 = vpop.f32.mrf.mxu0  ;;  %7590 = vmatprep.subr.bf16.mxu0 %v8012_v32 }
 0x152   : > { %v1926_v50 = vadd.f32 %v1895_v31, %v9531_v37  ;;  %v9657_v46 = vadd.f32 %v7294_v12, %v1928_v29  ;;  %v2105_v17 = vpop.f32.mrf.mxu1  ;;  %7614 = vmatprep.subr.bf16.mxu1 %v8013_v48  ;;  %7560 = vmatprep.mubr.bf16.mxu0 %v6541_v14  ;;  %v4292_v18 = vsel %vm10501_vm10, %v4287_v51, %v4291_v54  ;;  %vm10505_vm10 = vcmp.ne.s16.totalorder %v8515_v47, 0 }
 0x153   : > { %v7271_v62 = vpop.f32.mrf.mxu0  ;;  %7584 = vmatprep.mubr.bf16.mxu1 %v4284_v2 }
 0x154   : > { %v1929_v19 = vadd.f32 %v7271_v62, %v9540_v10  ;;  %v9665_v42 = vadd.f32 %v2105_v17, %v1926_v50  ;;  %7591 = vmatpush3.bf16.msra.mxu0 %v8012_v32  ;;  %v7295_v37 = vpop.f32.mrf.mxu1  ;;  %v8018_v10 = vld [vmem:[%s10405_s3 + $0x520] sm:$0xff]   ;;  %v8024_v62 = vld [vmem:[%s10405_s3 + $0x508] sm:$0xff]  }
 0x155   : > { %7615 = vmatpush3.bf16.msra.mxu1 %v8013_v48  ;;  %v1898_v1 = vpop.f32.mrf.mxu0  ;;  %7592 = vmatprep.subr.bf16.mxu0 %v8014_v25  ;;  %v6625_v48 = vcombine.low %v4603_v56, %v4604_v53  ;;  %v4426_v56 = vsel %vm1012_vm11, %v9588_v41, 0  ;;  %v4773_v53 = vld [vmem:[%s9468_s17 + $0x4] sm:$0xf] }
 0x156   : > { %v1927_v32 = vadd.f32 %v1898_v1, %v9546_v8  ;;  %v9678_v49 = vadd.f32 %v7295_v37, %v1929_v19  ;;  %v2108_v45 = vpop.f32.mrf.mxu1  ;;  %7616 = vmatprep.subr.bf16.mxu1 %v8015_v61  ;;  %v4425_v37 = vsel %vm1011_vm0, %v9585_v63, 0  ;;  %v9731_v1 = vld [vmem:[%s9468_s17 + $0x8] sm:$0xf] }
 0x157   : > { %v7274_v44 = vpop.f32.mrf.mxu0  ;;  %7561 = vmatmul.mubr.bf16.gmra.mxu0 %v6542_v3  ;;  %v4424_v3 = vsel %vm10503_vm7, %v9575_v15, 0  ;;  %vm10507_vm7 = vcmp.ne.s16.totalorder %v8526_v11, 0 }
 0x158   : > { %v1932_v14 = vadd.f32 %v7274_v44, %v9554_v26  ;;  %v9686_v35 = vadd.f32 %v2108_v45, %v1927_v32  ;;  %7593 = vmatpush3.bf16.msra.mxu0 %v8014_v25  ;;  %v7298_v8 = vpop.f32.mrf.mxu1  ;;  %7585 = vmatmul.mubr.bf16.gmra.mxu1 %v4292_v18  ;;  %v8021_v26 = vld [vmem:[%s10405_s3 + $0x558] sm:$0xff]   ;;  %v8026_v18 = vld [vmem:[%s10405_s3 + $0x500] sm:$0xff]   ;;  %v6599_v32 = vcombine.low %v4425_v37, %v4426_v56  ;;  %v4427_v45 = vsel %vm10504_vm1, %v9605_v5, 0 }
 0x159   : > { %7617 = vmatpush3.bf16.msra.mxu1 %v8015_v61  ;;  %v1911_v21 = vpop.f32.mrf.mxu0  ;;  %7594 = vmatprep.subr.bf16.mxu0 %v8018_v10  ;;  %v4606_v5 = vsel %vm8330_vm14, %v9572_v20, 0  ;;  %vm10508_vm1 = vsmask.f32 7424 }
 0x15a   : > { %v1930_v29 = vadd.f32 %v1911_v21, %v9560_v40  ;;  %v9692_v12 = vadd.f32 %v7298_v8, %v1932_v14  ;;  %v2121_v0 = vpop.f32.mrf.mxu1  ;;  %7618 = vmatprep.subr.bf16.mxu1 %v8019_v55  ;;  %7604 = vmatprep.mubr.bf16.mxu0 %v4470_v7  ;;  %v8022_v40 = vld [vmem:[%s10405_s3 + $0x510] sm:$0xff]   ;;  %v9746_v7 = vld [vmem:[%s9468_s17 + $0xc] sm:$0xf]  ;;  %v8028_v14 = vld [vmem:[%s10405_s3 + $0x5b8] sm:$0xff]   ;;  %v4605_v8 = vsel %vm8322_vm12, %v9490_v23, 0  ;;  %v4608_v23 = vsel %vm8414_vm9, %v9585_v63, 0 }
 0x15b   : > { %v7275_v9 = vpop.f32.mrf.mxu0  ;;  %7628 = vmatprep.mubr.bf16.mxu1 %v6625_v48  ;;  %v9749_v48 = vld [vmem:[%s9468_s17 + $0x10] sm:$0xf]  ;;  %v8029_v21 = vld [vmem:[%s10405_s3 + $0x5f8] sm:$0xff]  }
 0x15c   : > { %v1933_v2 = vadd.f32 %v7275_v9, %v9566_v30  ;;  %v9698_v31 = vadd.f32 %v2121_v0, %v1930_v29  ;;  %7595 = vmatpush3.bf16.msra.mxu0 %v8018_v10  ;;  %v7299_v25 = vpop.f32.mrf.mxu1  ;;  %v8023_v30 = vld [vmem:[%s10405_s3 + $0x550] sm:$0xff]   ;;  %v8027_v10 = vld [vmem:[%s10405_s3 + $0x540] sm:$0xff]   ;;  %v4607_v29 = vsel %vm8409_vm8, %v9575_v15, 0 }
 0x15d   : > { %7619 = vmatpush3.bf16.msra.mxu1 %v8019_v55  ;;  %v1914_v51 = vpop.f32.mrf.mxu0  ;;  %7596 = vmatprep.subr.bf16.mxu0 %v8020_v24  ;;  %v9743_v55 = vcombine.low %v4773_v53, %v9731_v1  ;;  %v4983_v0 = vld [vmem:[%s9468_s17 + $0x4] sm:$0xe]  ;;  %v8030_v15 = vld [vmem:[%s10405_s3 + $0x5b0] sm:$0xff]  }
 0x15e   : > { %v1931_v54 = vadd.f32 %v1914_v51, %v9577_v16  ;;  %v9704_v50 = vadd.f32 %v7299_v25, %v1933_v2  ;;  %v2124_v17 = vpop.f32.mrf.mxu1  ;;  %7620 = vmatprep.subr.bf16.mxu1 %v8021_v26  ;;  %v4423_v16 = vsel %vm10502_vm2, %v9572_v20, 0  ;;  %v9772_v20 = vcombine.low %v9746_v7, %v9749_v48  ;;  %v4602_v51 = vld [vmem:[%s9468_s17 + $0x20] sm:$0xf] }
 0x15f   : > { %v6598_v19 = vcombine.low %v4423_v16, %v4424_v3  ;;  %v4825_v9 = vshll.u32 %v9743_v55, 16  ;;  %v6626_v25 = vcombine.low %v4605_v8, %v4606_v5  ;;  %v4984_v63 = vsel %vm8493_vm15, %v4983_v0, 0 }
 0x160   : > { %v9709_v61 = vadd.f32 %v2124_v17, %v1931_v54  ;;  %7597 = vmatpush3.bf16.msra.mxu0 %v8020_v24  ;;  %v6600_v24 = vcombine.low %v4427_v45, %v4427_v45  ;;  %vm10506_vm2 = vcmp.ne.s16.totalorder %v8522_v33, 0  ;;  %v8031_v17 = vld [vmem:[%s10405_s3 + $0x5f0] sm:$0xff]   ;;  %v4609_v16 = vsel %vm8460_vm3, %v9588_v41, 0 }
 0x161   : > { %7621 = vmatpush3.bf16.msra.mxu1 %v8021_v26  ;;  %7598 = vmatprep.subr.bf16.mxu0 %v8022_v40  ;;  %v4471_v44 = vrot.slane %v6598_v19, 1  ;;  %v4473_v26 = vrot.slane %v6599_v32, 1  ;;  %v4986_v54 = vsel %vm10506_vm2, %v9746_v7, 0  ;;  %v4823_v19 = vshrl.u32 %v9743_v55, 16  ;;  %v8032_v55 = vld [vmem:[%s10405_s3 + $0x5a8] sm:$0xff]  }
 0x162   : > { %7622 = vmatprep.subr.bf16.mxu1 %v8023_v30  ;;  %v4827_v37 = vrot.slane %v4825_v9, 1  ;;  %v4830_v56 = vshll.u32 %v9772_v20, 16  ;;  %vm10510_vm2 = vcmp.ne.s16.totalorder %v8551_v39, 0 }
 0x163   : > { %v4472_v2 = vsel %vm1063_vm13, %v9662_v27, %v4471_v44  ;;  %v4987_v27 = vsel %vm10507_vm7, %v9749_v48, 0  ;;  %vm10511_vm7 = vcmp.ne.s16.totalorder %v8571_v52, 0 }
 0x164   : > { %7599 = vmatpush3.bf16.msra.mxu0 %v8022_v40  ;;  %v4985_v40 = vsel %vm10505_vm10, %v9731_v1, 0  ;;  %v6683_v45 = vcombine.low %v4986_v54, %v4987_v27  ;;  %v9814_v0 = vrot.slane %v4830_v56, 1  ;;  %vm10509_vm10 = vcmp.ne.s16.totalorder %v8547_v28, 0 }
 0x165   : > { %7623 = vmatpush3.bf16.msra.mxu1 %v8023_v30  ;;  %7600 = vmatprep.subr.bf16.mxu0 %v8024_v62  ;;  %v4475_v30 = vrot.slane %v6600_v24, 1  ;;  %v6682_v32 = vcombine.low %v4984_v63, %v4985_v40 }
 0x166   : > { %7624 = vmatprep.subr.bf16.mxu1 %v8025_v13 }
 0x168   : > { %7601 = vmatpush3.bf16.msra.mxu0 %v8024_v62  ;;  %v6627_v62 = vcombine.low %v4607_v29, %v4608_v23  ;;  %v4828_v29 = vor.u32 %v4827_v37, %v4823_v19  ;;  %v8037_v37 = vld [vmem:[%s10405_s3 + $0x5d8] sm:$0xff]  }
 0x169   : > { %7625 = vmatpush3.bf16.msra.mxu1 %v8025_v13  ;;  %7602 = vmatprep.subr.bf16.mxu0 %v8026_v18  ;;  %v4474_v13 = vsel %vm1063_vm13, %v4471_v44, %v4473_v26 }
 0x16a   : > { %7626 = vmatprep.subr.bf16.mxu1 %v8027_v10  ;;  %v4833_v27 = vsel %vm10508_vm1, %v4828_v29, %v9814_v0  ;;  %v8041_v29 = vld [vmem:[%s10405_s3 + $0x5c8] sm:$0xff]  }
 0x16c   : > { %7603 = vmatpush3.bf16.msra.mxu0 %v8026_v18 }
 0x16d   : > { %7627 = vmatpush3.bf16.msra.mxu1 %v8027_v10  ;;  %7636 = vmatprep.subr.bf16.mxu0 %v8028_v14  ;;  %v4610_v10 = vsel %vm8468_vm4, %v4602_v51, 0 }
 0x16e   : > { %7660 = vmatprep.subr.bf16.mxu1 %v8029_v21  ;;  %v6628_v24 = vcombine.low %v4609_v16, %v4610_v10 }
 0x16f   : > { %v7318_v3 = vpop.f32.mrf.mxu0  ;;  %7605 = vmatmul.mubr.bf16.vlgmr.msra.gmra.mxu0 %v4472_v2  ;;  %v5033_v2 = vrot.slane %v6682_v32, 1  ;;  %v8038_v32 = vld [vmem:[%s10405_s3 + $0x590] sm:$0xff]  }
 0x170   : > { %v2322_v53 = vadd.f32 %v7318_v3, %v9657_v46  ;;  %7629 = vmatmul.mubr.bf16.vlgmr.msra.gmra.mxu1 %v6626_v25  ;;  %7637 = vmatpush3.bf16.msra.mxu0 %v8028_v14  ;;  %v7342_v18 = vpop.f32.mrf.mxu1  ;;  %v8033_v14 = vld [vmem:[%s10405_s3 + $0x5e8] sm:$0xff]   ;;  %v9819_v25 = vrot.slane %v6683_v45, 1  ;;  %v8036_v3 = vld [vmem:[%s10405_s3 + $0x598] sm:$0xff]   ;;  %v9853_v45 = vld [vmem:[%s9468_s17 + $0x14] sm:$0xf] }
 0x171   : > { %7661 = vmatpush3.bf16.msra.mxu1 %v8029_v21  ;;  %v2289_v41 = vpop.f32.mrf.mxu0  ;;  %7638 = vmatprep.subr.bf16.mxu0 %v8030_v15  ;;  %v4476_v21 = vsel %vm1063_vm13, %v4473_v26, %v4475_v30  ;;  %v8034_v26 = vld [vmem:[%s10405_s3 + $0x5a0] sm:$0xff]  }
 0x172   : > { %v2320_v44 = vadd.f32 %v2289_v41, %v9665_v42  ;;  %v9808_v8 = vadd.f32 %v7342_v18, %v2322_v53  ;;  %v2467_v46 = vpop.f32.mrf.mxu1  ;;  %7662 = vmatprep.subr.bf16.mxu1 %v8031_v17  ;;  %7608 = vmatprep.mubr.bf16.mxu0 %v4474_v13  ;;  %v9856_v41 = vld [vmem:[%s9468_s17 + $0x18] sm:$0xf] }
 0x173   : > { %v7319_v5 = vpop.f32.mrf.mxu0  ;;  %7632 = vmatprep.mubr.bf16.mxu1 %v6627_v62  ;;  %v5172_v60 = vsel %vm8409_vm8, %v9856_v41, 0  ;;  %vm10518_vm8 = vcmp.ne.s16.totalorder %v8526_v11, 0 }
 0x174   : > { %v2323_v23 = vadd.f32 %v7319_v5, %v9678_v49  ;;  %v9817_v42 = vadd.f32 %v2467_v46, %v2320_v44  ;;  %7639 = vmatpush3.bf16.msra.mxu0 %v8030_v15  ;;  %v7343_v9 = vpop.f32.mrf.mxu1  ;;  %v8035_v49 = vld [vmem:[%s10405_s3 + $0x5e0] sm:$0xff]   ;;  %v8039_v46 = vld [vmem:[%s10405_s3 + $0x5d0] sm:$0xff]   ;;  %v6655_v5 = vcombine.low %v9853_v45, %v9856_v41 }
 0x175   : > { %7663 = vmatpush3.bf16.msra.mxu1 %v8031_v17  ;;  %v2292_v51 = vpop.f32.mrf.mxu0  ;;  %7640 = vmatprep.subr.bf16.mxu0 %v8032_v55 }
 0x176   : > { %v2321_v63 = vadd.f32 %v2292_v51, %v9686_v35  ;;  %v9825_v40 = vadd.f32 %v7343_v9, %v2323_v23  ;;  %v2470_v54 = vpop.f32.mrf.mxu1  ;;  %7664 = vmatprep.subr.bf16.mxu1 %v8033_v14  ;;  %v5035_v35 = vsel %vm1063_vm13, %v5033_v2, %v9819_v25  ;;  %v4988_v23 = vsel %vm10509_vm10, %v9853_v45, 0  ;;  %vm10512_vm10 = vmmov %vm10508_vm1 }
 0x177   : > { %v7322_v15 = vpop.f32.mrf.mxu0  ;;  %7609 = vmatmul.mubr.bf16.gmra.mxu0 %v4476_v21  ;;  %v9869_v21 = vld [vmem:[%s9468_s17 + $0x1c] sm:$0xf]  ;;  %v4989_v9 = vsel %vm10510_vm2, %v9856_v41, 0  ;;  %v4834_v51 = vshrl.u32 %v9772_v20, 16  ;;  %v9901_v20 = vld [vmem:[%s9468_s17 + $0xc] sm:$0xf]  ;;  %vm10513_vm2 = vmmov %vm10508_vm1 }
 0x178   : > { %v2326_v17 = vadd.f32 %v7322_v15, %v9692_v12  ;;  %v9833_v30 = vadd.f32 %v2470_v54, %v2321_v63  ;;  %7641 = vmatpush3.bf16.msra.mxu0 %v8032_v55  ;;  %v7346_v62 = vpop.f32.mrf.mxu1  ;;  %7633 = vmatmul.mubr.bf16.gmra.mxu1 %v6628_v24  ;;  %v9872_v24 = vld [vmem:[%s9468_s17 + $0x20] sm:$0xf]  ;;  %v4781_v63 = vld [vmem:[%s9468_s17 + $0x24] sm:$0x1]  ;;  %v4990_v54 = vsel %vm1011_vm0, %v9869_v21, 0 }
 0x179   : > { %7665 = vmatpush3.bf16.msra.mxu1 %v8033_v14  ;;  %v2305_v16 = vpop.f32.mrf.mxu0  ;;  %7642 = vmatprep.subr.bf16.mxu0 %v8034_v26  ;;  %v6656_v2 = vcombine.low %v9869_v21, %v9872_v24  ;;  %v8042_v15 = vld [vmem:[%s10405_s3 + $0x580] sm:$0xff]  }
 0x17a   : > { %v2324_v13 = vadd.f32 %v2305_v16, %v9698_v31  ;;  %v9841_v19 = vadd.f32 %v7346_v62, %v2326_v17  ;;  %v2483_v12 = vpop.f32.mrf.mxu1  ;;  %7666 = vmatprep.subr.bf16.mxu1 %v8035_v49  ;;  %7652 = vmatprep.mubr.bf16.mxu0 %v4833_v27  ;;  %v6684_v27 = vcombine.low %v4988_v23, %v4989_v9  ;;  %v5338_v17 = vld [vmem:[%s9468_s17 + $0x8] sm:$0xf]  ;;  %v8043_v62 = vld [vmem:[%s10405_s3 + $0x5c0] sm:$0xff]  }
 0x17b   : > { %v7323_v56 = vpop.f32.mrf.mxu0  ;;  %7676 = vmatprep.mubr.bf16.mxu1 %v5035_v35  ;;  %v4842_v35 = vshrl.u32 %v6655_v5, 16  ;;  %v4846_v16 = vshll.u32 %v6656_v2, 16 }
 0x17c   : > { %v2327_v53 = vadd.f32 %v7323_v56, %v9704_v50  ;;  %v9847_v18 = vadd.f32 %v2483_v12, %v2324_v13  ;;  %7643 = vmatpush3.bf16.msra.mxu0 %v8034_v26  ;;  %v7347_v31 = vpop.f32.mrf.mxu1  ;;  %v4838_v26 = vshll.u32 %v6655_v5, 16  ;;  %v4836_v12 = vor.u32 %v4834_v51, %v9814_v0 }
 0x17d   : > { %7667 = vmatpush3.bf16.msra.mxu1 %v8035_v49  ;;  %v2308_v10 = vpop.f32.mrf.mxu0  ;;  %7644 = vmatprep.subr.bf16.mxu0 %v8036_v3  ;;  %v4991_v49 = vsel %vm1012_vm11, %v9872_v24, 0  ;;  %v6739_v56 = vcombine.low %v5338_v17, %v9901_v20  ;;  %v4850_v5 = vshrl.u32 %v6656_v2, 16 }
 0x17e   : > { %v2325_v55 = vadd.f32 %v2308_v10, %v9709_v61  ;;  %v9859_v50 = vadd.f32 %v7347_v31, %v2327_v53  ;;  %v2486_v44 = vpop.f32.mrf.mxu1  ;;  %7668 = vmatprep.subr.bf16.mxu1 %v8037_v37  ;;  %v8040_v61 = vld [vmem:[%s10405_s3 + $0x588] sm:$0xff]   ;;  %v6685_v13 = vcombine.low %v4990_v54, %v4991_v49  ;;  %v8047_v53 = vld [vmem:[%s10405_s3 + $0x638] sm:$0xff]   ;;  %v5036_v31 = vrot.slane %v6684_v27, 1  ;;  %v9912_v10 = vld [vmem:[%s9468_s17 + $0x10] sm:$0xf] }
 0x17f   : > { %v5390_v51 = vshll.u32 %v6739_v56, 16  ;;  %v8050_v54 = vld [vmem:[%s10405_s3 + $0x670] sm:$0xff]  }
 0x180   : > { %v9864_v14 = vadd.f32 %v2486_v44, %v2325_v55  ;;  %7645 = vmatpush3.bf16.msra.mxu0 %v8036_v3  ;;  %v6657_v3 = vcombine.low %v4781_v63, %v4781_v63  ;;  %v8048_v55 = vld [vmem:[%s10405_s3 + $0x678] sm:$0xff]   ;;  %v4992_v44 = vsel %vm10511_vm7, %v4781_v63, 0  ;;  %v8049_v63 = vld [vmem:[%s10405_s3 + $0x630] sm:$0xff]   ;;  %vm10521_vm7 = vmmov %vm10508_vm1 }
 0x181   : > { %7669 = vmatpush3.bf16.msra.mxu1 %v8037_v37  ;;  %7646 = vmatprep.subr.bf16.mxu0 %v8038_v32  ;;  %v4840_v37 = vrot.slane %v4838_v26, 1  ;;  %v5037_v26 = vsel %vm1063_vm13, %v9819_v25, %v5036_v31  ;;  %v6686_v2 = vcombine.low %v4992_v44, %v4992_v44 }
 0x182   : > { %7670 = vmatprep.subr.bf16.mxu1 %v8039_v46 }
 0x183   : > { %v4844_v0 = vor.u32 %v4842_v35, %v4840_v37  ;;  %v4841_v23 = vsel %vm10508_vm1, %v4836_v12, %v4840_v37  ;;  %v8053_v37 = vld [vmem:[%s10405_s3 + $0x628] sm:$0xff]  }
 0x184   : > { %7647 = vmatpush3.bf16.msra.mxu0 %v8038_v32  ;;  %v9915_v32 = vld [vmem:[%s9468_s17 + $0x14] sm:$0xf] }
 0x185   : > { %7671 = vmatpush3.bf16.msra.mxu1 %v8039_v46  ;;  %7648 = vmatprep.subr.bf16.mxu0 %v8040_v61  ;;  %v4848_v46 = vrot.slane %v4846_v16, 1  ;;  %v9925_v9 = vcombine.low %v9912_v10, %v9915_v32  ;;  %v5388_v16 = vshrl.u32 %v6739_v56, 16  ;;  %v8054_v56 = vld [vmem:[%s10405_s3 + $0x668] sm:$0xff]   ;;  %v5552_v41 = vsel %vm10518_vm8, %v9915_v32, 0 }
 0x186   : > { %7672 = vmatprep.subr.bf16.mxu1 %v8041_v29  ;;  %v5174_v32 = vsel %vm8460_vm3, %v9872_v24, 0  ;;  %vm10523_vm3 = vcmp.ne.s16.totalorder %v8571_v52, 0 }
 0x187   : > { %v4852_v27 = vor.u32 %v4850_v5, %v4848_v46 }
 0x188   : > { %7649 = vmatpush3.bf16.msra.mxu0 %v8040_v61  ;;  %v4854_v61 = vshll.u32 %v6657_v3, 16  ;;  %v5392_v3 = vrot.slane %v5390_v51, 1 }
 0x189   : > { %7673 = vmatpush3.bf16.msra.mxu1 %v8041_v29  ;;  %7650 = vmatprep.subr.bf16.mxu0 %v8042_v15  ;;  %v5038_v29 = vrot.slane %v6685_v13, 1  ;;  %v5395_v13 = vshll.u32 %v9925_v9, 16 }
 0x18a   : > { %7674 = vmatprep.subr.bf16.mxu1 %v8043_v62  ;;  %v4856_v17 = vrot.slane %v4854_v61, 1  ;;  %v5393_v51 = vor.u32 %v5392_v3, %v5388_v16  ;;  %v8058_v16 = vld [vmem:[%s10405_s3 + $0x658] sm:$0xff]  }
 0x18c   : > { %7651 = vmatpush3.bf16.msra.mxu0 %v8042_v15  ;;  %v4849_v15 = vsel %vm10512_vm10, %v4844_v0, %v4848_v46  ;;  %v5040_v0 = vrot.slane %v6686_v2, 1  ;;  %v5168_v46 = vsel %vm8278_vm5, %v9731_v1, 0  ;;  %vm10514_vm5 = vmmov %vm10508_vm1 }
 0x18d   : > { %7675 = vmatpush3.bf16.msra.mxu1 %v8043_v62  ;;  %7684 = vmatprep.subr.bf16.mxu0 %v8047_v53  ;;  %v5039_v62 = vsel %vm1063_vm13, %v5036_v31, %v5038_v29 }
 0x18e   : > { %7708 = vmatprep.subr.bf16.mxu1 %v8048_v55 }
 0x18f   : > { %v7366_v49 = vpop.f32.mrf.mxu0  ;;  %7653 = vmatmul.mubr.bf16.vlgmr.msra.gmra.mxu0 %v4841_v23 }
 0x190   : > { %v2710_v25 = vadd.f32 %v7366_v49, %v9808_v8  ;;  %7677 = vmatmul.mubr.bf16.vlgmr.msra.gmra.mxu1 %v5037_v26  ;;  %7685 = vmatpush3.bf16.msra.mxu0 %v8047_v53  ;;  %v7390_v35 = vpop.f32.mrf.mxu1  ;;  %v9958_v26 = vrot.slane %v5395_v13, 1  ;;  %v5041_v49 = vsel %vm1063_vm13, %v5038_v29, %v5040_v0  ;;  %v9985_v13 = vld [vmem:[%s9468_s17 + $0x18] sm:$0xf] }
 0x191   : > { %7709 = vmatpush3.bf16.msra.mxu1 %v8048_v55  ;;  %v2677_v12 = vpop.f32.mrf.mxu0  ;;  %7686 = vmatprep.subr.bf16.mxu0 %v8049_v63  ;;  %v4857_v55 = vsel %vm10513_vm2, %v4852_v27, %v4856_v17 }
 0x192   : > { %v2708_v44 = vadd.f32 %v2677_v12, %v9817_v42  ;;  %v9943_v31 = vadd.f32 %v7390_v35, %v2710_v25  ;;  %v2861_v8 = vpop.f32.mrf.mxu1  ;;  %7710 = vmatprep.subr.bf16.mxu1 %v8050_v54  ;;  %7656 = vmatprep.mubr.bf16.mxu0 %v4849_v15  ;;  %v5169_v42 = vsel %vm8286_vm6, %v9746_v7, 0  ;;  %v9988_v12 = vld [vmem:[%s9468_s17 + $0x1c] sm:$0xf]  ;;  %vm10515_vm6 = vmmov %vm10508_vm1 }
 0x193   : > { %v7367_v53 = vpop.f32.mrf.mxu0  ;;  %7680 = vmatprep.mubr.bf16.mxu1 %v5039_v62  ;;  %v8057_v62 = vld [vmem:[%s10405_s3 + $0x618] sm:$0xff]  }
 0x194   : > { %v2711_v5 = vadd.f32 %v7367_v53, %v9825_v40  ;;  %v9956_v61 = vadd.f32 %v2861_v8, %v2708_v44  ;;  %7687 = vmatpush3.bf16.msra.mxu0 %v8049_v63  ;;  %v7391_v23 = vpop.f32.mrf.mxu1  ;;  %v8056_v40 = vld [vmem:[%s10405_s3 + $0x660] sm:$0xff]   ;;  %v6711_v63 = vcombine.low %v5168_v46, %v5169_v42  ;;  %v8059_v8 = vld [vmem:[%s10405_s3 + $0x610] sm:$0xff]   ;;  %v6741_v46 = vcombine.low %v9985_v13, %v9988_v12 }
 0x195   : > { %7711 = vmatpush3.bf16.msra.mxu1 %v8050_v54  ;;  %v2680_v2 = vpop.f32.mrf.mxu0  ;;  %7688 = vmatprep.subr.bf16.mxu0 %v8053_v37 }
 0x196   : > { %v2709_v38 = vadd.f32 %v2680_v2, %v9833_v30  ;;  %v9965_v1 = vadd.f32 %v7391_v23, %v2711_v5  ;;  %v2864_v7 = vpop.f32.mrf.mxu1  ;;  %7712 = vmatprep.subr.bf16.mxu1 %v8054_v56  ;;  %v5398_v30 = vsel %vm10514_vm5, %v5393_v51, %v9958_v26  ;;  %v5344_v5 = vld [vmem:[%s9468_s17 + $0x20] sm:$0xf]  ;;  %v5345_v23 = vld [vmem:[%s9468_s17 + $0x24] sm:$0xf]  ;;  %v8062_v51 = vld [vmem:[%s10405_s3 + $0x648] sm:$0xff]   ;;  %v5399_v2 = vshrl.u32 %v9925_v9, 16 }
 0x197   : > { %v7370_v54 = vpop.f32.mrf.mxu0  ;;  %7657 = vmatmul.mubr.bf16.gmra.mxu0 %v4857_v55  ;;  %v5170_v9 = vsel %vm8322_vm12, %v9749_v48, 0  ;;  %v5548_v48 = vld [vmem:[%s9468_s17 + $0x8] sm:$0xe]  ;;  %vm10516_vm12 = vcmp.ne.s16.totalorder %v8515_v47, 0 }
 0x198   : > { %v2714_v15 = vadd.f32 %v7370_v54, %v9841_v19  ;;  %v9971_v29 = vadd.f32 %v2864_v7, %v2709_v38  ;;  %7689 = vmatpush3.bf16.msra.mxu0 %v8053_v37  ;;  %v7394_v27 = vpop.f32.mrf.mxu1  ;;  %7681 = vmatmul.mubr.bf16.gmra.mxu1 %v5041_v49  ;;  %v5403_v49 = vshll.u32 %v6741_v46, 16  ;;  %v10016_v38 = vld [vmem:[%s9468_s17 + $0x28] sm:$0x1]  ;;  %v8063_v7 = vld [vmem:[%s10405_s3 + $0x600] sm:$0xff]   ;;  %v5550_v36 = vsel %vm10516_vm12, %v9901_v20, 0 }
 0x199   : > { %7713 = vmatpush3.bf16.msra.mxu1 %v8054_v56  ;;  %v2693_v17 = vpop.f32.mrf.mxu0  ;;  %7690 = vmatprep.subr.bf16.mxu0 %v8055_v34  ;;  %v5555_v20 = vsel %vm1011_vm0, %v5344_v5, 0  ;;  %vm10522_vm0 = vmmov %vm10508_vm1 }
 0x19a   : > { %v2712_v25 = vadd.f32 %v2693_v17, %v9847_v18  ;;  %v9979_v19 = vadd.f32 %v7394_v27, %v2714_v15  ;;  %v2877_v35 = vpop.f32.mrf.mxu1  ;;  %7714 = vmatprep.subr.bf16.mxu1 %v8056_v40  ;;  %7700 = vmatprep.mubr.bf16.mxu0 %v6711_v63  ;;  %v5401_v63 = vor.u32 %v5399_v2, %v9958_v26  ;;  %v5405_v54 = vrot.slane %v5403_v49, 1 }
 0x19b   : > { %v7371_v3 = vpop.f32.mrf.mxu0  ;;  %7724 = vmatprep.mubr.bf16.mxu1 %v5398_v30  ;;  %v5171_v15 = vsel %vm8330_vm14, %v9853_v45, 0  ;;  %v5407_v27 = vshrl.u32 %v6741_v46, 16  ;;  %v6743_v17 = vcombine.low %v10016_v38, %v10016_v38  ;;  %v5173_v45 = vsel %vm8414_vm9, %v9869_v21, 0  ;;  %v5167_v21 = vld [vmem:[%s9468_s17 + $0x24] sm:$0xf] }
 0x19c   : > { %v2715_v37 = vadd.f32 %v7371_v3, %v9859_v50  ;;  %v9991_v0 = vadd.f32 %v2877_v35, %v2712_v25  ;;  %7691 = vmatpush3.bf16.msra.mxu0 %v8055_v34  ;;  %v7395_v18 = vpop.f32.mrf.mxu1  ;;  %v8060_v50 = vld [vmem:[%s10405_s3 + $0x650] sm:$0xff]   ;;  %v6742_v34 = vcombine.low %v5344_v5, %v5345_v23  ;;  %v6712_v26 = vcombine.low %v5170_v9, %v5171_v15  ;;  %v8073_v9 = vld [vmem:[%s10405_s3 + $0x6a0] sm:$0xff]  }
 0x19d   : > { %7715 = vmatpush3.bf16.msra.mxu1 %v8056_v40  ;;  %v2696_v44 = vpop.f32.mrf.mxu0  ;;  %7692 = vmatprep.subr.bf16.mxu0 %v8057_v62  ;;  %v8064_v40 = vld [vmem:[%s10405_s3 + $0x640] sm:$0xff]   ;;  %v5409_v25 = vor.u32 %v5407_v27, %v5405_v54  ;;  %v5419_v3 = vshll.u32 %v6743_v17, 16  ;;  %vm10517_vm14 = vcmp.ne.s16.totalorder %v8522_v33, 0  ;;  %vm10519_vm9 = vcmp.ne.s16.totalorder %v8547_v28, 0 }
 0x19e   : > { %v2713_v56 = vadd.f32 %v2696_v44, %v9864_v14  ;;  %v9997_v53 = vadd.f32 %v7395_v18, %v2715_v37  ;;  %v2880_v55 = vpop.f32.mrf.mxu1  ;;  %7716 = vmatprep.subr.bf16.mxu1 %v8058_v16  ;;  %v8061_v14 = vld [vmem:[%s10405_s3 + $0x608] sm:$0xff]   ;;  %v5411_v30 = vshll.u32 %v6742_v34, 16  ;;  %v8069_v37 = vld [vmem:[%s10405_s3 + $0x6b0] sm:$0xff]   ;;  %v5549_v18 = vsel %vm8493_vm15, %v5548_v48, 0 }
 0x19f   : > { %v5551_v43 = vsel %vm10517_vm14, %v9912_v10, 0  ;;  %v5553_v22 = vsel %vm10519_vm9, %v9985_v13, 0  ;;  %vm10520_vm15 = vcmp.ne.s16.totalorder %v8551_v39, 0  ;;  %v5556_v33 = vsel %vm1012_vm11, %v5345_v23, 0 }
 0x1a0   : > { %v10004_v42 = vadd.f32 %v2880_v55, %v2713_v56  ;;  %7693 = vmatpush3.bf16.msra.mxu0 %v8057_v62  ;;  %v5406_v62 = vsel %vm10515_vm6, %v5401_v63, %v5405_v54  ;;  %v5413_v35 = vrot.slane %v5411_v30, 1  ;;  %v5554_v47 = vsel %vm10520_vm15, %v9988_v12, 0 }
 0x1a1   : > { %7717 = vmatpush3.bf16.msra.mxu1 %v8058_v16  ;;  %7694 = vmatprep.subr.bf16.mxu0 %v8059_v8  ;;  %v5415_v16 = vshrl.u32 %v6742_v34, 16  ;;  %v6713_v11 = vcombine.low %v5172_v60, %v5173_v45  ;;  %v6768_v13 = vcombine.low %v5549_v18, %v5550_v36  ;;  %v6769_v44 = vcombine.low %v5551_v43, %v5552_v41 }
 0x1a2   : > { %7718 = vmatprep.subr.bf16.mxu1 %v8060_v50  ;;  %v5414_v28 = vsel %vm10521_vm7, %v5409_v25, %v5413_v35  ;;  %v5175_v59 = vsel %vm8468_vm4, %v5167_v21, 0  ;;  %v6770_v12 = vcombine.low %v5553_v22, %v5554_v47  ;;  %v5421_v55 = vrot.slane %v5419_v3, 1 }
 0x1a3   : > { %v5417_v24 = vor.u32 %v5415_v16, %v5413_v35  ;;  %v6714_v5 = vcombine.low %v5174_v32, %v5175_v59  ;;  %v5598_v23 = vrot.slane %v6768_v13, 1  ;;  %v5557_v41 = vsel %vm10523_vm3, %v10016_v38, 0 }
 0x1a4   : > { %7695 = vmatpush3.bf16.msra.mxu0 %v8059_v8  ;;  %v6771_v8 = vcombine.low %v5555_v20, %v5556_v33  ;;  %v10087_v34 = vrot.slane %v6770_v12, 1  ;;  %v6772_v21 = vcombine.low %v5557_v41, %v5557_v41 }
 0x1a5   : > { %7719 = vmatpush3.bf16.msra.mxu1 %v8060_v50  ;;  %7696 = vmatprep.subr.bf16.mxu0 %v8061_v14 }
 0x1a6   : > { %7720 = vmatprep.subr.bf16.mxu1 %v8062_v51  ;;  %v5605_v22 = vrot.slane %v6772_v21, 1 }
 0x1a8   : > { %7697 = vmatpush3.bf16.msra.mxu0 %v8061_v14  ;;  %v10082_v14 = vrot.slane %v6769_v44, 1 }
 0x1a9   : > { %7721 = vmatpush3.bf16.msra.mxu1 %v8062_v51  ;;  %7698 = vmatprep.subr.bf16.mxu0 %v8063_v7 }
 0x1aa   : > { %7722 = vmatprep.subr.bf16.mxu1 %v8064_v40  ;;  %v5600_v27 = vsel %vm1063_vm13, %v5598_v23, %v10082_v14  ;;  %v5602_v52 = vsel %vm1063_vm13, %v10082_v14, %v10087_v34 }
 0x1ac   : > { %7699 = vmatpush3.bf16.msra.mxu0 %v8063_v7 }
 0x1ad   : > { %7723 = vmatpush3.bf16.msra.mxu1 %v8064_v40  ;;  %7732 = vmatprep.subr.bf16.mxu0 %v8067_v58  ;;  %v5422_v40 = vsel %vm10522_vm0, %v5417_v24, %v5421_v55 }
 0x1ae   : > { %7756 = vmatprep.subr.bf16.mxu1 %v8067_v58 }
 0x1af   : > { %v7414_v10 = vpop.f32.mrf.mxu0  ;;  %7701 = vmatmul.mubr.bf16.vlgmr.msra.gmra.mxu0 %v6712_v26  ;;  %v8074_v26 = vld [vmem:[%s10405_s3 + $0x698] sm:$0xff]  }
 0x1b0   : > { %v3065_v39 = vadd.f32 %v7414_v10, %v9943_v31  ;;  %7725 = vmatmul.mubr.bf16.vlgmr.msra.gmra.mxu1 %v5406_v62  ;;  %7733 = vmatpush3.bf16.msra.mxu0 %v8067_v58  ;;  %v7438_v57 = vpop.f32.mrf.mxu1 }
 0x1b1   : > { %7764 = vmatpush3.bf16.msra.mxu1 %v8067_v58  ;;  %v3032_v56 = vpop.f32.mrf.mxu0  ;;  %7734 = vmatprep.subr.bf16.mxu0 %v8069_v37 }
 0x1b2   : > { %v3063_v50 = vadd.f32 %v3032_v56, %v9956_v61  ;;  %v10080_v31 = vadd.f32 %v7438_v57, %v3065_v39  ;;  %v3242_v46 = vpop.f32.mrf.mxu1  ;;  %7757 = vmatprep.subr.bf16.mxu1 %v8069_v37  ;;  %7704 = vmatprep.mubr.bf16.mxu0 %v6713_v11  ;;  %v10089_v61 = vrot.slane %v6771_v8, 1 }
 0x1b3   : > { %v7415_v6 = vpop.f32.mrf.mxu0  ;;  %7728 = vmatprep.mubr.bf16.mxu1 %v5414_v28 }
 0x1b4   : > { %v3066_v51 = vadd.f32 %v7415_v6, %v9965_v1  ;;  %v10085_v2 = vadd.f32 %v3242_v46, %v3063_v50  ;;  %7735 = vmatpush3.bf16.msra.mxu0 %v8069_v37  ;;  %v7439_v49 = vpop.f32.mrf.mxu1  ;;  %v5606_v38 = vsel %vm1063_vm13, %v10089_v61, %v5605_v22 }
 0x1b5   : > { %7765 = vmatpush3.bf16.msra.mxu1 %v8069_v37  ;;  %v3035_v7 = vpop.f32.mrf.mxu0  ;;  %7736 = vmatprep.subr.bf16.mxu0 %v8070_v4  ;;  %v8075_v37 = vld [vmem:[%s10405_s3 + $0x690] sm:$0xff]  }
 0x1b6   : > { %v3064_v63 = vadd.f32 %v3035_v7, %v9971_v29  ;;  %v10096_v1 = vadd.f32 %v7439_v49, %v3066_v51  ;;  %v3245_v54 = vpop.f32.mrf.mxu1  ;;  %7758 = vmatprep.subr.bf16.mxu1 %v8070_v4  ;;  %v5604_v29 = vsel %vm1063_vm13, %v10087_v34, %v10089_v61 }
 0x1b7   : > { %v7418_v15 = vpop.f32.mrf.mxu0  ;;  %7705 = vmatmul.mubr.bf16.gmra.mxu0 %v6714_v5 }
 0x1b8   : > { %v3069_v30 = vadd.f32 %v7418_v15, %v9979_v19  ;;  %v10101_v17 = vadd.f32 %v3245_v54, %v3064_v63  ;;  %7737 = vmatpush3.bf16.msra.mxu0 %v8070_v4  ;;  %v7442_v58 = vpop.f32.mrf.mxu1  ;;  %7729 = vmatmul.mubr.bf16.gmra.mxu1 %v5422_v40 }
 0x1b9   : > { %7766 = vmatpush3.bf16.msra.mxu1 %v8070_v4  ;;  %v3048_v48 = vpop.f32.mrf.mxu0  ;;  %7738 = vmatprep.subr.bf16.mxu0 %v8073_v9 }
 0x1ba   : > { %v3067_v62 = vadd.f32 %v3048_v48, %v9991_v0  ;;  %v3279_v60 = vadd.f32 %v7442_v58, %v3069_v30  ;;  %v3258_v19 = vpop.f32.mrf.mxu1  ;;  %7759 = vmatprep.subr.bf16.mxu1 %v8073_v9  ;;  %7748 = vmatprep.mubr.bf16.mxu0 %v5600_v27 }
 0x1bb   : > { %v7419_v45 = vpop.f32.mrf.mxu0  ;;  %7752 = vmatprep.mubr.bf16.mxu1 %v5604_v29 }
 0x1bc   : > { %v3070_v25 = vadd.f32 %v7419_v45, %v9997_v53  ;;  %v3277_v35 = vadd.f32 %v3258_v19, %v3067_v62  ;;  %7739 = vmatpush3.bf16.msra.mxu0 %v8073_v9  ;;  %v7443_v16 = vpop.f32.mrf.mxu1  ;;  %v8076_v53 = vld [vmem:[%s10405_s3 + $0x688] sm:$0xff]  }
 0x1bd   : > { %7767 = vmatpush3.bf16.msra.mxu1 %v8073_v9  ;;  %v3051_v3 = vpop.f32.mrf.mxu0  ;;  %7740 = vmatprep.subr.bf16.mxu0 %v8074_v26 }
 0x1be   : > { %v3068_v0 = vadd.f32 %v3051_v3, %v10004_v42  ;;  %v3280_v18 = vadd.f32 %v7443_v16, %v3070_v25  ;;  %v3261_v36 = vpop.f32.mrf.mxu1  ;;  %7760 = vmatprep.subr.bf16.mxu1 %v8074_v26  ;;  %v8077_v42 = vld [vmem:[%s10405_s3 + $0x680] sm:$0xff]  }
 0x1c0   : > { %v3278_v43 = vadd.f32 %v3261_v36, %v3068_v0  ;;  %7741 = vmatpush3.bf16.msra.mxu0 %v8074_v26 }
 0x1c1   : > { %7768 = vmatpush3.bf16.msra.mxu1 %v8074_v26  ;;  %7742 = vmatprep.subr.bf16.mxu0 %v8075_v37 }
 0x1c2   : > { %7761 = vmatprep.subr.bf16.mxu1 %v8075_v37 }
 0x1c4   : > { %7743 = vmatpush3.bf16.msra.mxu0 %v8075_v37 }
 0x1c5   : > { %7769 = vmatpush3.bf16.msra.mxu1 %v8075_v37  ;;  %7744 = vmatprep.subr.bf16.mxu0 %v8076_v53 }
 0x1c6   : > { %7762 = vmatprep.subr.bf16.mxu1 %v8076_v53 }
 0x1c8   : > { %7745 = vmatpush3.bf16.msra.mxu0 %v8076_v53 }
 0x1c9   : > { %7770 = vmatpush3.bf16.msra.mxu1 %v8076_v53  ;;  %7746 = vmatprep.subr.bf16.mxu0 %v8077_v42 }
 0x1ca   : > { %7763 = vmatprep.subr.bf16.mxu1 %v8077_v42 }
 0x1cc   : > { %7747 = vmatpush3.bf16.msra.mxu0 %v8077_v42 }
 0x1cd   : > { %7771 = vmatpush3.bf16.msra.mxu1 %v8077_v42 }
 0x1cf   : > { %v7462_v47 = vpop.f32.mrf.mxu0  ;;  %7749 = vmatmul.mubr.bf16.vlgmr.msra.gmra.mxu0 %v5602_v52 }
 0x1d0   : > { %v3459_v20 = vadd.f32 %v7462_v47, %v10080_v31  ;;  %7753 = vmatmul.mubr.bf16.vlgmr.msra.gmra.mxu1 %v5606_v38  ;;  %v7486_v33 = vpop.f32.mrf.mxu1 }
 0x1d1   : > { %v3426_v11 = vpop.f32.mrf.mxu0 }
 0x1d2   : > { %v3457_v10 = vadd.f32 %v3426_v11, %v10085_v2  ;;  %v10131_v32 = vadd.f32 %v7486_v33, %v3459_v20  ;;  %v3597_v28 = vpop.f32.mrf.mxu1 }
 0x1d3   : > { %v7463_v13 = vpop.f32.mrf.mxu0 }
 0x1d4   : > { %v3460_v44 = vadd.f32 %v7463_v13, %v10096_v1  ;;  %v10134_v39 = vadd.f32 %v3597_v28, %v3457_v10  ;;  %v7487_v57 = vpop.f32.mrf.mxu1 }
 0x1d5   : > { %v3429_v59 = vpop.f32.mrf.mxu0 }
 0x1d6   : > { %v3458_v12 = vadd.f32 %v3429_v59, %v10101_v17  ;;  %v10137_v8 = vadd.f32 %v7487_v57, %v3460_v44  ;;  %v3600_v56 = vpop.f32.mrf.mxu1 }
 0x1d7   : > { %v7466_v4 = vpop.f32.mrf.mxu0 }
 0x1d8   : > { %v3463_v24 = vadd.f32 %v7466_v4, %v3279_v60  ;;  %v10139_v55 = vadd.f32 %v3600_v56, %v3458_v12  ;;  %v7490_v50 = vpop.f32.mrf.mxu1 }
 0x1d9   : > { %v3442_v31 = vpop.f32.mrf.mxu0 }
 0x1da   : > { %v3461_v46 = vadd.f32 %v3442_v31, %v3277_v35  ;;  %v10141_v6 = vadd.f32 %v7490_v50, %v3463_v24  ;;  %v3613_v5 = vpop.f32.mrf.mxu1 }
 0x1db   : > { %v7467_v23 = vpop.f32.mrf.mxu0 }
 0x1dc   : > { %v3464_v14 = vadd.f32 %v7467_v23, %v3280_v18  ;;  %v10143_v51 = vadd.f32 %v3613_v5, %v3461_v46  ;;  %v7491_v2 = vpop.f32.mrf.mxu1 }
 0x1dd   : > { %v3445_v49 = vpop.f32.mrf.mxu0 }
 0x1de   : > { %v3462_v34 = vadd.f32 %v3445_v49, %v3278_v43  ;;  %v10145_v61 = vadd.f32 %v7491_v2, %v3464_v14  ;;  %v3616_v7 = vpop.f32.mrf.mxu1 }
 0x1e0   : > { %v10147_v40 = vadd.f32 %v3616_v7, %v3462_v34 }
 0x1ef   : > { %v10149_v9 = vpop.f32.mrf.mxu0 }
 0x1f0   : > { %v10151_v63 = vpop.f32.mrf.mxu1 }
 0x1f1   : > { %v10153_v1 = vpop.f32.mrf.mxu0 }
 0x1f2   : > { %v10155_v54 = vpop.f32.mrf.mxu1 }
 0x1f3   : > { %v10157_v15 = vpop.f32.mrf.mxu0 }
 0x1f4   : > { %v10159_v27 = vpop.f32.mrf.mxu1 }
 0x1f5   : > { %v10161_v30 = vpop.f32.mrf.mxu0 }
 0x1f6   : > { %v10163_v17 = vpop.f32.mrf.mxu1 }
 0x1f7   : > { %v7514_v58 = vpop.f32.mrf.mxu0 }
 0x1f8   : > { %v10165_v29 = vpop.f32.mrf.mxu1 }
 0x1f9   : > { %v3823_v48 = vpop.f32.mrf.mxu0 }
 0x1fa   : > { %v10167_v26 = vpop.f32.mrf.mxu1 }
 0x1fb   : > { %v10169_v62 = vpop.f32.mrf.mxu0 }
 0x1fc   : > { %v10171_v60 = vpop.f32.mrf.mxu1 }
 0x1fd   : > { %v10173_v19 = vpop.f32.mrf.mxu0 }
 0x1fe   : > { %v10175_v45 = vpop.f32.mrf.mxu1 }
 0x20f   : > { %v7558_v25 = vpop.f32.mrf.mxu0 }
 0x210   : > { %v10177_v35 = vpop.f32.mrf.mxu1 }
 0x211   : > { %v10179_v16 = vpop.f32.mrf.mxu0 }
 0x212   : > { %v10181_v3 = vpop.f32.mrf.mxu1 }
 0x213   : > { %v10183_v37 = vpop.f32.mrf.mxu0 }
 0x214   : > { %v10185_v0 = vpop.f32.mrf.mxu1 }
 0x215   : > { %v10187_v18 = vpop.f32.mrf.mxu0 }
 0x216   : > { %v10189_v36 = vpop.f32.mrf.mxu1 }
 0x217   : > { %v7562_v43 = vpop.f32.mrf.mxu0 }
 0x218   : > { %v10191_v53 = vpop.f32.mrf.mxu1 }
 0x219   : > { %v4185_v41 = vpop.f32.mrf.mxu0 }
 0x21a   : > { %v10193_v21 = vpop.f32.mrf.mxu1 }
 0x21b   : > { %v10195_v42 = vpop.f32.mrf.mxu0 }
 0x21c   : > { %v10197_v22 = vpop.f32.mrf.mxu1 }
 0x21d   : > { %v10199_v52 = vpop.f32.mrf.mxu0 }
 0x21e   : > { %v10201_v38 = vpop.f32.mrf.mxu1 }
 0x22f   : > { %v10203_v47 = vpop.f32.mrf.mxu0 }
 0x230   : > { %v10205_v20 = vpop.f32.mrf.mxu1 }
 0x231   : > { %v10207_v33 = vpop.f32.mrf.mxu0 }
 0x232   : > { %v10209_v11 = vpop.f32.mrf.mxu1 }
 0x233   : > { %v10211_v10 = vpop.f32.mrf.mxu0 }
 0x234   : > { %v10213_v28 = vpop.f32.mrf.mxu1 }
 0x235   : > { %10524 = vst [vmem:[#allocation2_spill] sm:$0xff] %v10213_v28  ;;  %v10215_v13 = vpop.f32.mrf.mxu0 }
 0x236   : > { %v10217_v44 = vpop.f32.mrf.mxu1 }
 0x237   : > { %10525 = vst [vmem:[#allocation3_spill] sm:$0xff] %v10217_v44  ;;  %v7610_v57 = vpop.f32.mrf.mxu0 }
 0x238   : > { %v10219_v59 = vpop.f32.mrf.mxu1 }
 0x239   : > { %v10221_v12 = vpop.f32.mrf.mxu0 }
 0x23a   : > { %v10223_v56 = vpop.f32.mrf.mxu1 }
 0x23b   : > { %v10225_v4 = vpop.f32.mrf.mxu0 }
 0x23c   : > { %v10227_v24 = vpop.f32.mrf.mxu1 }
 0x23d   : > { %10526 = vst [vmem:[#allocation4_spill] sm:$0xff] %v10227_v24  ;;  %v10229_v50 = vpop.f32.mrf.mxu0 }
 0x23e   : > { %v10231_v31 = vpop.f32.mrf.mxu1 }
 0x23f   : > { %10527 = vst [vmem:[#allocation5_spill] sm:$0xff] %v10231_v31 }
 0x24f   : > { %v10233_v46 = vpop.f32.mrf.mxu0 }
 0x250   : > { %v10235_v5 = vpop.f32.mrf.mxu1 }
 0x251   : > { %10528 = vst [vmem:[#allocation6_spill] sm:$0xff] %v10235_v5  ;;  %v10237_v23 = vpop.f32.mrf.mxu0 }
 0x252   : > { %10529 = vst [vmem:[#allocation7_spill] sm:$0xff] %v10237_v23  ;;  %v10239_v14 = vpop.f32.mrf.mxu1 }
 0x253   : > { %10530 = vst [vmem:[#allocation8_spill] sm:$0xff] %v10239_v14  ;;  %v10241_v2 = vpop.f32.mrf.mxu0 }
 0x254   : > { %10531 = vst [vmem:[#allocation9_spill] sm:$0xff] %v10241_v2  ;;  %v10243_v49 = vpop.f32.mrf.mxu1 }
 0x255   : > { %10532 = vst [vmem:[#allocation10_spill] sm:$0xff] %v10243_v49  ;;  %v10245_v34 = vpop.f32.mrf.mxu0 }
 0x256   : > { %10533 = vst [vmem:[#allocation11_spill] sm:$0xff] %v10245_v34  ;;  %v10247_v7 = vpop.f32.mrf.mxu1 }
 0x257   : > { %10534 = vst [vmem:[#allocation12_spill] sm:$0xff] %v10247_v7  ;;  %v10249_v44 = vpop.f32.mrf.mxu0  ;;  %v3840_v7 = vadd.f32 %v10149_v9, %v10131_v32  ;;  %v3845_v9 = vadd.f32 %v10169_v62, %v10145_v61 }
 0x258   : > { %v10251_v24 = vpop.f32.mrf.mxu1 }
 0x259   : > { %10535 = vst [vmem:[#allocation13_spill] sm:$0xff] %v10251_v24  ;;  %v10253_v31 = vpop.f32.mrf.mxu0  ;;  %v3844_v24 = vadd.f32 %v7514_v58, %v10141_v6  ;;  %v4029_v61 = vadd.f32 %v10171_v60, %v3845_v9  ;;  %v10547_v9 = vld [vmem:[#allocation6_spill] sm:$0xff] }
 0x25a   : > { %10536 = vst [vmem:[#allocation14_spill] sm:$0xff] %v10253_v31  ;;  %v10255_v28 = vpop.f32.mrf.mxu1 }
 0x25b   : > { %10537 = vst [vmem:[#allocation15_spill] sm:$0xff] %v10255_v28  ;;  %v10257_v5 = vpop.f32.mrf.mxu0  ;;  %v3838_v28 = vadd.f32 %v10153_v1, %v10134_v39  ;;  %v4028_v32 = vadd.f32 %v10165_v29, %v3844_v24  ;;  %v3839_v39 = vadd.f32 %v10161_v30, %v10139_v55  ;;  %v10543_v24 = vld [vmem:[#allocation7_spill] sm:$0xff] }
 0x25c   : > { %10538 = vst [vmem:[#allocation16_spill] sm:$0xff] %v10257_v5  ;;  %v10259_v23 = vpop.f32.mrf.mxu1  ;;  %v3842_v5 = vadd.f32 %v3823_v48, %v10143_v51 }
 0x25d   : > { %10539 = vst [vmem:[#allocation17_spill] sm:$0xff] %v10259_v23  ;;  %v10261_v14 = vpop.f32.mrf.mxu0  ;;  %v4024_v23 = vadd.f32 %v10151_v63, %v3840_v7  ;;  %v4022_v6 = vadd.f32 %v10155_v54, %v3838_v28  ;;  %v3843_v63 = vadd.f32 %v10173_v19, %v10147_v40  ;;  %v4206_v58 = vadd.f32 %v7562_v43, %v4028_v32  ;;  %v10546_v7 = vld [vmem:[#allocation3_spill] sm:$0xff] }
 0x25e   : > { %10540 = vst [vmem:[#allocation18_spill] sm:$0xff] %v10261_v14  ;;  %v10263_v2 = vpop.f32.mrf.mxu1  ;;  %v4026_v1 = vadd.f32 %v10167_v26, %v3842_v5  ;;  %v4023_v55 = vadd.f32 %v10163_v17, %v3839_v39  ;;  %v10548_v39 = vld [vmem:[#allocation9_spill] sm:$0xff] }
 0x25f   : > { %10541 = vst [vmem:[#allocation19_spill] sm:$0xff] %v10263_v2  ;;  %v3841_v2 = vadd.f32 %v10157_v15, %v10137_v8  ;;  %v4202_v51 = vadd.f32 %v7558_v25, %v4024_v23  ;;  %v4200_v29 = vadd.f32 %v10179_v16, %v4022_v6  ;;  %v4027_v40 = vadd.f32 %v10175_v45, %v3843_v63 }
 0x260   : > { %v4204_v54 = vadd.f32 %v4185_v41, %v4026_v1  ;;  %v4416_v62 = vadd.f32 %v10191_v53, %v4206_v58  ;;  %v4201_v60 = vadd.f32 %v10187_v18, %v4023_v55 }
 0x261   : > { %v4025_v15 = vadd.f32 %v10159_v27, %v3841_v2  ;;  %v4412_v30 = vadd.f32 %v10177_v35, %v4202_v51  ;;  %v4207_v27 = vadd.f32 %v10195_v42, %v4029_v61  ;;  %v4410_v25 = vadd.f32 %v10181_v3, %v4200_v29  ;;  %v10545_v2 = vld [vmem:[#allocation14_spill] sm:$0xff]  ;;  %v10550_v51 = vld [vmem:[#allocation13_spill] sm:$0xff]  ;;  %v10552_v29 = vld [vmem:[#allocation8_spill] sm:$0xff] }
 0x262   : > { %v4414_v35 = vadd.f32 %v10193_v21, %v4204_v54  ;;  %v4600_v43 = vadd.f32 %v7610_v57, %v4416_v62  ;;  %v4411_v42 = vadd.f32 %v10189_v36, %v4201_v60  ;;  %v10553_v54 = vld [vmem:[#allocation11_spill] sm:$0xff] }
 0x263   : > { %v4203_v26 = vadd.f32 %v10183_v37, %v4025_v15  ;;  %v4596_v16 = vadd.f32 %v10203_v47, %v4412_v30  ;;  %v4205_v37 = vadd.f32 %v10199_v52, %v4027_v40  ;;  %v4594_v53 = vadd.f32 %v10207_v33, %v4410_v25  ;;  %v10551_v63 = vld [vmem:[#allocation16_spill] sm:$0xff]  ;;  %v10554_v40 = vld [vmem:[#allocation15_spill] sm:$0xff] }
 0x264   : > { %v4417_v3 = vadd.f32 %v10197_v22, %v4207_v27  ;;  %v4598_v18 = vadd.f32 %v10221_v12, %v4414_v35  ;;  %v4595_v22 = vadd.f32 %v10215_v13, %v4411_v42  ;;  %v10544_v13 = vld [vmem:[#allocation4_spill] sm:$0xff] }
 0x265   : > { %v4413_v45 = vadd.f32 %v10185_v0, %v4203_v26  ;;  %v4767_v47 = vadd.f32 %v10205_v20, %v4596_v16  ;;  %v4415_v28 = vadd.f32 %v10201_v38, %v4205_v37  ;;  %v4771_v0 = vadd.f32 %v10219_v59, %v4600_v43  ;;  %v10542_v59 = vld [vmem:[#allocation2_spill] sm:$0xff]  ;;  %v10557_v43 = vld [vmem:[#allocation17_spill] sm:$0xff] }
 0x266   : > { %v4601_v57 = vadd.f32 %v10225_v4, %v4417_v3  ;;  %v4765_v33 = vadd.f32 %v10209_v11, %v4594_v53  ;;  %v4769_v36 = vadd.f32 %v10223_v56, %v4598_v18  ;;  %v4766_v32 = vadd.f32 %v10546_v7, %v4595_v22  ;;  %v10555_v27 = vld [vmem:[#allocation18_spill] sm:$0xff]  ;;  %v10558_v18 = vld [vmem:[#allocation12_spill] sm:$0xff] }
 0x267   : > { %v4597_v21 = vadd.f32 %v10211_v10, %v4413_v45  ;;  %v4977_v12 = vadd.f32 %v10233_v46, %v4767_v47  ;;  %v4599_v20 = vadd.f32 %v10229_v50, %v4415_v28  ;;  %v4981_v38 = vadd.f32 %v10249_v44, %v4771_v0  ;;  %v10549_v50 = vld [vmem:[#allocation5_spill] sm:$0xff]  ;;  %v10556_v16 = vld [vmem:[#allocation10_spill] sm:$0xff]  ;;  %v10559_v28 = vld [vmem:[#allocation19_spill] sm:$0xff] }
 0x268   : > { %v4975_v11 = vadd.f32 %v10543_v24, %v4765_v33  ;;  %v4772_v23 = vadd.f32 %v10544_v13, %v4601_v57  ;;  %v4979_v46 = vadd.f32 %v10545_v2, %v4769_v36  ;;  %v4976_v55 = vadd.f32 %v10553_v54, %v4766_v32 }
 0x269   : > { %v4768_v4 = vadd.f32 %v10542_v59, %v4597_v21  ;;  %v5161_v6 = vadd.f32 %v10547_v9, %v4977_v12  ;;  %v4770_v44 = vadd.f32 %v10549_v50, %v4599_v20  ;;  %v5165_v1 = vadd.f32 %v10550_v51, %v4981_v38 }
 0x26a   : > { %v4982_v58 = vadd.f32 %v10551_v63, %v4772_v23  ;;  %v5159_v61 = vadd.f32 %v10552_v29, %v4975_v11  ;;  %v5163_v62 = vadd.f32 %v10554_v40, %v4979_v46  ;;  %v5160_v42 = vadd.f32 %v10558_v18, %v4976_v55 }
 0x26b   : > { %v4978_v56 = vadd.f32 %v10548_v39, %v4768_v4  ;;  %v4980_v25 = vadd.f32 %v10555_v27, %v4770_v44 }
 0x26c   : > { %v5166_v45 = vadd.f32 %v10557_v43, %v4982_v58 }
 0x26d   : > { %v5162_v35 = vadd.f32 %v10556_v16, %v4978_v56  ;;  %v5164_v0 = vadd.f32 %v10559_v28, %v4980_v25 }
 0x26f   : > { %v10265_v49 = vpop.f32.mrf.mxu0 }
 0x270   : > { %v10269_v34 = vpop.f32.mrf.mxu1  ;;  %v5332_v30 = vadd.f32 %v10265_v49, %v5161_v6 }
 0x271   : > { %v10275_v31 = vpop.f32.mrf.mxu0 }
 0x272   : > { %v10280_v14 = vpop.f32.mrf.mxu1  ;;  %v5330_v37 = vadd.f32 %v10275_v31, %v5159_v61  ;;  %v5542_v47 = vadd.f32 %v10269_v34, %v5332_v30  ;;  %v6781_v31 = vld [vmem:[%s10406_s4] ss:$0 sm:$0xff] }
 0x273   : > { %v10291_v8 = vpop.f32.mrf.mxu0 }
 0x274   : > { %v10295_v48 = vpop.f32.mrf.mxu1  ;;  %v5333_v49 = vadd.f32 %v10291_v8, %v5162_v35  ;;  %v5540_v22 = vadd.f32 %v10280_v14, %v5330_v37 }
 0x275   : > { %v10304_v19 = vpop.f32.mrf.mxu0 }
 0x276   : > { %v10309_v17 = vpop.f32.mrf.mxu1  ;;  %v5331_v12 = vadd.f32 %v10304_v19, %v5160_v42 }
 0x277   : > { %v7706_v41 = vpop.f32.mrf.mxu0 }
 0x278   : > { %v7730_v52 = vpop.f32.mrf.mxu1  ;;  %v5336_v60 = vadd.f32 %v7706_v41, %v5165_v1  ;;  %v5541_v13 = vadd.f32 %v10309_v17, %v5331_v12 }
 0x279   : > { %v5315_v10 = vpop.f32.mrf.mxu0 }
 0x27a   : > { %v5525_v5 = vpop.f32.mrf.mxu1  ;;  %v5334_v53 = vadd.f32 %v5315_v10, %v5163_v62  ;;  %v5546_v41 = vadd.f32 %v7730_v52, %v5336_v60  ;;  %v5543_v10 = vadd.f32 %v10295_v48, %v5333_v49 }
 0x27b   : > { %v7707_v15 = vpop.f32.mrf.mxu0 }
 0x27c   : > { %v7731_v26 = vpop.f32.mrf.mxu1  ;;  %v5337_v57 = vadd.f32 %v7707_v15, %v5166_v45  ;;  %v5544_v34 = vadd.f32 %v5525_v5, %v5334_v53 }
 0x27d   : > { %v5318_v3 = vpop.f32.mrf.mxu0 }
 0x27e   : > { %v5528_v21 = vpop.f32.mrf.mxu1  ;;  %v5335_v38 = vadd.f32 %v5318_v3, %v5164_v0  ;;  %v5547_v19 = vadd.f32 %v7731_v26, %v5337_v57 }
 0x280   : > { %v5545_v7 = vadd.f32 %v5528_v21, %v5335_v38 }
 0x28f   : > { %v7750_v33 = vpop.f32.mrf.mxu0 }
 0x290   : > { %v5726_v36 = vadd.f32 %v7750_v33, %v5542_v47  ;;  %v7754_v20 = vpop.f32.mrf.mxu1 }
 0x291   : > { %v5730_v8 = vadd.f32 %v7754_v20, %v5546_v41  ;;  %v5693_v52 = vpop.f32.mrf.mxu0 }
 0x292   : > { %v5741_v59 = vadd.f32 %v6781_v31, %v5726_v36  ;;  %v5724_v4 = vadd.f32 %v5693_v52, %v5540_v22  ;;  %v5709_v14 = vpop.f32.mrf.mxu1 }
 0x293   : > { %v5745_v24 = vadd.f32 %v6781_v31, %v5730_v8  ;;  %v5728_v11 = vadd.f32 %v5709_v14, %v5544_v34  ;;  %v7751_v5 = vpop.f32.mrf.mxu0 }
 0x294   : > { %5749 = vst [vmem:[%s10367_s21 + $0x10] sm:$0xff] %v5741_v59  ;;  %v5739_v23 = vadd.f32 %v6781_v31, %v5724_v4  ;;  %v5727_v2 = vadd.f32 %v7751_v5, %v5543_v10  ;;  %v7755_v46 = vpop.f32.mrf.mxu1  ;;  %v5771_v15 = vmul.f32 %v5741_v59, %v5741_v59 }
 0x295   : > { %5753 = vst [vmem:[%s10367_s21 + $0x30] sm:$0xff] %v5745_v24  ;;  %v5743_v48 = vadd.f32 %v6781_v31, %v5728_v11  ;;  %v5731_v32 = vadd.f32 %v7755_v46, %v5547_v19  ;;  %v5696_v9 = vpop.f32.mrf.mxu0  ;;  %v5775_v16 = vmul.f32 %v5745_v24, %v5745_v24 }
 0x296   : > { %5747 = vst [vmem:[%s10367_s21] sm:$0xff] %v5739_v23  ;;  %v5742_v6 = vadd.f32 %v6781_v31, %v5727_v2  ;;  %v5725_v39 = vadd.f32 %v5696_v9, %v5541_v13  ;;  %v5712_v56 = vpop.f32.mrf.mxu1  ;;  %v5769_v1 = vmul.f32 %v5739_v23, %v5739_v23 }
 0x297   : > { %5751 = vst [vmem:[%s10367_s21 + $0x20] sm:$0xff] %v5743_v48  ;;  %v5746_v50 = vadd.f32 %v6781_v31, %v5731_v32  ;;  %v5729_v17 = vadd.f32 %v5712_v56, %v5545_v7  ;;  %v5773_v26 = vmul.f32 %v5743_v48, %v5743_v48 }
 0x298   : > { %5750 = vst [vmem:[%s10367_s21 + $0x18] sm:$0xff] %v5742_v6  ;;  %v5740_v44 = vadd.f32 %v6781_v31, %v5725_v39  ;;  %v5772_v54 = vmul.f32 %v5742_v6, %v5742_v6 }
 0x299   : > { %5754 = vst [vmem:[%s10367_s21 + $0x38] sm:$0xff] %v5746_v50  ;;  %v5744_v51 = vadd.f32 %v6781_v31, %v5729_v17  ;;  %v5776_v43 = vmul.f32 %v5746_v50, %v5746_v50 }
 0x29a   : > { %5748 = vst [vmem:[%s10367_s21 + $0x8] sm:$0xff] %v5740_v44  ;;  %v5755_v63 = vadd.f32 %v5740_v44, %v5739_v23  ;;  %v5770_v58 = vmul.f32 %v5740_v44, %v5740_v44 }
 0x29b   : > { %5752 = vst [vmem:[%s10367_s21 + $0x28] sm:$0xff] %v5744_v51  ;;  %v5774_v25 = vmul.f32 %v5744_v51, %v5744_v51 }
 0x29c   : > { %v5756_v29 = vadd.f32 %v5755_v63, %v5741_v59  ;;  %v5777_v61 = vadd.f32 %v5770_v58, %v5769_v1 }
 0x29e   : > { %v5778_v55 = vadd.f32 %v5777_v61, %v5771_v15  ;;  %v5757_v30 = vadd.f32 %v5756_v29, %v5742_v6 }
 0x2a0   : > { %v5758_v40 = vadd.f32 %v5757_v30, %v5743_v48  ;;  %v5779_v62 = vadd.f32 %v5778_v55, %v5772_v54 }
 0x2a2   : > { %v5759_v27 = vadd.f32 %v5758_v40, %v5744_v51  ;;  %v5780_v60 = vadd.f32 %v5779_v62, %v5773_v26 }
 0x2a4   : > { %v5760_v35 = vadd.f32 %v5759_v27, %v5745_v24  ;;  %v5781_v37 = vadd.f32 %v5780_v60, %v5774_v25 }
 0x2a6   : > { %v5761_v45 = vadd.f32 %v5760_v35, %v5746_v50  ;;  %v5782_v53 = vadd.f32 %v5781_v37, %v5775_v16 }
 0x2a8   : > { %v5762_v3 = vrot.slane %v5761_v45, 4  ;;  %v5783_v18 = vadd.f32 %v5782_v53, %v5776_v43 }
 0x2aa   : > { %v5763_v42 = vadd.f32 %v5762_v3, %v5761_v45  ;;  %v5784_v47 = vrot.slane %v5783_v18, 4 }
 0x2ac   : > { %v5764_v49 = vrot.slane %v5763_v42, 2  ;;  %v5785_v21 = vadd.f32 %v5784_v47, %v5783_v18 }
 0x2ae   : > { %v5765_v28 = vadd.f32 %v5764_v49, %v5763_v42  ;;  %v5786_v0 = vrot.slane %v5785_v21, 2 }
 0x2b0   : > { %v5766_v41 = vrot.slane %v5765_v28, 1  ;;  %v5787_v57 = vadd.f32 %v5786_v0, %v5785_v21 }
 0x2b2   : > { %v5767_v33 = vadd.f32 %v5766_v41, %v5765_v28  ;;  %v5788_v31 = vrot.slane %v5787_v57, 1 }
 0x2b4   : > { %5768 = vst [vmem:[%s426_s11] sm:$0x1] %v5767_v33  ;;  %v5789_v22 = vadd.f32 %v5788_v31, %v5787_v57 }
 0x2b6   : > { %5790 = vst [vmem:[%s433_s15] sm:$0x1] %v5789_v22 }
 0x2b7 PF: > { %s18_s28 = sadd.s32 1, %s8116_s28   ;;  %s10560_s24 = smov %s8108_s26 }
 0x2b8   : > { %p15_p10 = scmp.ge.s32.totalorder %s18_s28, 18   ;;  %s10561_s25 = smov %s8112_s27 }
 0x2b9   : > { %s10562_s26 = smov %s10565_s29  ;;  %s10563_s27 = smov %s10569_s30 }
 0x2ba   :  { %17 = sbr.rel (!%p15_p10) target bundleno = 3 (0x3), region = 126 }

// kernel: upblock_forward.6
= control target key start
LH: loop header
LB: loop body
LE: loop exit
PB: predicated region body
PF: predicated region fallthrough
CT: control target
= control target key end

     0   :  { %s11898_s24 = smov 0   ;;  %s11900_s25 = smov 0   ;;  %s15453_s0 = inlined_call_operand.vmem [shape: bf16[2,10,82,256], index: 0, kind: input, shape index: {}, may-alias: {0,1,2}]   ;;  %s15454_s1 = inlined_call_operand.vmem [shape: bf16[2,10,82,256], index: 1, kind: input, shape index: {}, may-alias: {0,1,2}]   ;;  %s15455_s2 = inlined_call_operand.vmem [shape: bf16[2,10,82,256], index: 2, kind: input, shape index: {}, may-alias: {0,1,2}]   ;;  %s15456_s3 = inlined_call_operand.vmem [shape: bf16[27,256,128], index: 3, kind: input, shape index: {}]   ;;  %s15457_s4 = inlined_call_operand.vmem [shape: f32[1,128], index: 4, kind: input, shape index: {}]   ;;  %s15458_s5 = inlined_call_operand.vmem [shape: f32[2,8,64,128], index: 5, kind: output, shape index: {0}]   ;;  %s15459_s6 = inlined_call_operand.vmem [shape: f32[2,8,1,128], index: 6, kind: output, shape index: {1}]   ;;  %s15460_s7 = inlined_call_operand.vmem [shape: f32[2,8,1,128], index: 7, kind: output, shape index: {2}]  }
   0x1   :  { %s11902_s26 = smov 0   ;;  %s11904_s27 = smov 0  }
   0x2   :  { %s11906_s28 = smov 0  }
   0x3 LB: > { %s27_s29 = sadd.s32 1, %s11847_s26  ;;  %s30_s30 = sadd.s32 1, %s11851_s27  ;;  %s11855_s28 = sphi %s11906_s28, %s18_s28   ;;  %s11851_s27 = sphi %s11904_s27, %s15621_s27   ;;  %s11847_s26 = sphi %s11902_s26, %s15620_s26   ;;  %s11843_s25 = sphi %s11900_s25, %s15619_s25   ;;  %s11839_s24 = sphi %s11898_s24, %s15618_s24  }
   0x4   : > { %p28_p0 = scmp.ge.s32.totalorder %s27_s29, 8  ;;  %p8615_p1 = scmp.ge.s32.totalorder %s11855_s28, 1 }
   0x5   : > { %p306_p2 = scmp.lt.s32.totalorder %s11855_s28, 17 }
   0x6   : > { %s15623_s29 = smov (%p28_p0, %s27_s29), 0  ;;  %s15625_s30 = smov (!%p28_p0, %s30_s30), %s11851_s27 }
   0x7   : > { %p307_p3 = pnand %p8615_p1, %p306_p2  ;;  %p32_p4 = scmp.ge.s32.totalorder %s15625_s30, 2 }
   0x9   : > { %s15627_s30 = smov (%p32_p4, %s15625_s30), 0  ;;  %310 = sbr.rel (%p307_p3) target bundleno = 744 (0x2e8), region = 40 }
   0xe   : > { %v11284_v0 = vld [vmem:[%s15456_s3 + $0xf8] sm:$0xff]   ;;  %v11288_v4 = vld [vmem:[%s15456_s3 + $0xf0] sm:$0xff]   ;;  %p380_p5 = scmp.lt.s32.totalorder %s11843_s25, 1  ;;  %v11292_v8 = vld [vmem:[%s15456_s3 + $0xe8] sm:$0xff]   ;;  %p382_p6 = scmp.lt.s32.totalorder %s11839_s24, 9  ;;  %v437_v11 = vlaneseq }
   0xf   : > { %v11285_v1 = vld [vmem:[%s15456_s3 + $0x78] sm:$0xff]   ;;  %10143 = vmatprep.subr.bf16.mxu0 %v11284_v0  ;;  %v11289_v5 = vld [vmem:[%s15456_s3 + $0x70] sm:$0xff]   ;;  %v11293_v9 = vld [vmem:[%s15456_s3 + $0x68] sm:$0xff]   ;;  %vm15461_vm6 = vsmask.f32 7424  ;;  %s389_s8 = sadd.s32 1, %s11839_s24 }
  0x10   : > { %v11286_v2 = vld [vmem:[%s15456_s3 + $0xb8] sm:$0xff]   ;;  %10183 = vmatprep.subr.bf16.mxu1 %v11285_v1  ;;  %v11290_v6 = vld [vmem:[%s15456_s3 + $0xb0] sm:$0xff]   ;;  %v11294_v10 = vld [vmem:[%s15456_s3 + $0xa8] sm:$0xff]   ;;  %s15629_s25 = smov (!%p380_p5, %s11843_s25), 1  ;;  %v11983_v16 = vshrl.u32 %v437_v11, 7  ;;  %p12782_p7 = scmp.lt.s32.totalorder %s389_s8, 9 }
  0x11   : > { %v11287_v3 = vld [vmem:[%s15456_s3 + $0x38] sm:$0xff]   ;;  %10144 = vmatpush3.bf16.msra.mxu0 %v11286_v2  ;;  %v11291_v7 = vld [vmem:[%s15456_s3 + $0x30] sm:$0xff]   ;;  %v11295_v12 = vld [vmem:[%s15456_s3 + $0x28] sm:$0xff]   ;;  %s383_s18 = scalar_select %p382_p6, %s11839_s24, 9 }
  0x12   : > { %10184 = vmatpush3.bf16.msra.mxu1 %v11287_v3  ;;  %10145 = vmatprep.subr.bf16.mxu0 %v11288_v4  ;;  %v11296_v13 = vld [vmem:[%s15456_s3 + $0xe0] sm:$0xff]   ;;  %s11989_s9 = smul.u32 220, %s15629_s25  ;;  %v11300_v18 = vld [vmem:[%s15456_s3 + $0xd8] sm:$0xff]   ;;  %v439_v20 = vadd.s32 8, %v11983_v16  ;;  %v11304_v23 = vld [vmem:[%s15456_s3 + $0xd0] sm:$0xff]   ;;  %v450_v24 = vand.u32 7, %v11983_v16 }
  0x13   : > { %10185 = vmatprep.subr.bf16.mxu1 %v11289_v5  ;;  %v11297_v14 = vld [vmem:[%s15456_s3 + $0x60] sm:$0xff]   ;;  %s11239_s12 = smul.u32 22, %s383_s18  ;;  %v11301_v19 = vld [vmem:[%s15456_s3 + $0x58] sm:$0xff]   ;;  %v11305_v25 = vld [vmem:[%s15456_s3 + $0x50] sm:$0xff]   ;;  %v440_v34 = vadd.s32 16, %v11983_v16  ;;  %v441_v36 = vadd.s32 24, %v11983_v16 }
  0x14   : > { %v11298_v15 = vld [vmem:[%s15456_s3 + $0xa0] sm:$0xff]   ;;  %v11302_v21 = vld [vmem:[%s15456_s3 + $0x98] sm:$0xff]   ;;  %v457_v26 = vand.u32 7, %v439_v20  ;;  %v11306_v27 = vld [vmem:[%s15456_s3 + $0x90] sm:$0xff]   ;;  %vm12021_vm0 = vcmp.ne.s32.totalorder %v450_v24, 0  ;;  %vm12054_vm2 = vcmp.ne.s32.totalorder %v450_v24, 7 }
  0x15   : > { %10146 = vmatpush3.bf16.msra.mxu0 %v11290_v6  ;;  %v11299_v17 = vld [vmem:[%s15456_s3 + $0x20] sm:$0xff]   ;;  %v11303_v22 = vld [vmem:[%s15456_s3 + $0x18] sm:$0xff]   ;;  %s386_s21 = sadd.s32 %s11989_s9, %s11239_s12  ;;  %v11307_v28 = vld [vmem:[%s15456_s3 + $0x10] sm:$0xff]   ;;  %v464_v38 = vand.u32 7, %v440_v34  ;;  %v471_v40 = vand.u32 7, %v441_v36  ;;  %v12121_v61 = vadd.s32 32, %v11983_v16 }
  0x16   : > { %10186 = vmatpush3.bf16.msra.mxu1 %v11291_v7  ;;  %10147 = vmatprep.subr.bf16.mxu0 %v11292_v8  ;;  %s8616_s14 = sshll.u32 %s386_s21, 2  ;;  %v11308_v29 = vld [vmem:[%s15456_s3 + $0xc8] sm:$0xff]   ;;  %vm12028_vm1 = vcmp.ne.s32.totalorder %v457_v26, 0  ;;  %v11312_v37 = vld [vmem:[%s15456_s3 + $0xc0] sm:$0xff]   ;;  %vm12061_vm3 = vcmp.ne.s32.totalorder %v457_v26, 7  ;;  %vm12087_vm7 = vmpackc.low %vm12021_vm0, %vm12021_vm0  ;;  %v11857_v5 = vmov 0  }
  0x17   : > { %10187 = vmatprep.subr.bf16.mxu1 %v11293_v9  ;;  %v11309_v31 = vld [vmem:[%s15456_s3 + $0x48] sm:$0xff]   ;;  %v11313_v39 = vld [vmem:[%s15456_s3 + $0x40] sm:$0xff]   ;;  %s12049_s12 = scalar_lea.vmem %s15453_s0, %s8616_s14  ;;  %vm12072_vm4 = vcmp.ne.s32.totalorder %v464_v38, 0  ;;  %vm12076_vm5 = vcmp.ne.s32.totalorder %v471_v40, 0  ;;  %vm12092_vm8 = vcmp.ne.s32.totalorder %v464_v38, 7  ;;  %vm12103_vm9 = vmpackc.low %vm12028_vm1, %vm12028_vm1  ;;  %vm12116_vm10 = vcmp.ne.s32.totalorder %v471_v40, 7 }
  0x18   : > { %v11310_v33 = vld [vmem:[%s15456_s3 + $0x88] sm:$0xff]   ;;  %v11314_v41 = vld [vmem:[%s15456_s3 + $0x80] sm:$0xff]   ;;  %v12070_v47 = vld [vmem:[%s12049_s12 + $0x10] sm:$0xff]  ;;  %s15631_s8 = smov (!%p12782_p7, %s389_s8), 9  ;;  %s400_s22 = sadd.s32 2, %s11839_s24 }
  0x19   : > { %10148 = vmatpush3.bf16.msra.mxu0 %v11294_v10  ;;  %v11311_v35 = vld [vmem:[%s15456_s3 + $0x8] sm:$0xff]   ;;  %v11315_v43 = vld [vmem:[%s15456_s3] sm:$0xff]   ;;  %v12081_v50 = vld [vmem:[%s12049_s12 + $0x18] sm:$0xff]  ;;  %s11241_s23 = smul.u32 22, %s15631_s8  ;;  %p14093_p8 = scmp.lt.s32.totalorder %s400_s22, 9 }
  0x1a   : > { %10188 = vmatpush3.bf16.msra.mxu1 %v11295_v12  ;;  %10149 = vmatprep.subr.bf16.mxu0 %v11296_v13  ;;  %v558_v45 = vld [vmem:[%s12049_s12] sm:$0xff]  ;;  %v12067_v46 = vld [vmem:[%s12049_s12 + $0x8] sm:$0xff]  ;;  %v12098_v55 = vcombine.high %v12070_v47, %v12081_v50  ;;  %v12111_v58 = vcombine.low %v12070_v47, %v12081_v50  ;;  %v11320_v59 = vld [vmem:[%s15456_s3 + $0x178] sm:$0xff]   ;;  %p413_p9 = scmp.lt.s32.totalorder %s11839_s24, 7 }
  0x1b   : > { %10189 = vmatprep.subr.bf16.mxu1 %v11297_v14  ;;  %v8657_v51 = vcombine.high %v558_v45, %v12067_v46  ;;  %v8656_v53 = vcombine.low %v558_v45, %v12067_v46  ;;  %v590_v57 = vsel %vm12087_vm7, %v558_v45, 0  ;;  %v591_v0 = vsel %vm12103_vm9, %v12067_v46, 0  ;;  %vm1161_vm11 = vmpackc.low %vm12054_vm2, %vm12054_vm2  ;;  %v11321_v7 = vld [vmem:[%s15456_s3 + $0x1f8] sm:$0xff]   ;;  %v11324_v26 = vld [vmem:[%s15456_s3 + $0x170] sm:$0xff]   ;;  %s12980_s16 = sadd.s32 %s11241_s23, %s11989_s9  ;;  %s15633_s22 = smov (!%p14093_p8, %s400_s22), 9 }
  0x1c   : > { %v722_v2 = vshll.u32 %v12098_v55, 16  ;;  %v8682_v3 = vcombine.low %v590_v57, %v591_v0  ;;  %v8683_v4 = vcombine.high %v590_v57, %v591_v0  ;;  %vm1162_vm12 = vmpackc.low %vm12061_vm3, %vm12061_vm3  ;;  %v12134_v6 = vsel %vm1161_vm11, 65537, %v11857_v5  ;;  %v11326_v32 = vld [vmem:[%s15456_s3 + $0x130] sm:$0xff]   ;;  %v12201_v36 = vld [vmem:[%s12049_s12 + $0x28] sm:$0xff]  ;;  %s8617_s18 = sshll.u32 %s12980_s16, 2  ;;  %s11242_s15 = smul.u32 22, %s15633_s22 }
  0x1d   : > { %10150 = vmatpush3.bf16.msra.mxu0 %v11298_v15  ;;  %v715_v62 = vshrl.u32 %v8657_v51, 16  ;;  %v717_v63 = vshll.u32 %v8657_v51, 16  ;;  %v703_v1 = vshrl.u32 %v8656_v53, 16  ;;  %v12140_v9 = vsel %vm1162_vm12, 65537, %v11857_v5  ;;  %vm12146_vm13 = vmpackc.low %vm12072_vm4, %vm12072_vm4  ;;  %v11327_v34 = vld [vmem:[%s15456_s3 + $0x1b0] sm:$0xff]   ;;  %v11330_v49 = vld [vmem:[%s15456_s3 + $0x168] sm:$0xff]   ;;  %s13067_s21 = scalar_lea.vmem %s15454_s1, %s8617_s18 }
  0x1e   : > { %10190 = vmatpush3.bf16.msra.mxu1 %v11299_v17  ;;  %10151 = vmatprep.subr.bf16.mxu0 %v11300_v18  ;;  %v1180_v10 = vrot.slane %v12134_v6, 7  ;;  %v705_v11 = vshll.u32 %v8656_v53, 16  ;;  %v724_v13 = vrot.slane %v722_v2, 1  ;;  %v1182_v14 = vrot.slane %v12140_v9, 7  ;;  %vm12155_vm14 = vmpackc.low %vm12076_vm5, %vm12076_vm5  ;;  %v11331_v57 = vld [vmem:[%s15456_s3 + $0x1e8] sm:$0xff]   ;;  %v11334_v0 = vld [vmem:[%s15456_s3 + $0x160] sm:$0xff]   ;;  %s14229_s13 = sadd.s32 %s11242_s15, %s11989_s9 }
  0x1f   : > { %10191 = vmatprep.subr.bf16.mxu1 %v11301_v19  ;;  %v719_v8 = vrot.slane %v717_v63, 1  ;;  %1111 = vmatprep.mubr.bf16.mxu1 %v8683_v4  ;;  %v710_v15 = vshll.u32 %v12111_v58, 16  ;;  %v12160_v18 = vadd.s32 40, %v11983_v16  ;;  %vm1163_vm15 = vmpackc.low %vm12092_vm8, %vm12092_vm8  ;;  %v734_v30 = vshrl.u32 %v12098_v55, 16  ;;  %v11333_v63 = vld [vmem:[%s15456_s3 + $0x1a8] sm:$0xff]   ;;  %v11357_v6 = vld [vmem:[%s15456_s3 + $0x180] sm:$0xff]  }
  0x20   : > { %v12164_v20 = vrot.slane %v1180_v10, 4  ;;  %v12212_v38 = vsel %vm1163_vm15, 65537, %v11857_v5  ;;  %vm1164_vm0 = vmpackc.low %vm12116_vm10, %vm12116_vm10  ;;  %v478_v4 = vand.u32 7, %v12121_v61  ;;  %v12263_v61 = vld [vmem:[%s12049_s12 + $0x38] sm:$0xff]  ;;  %s8618_s15 = sshll.u32 %s14229_s13, 2  ;;  %s15635_s24 = smov (!%p413_p9, %s11839_s24), 7 }
  0x21   : > { %10152 = vmatpush3.bf16.msra.mxu0 %v11302_v21  ;;  %v720_v19 = vor.u32 %v719_v8, %v715_v62  ;;  %v707_v21 = vrot.slane %v705_v11, 1  ;;  %v712_v24 = vrot.slane %v710_v15, 1  ;;  %v1185_v42 = vrot.slane %v12212_v38, 7  ;;  %v11337_v11 = vld [vmem:[%s15456_s3 + $0x1a0] sm:$0xff]   ;;  %s14262_s13 = scalar_lea.vmem %s15455_s2, %s8618_s15  ;;  %s8619_s15 = sshll.u32 %s15635_s24, 3 }
  0x22   : > { %10192 = vmatpush3.bf16.msra.mxu1 %v11303_v22  ;;  %10153 = vmatprep.subr.bf16.mxu0 %v11304_v23  ;;  %v11322_v22 = vld [vmem:[%s15456_s3 + $0x138] sm:$0xff]   ;;  %v12174_v23 = vrot.slane %v1182_v14, 4  ;;  %v736_v44 = vor.u32 %v734_v30, %v724_v13  ;;  %v12224_v45 = vsel %vm1164_vm0, 65537, %v11857_v5  ;;  %v485_v8 = vand.u32 7, %v12160_v18  ;;  %s8622_s18 = sshll.u32 %s15629_s25, 3 }
  0x23   : > { %10193 = vmatprep.subr.bf16.mxu1 %v11305_v25  ;;  %v11323_v25 = vld [vmem:[%s15456_s3 + $0x1b8] sm:$0xff]   ;;  %v1188_v53 = vrot.slane %v12224_v45, 7  ;;  %vm546_vm1 = vcmp.ne.s32.totalorder %v478_v4, 0  ;;  %vm12258_vm2 = vcmp.ne.s32.totalorder %v478_v4, 7  ;;  %s425_s10 = sadd.s32 %s8622_s18, %s15635_s24 }
  0x24   : > { %vm547_vm3 = vcmp.ne.s32.totalorder %v485_v8, 0  ;;  %vm12265_vm4 = vcmp.ne.s32.totalorder %v485_v8, 7  ;;  %vm12269_vm5 = vmpackc.low %vm546_vm1, %vm546_vm1  ;;  %s426_s19 = scalar_lea.vmem %s15459_s6, %s425_s10 }
  0x25   : > { %10154 = vmatpush3.bf16.msra.mxu0 %v11306_v27  ;;  %v725_v27 = vsel %vm15461_vm6, %v720_v19, %v724_v13  ;;  %v12256_v13 = vld [vmem:[%s12049_s12 + $0x30] sm:$0xff]  ;;  %vm12275_vm8 = vmpackc.low %vm547_vm3, %vm547_vm3 }
  0x26   : > { %10194 = vmatpush3.bf16.msra.mxu1 %v11307_v28  ;;  %10155 = vmatprep.subr.bf16.mxu0 %v11308_v29  ;;  %v708_v28 = vor.u32 %v707_v21, %v703_v1  ;;  %v11325_v29 = vld [vmem:[%s15456_s3 + $0x1f0] sm:$0xff]   ;;  %v595_v30 = vsel %vm12275_vm8, %v12201_v36, 0  ;;  %vm1165_vm10 = vmpackc.low %vm12258_vm2, %vm12258_vm2 }
  0x27   : > { %10195 = vmatprep.subr.bf16.mxu1 %v11309_v31  ;;  %910 = vmatprep.mubr.bf16.mxu0 %v725_v27  ;;  %v11340_v27 = vld [vmem:[%s15456_s3 + $0x158] sm:$0xff]   ;;  %vm1166_vm11 = vmpackc.low %vm12265_vm4, %vm12265_vm4  ;;  %vm1177_vm4 = vcmask 1040384  }
  0x28   : > { %v713_v31 = vsel %vm15461_vm6, %v708_v28, %v712_v24  ;;  %v444_v28 = vadd.s32 48, %v11983_v16 }
  0x29   : > { %10156 = vmatpush3.bf16.msra.mxu0 %v11310_v33  ;;  %v592_v33 = vsel %vm12146_vm13, %v12070_v47, 0 }
  0x2a   : > { %10196 = vmatpush3.bf16.msra.mxu1 %v11311_v35  ;;  %10157 = vmatprep.subr.bf16.mxu0 %v11312_v37  ;;  %v12198_v35 = vld [vmem:[%s12049_s12 + $0x20] sm:$0xff]  ;;  %v593_v37 = vsel %vm12155_vm14, %v12081_v50, 0 }
  0x2b   : > { %10197 = vmatprep.subr.bf16.mxu1 %v11313_v39  ;;  %v726_v39 = vshrl.u32 %v12111_v58, 16  ;;  %v8661_v40 = vcombine.high %v12198_v35, %v12201_v36  ;;  %v8684_v48 = vcombine.low %v592_v33, %v593_v37  ;;  %v11332_v58 = vld [vmem:[%s15456_s3 + $0x128] sm:$0xff]  }
  0x2d   : > { %10158 = vmatpush3.bf16.msra.mxu0 %v11314_v41  ;;  %v8685_v41 = vcombine.high %v592_v33, %v593_v37  ;;  %v738_v51 = vshll.u32 %v8661_v40, 16  ;;  %v728_v54 = vor.u32 %v726_v39, %v712_v24  ;;  %v12299_v37 = vsel %vm1165_vm10, 65537, %v11857_v5 }
  0x2e   : > { %10198 = vmatpush3.bf16.msra.mxu1 %v11315_v43  ;;  %10223 = vmatprep.subr.bf16.mxu0 %v11320_v59  ;;  %v8660_v43 = vcombine.low %v12198_v35, %v12201_v36  ;;  %v750_v59 = vshrl.u32 %v8661_v40, 16  ;;  %v11341_v40 = vld [vmem:[%s15456_s3 + $0x1d8] sm:$0xff]  }
  0x2f   : > { %10263 = vmatprep.subr.bf16.mxu1 %v11321_v7  ;;  %v740_v60 = vrot.slane %v738_v51, 1  ;;  %v11336_v7 = vld [vmem:[%s15456_s3 + $0x120] sm:$0xff]  }
  0x30   : > { %911 = vmatmul.mubr.bf16.vlgmr.msra.gmra.mxu0 %v713_v31  ;;  %v730_v55 = vshll.u32 %v8660_v43, 16  ;;  %v742_v21 = vshrl.u32 %v8660_v43, 16 }
  0x31   : > { %1112 = vmatmul.mubr.bf16.vlgmr.msra.gmra.mxu1 %v8682_v3  ;;  %10224 = vmatpush3.bf16.msra.mxu0 %v11322_v22  ;;  %v741_v1 = vsel %vm15461_vm6, %v736_v44, %v740_v60  ;;  %v11335_v3 = vld [vmem:[%s15456_s3 + $0x1e0] sm:$0xff]   ;;  %v8663_v22 = vcombine.high %v12256_v13, %v12263_v61  ;;  %v11342_v44 = vld [vmem:[%s15456_s3 + $0x118] sm:$0xff]  }
  0x32   : > { %10264 = vmatpush3.bf16.msra.mxu1 %v11323_v25  ;;  %10225 = vmatprep.subr.bf16.mxu0 %v11324_v26  ;;  %v732_v62 = vrot.slane %v730_v55, 1  ;;  %v594_v25 = vsel %vm12269_vm5, %v12198_v35, 0  ;;  %v8662_v26 = vcombine.low %v12256_v13, %v12263_v61  ;;  %v11344_v55 = vld [vmem:[%s15456_s3 + $0x150] sm:$0xff]  }
  0x33   : > { %10265 = vmatprep.subr.bf16.mxu1 %v11325_v29  ;;  %1119 = vmatprep.mubr.bf16.mxu1 %v8685_v41  ;;  %v752_v29 = vor.u32 %v750_v59, %v740_v60  ;;  %v754_v33 = vshll.u32 %v8663_v22, 16  ;;  %v12305_v41 = vsel %vm1166_vm11, 65537, %v11857_v5  ;;  %v8686_v43 = vcombine.low %v594_v25, %v595_v30  ;;  %v11345_v59 = vld [vmem:[%s15456_s3 + $0x1d0] sm:$0xff]  }
  0x34   : > { %v733_v2 = vsel %vm15461_vm6, %v728_v54, %v732_v62  ;;  %918 = vmatprep.mubr.bf16.mxu0 %v741_v1  ;;  %v744_v31 = vor.u32 %v742_v21, %v732_v62  ;;  %v746_v39 = vshll.u32 %v8662_v26, 16  ;;  %v1194_v51 = vrot.slane %v12305_v41, 7  ;;  %v11346_v62 = vld [vmem:[%s15456_s3 + $0x110] sm:$0xff]   ;;  %v11371_v41 = vld [vmem:[%s15456_s3 + $0x2e0] sm:$0xff]  }
  0x35   : > { %10226 = vmatpush3.bf16.msra.mxu0 %v11326_v32  ;;  %v445_v32 = vadd.s32 56, %v11983_v16  ;;  %v1191_v16 = vrot.slane %v12299_v37, 7  ;;  %v766_v60 = vshrl.u32 %v8663_v22, 16  ;;  %v758_v4 = vshrl.u32 %v8662_v26, 16 }
  0x36   : > { %10266 = vmatpush3.bf16.msra.mxu1 %v11327_v34  ;;  %10227 = vmatprep.subr.bf16.mxu0 %v11330_v49  ;;  %v8687_v34 = vcombine.high %v594_v25, %v595_v30  ;;  %v756_v49 = vrot.slane %v754_v33, 1  ;;  %v748_v54 = vrot.slane %v746_v39, 1  ;;  %v11351_v30 = vld [vmem:[%s15456_s3 + $0x1c8] sm:$0xff]   ;;  %v1491_v37 = vsel %vm12155_vm14, %v12198_v35, 0 }
  0x37   : > { %10267 = vmatprep.subr.bf16.mxu1 %v11331_v57  ;;  %v499_v1 = vand.u32 7, %v445_v32 }
  0x38   : > { %919 = vmatmul.mubr.bf16.gmra.mxu0 %v733_v2  ;;  %v757_v57 = vsel %vm15461_vm6, %v752_v29, %v756_v49  ;;  %v12330_v2 = vld [vmem:[%s12049_s12 + $0x40] sm:$0x11]  ;;  %v768_v21 = vor.u32 %v766_v60, %v756_v49 }
  0x39   : > { %1120 = vmatmul.mubr.bf16.gmra.mxu1 %v8684_v48  ;;  %10228 = vmatpush3.bf16.msra.mxu0 %v11332_v58  ;;  %v11343_v48 = vld [vmem:[%s15456_s3 + $0x198] sm:$0xff]   ;;  %v749_v58 = vsel %vm15461_vm6, %v744_v31, %v748_v54  ;;  %v8665_v8 = vcombine.high %v12330_v2, %v12330_v2  ;;  %vm549_vm0 = vcmp.ne.s32.totalorder %v499_v1, 0  ;;  %vm12341_vm1 = vcmp.ne.s32.totalorder %v499_v1, 7 }
  0x3a   : > { %10268 = vmatpush3.bf16.msra.mxu1 %v11333_v63  ;;  %10229 = vmatprep.subr.bf16.mxu0 %v11334_v0  ;;  %v492_v63 = vand.u32 7, %v444_v28  ;;  %v11347_v0 = vld [vmem:[%s15456_s3 + $0x190] sm:$0xff]   ;;  %v8664_v19 = vcombine.low %v12330_v2, %v12330_v2  ;;  %vm12351_vm3 = vmpackc.low %vm549_vm0, %vm549_vm0  ;;  %v760_v28 = vor.u32 %v758_v4, %v748_v54  ;;  %v11353_v54 = vld [vmem:[%s15456_s3 + $0x188] sm:$0xff]   ;;  %vm12415_vm0 = vcmp.ne.s16.totalorder %v1180_v10, 0 }
  0x3b   : > { %10269 = vmatprep.subr.bf16.mxu1 %v11335_v3  ;;  %1127 = vmatprep.mubr.bf16.mxu1 %v8687_v34  ;;  %v770_v26 = vshll.u32 %v8665_v8, 16  ;;  %vm1168_vm11 = vmpackc.low %vm12341_vm1, %vm12341_vm1  ;;  %v11352_v34 = vld [vmem:[%s15456_s3 + $0x108] sm:$0xff]   ;;  %v1144_v10 = vld [vmem:[%s12049_s12] sm:$0xee] }
  0x3c   : > { %926 = vmatprep.mubr.bf16.mxu0 %v757_v57  ;;  %vm548_vm12 = vcmp.ne.s32.totalorder %v492_v63, 0  ;;  %vm12332_vm15 = vcmp.ne.s32.totalorder %v492_v63, 7  ;;  %v762_v29 = vshll.u32 %v8664_v19, 16  ;;  %v11358_v3 = vld [vmem:[%s15456_s3 + $0x278] sm:$0xff]   ;;  %v1489_v19 = vsel %vm12103_vm9, %v12070_v47, 0 }
  0x3d   : > { %10230 = vmatpush3.bf16.msra.mxu0 %v11336_v7  ;;  %v11350_v7 = vld [vmem:[%s15456_s3 + $0x148] sm:$0xff]   ;;  %vm12345_vm2 = vmpackc.low %vm548_vm12, %vm548_vm12  ;;  %vm1178_vm12 = vcmask 1044484   ;;  %v772_v39 = vrot.slane %v770_v26, 1  ;;  %v11359_v4 = vld [vmem:[%s15456_s3 + $0x2f8] sm:$0xff]  }
  0x3e   : > { %10270 = vmatpush3.bf16.msra.mxu1 %v11337_v11  ;;  %10231 = vmatprep.subr.bf16.mxu0 %v11340_v27  ;;  %v596_v25 = vsel %vm12345_vm2, %v12256_v13, 0  ;;  %v597_v27 = vsel %vm12351_vm3, %v12263_v61, 0  ;;  %vm1167_vm10 = vmpackc.low %vm12332_vm15, %vm12332_vm15  ;;  %v1488_v11 = vsel %vm12087_vm7, %v12067_v46, 0 }
  0x3f   : > { %10271 = vmatprep.subr.bf16.mxu1 %v11341_v40  ;;  %v8689_v31 = vcombine.high %v596_v25, %v597_v27  ;;  %v12371_v32 = vsel %vm1167_vm10, 65537, %v11857_v5  ;;  %v8688_v33 = vcombine.low %v596_v25, %v597_v27  ;;  %v12377_v40 = vsel %vm1168_vm11, 65537, %v11857_v5  ;;  %vm12381_vm15 = vmor %vm1177_vm4, %vm1178_vm12 }
  0x40   : > { %927 = vmatmul.mubr.bf16.gmra.mxu0 %v749_v58  ;;  %v1200_v49 = vrot.slane %v12377_v40, 7  ;;  %v12394_v5 = vsel %vm12381_vm15, %v12164_v20, %v1182_v14  ;;  %v11354_v58 = vld [vmem:[%s15456_s3 + $0x140] sm:$0xff]   ;;  %v12406_v9 = vsel %vm12381_vm15, %v12174_v23, %v1185_v42  ;;  %v1187_v14 = vrot.slane %v1185_v42, 4 }
  0x41   : > { %1128 = vmatmul.mubr.bf16.gmra.mxu1 %v8686_v43  ;;  %10232 = vmatpush3.bf16.msra.mxu0 %v11342_v44  ;;  %v1197_v43 = vrot.slane %v12371_v32, 7  ;;  %v764_v44 = vrot.slane %v762_v29, 1  ;;  %v11355_v20 = vld [vmem:[%s15456_s3 + $0x1c0] sm:$0xff]   ;;  %vm1204_vm1 = vcmp.ne.s16.totalorder %v12394_v5, 0  ;;  %vm15462_vm4 = vcmp.ne.s16.totalorder %v12406_v9, 0 }
  0x42   : > { %10272 = vmatpush3.bf16.msra.mxu1 %v11343_v48  ;;  %10233 = vmatprep.subr.bf16.mxu0 %v11344_v55  ;;  %v773_v55 = vsel %vm15461_vm6, %v768_v21, %v772_v39  ;;  %v11356_v23 = vld [vmem:[%s15456_s3 + $0x100] sm:$0xff]   ;;  %v12426_v38 = vsel %vm12381_vm15, %v1187_v14, %v1188_v53  ;;  %v1212_v42 = vsel %vm12415_vm0, %v1144_v10, 0  ;;  %v1213_v60 = vsel %vm1204_vm1, %v12067_v46, 0  ;;  %v11361_v46 = vld [vmem:[%s15456_s3 + $0x2b8] sm:$0xff]   ;;  %v11363_v39 = vld [vmem:[%s15456_s3 + $0x2f0] sm:$0xff]  }
  0x43   : > { %10273 = vmatprep.subr.bf16.mxu1 %v11345_v59  ;;  %1135 = vmatprep.mubr.bf16.mxu1 %v8689_v31  ;;  %v765_v57 = vsel %vm15461_vm6, %v760_v28, %v764_v44  ;;  %vm1206_vm10 = vcmp.ne.s16.totalorder %v12426_v38, 0  ;;  %v8739_v1 = vcombine.high %v1212_v42, %v1213_v60  ;;  %vm1291_vm11 = vcmask 1046528   ;;  %v11372_v32 = vld [vmem:[%s15456_s3 + $0x220] sm:$0xff]  }
  0x44   : > { %934 = vmatprep.mubr.bf16.mxu0 %v773_v55  ;;  %v1215_v63 = vsel %vm1206_vm10, %v12081_v50, 0  ;;  %v8796_v26 = vcombine.low %v1488_v11, %v1489_v19  ;;  %v8797_v27 = vcombine.high %v1488_v11, %v1489_v19  ;;  %v1193_v44 = vrot.slane %v1191_v16, 4  ;;  %v11365_v55 = vld [vmem:[%s15456_s3 + $0x2b0] sm:$0xff]  }
  0x45   : > { %10234 = vmatpush3.bf16.msra.mxu0 %v11346_v62  ;;  %v1214_v62 = vsel %vm15462_vm4, %v12070_v47, 0  ;;  %v1295_v25 = vrot.slane %v8739_v1, 1  ;;  %v1492_v11 = vsel %vm12269_vm5, %v12201_v36, 0 }
  0x46   : > { %10274 = vmatpush3.bf16.msra.mxu1 %v11347_v0  ;;  %10235 = vmatprep.subr.bf16.mxu0 %v11350_v7  ;;  %v8738_v0 = vcombine.low %v1212_v42, %v1213_v60  ;;  %v8740_v7 = vcombine.low %v1214_v62, %v1215_v63  ;;  %v8741_v8 = vcombine.high %v1214_v62, %v1215_v63  ;;  %v11368_v42 = vld [vmem:[%s15456_s3 + $0x228] sm:$0xff]   ;;  %v1196_v60 = vrot.slane %v1194_v51, 4 }
  0x47   : > { %10275 = vmatprep.subr.bf16.mxu1 %v11351_v30  ;;  %v11360_v30 = vld [vmem:[%s15456_s3 + $0x238] sm:$0xff]   ;;  %v11369_v62 = vld [vmem:[%s15456_s3 + $0x2a8] sm:$0xff]   ;;  %v1199_v63 = vrot.slane %v1197_v43, 4 }
  0x48   : > { %935 = vmatmul.mubr.bf16.gmra.mxu0 %v765_v57  ;;  %v1292_v21 = vrot.slane %v8738_v0, 1  ;;  %v1293_v28 = vrot.slane %v8740_v7, 1  ;;  %v1296_v29 = vrot.slane %v8741_v8, 1  ;;  %v12495_v57 = vsel %vm12381_vm15, %v1193_v44, %v1194_v51  ;;  %v11379_v44 = vld [vmem:[%s15456_s3 + $0x2d0] sm:$0xff]  }
  0x49   : > { %10236 = vmatpush3.bf16.msra.mxu0 %v11352_v34  ;;  %1136 = vmatmul.mubr.bf16.gmra.mxu1 %v8688_v33  ;;  %v11362_v33 = vld [vmem:[%s15456_s3 + $0x270] sm:$0xff]   ;;  %v1190_v34 = vrot.slane %v1188_v53, 4  ;;  %v1490_v53 = vsel %vm12146_vm13, %v12081_v50, 0  ;;  %v11366_v50 = vld [vmem:[%s15456_s3 + $0x268] sm:$0xff]   ;;  %vm15465_vm6 = vcmp.ne.s16.totalorder %v12495_v57, 0  ;;  %v12534_v51 = vsel %vm12381_vm15, %v1196_v60, %v1197_v43  ;;  %v11373_v43 = vld [vmem:[%s15456_s3 + $0x2a0] sm:$0xff]  }
  0x4a   : > { %10276 = vmatpush3.bf16.msra.mxu1 %v11353_v54  ;;  %10237 = vmatprep.subr.bf16.mxu0 %v11354_v58  ;;  %v1297_v31 = vsel %vm1291_vm11, %v1295_v25, %v1296_v29  ;;  %v1294_v47 = vsel %vm1291_vm11, %v1292_v21, %v1293_v28  ;;  %v11364_v54 = vld [vmem:[%s15456_s3 + $0x230] sm:$0xff]   ;;  %v8799_v58 = vcombine.high %v1490_v53, %v1491_v37  ;;  %vm15464_vm4 = vcmp.ne.s16.totalorder %v12534_v51, 0  ;;  %v11383_v60 = vld [vmem:[%s15456_s3 + $0x2c8] sm:$0xff]  }
  0x4b   : > { %10277 = vmatprep.subr.bf16.mxu1 %v11355_v20  ;;  %1697 = vmatprep.mubr.bf16.mxu1 %v8797_v27  ;;  %v12483_v45 = vsel %vm12381_vm15, %v1190_v34, %v1191_v16  ;;  %v8798_v14 = vcombine.low %v1490_v53, %v1491_v37  ;;  %v1217_v20 = vsel %vm15465_vm6, %v12201_v36, 0  ;;  %v1218_v48 = vsel %vm15464_vm4, %v12256_v13, 0  ;;  %v11377_v34 = vld [vmem:[%s15456_s3 + $0x298] sm:$0xff]  }
  0x4c   : > { %1446 = vmatprep.mubr.bf16.mxu0 %v1297_v31  ;;  %vm15466_vm12 = vcmp.ne.s16.totalorder %v12483_v45, 0  ;;  %v1493_v21 = vsel %vm12275_vm8, %v12256_v13, 0  ;;  %v12594_v53 = vcombine.high %v12201_v36, %v12256_v13 }
  0x4d   : > { %10238 = vmatpush3.bf16.msra.mxu0 %v11356_v23  ;;  %v1216_v16 = vsel %vm15466_vm12, %v12198_v35, 0  ;;  %v11367_v23 = vld [vmem:[%s15456_s3 + $0x2e8] sm:$0xff]  }
  0x4e   : > { %10278 = vmatpush3.bf16.msra.mxu1 %v11357_v6  ;;  %10303 = vmatprep.subr.bf16.mxu0 %v11358_v3  ;;  %v8743_v6 = vcombine.high %v1216_v16, %v1217_v20  ;;  %v8742_v10 = vcombine.low %v1216_v16, %v1217_v20  ;;  %v11370_v3 = vld [vmem:[%s15456_s3 + $0x260] sm:$0xff]  }
  0x4f   : > { %10343 = vmatprep.subr.bf16.mxu1 %v11359_v4  ;;  %v12540_v4 = vsel %vm12381_vm15, %v1199_v63, %v1200_v49 }
  0x50   : > { %1447 = vmatmul.mubr.bf16.vlgmr.msra.gmra.mxu0 %v1294_v47  ;;  %v1300_v0 = vrot.slane %v8743_v6, 1  ;;  %v1298_v1 = vrot.slane %v8742_v10, 1  ;;  %vm15463_vm15 = vcmp.ne.s16.totalorder %v12540_v4, 0  ;;  %v11382_v6 = vld [vmem:[%s15456_s3 + $0x248] sm:$0xff]  }
  0x51   : > { %1698 = vmatmul.mubr.bf16.vlgmr.msra.gmra.mxu1 %v8796_v26  ;;  %10304 = vmatpush3.bf16.msra.mxu0 %v11360_v30  ;;  %v1219_v19 = vsel %vm15463_vm15, %v12263_v61, 0  ;;  %v8801_v26 = vcombine.high %v1492_v11, %v1493_v21  ;;  %v11375_v30 = vld [vmem:[%s15456_s3 + $0x2d8] sm:$0xff]  }
  0x52   : > { %10344 = vmatpush3.bf16.msra.mxu1 %v11361_v46  ;;  %10305 = vmatprep.subr.bf16.mxu0 %v11362_v33  ;;  %v1301_v7 = vsel %vm1291_vm11, %v1296_v29, %v1300_v0  ;;  %v1299_v8 = vsel %vm1291_vm11, %v1293_v28, %v1298_v1  ;;  %v8745_v25 = vcombine.high %v1218_v48, %v1219_v19  ;;  %v11374_v29 = vld [vmem:[%s15456_s3 + $0x258] sm:$0xff]   ;;  %v12572_v46 = vrot.slane %v1200_v49, 4  ;;  %v11378_v49 = vld [vmem:[%s15456_s3 + $0x250] sm:$0xff]  }
  0x53   : > { %10345 = vmatprep.subr.bf16.mxu1 %v11363_v39  ;;  %1705 = vmatprep.mubr.bf16.mxu1 %v8799_v58  ;;  %v8744_v27 = vcombine.low %v1218_v48, %v1219_v19  ;;  %v8800_v28 = vcombine.low %v1492_v11, %v1493_v21  ;;  %v11376_v33 = vld [vmem:[%s15456_s3 + $0x218] sm:$0xff]   ;;  %v12606_v58 = vld [vmem:[%s12049_s12 + $0x40] sm:$0xff] }
  0x54   : > { %1454 = vmatprep.mubr.bf16.mxu0 %v1301_v7  ;;  %v1304_v31 = vrot.slane %v8745_v25, 1  ;;  %vm1211_vm15 = vcmp.ne.s16.totalorder %v12572_v46, 0  ;;  %v1495_v20 = vsel %vm12351_vm3, %v12606_v58, 0  ;;  %v12637_v7 = vsel %vm15465_vm6, %v12256_v13, 0  ;;  %v11387_v48 = vld [vmem:[%s15456_s3 + $0x2c0] sm:$0xff]  }
  0x55   : > { %10306 = vmatpush3.bf16.msra.mxu0 %v11364_v54  ;;  %v1302_v47 = vrot.slane %v8744_v27, 1  ;;  %v1220_v54 = vsel %vm1211_vm15, %v12330_v2, 0  ;;  %v11381_v2 = vld [vmem:[%s15456_s3 + $0x290] sm:$0xff]   ;;  %v11388_v19 = vld [vmem:[%s15456_s3 + $0x200] sm:$0xff]   ;;  %v1738_v27 = vld [vmem:[%s12049_s12 + $0x8] sm:$0xff] }
  0x56   : > { %10346 = vmatpush3.bf16.msra.mxu1 %v11365_v55  ;;  %10307 = vmatprep.subr.bf16.mxu0 %v11366_v50  ;;  %v1305_v39 = vsel %vm1291_vm11, %v1300_v0, %v1304_v31  ;;  %v11380_v55 = vld [vmem:[%s15456_s3 + $0x210] sm:$0xff]   ;;  %v8747_v37 = vcombine.high %v1220_v54, %v1220_v54  ;;  %v1494_v50 = vsel %vm12345_vm2, %v12263_v61, 0  ;;  %v8746_v16 = vcombine.low %v1220_v54, %v1220_v54  ;;  %v11384_v0 = vld [vmem:[%s15456_s3 + $0x208] sm:$0xff]   ;;  %v11389_v25 = vld [vmem:[%s15456_s3 + $0x280] sm:$0xff]  }
  0x57   : > { %10347 = vmatprep.subr.bf16.mxu1 %v11367_v23  ;;  %v1303_v40 = vsel %vm1291_vm11, %v1298_v1, %v1302_v47  ;;  %v8803_v10 = vcombine.high %v1494_v50, %v1495_v20  ;;  %v12625_v1 = vsel %vm15466_vm12, %v12201_v36, 0  ;;  %v11804_v46 = vld [vmem:[%s15456_s3 + $0xd40] sm:$0xff]  }
  0x58   : > { %1455 = vmatmul.mubr.bf16.gmra.mxu0 %v1299_v8  ;;  %v1306_v23 = vrot.slane %v8746_v16, 1 }
  0x59   : > { %1706 = vmatmul.mubr.bf16.gmra.mxu1 %v8798_v14  ;;  %10308 = vmatpush3.bf16.msra.mxu0 %v11368_v42  ;;  %v1308_v14 = vrot.slane %v8747_v37, 1  ;;  %v8802_v42 = vcombine.low %v1494_v50, %v1495_v20  ;;  %v11395_v20 = vld [vmem:[%s15456_s3 + $0x3f8] sm:$0xff]  }
  0x5a   : > { %10348 = vmatpush3.bf16.msra.mxu1 %v11369_v62  ;;  %10309 = vmatprep.subr.bf16.mxu0 %v11370_v3  ;;  %v1853_v62 = vshll.u32 %v12594_v53, 16  ;;  %v12629_v3 = vcombine.low %v12201_v36, %v12256_v13  ;;  %v1307_v8 = vsel %vm1291_vm11, %v1302_v47, %v1306_v23  ;;  %v11386_v36 = vld [vmem:[%s15456_s3 + $0x240] sm:$0xff]   ;;  %v12650_v13 = vcombine.high %v12263_v61, %v12606_v58 }
  0x5b   : > { %10349 = vmatprep.subr.bf16.mxu1 %v11371_v41  ;;  %1713 = vmatprep.mubr.bf16.mxu1 %v8801_v26  ;;  %v1309_v63 = vsel %vm1291_vm11, %v1304_v31, %v1308_v14  ;;  %v11385_v41 = vld [vmem:[%s15456_s3 + $0x288] sm:$0xff]   ;;  %v1865_v26 = vshrl.u32 %v12594_v53, 16  ;;  %v12678_v47 = vsel %vm15464_vm4, %v12263_v61, 0  ;;  %vm15511_vm4 = vcmp.ne.s16.totalorder %v12406_v9, 0 }
  0x5c   : > { %1462 = vmatprep.mubr.bf16.mxu0 %v1305_v39  ;;  %v12655_v11 = vrot.slane %v1853_v62, 1  ;;  %v1845_v21 = vshll.u32 %v12629_v3, 16  ;;  %v1869_v31 = vshll.u32 %v12650_v13, 16  ;;  %v11406_v53 = vld [vmem:[%s15456_s3 + $0x328] sm:$0xff]  }
  0x5d   : > { %10310 = vmatpush3.bf16.msra.mxu0 %v11372_v32  ;;  %v2070_v32 = vsel %vm1206_vm10, %v12198_v35, 0 }
  0x5e   : > { %10350 = vmatpush3.bf16.msra.mxu1 %v11373_v43  ;;  %10311 = vmatprep.subr.bf16.mxu0 %v11374_v29  ;;  %v8915_v43 = vcombine.high %v12625_v1, %v12637_v7  ;;  %v12670_v29 = vld [vmem:[%s12049_s12 + $0x18] sm:$0xff] }
  0x5f   : > { %10351 = vmatprep.subr.bf16.mxu1 %v11375_v30  ;;  %v8855_v39 = vcombine.high %v12670_v29, %v12198_v35  ;;  %v8854_v37 = vcombine.low %v12670_v29, %v12198_v35 }
  0x60   : > { %1463 = vmatmul.mubr.bf16.gmra.mxu0 %v1303_v40  ;;  %v12672_v30 = vrot.slane %v8915_v43, 1  ;;  %v2066_v40 = vld [vmem:[%s12049_s12 + $0x8] sm:$0xee] }
  0x61   : > { %1714 = vmatmul.mubr.bf16.gmra.mxu1 %v8800_v28  ;;  %10312 = vmatpush3.bf16.msra.mxu0 %v11376_v33  ;;  %v12667_v28 = vld [vmem:[%s12049_s12 + $0x10] sm:$0xff]  ;;  %v2067_v54 = vsel %vm12415_vm0, %v2066_v40, 0 }
  0x62   : > { %10352 = vmatpush3.bf16.msra.mxu1 %v11377_v34  ;;  %10313 = vmatprep.subr.bf16.mxu0 %v11378_v49  ;;  %v8852_v33 = vcombine.low %v1738_v27, %v12667_v28  ;;  %v8853_v34 = vcombine.high %v1738_v27, %v12667_v28  ;;  %v2068_v49 = vsel %vm1204_vm1, %v12667_v28, 0 }
  0x63   : > { %10353 = vmatprep.subr.bf16.mxu1 %v11379_v44  ;;  %1470 = vmatprep.mubr.bf16.mxu0 %v1309_v63  ;;  %v11394_v44 = vld [vmem:[%s15456_s3 + $0x378] sm:$0xff]   ;;  %v8910_v14 = vcombine.low %v2067_v54, %v2068_v49  ;;  %v8911_v23 = vcombine.high %v2067_v54, %v2068_v49  ;;  %v11398_v54 = vld [vmem:[%s15456_s3 + $0x370] sm:$0xff]  }
  0x64   : > { %1721 = vmatprep.mubr.bf16.mxu1 %v8803_v10  ;;  %v1830_v50 = vshrl.u32 %v8853_v34, 16  ;;  %v1832_v16 = vshll.u32 %v8853_v34, 16 }
  0x65   : > { %10314 = vmatpush3.bf16.msra.mxu0 %v11380_v55  ;;  %v2069_v55 = vsel %vm15511_vm4, %v12670_v29, 0  ;;  %v2146_v63 = vrot.slane %v8910_v14, 1  ;;  %vm15512_vm4 = vsmask.f32 7424 }
  0x66   : > { %10354 = vmatpush3.bf16.msra.mxu1 %v11381_v2  ;;  %10315 = vmatprep.subr.bf16.mxu0 %v11382_v6  ;;  %v1837_v2 = vshll.u32 %v8855_v39, 16  ;;  %v8912_v6 = vcombine.low %v2069_v55, %v2070_v32  ;;  %v8913_v10 = vcombine.high %v2069_v55, %v2070_v32  ;;  %v1841_v55 = vshrl.u32 %v8854_v37, 16  ;;  %vm15513_vm6 = vmmov %vm15512_vm4 }
  0x67   : > { %10355 = vmatprep.subr.bf16.mxu1 %v11383_v60  ;;  %v1834_v60 = vrot.slane %v1832_v16, 1  ;;  %v11401_v16 = vld [vmem:[%s15456_s3 + $0x3b0] sm:$0xff]  }
  0x68   : > { %1471 = vmatmul.mubr.bf16.gmra.mxu0 %v1307_v8  ;;  %v1839_v62 = vrot.slane %v1837_v2, 1  ;;  %v2147_v35 = vrot.slane %v8912_v6, 1  ;;  %v2150_v8 = vrot.slane %v8913_v10, 1  ;;  %v1847_v10 = vrot.slane %v1845_v21, 1 }
  0x69   : > { %1722 = vmatmul.mubr.bf16.gmra.mxu1 %v8802_v42  ;;  %10316 = vmatpush3.bf16.msra.mxu0 %v11384_v0  ;;  %v1818_v42 = vshrl.u32 %v8852_v33, 16  ;;  %v1820_v0 = vshll.u32 %v8852_v33, 16  ;;  %v1835_v43 = vor.u32 %v1834_v60, %v1830_v50  ;;  %v11396_v33 = vld [vmem:[%s15456_s3 + $0x338] sm:$0xff]  }
  0x6a   : > { %10356 = vmatpush3.bf16.msra.mxu1 %v11385_v41  ;;  %10317 = vmatprep.subr.bf16.mxu0 %v11386_v36  ;;  %v2149_v41 = vrot.slane %v8911_v23, 1  ;;  %v1825_v36 = vshll.u32 %v8854_v37, 16  ;;  %v2148_v34 = vsel %vm1291_vm11, %v2146_v63, %v2147_v35  ;;  %v2155_v40 = vsel %vm1291_vm11, %v2150_v8, %v12672_v30 }
  0x6b   : > { %10357 = vmatprep.subr.bf16.mxu1 %v11387_v48  ;;  %v1822_v48 = vrot.slane %v1820_v0, 1  ;;  %v1840_v49 = vsel %vm15512_vm4, %v1835_v43, %v1839_v62  ;;  %vm15514_vm4 = vcmp.ne.s16.totalorder %v12540_v4, 0  ;;  %v12751_v63 = vrot.slane %v1869_v31, 1  ;;  %v11407_v0 = vld [vmem:[%s15456_s3 + $0x3a8] sm:$0xff]   ;;  %v11409_v31 = vld [vmem:[%s15456_s3 + $0x3e0] sm:$0xff]  }
  0x6c   : > { %v2151_v32 = vsel %vm1291_vm11, %v2149_v41, %v2150_v8  ;;  %v1827_v27 = vrot.slane %v1825_v36, 1  ;;  %2025 = vmatprep.mubr.bf16.mxu0 %v1840_v49  ;;  %v2074_v37 = vsel %vm15514_vm4, %v12606_v58, 0  ;;  %vm15515_vm4 = vmmov %vm15513_vm6  ;;  %v11408_v36 = vld [vmem:[%s15456_s3 + $0x360] sm:$0xff]  }
  0x6d   : > { %10318 = vmatpush3.bf16.msra.mxu0 %v11388_v19  ;;  %v11397_v19 = vld [vmem:[%s15456_s3 + $0x3b8] sm:$0xff]   ;;  %2300 = vmatprep.mubr.bf16.mxu1 %v2151_v32  ;;  %v8917_v60 = vcombine.high %v12678_v47, %v2074_v37  ;;  %v8916_v8 = vcombine.low %v12678_v47, %v2074_v37  ;;  %v11411_v43 = vld [vmem:[%s15456_s3 + $0x3a0] sm:$0xff]  }
  0x6e   : > { %10358 = vmatpush3.bf16.msra.mxu1 %v11389_v25  ;;  %10383 = vmatprep.subr.bf16.mxu0 %v11394_v44  ;;  %v8914_v25 = vcombine.low %v12625_v1, %v12637_v7  ;;  %v1823_v44 = vor.u32 %v1822_v48, %v1818_v42  ;;  %v11399_v1 = vld [vmem:[%s15456_s3 + $0x3f0] sm:$0xff]   ;;  %v1849_v7 = vshrl.u32 %v8855_v39, 16  ;;  %v1843_v6 = vor.u32 %v1841_v55, %v1827_v27  ;;  %v11405_v42 = vld [vmem:[%s15456_s3 + $0x3e8] sm:$0xff]   ;;  %v11415_v32 = vld [vmem:[%s15456_s3 + $0x3d8] sm:$0xff]  }
  0x6f   : > { %10423 = vmatprep.subr.bf16.mxu1 %v11395_v20  ;;  %v11400_v39 = vld [vmem:[%s15456_s3 + $0x330] sm:$0xff]   ;;  %v12733_v20 = vcombine.low %v12263_v61, %v12606_v58  ;;  %v11404_v61 = vld [vmem:[%s15456_s3 + $0x368] sm:$0xff]   ;;  %v12757_v41 = vrot.slane %v8917_v60, 1  ;;  %v2156_v48 = vrot.slane %v8916_v8, 1  ;;  %v12820_v55 = vsel %vm12103_vm9, %v12670_v29, 0 }
  0x70   : > { %v1828_v50 = vsel %vm15513_vm6, %v1823_v44, %v1827_v27  ;;  %v1851_v2 = vor.u32 %v1849_v7, %v1839_v62  ;;  %v2152_v14 = vrot.slane %v8914_v25, 1  ;;  %v1867_v62 = vor.u32 %v1865_v26, %v12655_v11  ;;  %v11414_v27 = vld [vmem:[%s15456_s3 + $0x358] sm:$0xff]   ;;  %v11425_v60 = vld [vmem:[%s15456_s3 + $0x3c8] sm:$0xff]  }
  0x71   : > { %2301 = vmatmul.mubr.bf16.vlgmr.msra.gmra.mxu1 %v2148_v34  ;;  %2026 = vmatmul.mubr.bf16.vlgmr.msra.gmra.mxu0 %v1828_v50  ;;  %v1848_v26 = vsel %vm15515_vm4, %v1843_v6, %v1847_v10  ;;  %v1861_v47 = vshll.u32 %v12733_v20, 16  ;;  %v1881_v34 = vshrl.u32 %v12650_v13, 16  ;;  %v1873_v49 = vshrl.u32 %v12733_v20, 16 }
  0x72   : > { %10424 = vmatpush3.bf16.msra.mxu1 %v11397_v19  ;;  %2308 = vmatprep.mubr.bf16.mxu1 %v2155_v40  ;;  %v1856_v23 = vsel %vm15513_vm6, %v1851_v2, %v12655_v11  ;;  %v2153_v21 = vsel %vm1291_vm11, %v2147_v35, %v2152_v14  ;;  %v1857_v11 = vshrl.u32 %v12629_v3, 16  ;;  %v2159_v35 = vsel %vm1291_vm11, %v12672_v30, %v12757_v41  ;;  %vm15516_vm6 = vmmov %vm15515_vm4  ;;  %v11410_v30 = vld [vmem:[%s15456_s3 + $0x320] sm:$0xff]   ;;  %v11417_v40 = vld [vmem:[%s15456_s3 + $0x398] sm:$0xff]  }
  0x73   : > { %10425 = vmatprep.subr.bf16.mxu1 %v11399_v1  ;;  %10384 = vmatpush3.bf16.msra.mxu0 %v11396_v33  ;;  %v1872_v3 = vsel %vm15516_vm6, %v1867_v62, %v12751_v63  ;;  %v1863_v25 = vrot.slane %v1861_v47, 1  ;;  %v2157_v33 = vsel %vm1291_vm11, %v2152_v14, %v2156_v48  ;;  %v12803_v44 = vcombine.high %v12667_v28, %v12670_v29  ;;  %v11416_v1 = vld [vmem:[%s15456_s3 + $0x318] sm:$0xff]   ;;  %v11421_v14 = vld [vmem:[%s15456_s3 + $0x390] sm:$0xff]   ;;  %vm15518_vm6 = vmmov %vm15515_vm4 }
  0x74   : > { %10385 = vmatprep.subr.bf16.mxu0 %v11398_v54  ;;  %2033 = vmatprep.mubr.bf16.mxu0 %v1856_v23  ;;  %v1859_v19 = vor.u32 %v1857_v11, %v1847_v10  ;;  %v12811_v13 = vsel %vm12087_vm7, %v12667_v28, 0  ;;  %v11419_v54 = vld [vmem:[%s15456_s3 + $0x3d0] sm:$0xff]   ;;  %v12824_v50 = vcombine.low %v12667_v28, %v12670_v29  ;;  %v1883_v62 = vor.u32 %v1881_v34, %v12751_v63  ;;  %v11427_v11 = vld [vmem:[%s15456_s3 + $0x388] sm:$0xff]  }
  0x75   : > { %v2684_v2 = vshrl.u32 %v12803_v44, 16  ;;  %v2686_v37 = vshll.u32 %v12803_v44, 16  ;;  %v11420_v28 = vld [vmem:[%s15456_s3 + $0x310] sm:$0xff]  }
  0x76   : > { %10426 = vmatpush3.bf16.msra.mxu1 %v11401_v16  ;;  %v1864_v7 = vsel %vm15515_vm4, %v1859_v19, %v1863_v25  ;;  %v11418_v16 = vld [vmem:[%s15456_s3 + $0x350] sm:$0xff]  }
  0x77   : > { %10427 = vmatprep.subr.bf16.mxu1 %v11405_v42  ;;  %10386 = vmatpush3.bf16.msra.mxu0 %v11400_v39  ;;  %v1746_v39 = vld [vmem:[%s12049_s12 + $0x48] sm:$0x11] }
  0x78   : > { %10387 = vmatprep.subr.bf16.mxu0 %v11404_v61  ;;  %v8861_v20 = vcombine.high %v1746_v39, %v1746_v39  ;;  %v2075_v23 = vsel %vm1211_vm15, %v1746_v39, 0  ;;  %v8860_v6 = vcombine.low %v1746_v39, %v1746_v39  ;;  %v2674_v61 = vshll.u32 %v12824_v50, 16 }
  0x79   : > { %2309 = vmatmul.mubr.bf16.gmra.mxu1 %v2153_v21  ;;  %2034 = vmatmul.mubr.bf16.gmra.mxu0 %v1848_v26  ;;  %v8919_v10 = vcombine.high %v2075_v23, %v2075_v23  ;;  %v8918_v42 = vcombine.low %v2075_v23, %v2075_v23  ;;  %v11438_v23 = vld [vmem:[%s15456_s3 + $0x438] sm:$0xff]  }
  0x7a   : > { %10428 = vmatpush3.bf16.msra.mxu1 %v11407_v0  ;;  %2316 = vmatprep.mubr.bf16.mxu1 %v2159_v35  ;;  %v1885_v21 = vshll.u32 %v8861_v20, 16  ;;  %v1875_v0 = vor.u32 %v1873_v49, %v1863_v25  ;;  %v1877_v8 = vshll.u32 %v8860_v6, 16  ;;  %v11426_v35 = vld [vmem:[%s15456_s3 + $0x308] sm:$0xff]   ;;  %v2676_v34 = vrot.slane %v2674_v61, 1 }
  0x7b   : > { %10429 = vmatprep.subr.bf16.mxu1 %v11409_v31  ;;  %10388 = vmatpush3.bf16.msra.mxu0 %v11406_v53  ;;  %v11424_v53 = vld [vmem:[%s15456_s3 + $0x348] sm:$0xff]   ;;  %v2162_v26 = vrot.slane %v8919_v10, 1  ;;  %v2160_v31 = vrot.slane %v8918_v42, 1  ;;  %v8968_v20 = vcombine.low %v12811_v13, %v12820_v55 }
  0x7c   : > { %2041 = vmatprep.mubr.bf16.mxu0 %v1872_v3  ;;  %10389 = vmatprep.subr.bf16.mxu0 %v11408_v36  ;;  %v1887_v47 = vrot.slane %v1885_v21, 1  ;;  %v1879_v63 = vrot.slane %v1877_v8, 1  ;;  %v12878_v49 = vld [vmem:[%s12049_s12 + $0x28] sm:$0xff]  ;;  %v11442_v8 = vld [vmem:[%s15456_s3 + $0x430] sm:$0xff]  }
  0x7d   : > { %v2163_v36 = vsel %vm1291_vm11, %v12757_v41, %v2162_v26  ;;  %v2161_v3 = vsel %vm1291_vm11, %v2156_v48, %v2160_v31  ;;  %v11429_v41 = vld [vmem:[%s15456_s3 + $0x3c0] sm:$0xff]   ;;  %v8969_v48 = vcombine.high %v12811_v13, %v12820_v55  ;;  %v11807_v6 = vld [vmem:[%s12049_s12 + $0x28] sm:$0xff]  ;;  %v11440_v13 = vld [vmem:[%s15456_s3 + $0x470] sm:$0xff]  }
  0x7e   : > { %10430 = vmatpush3.bf16.msra.mxu1 %v11411_v43  ;;  %v11428_v43 = vld [vmem:[%s15456_s3 + $0x340] sm:$0xff]   ;;  %v1888_v19 = vsel %vm15518_vm6, %v1883_v62, %v1887_v47  ;;  %v1880_v25 = vsel %vm15515_vm4, %v1875_v0, %v1879_v63  ;;  %v2345_v10 = vsel %vm12155_vm14, %v11807_v6, 0  ;;  %vm15519_vm6 = vmmov %vm15515_vm4  ;;  %v11441_v62 = vld [vmem:[%s15456_s3 + $0x4f0] sm:$0xff]  }
  0x7f   : > { %10431 = vmatprep.subr.bf16.mxu1 %v11415_v32  ;;  %10390 = vmatpush3.bf16.msra.mxu0 %v11410_v30  ;;  %v2672_v30 = vshrl.u32 %v12824_v50, 16  ;;  %v2688_v32 = vrot.slane %v2686_v37, 1  ;;  %v11806_v50 = vld [vmem:[%s12049_s12 + $0x20] sm:$0xff]  ;;  %v2596_v26 = vld [vmem:[%s12049_s12 + $0x30] sm:$0xff]  ;;  %v12930_v31 = vld [vmem:[%s12049_s12 + $0x38] sm:$0xff] }
  0x80   : > { %10391 = vmatprep.subr.bf16.mxu0 %v11414_v27  ;;  %v11430_v27 = vld [vmem:[%s15456_s3 + $0x300] sm:$0xff]   ;;  %v9029_v63 = vcombine.high %v2596_v26, %v12930_v31  ;;  %v12986_v6 = vld [vmem:[%s12049_s12 + $0x48] sm:$0xff] }
  0x81   : > { %2317 = vmatmul.mubr.bf16.gmra.mxu1 %v2157_v33  ;;  %2042 = vmatmul.mubr.bf16.gmra.mxu0 %v1864_v7  ;;  %v11431_v33 = vld [vmem:[%s15456_s3 + $0x380] sm:$0xff]   ;;  %v11436_v7 = vld [vmem:[%s15456_s3 + $0x478] sm:$0xff]   ;;  %v2677_v37 = vor.u32 %v2676_v34, %v2672_v30 }
  0x82   : > { %10432 = vmatpush3.bf16.msra.mxu1 %v11417_v40  ;;  %2324 = vmatprep.mubr.bf16.mxu1 %v2163_v36  ;;  %v12875_v40 = vld [vmem:[%s12049_s12 + $0x20] sm:$0xff]  ;;  %v9028_v36 = vcombine.low %v2596_v26, %v12930_v31 }
  0x83   : > { %10433 = vmatprep.subr.bf16.mxu1 %v11419_v54  ;;  %10392 = vmatpush3.bf16.msra.mxu0 %v11416_v1  ;;  %v9027_v44 = vcombine.high %v12875_v40, %v12878_v49  ;;  %v9026_v1 = vcombine.low %v12875_v40, %v12878_v49  ;;  %v11437_v54 = vld [vmem:[%s15456_s3 + $0x4f8] sm:$0xff]  }
  0x84   : > { %10393 = vmatprep.subr.bf16.mxu0 %v11418_v16  ;;  %2049 = vmatprep.mubr.bf16.mxu0 %v1888_v19  ;;  %v12899_v16 = vsel %vm12146_vm13, %v11806_v50, 0  ;;  %v2699_v34 = vshll.u32 %v9028_v36, 16  ;;  %v11450_v50 = vld [vmem:[%s15456_s3 + $0x460] sm:$0xff]  }
  0x85   : > { %v2691_v39 = vshll.u32 %v9027_v44, 16  ;;  %v8971_v21 = vcombine.high %v12899_v16, %v2345_v10  ;;  %v2703_v0 = vshrl.u32 %v9027_v44, 16  ;;  %v8970_v19 = vcombine.low %v12899_v16, %v2345_v10 }
  0x86   : > { %10434 = vmatpush3.bf16.msra.mxu1 %v11421_v14  ;;  %v2689_v14 = vor.u32 %v2688_v32, %v2684_v2  ;;  %v11439_v2 = vld [vmem:[%s15456_s3 + $0x4b8] sm:$0xff]   ;;  %v2707_v32 = vshll.u32 %v9029_v63, 16  ;;  %v12960_v44 = vsel %vm1204_vm1, %v12670_v29, 0 }
  0x87   : > { %10435 = vmatprep.subr.bf16.mxu1 %v11425_v60  ;;  %10394 = vmatpush3.bf16.msra.mxu0 %v11420_v28  ;;  %v2679_v28 = vshll.u32 %v9026_v1, 16  ;;  %v2693_v42 = vrot.slane %v2691_v39, 1  ;;  %v11451_v39 = vld [vmem:[%s15456_s3 + $0x4e0] sm:$0xff]  }
  0x88   : > { %10395 = vmatprep.subr.bf16.mxu0 %v11424_v53  ;;  %v2695_v53 = vshrl.u32 %v9026_v1, 16  ;;  %v2709_v1 = vrot.slane %v2707_v32, 1 }
  0x89   : > { %2325 = vmatmul.mubr.bf16.gmra.mxu1 %v2161_v3  ;;  %2050 = vmatmul.mubr.bf16.gmra.mxu0 %v1880_v25  ;;  %v2681_v60 = vrot.slane %v2679_v28, 1  ;;  %v2694_v55 = vsel %vm15519_vm6, %v2689_v14, %v2693_v42  ;;  %v11446_v3 = vld [vmem:[%s15456_s3 + $0x468] sm:$0xff]   ;;  %vm15520_vm6 = vmmov %vm15515_vm4  ;;  %v11452_v28 = vld [vmem:[%s15456_s3 + $0x420] sm:$0xff]  }
  0x8a   : > { %10436 = vmatpush3.bf16.msra.mxu1 %v11427_v11  ;;  %2551 = vmatprep.mubr.bf16.mxu0 %v8969_v48  ;;  %v11443_v11 = vld [vmem:[%s15456_s3 + $0x4b0] sm:$0xff]   ;;  %v11447_v25 = vld [vmem:[%s15456_s3 + $0x4e8] sm:$0xff]   ;;  %v2705_v48 = vor.u32 %v2703_v0, %v2693_v42  ;;  %v2924_v42 = vsel %vm1206_vm10, %v12878_v49, 0 }
  0x8b   : > { %10396 = vmatpush3.bf16.msra.mxu0 %v11426_v35  ;;  %10437 = vmatprep.subr.bf16.mxu1 %v11429_v41  ;;  %v2682_v61 = vsel %vm15515_vm4, %v2677_v37, %v2681_v60  ;;  %v11808_v35 = vld [vmem:[%s12049_s12 + $0x30] sm:$0xff]  ;;  %v12952_v41 = vsel %vm12345_vm2, %v12606_v58, 0  ;;  %v2719_v37 = vshrl.u32 %v9029_v63, 16 }
  0x8c   : > { %10397 = vmatprep.subr.bf16.mxu0 %v11428_v43  ;;  %2879 = vmatprep.mubr.bf16.mxu1 %v2694_v55  ;;  %v12935_v47 = vsel %vm12269_vm5, %v11808_v35, 0  ;;  %v11809_v43 = vld [vmem:[%s12049_s12 + $0x38] sm:$0xff]  ;;  %v2710_v29 = vsel %vm15520_vm6, %v2705_v48, %v2709_v1  ;;  %vm15521_vm6 = vcmp.ne.s16.totalorder %v12406_v9, 0  ;;  %v11461_v63 = vld [vmem:[%s15456_s3 + $0x4d0] sm:$0xff]  }
  0x8d   : > { %v2347_v30 = vsel %vm12275_vm8, %v11809_v43, 0  ;;  %v2923_v10 = vsel %vm15521_vm6, %v12875_v40, 0  ;;  %v2349_v40 = vsel %vm12351_vm3, %v12986_v6, 0  ;;  %v2721_v55 = vor.u32 %v2719_v37, %v2709_v1  ;;  %vm15522_vm6 = vmmov %vm15515_vm4  ;;  %v2600_v48 = vld [vmem:[%s12049_s12 + $0x50] sm:$0x11]  ;;  %v11466_v1 = vld [vmem:[%s15456_s3 + $0x448] sm:$0xff]  }
  0x8e   : > { %10438 = vmatpush3.bf16.msra.mxu1 %v11431_v33  ;;  %v11448_v33 = vld [vmem:[%s15456_s3 + $0x428] sm:$0xff]   ;;  %v8973_v16 = vcombine.high %v12935_v47, %v2347_v30  ;;  %v8972_v49 = vcombine.low %v12935_v47, %v2347_v30  ;;  %v11460_v47 = vld [vmem:[%s15456_s3 + $0x450] sm:$0xff]  }
  0x8f   : > { %10398 = vmatpush3.bf16.msra.mxu0 %v11430_v27  ;;  %10503 = vmatprep.subr.bf16.mxu1 %v11437_v54  ;;  %v2697_v27 = vor.u32 %v2695_v53, %v2681_v60  ;;  %v11449_v54 = vld [vmem:[%s15456_s3 + $0x4a8] sm:$0xff]   ;;  %v9031_v60 = vcombine.high %v12606_v58, %v12986_v6  ;;  %v8975_v53 = vcombine.high %v12952_v41, %v2349_v40  ;;  %v11462_v30 = vld [vmem:[%s15456_s3 + $0x410] sm:$0xff]  }
  0x90   : > { %10463 = vmatprep.subr.bf16.mxu0 %v11436_v7  ;;  %v2701_v7 = vrot.slane %v2699_v34, 1  ;;  %v9033_v34 = vcombine.high %v2600_v48, %v2600_v48 }
  0x91   : > { %2880 = vmatmul.mubr.bf16.vlgmr.msra.gmra.mxu1 %v2682_v61  ;;  %v11457_v61 = vld [vmem:[%s15456_s3 + $0x4d8] sm:$0xff]  }
  0x92   : > { %2552 = vmatmul.mubr.bf16.vlgmr.msra.gmra.mxu0 %v8968_v20  ;;  %10504 = vmatpush3.bf16.msra.mxu1 %v11439_v2  ;;  %v2702_v14 = vsel %vm15515_vm4, %v2697_v27, %v2701_v7  ;;  %v2711_v20 = vshrl.u32 %v9028_v36, 16  ;;  %v9030_v2 = vcombine.low %v12606_v58, %v12986_v6  ;;  %v2723_v58 = vshll.u32 %v9031_v60, 16 }
  0x93   : > { %10464 = vmatpush3.bf16.msra.mxu0 %v11438_v23  ;;  %10505 = vmatprep.subr.bf16.mxu1 %v11441_v62  ;;  %v11453_v23 = vld [vmem:[%s15456_s3 + $0x4a0] sm:$0xff]   ;;  %v13010_v62 = vsel %vm15466_vm12, %v2596_v26, 0  ;;  %v9084_v36 = vcombine.low %v2923_v10, %v2924_v42  ;;  %v9085_v27 = vcombine.high %v2923_v10, %v2924_v42  ;;  %v11469_v10 = vld [vmem:[%s15456_s3 + $0x488] sm:$0xff]   ;;  %vm15525_vm12 = vcmp.ne.s16.totalorder %v12534_v51, 0 }
  0x94   : > { %10465 = vmatprep.subr.bf16.mxu0 %v11440_v13  ;;  %2559 = vmatprep.mubr.bf16.mxu0 %v8971_v21  ;;  %v11456_v13 = vld [vmem:[%s15456_s3 + $0x458] sm:$0xff]   ;;  %v2713_v21 = vor.u32 %v2711_v20, %v2701_v7  ;;  %v2715_v0 = vshll.u32 %v9030_v2, 16  ;;  %v2725_v35 = vrot.slane %v2723_v58, 1  ;;  %v2727_v32 = vshrl.u32 %v9030_v2, 16  ;;  %v11470_v42 = vld [vmem:[%s15456_s3 + $0x440] sm:$0xff]  }
  0x95   : > { %2887 = vmatprep.mubr.bf16.mxu1 %v2710_v29  ;;  %v11473_v58 = vld [vmem:[%s15456_s3 + $0x480] sm:$0xff]  }
  0x96   : > { %10506 = vmatpush3.bf16.msra.mxu1 %v11443_v11  ;;  %v11459_v11 = vld [vmem:[%s15456_s3 + $0x498] sm:$0xff]   ;;  %v2717_v26 = vrot.slane %v2715_v0, 1  ;;  %v3195_v0 = vld [vmem:[%s13067_s21] sm:$0xff] }
  0x97   : > { %10466 = vmatpush3.bf16.msra.mxu0 %v11442_v8  ;;  %10507 = vmatprep.subr.bf16.mxu1 %v11447_v25  ;;  %v11458_v8 = vld [vmem:[%s15456_s3 + $0x418] sm:$0xff]   ;;  %v11463_v25 = vld [vmem:[%s15456_s3 + $0x490] sm:$0xff]  }
  0x98   : > { %10467 = vmatprep.subr.bf16.mxu0 %v11446_v3  ;;  %v2726_v3 = vsel %vm15515_vm4, %v2721_v55, %v2725_v35  ;;  %v2718_v43 = vsel %vm15522_vm6, %v2713_v21, %v2717_v26  ;;  %vm15523_vm4 = vcmp.ne.s16.totalorder %v12495_v57, 0  ;;  %v2920_v21 = vld [vmem:[%s12049_s12 + $0x10] sm:$0xee] }
  0x99   : > { %2888 = vmatmul.mubr.bf16.gmra.mxu1 %v2702_v14  ;;  %v13041_v7 = vsel %vm15523_vm4, %v12930_v31, 0  ;;  %v2739_v14 = vshll.u32 %v9033_v34, 16  ;;  %v11468_v31 = vld [vmem:[%s15456_s3 + $0x408] sm:$0xff]   ;;  %vm15524_vm4 = vmmov %vm15522_vm6 }
  0x9a   : > { %2560 = vmatmul.mubr.bf16.gmra.mxu0 %v8970_v19  ;;  %10508 = vmatpush3.bf16.msra.mxu1 %v11449_v54  ;;  %v2735_v19 = vshrl.u32 %v9031_v60, 16  ;;  %v8974_v54 = vcombine.low %v12952_v41, %v2349_v40  ;;  %v13052_v41 = vrot.slane %v9085_v27, 1  ;;  %v11810_v40 = vld [vmem:[%s12049_s12 + $0x40] sm:$0xff] }
  0x9b   : > { %10468 = vmatpush3.bf16.msra.mxu0 %v11448_v33  ;;  %2567 = vmatprep.mubr.bf16.mxu0 %v8973_v16  ;;  %v9032_v33 = vcombine.low %v2600_v48, %v2600_v48  ;;  %v13047_v16 = vrot.slane %v9084_v36, 1  ;;  %v2741_v20 = vrot.slane %v2739_v14, 1  ;;  %v2927_v55 = vsel %vm15525_vm12, %v11810_v40, 0 }
  0x9c   : > { %10469 = vmatprep.subr.bf16.mxu0 %v11450_v50  ;;  %10509 = vmatprep.subr.bf16.mxu1 %v11451_v39  ;;  %v11467_v50 = vld [vmem:[%s15456_s3 + $0x4c8] sm:$0xff]   ;;  %v2737_v29 = vor.u32 %v2735_v19, %v2725_v35  ;;  %v2729_v39 = vor.u32 %v2727_v32, %v2717_v26  ;;  %v3203_v26 = vsel %vm12087_vm7, %v3195_v0, 0  ;;  %v11477_v32 = vld [vmem:[%s15456_s3 + $0x5b8] sm:$0xff]   ;;  %vm15527_vm12 = vcmp.ne.s16.totalorder %v12406_v9, 0 }
  0x9d   : > { %2895 = vmatprep.mubr.bf16.mxu1 %v2726_v3  ;;  %v2731_v37 = vshll.u32 %v9032_v33, 16  ;;  %v13095_v35 = vld [vmem:[%s13067_s21 + $0x8] sm:$0xff]  ;;  %v11475_v3 = vld [vmem:[%s15456_s3 + $0x5f8] sm:$0xff]  }
  0x9e   : > { %10510 = vmatpush3.bf16.msra.mxu1 %v11453_v23  ;;  %v2742_v60 = vsel %vm15522_vm6, %v2737_v29, %v2741_v20  ;;  %vm15526_vm6 = vcmp.ne.s16.totalorder %v12540_v4, 0  ;;  %v3204_v36 = vsel %vm12103_vm9, %v13095_v35, 0  ;;  %v13131_v14 = vcombine.high %v3195_v0, %v13095_v35  ;;  %v13145_v20 = vld [vmem:[%s13067_s21 + $0x10] sm:$0xff] }
  0x9f   : > { %10470 = vmatpush3.bf16.msra.mxu0 %v11452_v28  ;;  %10511 = vmatprep.subr.bf16.mxu1 %v11457_v61  ;;  %v9087_v28 = vcombine.high %v13010_v62, %v13041_v7  ;;  %v2733_v23 = vrot.slane %v2731_v37, 1 }
  0xa0   : > { %10471 = vmatprep.subr.bf16.mxu0 %v11456_v13  ;;  %v11471_v13 = vld [vmem:[%s15456_s3 + $0x4c0] sm:$0xff]  }
  0xa1   : > { %2896 = vmatmul.mubr.bf16.gmra.mxu1 %v2718_v43  ;;  %v2734_v2 = vsel %vm15524_vm4, %v2729_v39, %v2733_v23  ;;  %v13080_v61 = vrot.slane %v9087_v28, 1  ;;  %v9141_v43 = vcombine.high %v3203_v26, %v3204_v36  ;;  %v11480_v39 = vld [vmem:[%s15456_s3 + $0x530] sm:$0xff]   ;;  %v13148_v23 = vld [vmem:[%s13067_s21 + $0x18] sm:$0xff]  ;;  %vm15528_vm4 = vcmp.ne.s16.totalorder %v12483_v45, 0 }
  0xa2   : > { %2568 = vmatmul.mubr.bf16.gmra.mxu0 %v8972_v49  ;;  %10512 = vmatpush3.bf16.msra.mxu1 %v11459_v11  ;;  %v11472_v49 = vld [vmem:[%s15456_s3 + $0x400] sm:$0xff]   ;;  %v2921_v11 = vsel %vm12415_vm0, %v2920_v21, 0  ;;  %v11481_v28 = vld [vmem:[%s15456_s3 + $0x5b0] sm:$0xff]   ;;  %v11483_v21 = vld [vmem:[%s15456_s3 + $0x5e8] sm:$0xff]  }
  0xa3   : > { %10472 = vmatpush3.bf16.msra.mxu0 %v11458_v8  ;;  %2575 = vmatprep.mubr.bf16.mxu0 %v8975_v53  ;;  %v2928_v8 = vsel %vm15526_vm6, %v12986_v6, 0  ;;  %v2929_v53 = vsel %vm1211_vm15, %v2600_v48, 0  ;;  %v9082_v6 = vcombine.low %v2921_v11, %v12960_v44  ;;  %v9140_v48 = vcombine.low %v3203_v26, %v3204_v36  ;;  %v11484_v26 = vld [vmem:[%s15456_s3 + $0x528] sm:$0xff]   ;;  %v11487_v36 = vld [vmem:[%s15456_s3 + $0x5e0] sm:$0xff]  }
  0xa4   : > { %10473 = vmatprep.subr.bf16.mxu0 %v11460_v47  ;;  %10513 = vmatprep.subr.bf16.mxu1 %v11461_v63  ;;  %v11474_v47 = vld [vmem:[%s15456_s3 + $0x578] sm:$0xff]   ;;  %v9083_v63 = vcombine.high %v2921_v11, %v12960_v44  ;;  %v9089_v27 = vcombine.high %v2927_v55, %v2928_v8  ;;  %v9088_v34 = vcombine.low %v2927_v55, %v2928_v8  ;;  %v11482_v55 = vld [vmem:[%s15456_s3 + $0x568] sm:$0xff]   ;;  %vm15529_vm6 = vcmp.ne.s16.totalorder %v12495_v57, 0 }
  0xa5   : > { %2903 = vmatprep.mubr.bf16.mxu1 %v2742_v60  ;;  %v3000_v19 = vrot.slane %v9082_v6, 1  ;;  %v11476_v44 = vld [vmem:[%s15456_s3 + $0x538] sm:$0xff]   ;;  %v9091_v33 = vcombine.high %v2929_v53, %v2929_v53  ;;  %v3009_v37 = vsel %vm1291_vm11, %v13052_v41, %v13080_v61  ;;  %v13174_v8 = vcombine.low %v3195_v0, %v13095_v35  ;;  %v11485_v0 = vld [vmem:[%s15456_s3 + $0x5a8] sm:$0xff]  }
  0xa6   : > { %10514 = vmatpush3.bf16.msra.mxu1 %v11463_v25  ;;  %v3003_v25 = vrot.slane %v9083_v63, 1  ;;  %v3785_v6 = vsel %vm1206_vm10, %v13148_v23, 0  ;;  %v3545_v63 = vshrl.u32 %v13131_v14, 16 }
  0xa7   : > { %10474 = vmatpush3.bf16.msra.mxu0 %v11462_v30  ;;  %10515 = vmatprep.subr.bf16.mxu1 %v11467_v50  ;;  %v9086_v30 = vcombine.low %v13010_v62, %v13041_v7  ;;  %v3002_v7 = vsel %vm1291_vm11, %v3000_v19, %v13047_v16  ;;  %v11479_v50 = vld [vmem:[%s15456_s3 + $0x5f0] sm:$0xff]   ;;  %v13209_v19 = vsel %vm1204_vm1, %v13095_v35, 0 }
  0xa8   : > { %10475 = vmatprep.subr.bf16.mxu0 %v11466_v1  ;;  %v9090_v1 = vcombine.low %v2929_v53, %v2929_v53  ;;  %v3005_v62 = vsel %vm1291_vm11, %v3003_v25, %v13052_v41  ;;  %v3205_v41 = vsel %vm12146_vm13, %v13145_v20, 0  ;;  %v3784_v53 = vsel %vm15527_vm12, %v13145_v20, 0 }
  0xa9   : > { %2904 = vmatmul.mubr.bf16.gmra.mxu1 %v2734_v2  ;;  %v13128_v29 = vrot.slane %v9086_v30, 1  ;;  %v3206_v2 = vsel %vm12155_vm14, %v13148_v23, 0  ;;  %v11488_v30 = vld [vmem:[%s15456_s3 + $0x520] sm:$0xff]   ;;  %v9256_v25 = vcombine.low %v3784_v53, %v3785_v6  ;;  %vm15530_vm12 = vsmask.f32 7424 }
  0xaa   : > { %2576 = vmatmul.mubr.bf16.gmra.mxu0 %v8974_v54  ;;  %10516 = vmatpush3.bf16.msra.mxu1 %v11469_v10  ;;  %v11478_v54 = vld [vmem:[%s15456_s3 + $0x570] sm:$0xff]   ;;  %v13150_v10 = vrot.slane %v9088_v34, 1  ;;  %v13154_v60 = vrot.slane %v9090_v1, 1  ;;  %v9143_v40 = vcombine.high %v3205_v41, %v3206_v2  ;;  %v9257_v34 = vcombine.high %v3784_v53, %v3785_v6 }
  0xab   : > { %10476 = vmatpush3.bf16.msra.mxu0 %v11468_v31  ;;  %10517 = vmatprep.subr.bf16.mxu1 %v11471_v13  ;;  %v13139_v31 = vrot.slane %v9089_v27, 1  ;;  %v13164_v13 = vcombine.high %v13145_v20, %v13148_v23  ;;  %v3007_v11 = vsel %vm1291_vm11, %v13047_v16, %v13128_v29  ;;  %v11486_v16 = vld [vmem:[%s15456_s3 + $0x560] sm:$0xff]   ;;  %v13288_v6 = vld [vmem:[%s13067_s21 + $0x30] sm:$0xff] }
  0xac   : > { %10477 = vmatprep.subr.bf16.mxu0 %v11470_v42  ;;  %3412 = vmatprep.mubr.bf16.mxu1 %v9141_v43  ;;  %v13152_v42 = vrot.slane %v9091_v33, 1  ;;  %v3535_v43 = vshll.u32 %v13174_v8, 16  ;;  %v3533_v33 = vshrl.u32 %v13174_v8, 16  ;;  %v11504_v8 = vld [vmem:[%s15456_s3 + $0x500] sm:$0xff]  }
  0xad   : > { %3154 = vmatprep.mubr.bf16.mxu0 %v3005_v62 }
  0xae   : > { %10518 = vmatpush3.bf16.msra.mxu1 %v11473_v58  ;;  %v9142_v58 = vcombine.low %v3205_v41, %v3206_v2  ;;  %v13242_v41 = vrot.slane %v9256_v25, 1  ;;  %v11492_v2 = vld [vmem:[%s15456_s3 + $0x518] sm:$0xff]   ;;  %v3209_v25 = vsel %vm12345_vm2, %v13288_v6, 0 }
  0xaf   : > { %10478 = vmatpush3.bf16.msra.mxu0 %v11472_v49  ;;  %10583 = vmatprep.subr.bf16.mxu1 %v11475_v3  ;;  %v3547_v49 = vshll.u32 %v13131_v14, 16  ;;  %v3013_v3 = vsel %vm1291_vm11, %v13080_v61, %v13139_v31  ;;  %v11489_v61 = vld [vmem:[%s15456_s3 + $0x5a0] sm:$0xff]   ;;  %v11490_v14 = vld [vmem:[%s15456_s3 + $0x558] sm:$0xff]  }
  0xb0   : > { %10543 = vmatprep.subr.bf16.mxu0 %v11474_v47  ;;  %v3552_v47 = vshll.u32 %v13164_v13, 16 }
  0xb1   : > { %3413 = vmatmul.mubr.bf16.vlgmr.msra.gmra.mxu1 %v9140_v48  ;;  %v13215_v48 = vld [vmem:[%s13067_s21 + $0x20] sm:$0xff] }
  0xb2   : > { %3155 = vmatmul.mubr.bf16.vlgmr.msra.gmra.mxu0 %v3002_v7  ;;  %10584 = vmatpush3.bf16.msra.mxu1 %v11477_v32  ;;  %v3549_v32 = vrot.slane %v3547_v49, 1  ;;  %v13220_v27 = vrot.slane %v3552_v47, 1  ;;  %v3207_v1 = vsel %vm12269_vm5, %v13215_v48, 0  ;;  %v13231_v7 = vcombine.low %v13145_v20, %v13148_v23 }
  0xb3   : > { %10544 = vmatpush3.bf16.msra.mxu0 %v11476_v44  ;;  %10585 = vmatprep.subr.bf16.mxu1 %v11479_v50  ;;  %v13218_v44 = vld [vmem:[%s13067_s21 + $0x28] sm:$0xff]  ;;  %v3017_v49 = vsel %vm1291_vm11, %v13139_v31, %v13152_v42  ;;  %v13266_v53 = vsel %vm15528_vm4, %v13215_v48, 0  ;;  %v11495_v31 = vld [vmem:[%s15456_s3 + $0x5d0] sm:$0xff]   ;;  %vm15531_vm4 = vcmp.ne.s16.totalorder %v12534_v51, 0 }
  0xb4   : > { %10545 = vmatprep.subr.bf16.mxu0 %v11478_v54  ;;  %3162 = vmatprep.mubr.bf16.mxu0 %v3009_v37  ;;  %v3208_v62 = vsel %vm12275_vm8, %v13218_v44, 0  ;;  %v3011_v37 = vsel %vm1291_vm11, %v13128_v29, %v13150_v10  ;;  %v11493_v29 = vld [vmem:[%s15456_s3 + $0x598] sm:$0xff]   ;;  %v13274_v42 = vsel %vm15529_vm6, %v13218_v44, 0  ;;  %vm15532_vm6 = vcmp.ne.s16.totalorder %v12540_v4, 0 }
  0xb5   : > { %3420 = vmatprep.mubr.bf16.mxu1 %v9143_v40  ;;  %v9145_v54 = vcombine.high %v3207_v1, %v3208_v62  ;;  %v9144_v50 = vcombine.low %v3207_v1, %v3208_v62  ;;  %v13247_v40 = vrot.slane %v9257_v34, 1  ;;  %v9259_v34 = vcombine.high %v13266_v53, %v13274_v42  ;;  %v11498_v1 = vld [vmem:[%s15456_s3 + $0x548] sm:$0xff]  }
  0xb6   : > { %10586 = vmatpush3.bf16.msra.mxu1 %v11481_v28  ;;  %v11491_v28 = vld [vmem:[%s15456_s3 + $0x5d8] sm:$0xff]  }
  0xb7   : > { %10546 = vmatpush3.bf16.msra.mxu0 %v11480_v39  ;;  %10587 = vmatprep.subr.bf16.mxu1 %v11483_v21  ;;  %v3537_v39 = vrot.slane %v3535_v43, 1  ;;  %v11494_v21 = vld [vmem:[%s15456_s3 + $0x550] sm:$0xff]   ;;  %v3564_v43 = vshrl.u32 %v13164_v13, 16  ;;  %v3015_v13 = vsel %vm1291_vm11, %v13150_v10, %v13154_v60 }
  0xb8   : > { %10547 = vmatprep.subr.bf16.mxu0 %v11482_v55  ;;  %v13251_v55 = vcombine.high %v13215_v48, %v13218_v44 }
  0xb9   : > { %3421 = vmatmul.mubr.bf16.gmra.mxu1 %v9142_v58  ;;  %v3540_v58 = vshll.u32 %v13231_v7, 16 }
  0xba   : > { %3163 = vmatmul.mubr.bf16.gmra.mxu0 %v3007_v11  ;;  %10588 = vmatpush3.bf16.msra.mxu1 %v11485_v0  ;;  %v13278_v11 = vcombine.low %v13215_v48, %v13218_v44  ;;  %v3568_v47 = vshll.u32 %v13251_v55, 16  ;;  %v11497_v0 = vld [vmem:[%s15456_s3 + $0x590] sm:$0xff]  }
  0xbb   : > { %10548 = vmatpush3.bf16.msra.mxu0 %v11484_v26  ;;  %10589 = vmatprep.subr.bf16.mxu1 %v11487_v36  ;;  %v11496_v26 = vld [vmem:[%s15456_s3 + $0x510] sm:$0xff]   ;;  %v3550_v36 = vor.u32 %v3549_v32, %v3545_v63 }
  0xbc   : > { %10549 = vmatprep.subr.bf16.mxu0 %v11486_v16  ;;  %3170 = vmatprep.mubr.bf16.mxu0 %v3013_v3  ;;  %v13291_v16 = vld [vmem:[%s13067_s21 + $0x38] sm:$0xff]  ;;  %v13293_v3 = vrot.slane %v3540_v58, 1  ;;  %v3560_v62 = vshll.u32 %v13278_v11, 16 }
  0xbd   : > { %3428 = vmatprep.mubr.bf16.mxu1 %v9145_v54  ;;  %v11499_v54 = vld [vmem:[%s15456_s3 + $0x5c8] sm:$0xff]   ;;  %v3555_v10 = vsel %vm15530_vm12, %v3550_v36, %v13220_v27  ;;  %v13324_v60 = vcombine.high %v13288_v6, %v13291_v16 }
  0xbe   : > { %10590 = vmatpush3.bf16.msra.mxu1 %v11489_v61  ;;  %v3210_v61 = vsel %vm12351_vm3, %v13291_v16, 0  ;;  %v13338_v58 = vrot.slane %v3560_v62, 1 }
  0xbf   : > { %10550 = vmatpush3.bf16.msra.mxu0 %v11488_v30  ;;  %10591 = vmatprep.subr.bf16.mxu1 %v11491_v28  ;;  %v3556_v30 = vshrl.u32 %v13231_v7, 16  ;;  %v9147_v63 = vcombine.high %v3209_v25, %v3210_v61  ;;  %v9146_v32 = vcombine.low %v3209_v25, %v3210_v61  ;;  %v11501_v28 = vld [vmem:[%s15456_s3 + $0x588] sm:$0xff]   ;;  %v11511_v61 = vld [vmem:[%s15456_s3 + $0x6f8] sm:$0xff]   ;;  %v11516_v7 = vld [vmem:[%s15456_s3 + $0x630] sm:$0xff]  }
  0xc0   : > { %10551 = vmatprep.subr.bf16.mxu0 %v11490_v14  ;;  %v11500_v14 = vld [vmem:[%s15456_s3 + $0x508] sm:$0xff]  }
  0xc1   : > { %3429 = vmatmul.mubr.bf16.gmra.mxu1 %v9144_v50  ;;  %v13315_v50 = vrot.slane %v3568_v47, 1 }
  0xc2   : > { %3171 = vmatmul.mubr.bf16.gmra.mxu0 %v3011_v37  ;;  %10592 = vmatpush3.bf16.msra.mxu1 %v11493_v29  ;;  %v3580_v37 = vshrl.u32 %v13251_v55, 16  ;;  %v11502_v29 = vld [vmem:[%s15456_s3 + $0x540] sm:$0xff]   ;;  %v3566_v55 = vor.u32 %v3564_v43, %v13220_v27  ;;  %v3584_v27 = vshll.u32 %v13324_v60, 16 }
  0xc3   : > { %10552 = vmatpush3.bf16.msra.mxu0 %v11492_v2  ;;  %3178 = vmatprep.mubr.bf16.mxu0 %v3017_v49  ;;  %v13330_v2 = vrot.slane %v9259_v34, 1  ;;  %v3538_v49 = vor.u32 %v3537_v39, %v3533_v33  ;;  %v11505_v33 = vld [vmem:[%s15456_s3 + $0x580] sm:$0xff]  }
  0xc4   : > { %10553 = vmatprep.subr.bf16.mxu0 %v11494_v21  ;;  %10593 = vmatprep.subr.bf16.mxu1 %v11495_v31  ;;  %v11503_v21 = vld [vmem:[%s15456_s3 + $0x5c0] sm:$0xff]   ;;  %v9258_v31 = vcombine.low %v13266_v53, %v13274_v42  ;;  %v3789_v53 = vsel %vm15532_vm6, %v13291_v16, 0 }
  0xc5   : > { %3436 = vmatprep.mubr.bf16.mxu1 %v9147_v63  ;;  %v3781_v39 = vld [vmem:[%s13067_s21] sm:$0xee]  ;;  %v3543_v47 = vsel %vm15530_vm12, %v3538_v49, %v13293_v3  ;;  %v13377_v63 = vcombine.low %v13288_v6, %v13291_v16 }
  0xc6   : > { %10594 = vmatpush3.bf16.msra.mxu1 %v11497_v0  ;;  %v3782_v42 = vsel %vm12415_vm0, %v3781_v39, 0  ;;  %v11510_v0 = vld [vmem:[%s15456_s3 + $0x678] sm:$0xff]   ;;  %v13373_v34 = vrot.slane %v9258_v31, 1  ;;  %v3572_v31 = vshrl.u32 %v13278_v11, 16  ;;  %v11521_v11 = vld [vmem:[%s15456_s3 + $0x6e8] sm:$0xff]  }
  0xc7   : > { %10554 = vmatpush3.bf16.msra.mxu0 %v11496_v26  ;;  %10595 = vmatprep.subr.bf16.mxu1 %v11499_v54  ;;  %v3788_v26 = vsel %vm15531_vm4, %v13288_v6, 0  ;;  %vm15533_vm4 = vmmov %vm15530_vm12  ;;  %v9254_v43 = vcombine.low %v3782_v42, %v13209_v19  ;;  %v9255_v25 = vcombine.high %v3782_v42, %v13209_v19  ;;  %v11513_v19 = vld [vmem:[%s15456_s3 + $0x6b8] sm:$0xff]   ;;  %v11514_v54 = vld [vmem:[%s15456_s3 + $0x670] sm:$0xff]   ;;  %v3596_v42 = vshrl.u32 %v13324_v60, 16 }
  0xc8   : > { %10555 = vmatprep.subr.bf16.mxu0 %v11498_v1  ;;  %v3571_v36 = vsel %vm15533_vm4, %v3566_v55, %v13315_v50  ;;  %v11515_v55 = vld [vmem:[%s15456_s3 + $0x6f0] sm:$0xff]   ;;  %vm15534_vm6 = vmmov %vm15533_vm4  ;;  %v11522_v39 = vld [vmem:[%s15456_s3 + $0x628] sm:$0xff]   ;;  %v13545_v60 = vsel %vm12146_vm13, %v13148_v23, 0 }
  0xc9   : > { %3437 = vmatmul.mubr.bf16.gmra.mxu1 %v9146_v32  ;;  %v13382_v32 = vrot.slane %v3584_v27, 1  ;;  %v3861_v1 = vrot.slane %v9254_v43, 1  ;;  %v3864_v62 = vrot.slane %v9255_v25, 1  ;;  %vm15535_vm12 = vmmov %vm15533_vm4  ;;  %v11524_v43 = vld [vmem:[%s15456_s3 + $0x660] sm:$0xff]   ;;  %v3574_v25 = vor.u32 %v3572_v31, %v13338_v58 }
  0xca   : > { %3179 = vmatmul.mubr.bf16.gmra.mxu0 %v3015_v13  ;;  %10596 = vmatpush3.bf16.msra.mxu1 %v11501_v28  ;;  %v11512_v13 = vld [vmem:[%s15456_s3 + $0x638] sm:$0xff]   ;;  %v9260_v28 = vcombine.low %v3788_v26, %v3789_v53 }
  0xcb   : > { %10556 = vmatpush3.bf16.msra.mxu0 %v11500_v14  ;;  %3740 = vmatprep.mubr.bf16.mxu0 %v3555_v10  ;;  %v9261_v14 = vcombine.high %v3788_v26, %v3789_v53  ;;  %v3558_v10 = vor.u32 %v3556_v30, %v13293_v3  ;;  %v3863_v49 = vsel %vm1291_vm11, %v3861_v1, %v13242_v41  ;;  %v11517_v26 = vld [vmem:[%s15456_s3 + $0x6b0] sm:$0xff]  }
  0xcc   : > { %10557 = vmatprep.subr.bf16.mxu0 %v11502_v29  ;;  %10597 = vmatprep.subr.bf16.mxu1 %v11503_v21  ;;  %v3866_v29 = vsel %vm1291_vm11, %v3864_v62, %v13247_v40  ;;  %v3576_v21 = vshll.u32 %v13377_v63, 16  ;;  %v3870_v3 = vsel %vm1291_vm11, %v13247_v40, %v13330_v2  ;;  %v3582_v30 = vor.u32 %v3580_v37, %v13315_v50  ;;  %v11520_v40 = vld [vmem:[%s15456_s3 + $0x668] sm:$0xff]  }
  0xcd   : > { %4015 = vmatprep.mubr.bf16.mxu1 %v3866_v29  ;;  %v3563_v27 = vsel %vm15534_vm6, %v3558_v10, %v13338_v58  ;;  %v13428_v37 = vcombine.high %v13095_v35, %v13145_v20  ;;  %v11526_v58 = vld [vmem:[%s15456_s3 + $0x620] sm:$0xff]   ;;  %v13481_v29 = vcombine.low %v13148_v23, %v13215_v48  ;;  %vm15536_vm6 = vmmov %vm15533_vm4 }
  0xce   : > { %10598 = vmatpush3.bf16.msra.mxu1 %v11505_v33  ;;  %v13419_v33 = vrot.slane %v9260_v28, 1  ;;  %v13424_v50 = vrot.slane %v3576_v21, 1  ;;  %v3587_v53 = vsel %vm15535_vm12, %v3582_v30, %v13382_v32  ;;  %v11527_v10 = vld [vmem:[%s15456_s3 + $0x6a0] sm:$0xff]   ;;  %v11531_v21 = vld [vmem:[%s15456_s3 + $0x6d8] sm:$0xff]   ;;  %vm15537_vm12 = vmmov %vm15533_vm4 }
  0xcf   : > { %10558 = vmatpush3.bf16.msra.mxu0 %v11504_v8  ;;  %10663 = vmatprep.subr.bf16.mxu1 %v11511_v61  ;;  %v13412_v8 = vrot.slane %v9261_v14, 1  ;;  %v13450_v61 = vsel %vm12087_vm7, %v13095_v35, 0  ;;  %v4401_v1 = vshll.u32 %v13428_v37, 16  ;;  %v13473_v14 = vcombine.low %v13095_v35, %v13145_v20  ;;  %v11530_v35 = vld [vmem:[%s15456_s3 + $0x658] sm:$0xff]  }
  0xd0   : > { %10623 = vmatprep.subr.bf16.mxu0 %v11510_v0  ;;  %v3588_v0 = vshrl.u32 %v13377_v63, 16  ;;  %v4399_v28 = vshrl.u32 %v13428_v37, 16  ;;  %v11532_v30 = vld [vmem:[%s15456_s3 + $0x618] sm:$0xff]   ;;  %v13560_v63 = vcombine.low %v13218_v44, %v13288_v6 }
  0xd1   : > { %4016 = vmatmul.mubr.bf16.vlgmr.msra.gmra.mxu1 %v3863_v49  ;;  %v3579_v49 = vsel %vm15533_vm4, %v3574_v25, %v13424_v50  ;;  %v11535_v25 = vld [vmem:[%s15456_s3 + $0x6d0] sm:$0xff]  }
  0xd2   : > { %3741 = vmatmul.mubr.bf16.vlgmr.msra.gmra.mxu0 %v3543_v47  ;;  %10664 = vmatpush3.bf16.msra.mxu1 %v11513_v19  ;;  %v11523_v47 = vld [vmem:[%s15456_s3 + $0x6a8] sm:$0xff]   ;;  %v3874_v19 = vsel %vm1291_vm11, %v13330_v2, %v13412_v8 }
  0xd3   : > { %10624 = vmatpush3.bf16.msra.mxu0 %v11512_v13  ;;  %3748 = vmatprep.mubr.bf16.mxu0 %v3571_v36  ;;  %v3868_v36 = vsel %vm1291_vm11, %v13242_v41, %v13373_v34  ;;  %v13454_v13 = vcombine.high %v13148_v23, %v13215_v48  ;;  %v11525_v41 = vld [vmem:[%s15456_s3 + $0x6e0] sm:$0xff]  }
  0xd4   : > { %10625 = vmatprep.subr.bf16.mxu0 %v11514_v54  ;;  %10665 = vmatprep.subr.bf16.mxu1 %v11515_v55  ;;  %v13469_v54 = vsel %vm12103_vm9, %v13145_v20, 0 }
  0xd5   : > { %4023 = vmatprep.mubr.bf16.mxu1 %v3870_v3  ;;  %v4406_v20 = vshll.u32 %v13454_v13, 16 }
  0xd6   : > { %10666 = vmatpush3.bf16.msra.mxu1 %v11517_v26  ;;  %v4389_v26 = vshll.u32 %v13473_v14, 16 }
  0xd7   : > { %10626 = vmatpush3.bf16.msra.mxu0 %v11516_v7  ;;  %10667 = vmatprep.subr.bf16.mxu1 %v11521_v11  ;;  %v13492_v7 = vrot.slane %v4401_v1, 1 }
  0xd8   : > { %10627 = vmatprep.subr.bf16.mxu0 %v11520_v40  ;;  %v4394_v40 = vshll.u32 %v13481_v29, 16 }
  0xd9   : > { %4024 = vmatmul.mubr.bf16.gmra.mxu1 %v3868_v36 }
  0xda   : > { %3749 = vmatmul.mubr.bf16.gmra.mxu0 %v3563_v27  ;;  %10668 = vmatpush3.bf16.msra.mxu1 %v11523_v47  ;;  %v11533_v27 = vld [vmem:[%s15456_s3 + $0x698] sm:$0xff]   ;;  %v13508_v47 = vrot.slane %v4406_v20, 1  ;;  %v13529_v20 = vcombine.high %v13218_v44, %v13288_v6 }
  0xdb   : > { %10628 = vmatpush3.bf16.msra.mxu0 %v11522_v39  ;;  %3756 = vmatprep.mubr.bf16.mxu0 %v3587_v53  ;;  %v3872_v39 = vsel %vm1291_vm11, %v13373_v34, %v13419_v33  ;;  %v11534_v53 = vld [vmem:[%s15456_s3 + $0x650] sm:$0xff]  }
  0xdc   : > { %10629 = vmatprep.subr.bf16.mxu0 %v11524_v43  ;;  %10669 = vmatprep.subr.bf16.mxu1 %v11525_v41  ;;  %v4387_v41 = vshrl.u32 %v13473_v14, 16  ;;  %v11536_v34 = vld [vmem:[%s15456_s3 + $0x610] sm:$0xff]   ;;  %v11553_v14 = vld [vmem:[%s15456_s3 + $0x7f8] sm:$0xff]  }
  0xdd   : > { %4031 = vmatprep.mubr.bf16.mxu1 %v3874_v19 }
  0xde   : > { %10670 = vmatpush3.bf16.msra.mxu1 %v11527_v10  ;;  %v11537_v10 = vld [vmem:[%s15456_s3 + $0x690] sm:$0xff]  }
  0xdf   : > { %10630 = vmatpush3.bf16.msra.mxu0 %v11526_v58  ;;  %10671 = vmatprep.subr.bf16.mxu1 %v11531_v21 }
  0xe0   : > { %10631 = vmatprep.subr.bf16.mxu0 %v11530_v35 }
  0xe1   : > { %4032 = vmatmul.mubr.bf16.gmra.mxu1 %v3872_v39 }
  0xe2   : > { %3757 = vmatmul.mubr.bf16.gmra.mxu0 %v3579_v49  ;;  %v13523_v49 = vrot.slane %v4394_v40, 1  ;;  %10672 = vmatpush3.bf16.msra.mxu1 %v11533_v27  ;;  %v11541_v27 = vld [vmem:[%s15456_s3 + $0x6c8] sm:$0xff]  }
  0xe3   : > { %10632 = vmatpush3.bf16.msra.mxu0 %v11532_v30  ;;  %10673 = vmatprep.subr.bf16.mxu1 %v11535_v25 }
  0xe4   : > { %10633 = vmatprep.subr.bf16.mxu0 %v11534_v53 }
  0xe6   : > { %10674 = vmatpush3.bf16.msra.mxu1 %v11537_v10  ;;  %v11544_v10 = vld [vmem:[%s15456_s3 + $0x640] sm:$0xff]  }
  0xe7   : > { %10634 = vmatpush3.bf16.msra.mxu0 %v11536_v34  ;;  %10675 = vmatprep.subr.bf16.mxu1 %v11541_v27 }
  0xf0   : > { %v10159_v31 = vpop.f32.mrf.mxu0 }
  0xf1   : > { %v10199_v62 = vpop.f32.mrf.mxu1 }
  0xf2   : > { %v10160_v36 = vpop.f32.mrf.mxu0 }
  0xf3   : > { %v10200_v2 = vpop.f32.mrf.mxu1  ;;  %v10161_v1 = vadd.f32 %v10160_v36, %v10159_v31 }
  0xf4   : > { %v10201_v55 = vadd.f32 %v10200_v2, %v10199_v62  ;;  %v13517_v62 = vrot.slane %v4389_v26, 1  ;;  %v10162_v58 = vpop.f32.mrf.mxu0  ;;  %v3461_v2 = vld [vmem:[%s13067_s21 + $0x40] sm:$0x11] }
  0xf5   : > { %v10202_v3 = vpop.f32.mrf.mxu1  ;;  %v9205_v21 = vcombine.high %v3461_v2, %v3461_v2  ;;  %v3790_v30 = vsel %vm1211_vm15, %v3461_v2, 0  ;;  %v9204_v31 = vcombine.low %v3461_v2, %v3461_v2 }
  0xf6   : > { %v13525_v35 = vadd.f32 %v10201_v55, %v10161_v1  ;;  %v11540_v55 = vld [vmem:[%s15456_s3 + $0x648] sm:$0xff]   ;;  %v10163_v26 = vpop.f32.mrf.mxu0  ;;  %v9262_v39 = vcombine.low %v3790_v30, %v3790_v30 }
  0xf7   : > { %v10203_v11 = vpop.f32.mrf.mxu1  ;;  %v10164_v53 = vadd.f32 %v10163_v26, %v10162_v58  ;;  %v3592_v36 = vshll.u32 %v9204_v31, 16  ;;  %10635 = vmatprep.subr.bf16.mxu0 %v11540_v55  ;;  %v11542_v58 = vld [vmem:[%s15456_s3 + $0x608] sm:$0xff]   ;;  %v4404_v31 = vor.u32 %v13492_v7, %v4399_v28 }
  0xf8   : > { %v10204_v43 = vadd.f32 %v10203_v11, %v10202_v3  ;;  %v3598_v3 = vor.u32 %v3596_v42, %v13382_v32  ;;  %v9263_v11 = vcombine.high %v3790_v30, %v3790_v30  ;;  %v3600_v32 = vshll.u32 %v9205_v21, 16  ;;  %v11543_v30 = vld [vmem:[%s15456_s3 + $0x688] sm:$0xff]   ;;  %v10165_v21 = vpop.f32.mrf.mxu0  ;;  %10636 = vmatpush3.bf16.msra.mxu0 %v11542_v58 }
  0xf9   : > { %v10205_v19 = vpop.f32.mrf.mxu1  ;;  %v3590_v42 = vor.u32 %v3588_v0, %v13424_v50  ;;  %v3875_v2 = vrot.slane %v9262_v39, 1  ;;  %v3594_v0 = vrot.slane %v3592_v36, 1  ;;  %v4422_v39 = vshll.u32 %v13529_v20, 16  ;;  %10676 = vmatpush3.bf16.msra.mxu1 %v11543_v30  ;;  %10637 = vmatprep.subr.bf16.mxu0 %v11544_v10 }
  0xfa   : > { %v3877_v34 = vrot.slane %v9263_v11, 1  ;;  %v13556_v26 = vadd.f32 %v10204_v43, %v10164_v53  ;;  %v3602_v50 = vrot.slane %v3600_v32, 1  ;;  %v13577_v11 = vsel %vm12155_vm14, %v13215_v48, 0  ;;  %v10166_v37 = vpop.f32.mrf.mxu0  ;;  %v11546_v53 = vld [vmem:[%s15456_s3 + $0x600] sm:$0xff]  }
  0xfb   : > { %v10206_v40 = vpop.f32.mrf.mxu1  ;;  %v10167_v27 = vadd.f32 %v10166_v37, %v10165_v21  ;;  %v4418_v32 = vshrl.u32 %v13454_v13, 16  ;;  %v11552_v13 = vld [vmem:[%s15456_s3 + $0x778] sm:$0xff]   ;;  %v4410_v58 = vshrl.u32 %v13481_v29, 16  ;;  %v9312_v21 = vcombine.low %v13450_v61, %v13469_v54 }
  0xfc   : > { %v10207_v25 = vadd.f32 %v10206_v40, %v10205_v19  ;;  %v9313_v19 = vcombine.high %v13450_v61, %v13469_v54  ;;  %v3878_v43 = vsel %vm1291_vm11, %v13412_v8, %v3877_v34  ;;  %v3876_v40 = vsel %vm1291_vm11, %v13419_v33, %v3875_v2  ;;  %v11545_v33 = vld [vmem:[%s15456_s3 + $0x6c0] sm:$0xff]   ;;  %v10168_v36 = vpop.f32.mrf.mxu0  ;;  %10638 = vmatpush3.bf16.msra.mxu0 %v11546_v53  ;;  %v11554_v29 = vld [vmem:[%s15456_s3 + $0x738] sm:$0xff]   ;;  %v11559_v53 = vld [vmem:[%s15456_s3 + $0x7b0] sm:$0xff]  }
  0xfd   : > { %v10208_v1 = vpop.f32.mrf.mxu1  ;;  %v3603_v7 = vsel %vm15536_vm6, %v3598_v3, %v3602_v50  ;;  %4039 = vmatprep.mubr.bf16.mxu1 %v3878_v43  ;;  %v3595_v8 = vsel %vm15537_vm12, %v3590_v42, %v3594_v0  ;;  %v11547_v3 = vld [vmem:[%s15456_s3 + $0x680] sm:$0xff]   ;;  %v4409_v42 = vsel %vm15533_vm4, %v4404_v31, %v13508_v47  ;;  %v4414_v34 = vshll.u32 %v13560_v63, 16  ;;  %10677 = vmatprep.subr.bf16.mxu1 %v11545_v33  ;;  %vm15538_vm6 = vmmov %vm15533_vm4  ;;  %v11556_v43 = vld [vmem:[%s15456_s3 + $0x770] sm:$0xff]  }
  0xfe   : > { %3764 = vmatprep.mubr.bf16.mxu0 %v3603_v7  ;;  %4040 = vmatmul.mubr.bf16.gmra.mxu1 %v3876_v40  ;;  %v13598_v2 = vadd.f32 %v10207_v25, %v10167_v27  ;;  %v10169_v30 = vpop.f32.mrf.mxu0  ;;  %v13617_v50 = vsel %vm12269_vm5, %v13218_v44, 0  ;;  %v4420_v61 = vor.u32 %v4418_v32, %v13508_v47  ;;  %vm15539_vm12 = vcmp.ne.s16.totalorder %v12406_v9, 0  ;;  %v11557_v47 = vld [vmem:[%s15456_s3 + $0x7f0] sm:$0xff]  }
  0xff   : > { %v10209_v55 = vpop.f32.mrf.mxu1  ;;  %3765 = vmatmul.mubr.bf16.gmra.mxu0 %v3595_v8  ;;  %4594 = vmatprep.mubr.bf16.mxu1 %v4409_v42  ;;  %v13625_v54 = vrot.slane %v4414_v34, 1  ;;  %v13635_v37 = vsel %vm15539_vm12, %v13148_v23, 0  ;;  %v13645_v8 = vsel %vm1206_vm10, %v13215_v48, 0  ;;  %v11558_v33 = vld [vmem:[%s15456_s3 + $0x730] sm:$0xff]   ;;  %v13653_v23 = vsel %vm12275_vm8, %v13288_v6, 0  ;;  %v11562_v34 = vld [vmem:[%s15456_s3 + $0x768] sm:$0xff]   ;;  %vm15541_vm12 = vmmov %vm15533_vm4 }
 0x100   : > { %v10210_v28 = vadd.f32 %v10209_v55, %v10208_v1  ;;  %v4392_v1 = vor.u32 %v13517_v62, %v4387_v41  ;;  %4266 = vmatprep.mubr.bf16.mxu0 %v9313_v19  ;;  %v13607_v41 = vrot.slane %v4422_v39, 1  ;;  %v10170_v62 = vadd.f32 %v10169_v30, %v10168_v36  ;;  %10703 = vmatprep.subr.bf16.mxu0 %v11552_v13  ;;  %v11555_v19 = vld [vmem:[%s15456_s3 + $0x7b8] sm:$0xff]   ;;  %v10171_v40 = vpop.f32.mrf.mxu0 }
 0x101   : > { %v10211_v25 = vpop.f32.mrf.mxu1  ;;  %10678 = vmatpush3.bf16.msra.mxu1 %v11547_v3  ;;  %v9429_v27 = vcombine.high %v13635_v37, %v13645_v8  ;;  %v4412_v36 = vor.u32 %v4410_v58, %v13523_v49  ;;  %v4434_v3 = vshrl.u32 %v13529_v20, 16  ;;  %v4426_v13 = vshrl.u32 %v13560_v63, 16 }
 0x102   : > { %v4397_v0 = vsel %vm15538_vm6, %v4392_v1, %v13523_v49  ;;  %v13627_v31 = vadd.f32 %v10210_v28, %v10170_v62  ;;  %10743 = vmatprep.subr.bf16.mxu1 %v11553_v14  ;;  %v9315_v28 = vcombine.high %v13545_v60, %v13577_v11  ;;  %v10172_v39 = vpop.f32.mrf.mxu0  ;;  %v4425_v32 = vsel %vm15533_vm4, %v4420_v61, %v13607_v41  ;;  %v11563_v49 = vld [vmem:[%s15456_s3 + $0x7e8] sm:$0xff]  }
 0x103   : > { %v10212_v55 = vpop.f32.mrf.mxu1  ;;  %v10173_v42 = vadd.f32 %v10172_v39, %v10171_v40  ;;  %v13673_v20 = vrot.slane %v9429_v27, 1  ;;  %v11564_v62 = vld [vmem:[%s15456_s3 + $0x728] sm:$0xff]   ;;  %vm15540_vm6 = vcmp.ne.s16.totalorder %v12483_v45, 0  ;;  %vm15542_vm4 = vcmp.ne.s16.totalorder %v12495_v57, 0 }
 0x104   : > { %v10213_v10 = vadd.f32 %v10212_v55, %v10211_v25  ;;  %v10174_v30 = vpop.f32.mrf.mxu0  ;;  %v4640_v63 = vsel %vm15540_vm6, %v13218_v44, 0  ;;  %v4641_v61 = vsel %vm15542_vm4, %v13288_v6, 0  ;;  %v11566_v55 = vld [vmem:[%s15456_s3 + $0x760] sm:$0xff]   ;;  %v13699_v40 = vsel %vm12146_vm13, %v13215_v48, 0  ;;  %vm15543_vm6 = vmmov %vm15541_vm12 }
 0x105   : > { %v10214_v7 = vpop.f32.mrf.mxu1  ;;  %v11567_v6 = vld [vmem:[%s15456_s3 + $0x7e0] sm:$0xff]   ;;  %vm15545_vm4 = vmmov %vm15543_vm6 }
 0x106   : > { %4595 = vmatmul.mubr.bf16.vlgmr.msra.gmra.mxu1 %v4397_v0  ;;  %v13671_v58 = vadd.f32 %v10213_v10, %v10173_v42  ;;  %v10175_v25 = vpop.f32.mrf.mxu0  ;;  %v11565_v0 = vld [vmem:[%s15456_s3 + $0x7a8] sm:$0xff]   ;;  %v9430_v10 = vcombine.low %v4640_v63, %v4641_v61  ;;  %v11568_v48 = vld [vmem:[%s15456_s3 + $0x720] sm:$0xff]  }
 0x107   : > { %4267 = vmatmul.mubr.bf16.vlgmr.msra.gmra.mxu0 %v9312_v21  ;;  %10744 = vmatpush3.bf16.msra.mxu1 %v11555_v19  ;;  %v10215_v1 = vpop.f32.mrf.mxu1  ;;  %v9314_v21 = vcombine.low %v13545_v60, %v13577_v11  ;;  %v10176_v19 = vadd.f32 %v10175_v25, %v10174_v30  ;;  %v9428_v60 = vcombine.low %v13635_v37, %v13645_v8  ;;  %v13711_v37 = vsel %vm12155_vm14, %v13218_v44, 0  ;;  %v11569_v44 = vld [vmem:[%s15456_s3 + $0x7a0] sm:$0xff]  }
 0x108   : > { %10704 = vmatpush3.bf16.msra.mxu0 %v11554_v29  ;;  %10745 = vmatprep.subr.bf16.mxu1 %v11557_v47  ;;  %v10216_v14 = vadd.f32 %v10215_v1, %v10214_v7  ;;  %v4417_v29 = vsel %vm15541_vm12, %v4412_v36, %v13625_v54  ;;  %v9431_v11 = vcombine.high %v4640_v63, %v4641_v61  ;;  %v10177_v7 = vpop.f32.mrf.mxu0  ;;  %v13728_v36 = vrot.slane %v9430_v10, 1  ;;  %v11573_v63 = vld [vmem:[%s15456_s3 + $0x7d8] sm:$0xff]   ;;  %vm15544_vm12 = vmmov %vm15543_vm6 }
 0x109   : > { %10705 = vmatprep.subr.bf16.mxu0 %v11556_v43  ;;  %4274 = vmatprep.mubr.bf16.mxu0 %v9315_v28  ;;  %v10217_v43 = vpop.f32.mrf.mxu1  ;;  %v9317_v47 = vcombine.high %v13617_v50, %v13653_v23  ;;  %v9487_v27 = vcombine.high %v13699_v40, %v13711_v37  ;;  %v4436_v25 = vor.u32 %v4434_v3, %v13607_v41 }
 0x10a   : > { %4602 = vmatprep.mubr.bf16.mxu1 %v4425_v32  ;;  %v13706_v28 = vadd.f32 %v10216_v14, %v10176_v19  ;;  %v10178_v30 = vpop.f32.mrf.mxu0  ;;  %v4428_v19 = vor.u32 %v4426_v13, %v13625_v54  ;;  %v9316_v3 = vcombine.low %v13617_v50, %v13653_v23  ;;  %v11575_v50 = vld [vmem:[%s15456_s3 + $0x798] sm:$0xff]   ;;  %v11576_v23 = vld [vmem:[%s15456_s3 + $0x750] sm:$0xff]  }
 0x10b   : > { %10746 = vmatpush3.bf16.msra.mxu1 %v11559_v53  ;;  %v10218_v8 = vpop.f32.mrf.mxu1  ;;  %v13726_v53 = vld [vmem:[%s13067_s21 + $0x40] sm:$0xff] }
 0x10c   : > { %10706 = vmatpush3.bf16.msra.mxu0 %v11558_v33  ;;  %10747 = vmatprep.subr.bf16.mxu1 %v11563_v49  ;;  %v13716_v33 = vrot.slane %v9431_v11, 1  ;;  %v10219_v32 = vadd.f32 %v10218_v8, %v10217_v43  ;;  %v13732_v42 = vcombine.high %v13291_v16, %v13726_v53  ;;  %v13736_v1 = vcombine.low %v13291_v16, %v13726_v53  ;;  %v11577_v8 = vld [vmem:[%s15456_s3 + $0x7d0] sm:$0xff]  }
 0x10d   : > { %10707 = vmatprep.subr.bf16.mxu0 %v11562_v34  ;;  %v11572_v34 = vld [vmem:[%s15456_s3 + $0x758] sm:$0xff]   ;;  %v10220_v14 = vpop.f32.mrf.mxu1  ;;  %v13741_v49 = vrot.slane %v9428_v60, 1  ;;  %v13773_v54 = vsel %vm12351_vm3, %v13726_v53, 0 }
 0x10e   : > { %4603 = vmatmul.mubr.bf16.gmra.mxu1 %v4417_v29  ;;  %v10179_v29 = vadd.f32 %v10178_v30, %v10177_v7  ;;  %v4430_v61 = vshll.u32 %v13736_v1, 16 }
 0x10f   : > { %4275 = vmatmul.mubr.bf16.gmra.mxu0 %v9314_v21  ;;  %10748 = vmatpush3.bf16.msra.mxu1 %v11565_v0  ;;  %v13755_v21 = vsel %vm12345_vm2, %v13291_v16, 0  ;;  %v4438_v0 = vshll.u32 %v13732_v42, 16  ;;  %v10221_v43 = vpop.f32.mrf.mxu1  ;;  %v13763_v41 = vsel %vm1291_vm11, %v13741_v49, %v13728_v36  ;;  %v11574_v16 = vld [vmem:[%s15456_s3 + $0x718] sm:$0xff]  }
 0x110   : > { %10708 = vmatpush3.bf16.msra.mxu0 %v11564_v62  ;;  %10749 = vmatprep.subr.bf16.mxu1 %v11567_v6  ;;  %v13746_v62 = vsel %vm1291_vm11, %v13673_v20, %v13716_v33  ;;  %v13775_v13 = vadd.f32 %v10219_v32, %v10179_v29  ;;  %v10222_v60 = vadd.f32 %v10221_v43, %v10220_v14  ;;  %v4432_v10 = vrot.slane %v4430_v61, 1  ;;  %v13801_v29 = vld [vmem:[%s13067_s21 + $0x48] sm:$0x11] }
 0x111   : > { %10709 = vmatprep.subr.bf16.mxu0 %v11566_v55  ;;  %4282 = vmatprep.mubr.bf16.mxu0 %v9317_v47  ;;  %v10180_v55 = vpop.f32.mrf.mxu0  ;;  %v4440_v11 = vrot.slane %v4438_v0, 1  ;;  %v4450_v32 = vshrl.u32 %v13732_v42, 16  ;;  %v10279_v30 = vpop.f32.mrf.mxu1  ;;  %v4442_v14 = vshrl.u32 %v13736_v1, 16  ;;  %v11811_v42 = vld [vmem:[%s13067_s21 + $0x10] sm:$0xff]  ;;  %v9377_v1 = vcombine.high %v13801_v29, %v13801_v29  ;;  %v11582_v43 = vld [vmem:[%s15456_s3 + $0x748] sm:$0xff]  }
 0x112   : > { %v13806_v0 = vsel %vm1204_vm1, %v11811_v42, 0 }
 0x113   : > { %10750 = vmatpush3.bf16.msra.mxu1 %v11569_v44  ;;  %v10181_v6 = vpop.f32.mrf.mxu0  ;;  %v4441_v7 = vsel %vm15543_vm6, %v4436_v25, %v4440_v11  ;;  %v9319_v44 = vcombine.high %v13755_v21, %v13773_v54  ;;  %v10280_v61 = vpop.f32.mrf.mxu1  ;;  %v4444_v39 = vor.u32 %v4442_v14, %v4432_v10  ;;  %v11587_v14 = vld [vmem:[%s15456_s3 + $0x7c0] sm:$0xff]   ;;  %vm15546_vm6 = vmmov %vm15545_vm4 }
 0x114   : > { %10710 = vmatpush3.bf16.msra.mxu0 %v11568_v48  ;;  %10751 = vmatprep.subr.bf16.mxu1 %v11573_v63  ;;  %v10182_v47 = vadd.f32 %v10181_v6, %v10180_v55  ;;  %v4433_v48 = vsel %vm15544_vm12, %v4428_v19, %v4432_v10  ;;  %v11579_v63 = vld [vmem:[%s15456_s3 + $0x790] sm:$0xff]   ;;  %v9376_v55 = vcombine.low %v13801_v29, %v13801_v29  ;;  %v11812_v6 = vld [vmem:[%s13067_s21 + $0x18] sm:$0xff]  ;;  %v11586_v10 = vld [vmem:[%s15456_s3 + $0x740] sm:$0xff]   ;;  %vm15547_vm12 = vcmp.ne.s16.totalorder %v12534_v51, 0 }
 0x115   : > { %10711 = vmatprep.subr.bf16.mxu0 %v11572_v34  ;;  %4610 = vmatprep.mubr.bf16.mxu1 %v4441_v7  ;;  %v11578_v34 = vld [vmem:[%s15456_s3 + $0x710] sm:$0xff]   ;;  %v10239_v19 = vpop.f32.mrf.mxu0 }
 0x116   : > { %v13795_v25 = vadd.f32 %v10222_v60, %v10182_v47  ;;  %4611 = vmatmul.mubr.bf16.gmra.mxu1 %v4433_v48  ;;  %v4452_v60 = vor.u32 %v4450_v32, %v4440_v11  ;;  %v13827_v47 = vsel %vm12103_vm9, %v11812_v6, 0  ;;  %v10282_v48 = vpop.f32.mrf.mxu1  ;;  %v11584_v11 = vld [vmem:[%s15456_s3 + $0x708] sm:$0xff]  }
 0x117   : > { %4283 = vmatmul.mubr.bf16.gmra.mxu0 %v9316_v3  ;;  %10752 = vmatpush3.bf16.msra.mxu1 %v11575_v50  ;;  %v13817_v3 = vsel %vm12087_vm7, %v11811_v42, 0  ;;  %v9318_v50 = vcombine.low %v13755_v21, %v13773_v54  ;;  %v10240_v7 = vpop.f32.mrf.mxu0  ;;  %v4454_v42 = vshll.u32 %v9377_v1, 16  ;;  %v11585_v21 = vld [vmem:[%s15456_s3 + $0x788] sm:$0xff]  }
 0x118   : > { %10712 = vmatpush3.bf16.msra.mxu0 %v11574_v16  ;;  %v10281_v16 = vadd.f32 %v10280_v61, %v10279_v30  ;;  %10753 = vmatprep.subr.bf16.mxu1 %v11577_v8  ;;  %v4446_v30 = vshll.u32 %v9376_v55, 16  ;;  %v10241_v8 = vadd.f32 %v10240_v7, %v10239_v19  ;;  %v9485_v1 = vcombine.high %v13817_v3, %v13827_v47  ;;  %v11588_v7 = vld [vmem:[%s15456_s3 + $0x700] sm:$0xff]  }
 0x119   : > { %10713 = vmatprep.subr.bf16.mxu0 %v11576_v23  ;;  %4290 = vmatprep.mubr.bf16.mxu0 %v9319_v44  ;;  %v11583_v23 = vld [vmem:[%s15456_s3 + $0x7c8] sm:$0xff]   ;;  %v10242_v54 = vpop.f32.mrf.mxu0  ;;  %v10283_v44 = vpop.f32.mrf.mxu1  ;;  %v4456_v32 = vrot.slane %v4454_v42, 1 }
 0x11a   : > { %v4448_v61 = vrot.slane %v4446_v30, 1  ;;  %v10284_v19 = vadd.f32 %v10283_v44, %v10282_v48 }
 0x11b   : > { %10754 = vmatpush3.bf16.msra.mxu1 %v11579_v63  ;;  %v10243_v63 = vpop.f32.mrf.mxu0  ;;  %v10285_v55 = vpop.f32.mrf.mxu1 }
 0x11c   : > { %10714 = vmatpush3.bf16.msra.mxu0 %v11578_v34  ;;  %v1479_v34 = vadd.f32 %v10241_v8, %v13525_v35  ;;  %10755 = vmatprep.subr.bf16.mxu1 %v11583_v23  ;;  %v4449_v6 = vsel %vm15546_vm6, %v4444_v39, %v4448_v61  ;;  %v10244_v30 = vadd.f32 %v10243_v63, %v10242_v54  ;;  %v11589_v35 = vld [vmem:[%s15456_s3 + $0x780] sm:$0xff]   ;;  %v4635_v23 = vld [vmem:[%s13067_s21 + $0x8] sm:$0xee]  ;;  %v11591_v54 = vld [vmem:[%s15456_s3 + $0x8f8] sm:$0xff]   ;;  %vm15550_vm6 = vcmp.ne.s16.totalorder %v12406_v9, 0 }
 0x11d   : > { %10715 = vmatprep.subr.bf16.mxu0 %v11582_v43  ;;  %v4457_v43 = vsel %vm15545_vm4, %v4452_v60, %v4456_v32  ;;  %v10286_v48 = vpop.f32.mrf.mxu1  ;;  %v4636_v39 = vsel %vm12415_vm0, %v4635_v23, 0  ;;  %v10245_v44 = vpop.f32.mrf.mxu0  ;;  %v11813_v61 = vld [vmem:[%s13067_s21 + $0x38] sm:$0xff]  ;;  %vm15548_vm4 = vcmp.ne.s16.totalorder %v12540_v4, 0  ;;  %v11594_v23 = vld [vmem:[%s15456_s3 + $0x870] sm:$0xff]  }
 0x11e   : > { %v13849_v42 = vadd.f32 %v10281_v16, %v1479_v34  ;;  %4618 = vmatprep.mubr.bf16.mxu1 %v4457_v43  ;;  %v11590_v16 = vld [vmem:[%s15456_s3 + $0x878] sm:$0xff]   ;;  %v1480_v60 = vadd.f32 %v10244_v30, %v13556_v26  ;;  %v9427_v8 = vcombine.high %v4636_v39, %v13806_v0  ;;  %v9484_v43 = vcombine.low %v13817_v3, %v13827_v47 }
 0x11f   : > { %4291 = vmatmul.mubr.bf16.gmra.mxu0 %v9318_v50  ;;  %4619 = vmatmul.mubr.bf16.gmra.mxu1 %v4449_v6  ;;  %v10287_v50 = vadd.f32 %v10286_v48, %v10285_v55  ;;  %v10288_v32 = vpop.f32.mrf.mxu1  ;;  %v11592_v26 = vld [vmem:[%s15456_s3 + $0x838] sm:$0xff]   ;;  %v10246_v63 = vpop.f32.mrf.mxu0 }
 0x120   : > { %10716 = vmatpush3.bf16.msra.mxu0 %v11584_v11  ;;  %10756 = vmatpush3.bf16.msra.mxu1 %v11585_v21  ;;  %v9426_v11 = vcombine.low %v4636_v39, %v13806_v0  ;;  %v13874_v21 = vadd.f32 %v10284_v19, %v1480_v60  ;;  %v13879_v0 = vsel %vm15548_vm4, %v13726_v53, 0  ;;  %v10247_v19 = vadd.f32 %v10246_v63, %v10245_v44  ;;  %v11597_v60 = vld [vmem:[%s15456_s3 + $0x8b0] sm:$0xff]  }
 0x121   : > { %10717 = vmatprep.subr.bf16.mxu0 %v11586_v10  ;;  %5120 = vmatprep.mubr.bf16.mxu1 %v9485_v1  ;;  %v13869_v10 = vsel %vm15547_vm12, %v11813_v61, 0  ;;  %v4718_v1 = vrot.slane %v9427_v8, 1  ;;  %v10289_v55 = vpop.f32.mrf.mxu1  ;;  %v10248_v48 = vpop.f32.mrf.mxu0  ;;  %vm15551_vm12 = vsmask.f32 7424 }
 0x122   : > { %10757 = vmatprep.subr.bf16.mxu1 %v11587_v14  ;;  %v4715_v34 = vrot.slane %v9426_v11, 1  ;;  %v11593_v14 = vld [vmem:[%s15456_s3 + $0x8b8] sm:$0xff]   ;;  %v10290_v6 = vadd.f32 %v10289_v55, %v10288_v32  ;;  %v9433_v3 = vcombine.high %v13869_v10, %v13879_v0  ;;  %v11600_v55 = vld [vmem:[%s15456_s3 + $0x828] sm:$0xff]   ;;  %vm15552_vm4 = vmmov %vm15551_vm12 }
 0x123   : > { %v4720_v30 = vsel %vm1291_vm11, %v4718_v1, %v13673_v20  ;;  %v10291_v47 = vpop.f32.mrf.mxu1  ;;  %v1481_v20 = vadd.f32 %v10247_v19, %v13598_v2  ;;  %v10249_v39 = vpop.f32.mrf.mxu0  ;;  %v11598_v2 = vld [vmem:[%s15456_s3 + $0x868] sm:$0xff]   ;;  %v11814_v1 = vld [vmem:[%s13067_s21 + $0x30] sm:$0xff] }
 0x124   : > { %10718 = vmatpush3.bf16.msra.mxu0 %v11588_v7  ;;  %10758 = vmatpush3.bf16.msra.mxu1 %v11589_v35  ;;  %v4717_v7 = vsel %vm1291_vm11, %v4715_v34, %v13741_v49  ;;  %v11595_v35 = vld [vmem:[%s15456_s3 + $0x8f0] sm:$0xff]   ;;  %v10250_v8 = vadd.f32 %v10249_v39, %v10248_v48  ;;  %v13910_v44 = vrot.slane %v9433_v3, 1  ;;  %v13920_v63 = vsel %vm12269_vm5, %v11814_v1, 0  ;;  %v11601_v19 = vld [vmem:[%s15456_s3 + $0x8a8] sm:$0xff]  }
 0x125   : > { %10783 = vmatprep.subr.bf16.mxu0 %v11590_v16  ;;  %4869 = vmatprep.mubr.bf16.mxu0 %v4720_v30  ;;  %v11596_v49 = vld [vmem:[%s15456_s3 + $0x830] sm:$0xff]   ;;  %v10292_v16 = vpop.f32.mrf.mxu1  ;;  %v13905_v11 = vadd.f32 %v10287_v50, %v1481_v20  ;;  %v10251_v32 = vpop.f32.mrf.mxu0  ;;  %v11599_v50 = vld [vmem:[%s15456_s3 + $0x8e8] sm:$0xff]  }
 0x126   : > { %10823 = vmatprep.subr.bf16.mxu1 %v11591_v54  ;;  %v10293_v54 = vadd.f32 %v10292_v16, %v10291_v47  ;;  %v4728_v3 = vsel %vm1291_vm11, %v13716_v33, %v13910_v44  ;;  %v11606_v33 = vld [vmem:[%s15456_s3 + $0x858] sm:$0xff]  }
 0x127   : > { %4870 = vmatmul.mubr.bf16.vlgmr.msra.gmra.mxu0 %v4717_v7  ;;  %5121 = vmatmul.mubr.bf16.vlgmr.msra.gmra.mxu1 %v9484_v43  ;;  %v10294_v34 = vpop.f32.mrf.mxu1  ;;  %v10252_v43 = vpop.f32.mrf.mxu0 }
 0x128   : > { %10784 = vmatpush3.bf16.msra.mxu0 %v11592_v26  ;;  %10824 = vmatpush3.bf16.msra.mxu1 %v11593_v14  ;;  %v1482_v26 = vadd.f32 %v10250_v8, %v13627_v31  ;;  %v9432_v31 = vcombine.low %v13869_v10, %v13879_v0  ;;  %v11603_v0 = vld [vmem:[%s15456_s3 + $0x8e0] sm:$0xff]  }
 0x129   : > { %10785 = vmatprep.subr.bf16.mxu0 %v11594_v23  ;;  %10825 = vmatprep.subr.bf16.mxu1 %v11595_v35  ;;  %v10295_v14 = vpop.f32.mrf.mxu1  ;;  %v4644_v23 = vsel %vm1211_vm15, %v13801_v29, 0  ;;  %v10254_v10 = vpop.f32.mrf.mxu0  ;;  %v11604_v29 = vld [vmem:[%s15456_s3 + $0x820] sm:$0xff]  }
 0x12a   : > { %4877 = vmatprep.mubr.bf16.mxu0 %v13746_v62  ;;  %5128 = vmatprep.mubr.bf16.mxu1 %v9487_v27  ;;  %v13930_v62 = vsel %vm12275_vm8, %v11813_v61, 0  ;;  %v13937_v30 = vadd.f32 %v10290_v6, %v1482_v26  ;;  %v10253_v27 = vadd.f32 %v10252_v43, %v10251_v32  ;;  %v10296_v7 = vadd.f32 %v10295_v14, %v10294_v34  ;;  %v11602_v61 = vld [vmem:[%s15456_s3 + $0x860] sm:$0xff]   ;;  %v11608_v34 = vld [vmem:[%s15456_s3 + $0x818] sm:$0xff]  }
 0x12b   : > { %v10297_v48 = vpop.f32.mrf.mxu1  ;;  %v9489_v47 = vcombine.high %v13920_v63, %v13930_v62  ;;  %v10255_v35 = vpop.f32.mrf.mxu0  ;;  %v9435_v20 = vcombine.high %v4644_v23, %v4644_v23  ;;  %v9488_v32 = vcombine.low %v13920_v63, %v13930_v62  ;;  %v11610_v62 = vld [vmem:[%s15456_s3 + $0x850] sm:$0xff]  }
 0x12c   : > { %10786 = vmatpush3.bf16.msra.mxu0 %v11596_v49  ;;  %10826 = vmatpush3.bf16.msra.mxu1 %v11597_v60  ;;  %v1483_v6 = vadd.f32 %v10253_v27, %v13671_v58  ;;  %v15549_v49 = vcombine.low %v13699_v40, %v13711_v37  ;;  %v11605_v58 = vld [vmem:[%s15456_s3 + $0x8a0] sm:$0xff]   ;;  %v10256_v16 = vadd.f32 %v10255_v35, %v10254_v10  ;;  %v11607_v40 = vld [vmem:[%s15456_s3 + $0x8d8] sm:$0xff]  }
 0x12d   : > { %10787 = vmatprep.subr.bf16.mxu0 %v11598_v2  ;;  %10827 = vmatprep.subr.bf16.mxu1 %v11599_v50  ;;  %v10298_v60 = vpop.f32.mrf.mxu1  ;;  %v10257_v8 = vpop.f32.mrf.mxu0  ;;  %v4731_v50 = vrot.slane %v9435_v20, 1  ;;  %v11616_v20 = vld [vmem:[%s15456_s3 + $0x808] sm:$0xff]  }
 0x12e   : > { %v13964_v39 = vadd.f32 %v10293_v54, %v1483_v6  ;;  %v10299_v2 = vadd.f32 %v10298_v60, %v10297_v48  ;;  %v1484_v37 = vadd.f32 %v10256_v16, %v13706_v28  ;;  %v11617_v16 = vld [vmem:[%s15456_s3 + $0x888] sm:$0xff]  }
 0x12f   : > { %4878 = vmatmul.mubr.bf16.gmra.mxu0 %v13763_v41  ;;  %5129 = vmatmul.mubr.bf16.gmra.mxu1 %v15549_v49  ;;  %v4725_v41 = vrot.slane %v9432_v31, 1  ;;  %v10300_v54 = vpop.f32.mrf.mxu1  ;;  %v10258_v26 = vpop.f32.mrf.mxu0  ;;  %v9434_v31 = vcombine.low %v4644_v23, %v4644_v23  ;;  %v4732_v23 = vsel %vm1291_vm11, %v13910_v44, %v4731_v50 }
 0x130   : > { %10788 = vmatpush3.bf16.msra.mxu0 %v11600_v55  ;;  %10828 = vmatpush3.bf16.msra.mxu1 %v11601_v19  ;;  %v11609_v55 = vld [vmem:[%s15456_s3 + $0x898] sm:$0xff]   ;;  %v13983_v28 = vadd.f32 %v10296_v7, %v1484_v37  ;;  %v10259_v43 = vadd.f32 %v10258_v26, %v10257_v8  ;;  %v11612_v7 = vld [vmem:[%s15456_s3 + $0x810] sm:$0xff]  }
 0x131   : > { %10789 = vmatprep.subr.bf16.mxu0 %v11602_v61  ;;  %10829 = vmatprep.subr.bf16.mxu1 %v11603_v0  ;;  %v4726_v1 = vsel %vm1291_vm11, %v13728_v36, %v4725_v41  ;;  %v10301_v63 = vpop.f32.mrf.mxu1  ;;  %v10260_v14 = vpop.f32.mrf.mxu0  ;;  %v11611_v36 = vld [vmem:[%s15456_s3 + $0x8d0] sm:$0xff]   ;;  %v4917_v61 = vsel %vm12345_vm2, %v13726_v53, 0  ;;  %v4729_v6 = vrot.slane %v9434_v31, 1  ;;  %v11614_v53 = vld [vmem:[%s15456_s3 + $0x848] sm:$0xff]   ;;  %v5162_v26 = vld [vmem:[%s13067_s21 + $0x18] sm:$0xff] }
 0x132   : > { %4885 = vmatprep.mubr.bf16.mxu0 %v4728_v3  ;;  %5136 = vmatprep.mubr.bf16.mxu1 %v9489_v47  ;;  %v10302_v19 = vadd.f32 %v10301_v63, %v10300_v54  ;;  %v1485_v27 = vadd.f32 %v10259_v43, %v13775_v13  ;;  %v11613_v0 = vld [vmem:[%s15456_s3 + $0x890] sm:$0xff]   ;;  %v14004_v13 = vld [vmem:[%s13067_s21 + $0x48] sm:$0xff]  ;;  %v11621_v54 = vld [vmem:[%s15456_s3 + $0x880] sm:$0xff]  }
 0x133   : > { %v10261_v10 = vpop.f32.mrf.mxu0  ;;  %v4918_v44 = vsel %vm12351_vm3, %v14004_v13, 0  ;;  %v11615_v47 = vld [vmem:[%s15456_s3 + $0x8c8] sm:$0xff]  }
 0x134   : > { %10790 = vmatpush3.bf16.msra.mxu0 %v11604_v29  ;;  %10830 = vmatpush3.bf16.msra.mxu1 %v11605_v58  ;;  %v14006_v48 = vadd.f32 %v10299_v2, %v1485_v27  ;;  %v10262_v29 = vadd.f32 %v10261_v10, %v10260_v14  ;;  %v9491_v3 = vcombine.high %v4917_v61, %v4918_v44 }
 0x135   : > { %10791 = vmatprep.subr.bf16.mxu0 %v11606_v33  ;;  %10831 = vmatprep.subr.bf16.mxu1 %v11607_v40  ;;  %v9490_v49 = vcombine.low %v4917_v61, %v4918_v44  ;;  %v4730_v58 = vsel %vm1291_vm11, %v4725_v41, %v4729_v6  ;;  %v10359_v33 = vpop.f32.mrf.mxu1  ;;  %v11619_v41 = vld [vmem:[%s15456_s3 + $0x8c0] sm:$0xff]   ;;  %v10319_v8 = vpop.f32.mrf.mxu0  ;;  %v11627_v6 = vld [vmem:[%s15456_s3 + $0x9f8] sm:$0xff]  }
 0x136   : > { %v1486_v35 = vadd.f32 %v10262_v29, %v13795_v25  ;;  %v11618_v25 = vld [vmem:[%s15456_s3 + $0x840] sm:$0xff]  }
 0x137   : > { %4886 = vmatmul.mubr.bf16.gmra.mxu0 %v4726_v1  ;;  %5137 = vmatmul.mubr.bf16.gmra.mxu1 %v9488_v32  ;;  %v10360_v2 = vpop.f32.mrf.mxu1  ;;  %v11620_v40 = vld [vmem:[%s15456_s3 + $0x800] sm:$0xff]   ;;  %v5161_v32 = vld [vmem:[%s13067_s21 + $0x10] sm:$0xff] }
 0x138   : > { %10792 = vmatpush3.bf16.msra.mxu0 %v11608_v34  ;;  %10832 = vmatpush3.bf16.msra.mxu1 %v11609_v55  ;;  %v14025_v60 = vadd.f32 %v10302_v19, %v1486_v35  ;;  %v14036_v37 = vadd.f32 %v10360_v2, %v10359_v33  ;;  %v10320_v34 = vpop.f32.mrf.mxu0  ;;  %v5163_v1 = vld [vmem:[%s13067_s21 + $0x20] sm:$0xff]  ;;  %v5164_v55 = vld [vmem:[%s13067_s21 + $0x28] sm:$0xff]  ;;  %v9540_v43 = vcombine.low %v5161_v32, %v5162_v26  ;;  %v5489_v19 = vld [vmem:[%s13067_s21 + $0x10] sm:$0xee] }
 0x139   : > { %10793 = vmatprep.subr.bf16.mxu0 %v11610_v62  ;;  %10833 = vmatprep.subr.bf16.mxu1 %v11611_v36  ;;  %v10362_v50 = vpop.f32.mrf.mxu1  ;;  %v10321_v31 = vadd.f32 %v10320_v34, %v10319_v8  ;;  %v9541_v63 = vcombine.high %v5161_v32, %v5162_v26  ;;  %v14045_v62 = vcombine.low %v5163_v1, %v5164_v55  ;;  %v5492_v61 = vsel %vm15550_vm6, %v5163_v1, 0 }
 0x13a   : > { %4893 = vmatprep.mubr.bf16.mxu0 %v4732_v23  ;;  %5144 = vmatprep.mubr.bf16.mxu1 %v9491_v3  ;;  %v14047_v14 = vcombine.high %v5163_v1, %v5164_v55  ;;  %v10322_v36 = vpop.f32.mrf.mxu0  ;;  %v5491_v23 = vsel %vm1204_vm1, %v5162_v26, 0  ;;  %v5493_v10 = vsel %vm1206_vm10, %v5164_v55, 0  ;;  %v5241_v29 = vshrl.u32 %v9540_v43, 16  ;;  %v11628_v1 = vld [vmem:[%s15456_s3 + $0x938] sm:$0xff]  }
 0x13b   : > { %v10363_v27 = vpop.f32.mrf.mxu1  ;;  %v5243_v44 = vshll.u32 %v9540_v43, 16  ;;  %v5255_v3 = vshll.u32 %v9541_v63, 16  ;;  %v5248_v8 = vshll.u32 %v14045_v62, 16  ;;  %v11629_v55 = vld [vmem:[%s15456_s3 + $0x9b8] sm:$0xff]   ;;  %vm15554_vm6 = vcmp.ne.s16.totalorder %v12540_v4, 0 }
 0x13c   : > { %10794 = vmatpush3.bf16.msra.mxu0 %v11612_v7  ;;  %10834 = vmatpush3.bf16.msra.mxu1 %v11613_v0  ;;  %v5490_v7 = vsel %vm12415_vm0, %v5489_v19, 0  ;;  %v11626_v0 = vld [vmem:[%s15456_s3 + $0x978] sm:$0xff]  }
 0x13d   : > { %10795 = vmatprep.subr.bf16.mxu0 %v11614_v53  ;;  %10835 = vmatprep.subr.bf16.mxu1 %v11615_v47  ;;  %v5253_v53 = vshrl.u32 %v9541_v63, 16  ;;  %v10323_v47 = vpop.f32.mrf.mxu0  ;;  %v10365_v35 = vpop.f32.mrf.mxu1  ;;  %v5245_v33 = vrot.slane %v5243_v44, 1 }
 0x13e   : > { %v10324_v44 = vadd.f32 %v10323_v47, %v10322_v36  ;;  %v11632_v36 = vld [vmem:[%s15456_s3 + $0x930] sm:$0xff]  }
 0x13f   : > { %4894 = vmatmul.mubr.bf16.gmra.mxu0 %v4730_v58  ;;  %5145 = vmatmul.mubr.bf16.gmra.mxu1 %v9490_v49  ;;  %v9598_v49 = vcombine.low %v5490_v7, %v5491_v23  ;;  %v9599_v58 = vcombine.high %v5490_v7, %v5491_v23  ;;  %v10325_v2 = vpop.f32.mrf.mxu0  ;;  %v5246_v19 = vor.u32 %v5245_v33, %v5241_v29  ;;  %v5250_v7 = vrot.slane %v5248_v8, 1  ;;  %v11633_v47 = vld [vmem:[%s15456_s3 + $0x9b0] sm:$0xff]  }
 0x140   : > { %10796 = vmatpush3.bf16.msra.mxu0 %v11616_v20  ;;  %10836 = vmatpush3.bf16.msra.mxu1 %v11617_v16  ;;  %v5260_v20 = vshll.u32 %v14047_v14, 16  ;;  %v9600_v16 = vcombine.low %v5492_v61, %v5493_v10  ;;  %v5264_v33 = vshrl.u32 %v14045_v62, 16  ;;  %v14112_v8 = vsel %vm15554_vm6, %v14004_v13, 0 }
 0x141   : > { %10797 = vmatprep.subr.bf16.mxu0 %v11618_v25  ;;  %10837 = vmatprep.subr.bf16.mxu1 %v11619_v41  ;;  %v5257_v25 = vrot.slane %v5255_v3, 1  ;;  %v9601_v41 = vcombine.high %v5492_v61, %v5493_v10  ;;  %v5569_v34 = vrot.slane %v9598_v49, 1  ;;  %v10326_v23 = vpop.f32.mrf.mxu0  ;;  %v10364_v3 = vadd.f32 %v10363_v27, %v10362_v50  ;;  %v11631_v49 = vld [vmem:[%s15456_s3 + $0x9f0] sm:$0xff]  }
 0x142   : > { %v5262_v32 = vrot.slane %v5260_v20, 1  ;;  %v14067_v26 = vrot.slane %v9600_v16, 1  ;;  %v5251_v20 = vsel %vm15552_vm4, %v5246_v19, %v5250_v7  ;;  %v2059_v27 = vadd.f32 %v10324_v44, %v13874_v21  ;;  %v5165_v16 = vld [vmem:[%s13067_s21 + $0x30] sm:$0xff] }
 0x143   : > { %v5258_v43 = vor.u32 %v5257_v25, %v5253_v53  ;;  %v14075_v63 = vrot.slane %v9601_v41, 1  ;;  %vm15556_vm4 = vcmp.ne.s16.totalorder %v12495_v57, 0  ;;  %vm15557_vm6 = vsmask.f32 7424 }
 0x144   : > { %10798 = vmatpush3.bf16.msra.mxu0 %v11620_v40  ;;  %10838 = vmatpush3.bf16.msra.mxu1 %v11621_v54  ;;  %v10366_v40 = vpop.f32.mrf.mxu1  ;;  %v5572_v54 = vrot.slane %v9599_v58, 1  ;;  %v5571_v10 = vsel %vm1291_vm11, %v5569_v34, %v14067_v26  ;;  %v14114_v21 = vadd.f32 %v10364_v3, %v2059_v27  ;;  %v5266_v3 = vor.u32 %v5264_v33, %v5250_v7  ;;  %v11641_v7 = vld [vmem:[%s15456_s3 + $0x9e0] sm:$0xff]  }
 0x145   : > { %10863 = vmatprep.subr.bf16.mxu0 %v11626_v0  ;;  %10903 = vmatprep.subr.bf16.mxu1 %v11627_v6  ;;  %v2058_v0 = vadd.f32 %v10321_v31, %v13849_v42  ;;  %v11630_v6 = vld [vmem:[%s15456_s3 + $0x970] sm:$0xff]   ;;  %v5263_v53 = vsel %vm15551_vm12, %v5258_v43, %v5262_v32  ;;  %v5272_v42 = vshrl.u32 %v14047_v14, 16  ;;  %v10328_v31 = vpop.f32.mrf.mxu0  ;;  %v10327_v14 = vadd.f32 %v10326_v23, %v10325_v2  ;;  %v5166_v2 = vld [vmem:[%s13067_s21 + $0x38] sm:$0xff] }
 0x146   : > { %v10368_v61 = vpop.f32.mrf.mxu1  ;;  %v5574_v29 = vsel %vm1291_vm11, %v5572_v54, %v14075_v63  ;;  %5448 = vmatprep.mubr.bf16.mxu0 %v5263_v53  ;;  %v10367_v25 = vadd.f32 %v10366_v40, %v10365_v35  ;;  %vm15555_vm12 = vcmp.ne.s16.totalorder %v12483_v45, 0  ;;  %v9545_v35 = vcombine.high %v5165_v16, %v5166_v2 }
 0x147   : > { %5723 = vmatprep.mubr.bf16.mxu1 %v5574_v29  ;;  %v14098_v50 = vadd.f32 %v14036_v37, %v2058_v0  ;;  %5449 = vmatmul.mubr.bf16.vlgmr.msra.gmra.mxu0 %v5251_v20  ;;  %v10329_v37 = vpop.f32.mrf.mxu0  ;;  %v5274_v54 = vor.u32 %v5272_v42, %v5262_v32  ;;  %v5494_v43 = vsel %vm15555_vm12, %v5165_v16, 0  ;;  %v2060_v62 = vadd.f32 %v10327_v14, %v13905_v11  ;;  %v11637_v11 = vld [vmem:[%s15456_s3 + $0x9e8] sm:$0xff]   ;;  %vm15558_vm12 = vmmov %vm15557_vm6 }
 0x148   : > { %v10369_v58 = vpop.f32.mrf.mxu1  ;;  %5724 = vmatmul.mubr.bf16.vlgmr.msra.gmra.mxu1 %v5571_v10  ;;  %10864 = vmatpush3.bf16.msra.mxu0 %v11628_v1  ;;  %v5495_v40 = vsel %vm15556_vm4, %v5166_v2, 0  ;;  %v14122_v19 = vcombine.low %v5165_v16, %v5166_v2  ;;  %v11636_v1 = vld [vmem:[%s15456_s3 + $0x968] sm:$0xff]   ;;  %v10330_v32 = vadd.f32 %v10329_v37, %v10328_v31  ;;  %v5276_v44 = vshll.u32 %v9545_v35, 16 }
 0x149   : > { %v10370_v41 = vadd.f32 %v10369_v58, %v10368_v61  ;;  %10904 = vmatpush3.bf16.msra.mxu1 %v11629_v55  ;;  %10865 = vmatprep.subr.bf16.mxu0 %v11630_v6  ;;  %v10331_v55 = vpop.f32.mrf.mxu0  ;;  %v9603_v61 = vcombine.high %v5494_v43, %v5495_v40  ;;  %v9602_v10 = vcombine.low %v5494_v43, %v5495_v40  ;;  %v11638_v58 = vld [vmem:[%s15456_s3 + $0x928] sm:$0xff]   ;;  %v5288_v40 = vshrl.u32 %v9545_v35, 16 }
 0x14a   : > { %v10371_v34 = vpop.f32.mrf.mxu1  ;;  %10905 = vmatprep.subr.bf16.mxu1 %v11631_v49  ;;  %v14130_v0 = vadd.f32 %v10367_v25, %v2060_v62  ;;  %v5268_v53 = vshll.u32 %v14122_v19, 16  ;;  %v2061_v29 = vadd.f32 %v10330_v32, %v13937_v30  ;;  %v5278_v14 = vrot.slane %v5276_v44, 1  ;;  %v11639_v30 = vld [vmem:[%s15456_s3 + $0x9a8] sm:$0xff]   ;;  %v11640_v62 = vld [vmem:[%s15456_s3 + $0x960] sm:$0xff]  }
 0x14b   : > { %v10332_v20 = vpop.f32.mrf.mxu0  ;;  %v14140_v42 = vrot.slane %v9603_v61, 1  ;;  %v14142_v31 = vrot.slane %v9602_v10, 1  ;;  %vm15559_vm4 = vcmp.ne.s16.totalorder %v12534_v51, 0 }
 0x14c   : > { %v10372_v23 = vpop.f32.mrf.mxu1  ;;  %10866 = vmatpush3.bf16.msra.mxu0 %v11632_v36  ;;  %v10333_v27 = vadd.f32 %v10332_v20, %v10331_v55  ;;  %v5270_v16 = vrot.slane %v5268_v53, 1  ;;  %v14153_v36 = vadd.f32 %v10370_v41, %v2061_v29  ;;  %v5279_v43 = vsel %vm15557_vm6, %v5274_v54, %v5278_v14  ;;  %v11647_v29 = vld [vmem:[%s15456_s3 + $0x9d8] sm:$0xff]  }
 0x14d   : > { %v10373_v6 = vadd.f32 %v10372_v23, %v10371_v34  ;;  %10906 = vmatpush3.bf16.msra.mxu1 %v11633_v47  ;;  %10867 = vmatprep.subr.bf16.mxu0 %v11636_v1  ;;  %v10334_v47 = vpop.f32.mrf.mxu0  ;;  %v5578_v25 = vsel %vm1291_vm11, %v14075_v63, %v14140_v42  ;;  %v5576_v37 = vsel %vm1291_vm11, %v14067_v26, %v14142_v31  ;;  %v11642_v26 = vld [vmem:[%s15456_s3 + $0x920] sm:$0xff]   ;;  %v5280_v54 = vshrl.u32 %v14122_v19, 16  ;;  %v11646_v19 = vld [vmem:[%s15456_s3 + $0x958] sm:$0xff]  }
 0x14e   : > { %v10374_v49 = vpop.f32.mrf.mxu1  ;;  %10907 = vmatprep.subr.bf16.mxu1 %v11637_v11  ;;  %v2062_v34 = vadd.f32 %v10333_v27, %v13964_v39  ;;  %5731 = vmatprep.mubr.bf16.mxu1 %v5578_v25  ;;  %v5271_v41 = vsel %vm15558_vm12, %v5266_v3, %v5270_v16  ;;  %v11643_v39 = vld [vmem:[%s15456_s3 + $0x9a0] sm:$0xff]   ;;  %v5290_v61 = vor.u32 %v5288_v40, %v5278_v14  ;;  %vm15560_vm12 = vmmov %vm15557_vm6 }
 0x14f   : > { %v10335_v1 = vpop.f32.mrf.mxu0  ;;  %5456 = vmatprep.mubr.bf16.mxu0 %v5279_v43  ;;  %v5167_v63 = vld [vmem:[%s13067_s21 + $0x40] sm:$0xff]  ;;  %v5282_v3 = vor.u32 %v5280_v54, %v5270_v16  ;;  %v11649_v16 = vld [vmem:[%s15456_s3 + $0x998] sm:$0xff]  }
 0x150   : > { %v10375_v33 = vpop.f32.mrf.mxu1  ;;  %5732 = vmatmul.mubr.bf16.gmra.mxu1 %v5576_v37  ;;  %v14175_v32 = vadd.f32 %v10373_v6, %v2062_v34  ;;  %v10336_v55 = vadd.f32 %v10335_v1, %v10334_v47  ;;  %5457 = vmatmul.mubr.bf16.gmra.mxu0 %v5271_v41  ;;  %v14178_v35 = vcombine.high %v5167_v63, %v14004_v13  ;;  %v5496_v10 = vsel %vm15559_vm4, %v5167_v63, 0  ;;  %vm15561_vm4 = vmmov %vm15557_vm6 }
 0x151   : > { %v10376_v2 = vadd.f32 %v10375_v33, %v10374_v49  ;;  %10908 = vmatpush3.bf16.msra.mxu1 %v11639_v30  ;;  %v14183_v11 = vcombine.low %v5167_v63, %v14004_v13  ;;  %v10337_v6 = vpop.f32.mrf.mxu0  ;;  %10868 = vmatpush3.bf16.msra.mxu0 %v11638_v58  ;;  %v9605_v44 = vcombine.high %v5496_v10, %v14112_v8 }
 0x152   : > { %v10377_v23 = vpop.f32.mrf.mxu1  ;;  %10909 = vmatprep.subr.bf16.mxu1 %v11641_v7  ;;  %v9604_v53 = vcombine.low %v5496_v10, %v14112_v8  ;;  %10869 = vmatprep.subr.bf16.mxu0 %v11640_v62  ;;  %v5292_v13 = vshll.u32 %v14178_v35, 16  ;;  %v2063_v27 = vadd.f32 %v10336_v55, %v13983_v28  ;;  %v11648_v8 = vld [vmem:[%s15456_s3 + $0x918] sm:$0xff]   ;;  %v11650_v62 = vld [vmem:[%s15456_s3 + $0x950] sm:$0xff]  }
 0x153   : > { %v5284_v49 = vshll.u32 %v14183_v11, 16  ;;  %v10338_v14 = vpop.f32.mrf.mxu0  ;;  %v14197_v30 = vrot.slane %v9605_v44, 1  ;;  %v11656_v44 = vld [vmem:[%s15456_s3 + $0x948] sm:$0xff]  }
 0x154   : > { %v10378_v20 = vpop.f32.mrf.mxu1  ;;  %v14199_v7 = vrot.slane %v9604_v53, 1  ;;  %v10339_v47 = vadd.f32 %v10338_v14, %v10337_v6  ;;  %v5294_v25 = vrot.slane %v5292_v13, 1  ;;  %v14207_v28 = vadd.f32 %v10376_v2, %v2063_v27  ;;  %v11657_v27 = vld [vmem:[%s15456_s3 + $0x9c8] sm:$0xff]  }
 0x155   : > { %v10379_v58 = vadd.f32 %v10378_v20, %v10377_v23  ;;  %10910 = vmatpush3.bf16.msra.mxu1 %v11643_v39  ;;  %v5286_v37 = vrot.slane %v5284_v49, 1  ;;  %v10340_v34 = vpop.f32.mrf.mxu0  ;;  %10870 = vmatpush3.bf16.msra.mxu0 %v11642_v26  ;;  %v5582_v43 = vsel %vm1291_vm11, %v14140_v42, %v14197_v30  ;;  %v5304_v2 = vshrl.u32 %v14178_v35, 16  ;;  %v11653_v35 = vld [vmem:[%s15456_s3 + $0x990] sm:$0xff]  }
 0x156   : > { %v10380_v33 = vpop.f32.mrf.mxu1  ;;  %v5580_v41 = vsel %vm1291_vm11, %v14142_v31, %v14199_v7  ;;  %10911 = vmatprep.subr.bf16.mxu1 %v11647_v29  ;;  %v2064_v40 = vadd.f32 %v10339_v47, %v14006_v48  ;;  %v5295_v26 = vsel %vm15557_vm6, %v5290_v61, %v5294_v25  ;;  %5739 = vmatprep.mubr.bf16.mxu1 %v5582_v43  ;;  %v11651_v31 = vld [vmem:[%s15456_s3 + $0x9d0] sm:$0xff]   ;;  %v5296_v39 = vshrl.u32 %v14183_v11, 16  ;;  %vm15562_vm6 = vmmov %vm15561_vm4 }
 0x157   : > { %v5287_v42 = vsel %vm15560_vm12, %v5282_v3, %v5286_v37  ;;  %10871 = vmatprep.subr.bf16.mxu0 %v11646_v19  ;;  %v10341_v63 = vpop.f32.mrf.mxu0  ;;  %5464 = vmatprep.mubr.bf16.mxu0 %v5295_v26  ;;  %v11652_v48 = vld [vmem:[%s15456_s3 + $0x910] sm:$0xff]   ;;  %v5306_v29 = vor.u32 %v5304_v2, %v5294_v25  ;;  %v11658_v25 = vld [vmem:[%s15456_s3 + $0x908] sm:$0xff]   ;;  %vm15563_vm12 = vmmov %vm15561_vm4 }
 0x158   : > { %v10381_v1 = vpop.f32.mrf.mxu1  ;;  %5740 = vmatmul.mubr.bf16.gmra.mxu1 %v5580_v41  ;;  %v14234_v55 = vadd.f32 %v10379_v58, %v2064_v40  ;;  %v10342_v23 = vadd.f32 %v10341_v63, %v10340_v34  ;;  %5465 = vmatmul.mubr.bf16.gmra.mxu0 %v5287_v42  ;;  %v5169_v61 = vld [vmem:[%s13067_s21 + $0x50] sm:$0x11]  ;;  %v5298_v13 = vor.u32 %v5296_v39, %v5286_v37  ;;  %v11659_v37 = vld [vmem:[%s15456_s3 + $0x988] sm:$0xff]   ;;  %s8620_s21 = sshll.u32 %s15629_s25, 6 }
 0x159   : > { %v10382_v54 = vadd.f32 %v10381_v1, %v10380_v33  ;;  %10912 = vmatpush3.bf16.msra.mxu1 %v11649_v16  ;;  %v10399_v10 = vpop.f32.mrf.mxu0  ;;  %10872 = vmatpush3.bf16.msra.mxu0 %v11648_v8  ;;  %v9549_v11 = vcombine.high %v5169_v61, %v5169_v61  ;;  %v5498_v19 = vsel %vm1211_vm15, %v5169_v61, 0  ;;  %v9548_v6 = vcombine.low %v5169_v61, %v5169_v61  ;;  %s15379_s8 = sadd.s32 %s8620_s21, %s8619_s15  ;;  %s433_s15 = scalar_lea.vmem %s15460_s7, %s425_s10 }
 0x15a   : > { %10913 = vmatprep.subr.bf16.mxu1 %v11651_v31  ;;  %v2065_v3 = vadd.f32 %v10342_v23, %v14025_v60  ;;  %v10439_v53 = vpop.f32.mrf.mxu1  ;;  %10873 = vmatprep.subr.bf16.mxu0 %v11650_v62  ;;  %v9607_v20 = vcombine.high %v5498_v19, %v5498_v19  ;;  %v9606_v49 = vcombine.low %v5498_v19, %v5498_v19  ;;  %v11660_v31 = vld [vmem:[%s15456_s3 + $0x940] sm:$0xff]   ;;  %s8621_s23 = sshll.u32 %s15379_s8, 3 }
 0x15b   : > { %v10400_v14 = vpop.f32.mrf.mxu0  ;;  %v5308_v58 = vshll.u32 %v9549_v11, 16  ;;  %v5300_v8 = vshll.u32 %v9548_v6, 16  ;;  %v11662_v23 = vld [vmem:[%s15456_s3 + $0x900] sm:$0xff]   ;;  %v14287_v6 = vld [vmem:[%s14262_s13 + $0x8] sm:$0xff]  ;;  %s15406_s16 = scalar_lea.vmem %s15458_s5, %s8621_s23 }
 0x15c   : > { %v14250_v16 = vadd.f32 %v10382_v54, %v2065_v3  ;;  %v10401_v47 = vadd.f32 %v10400_v14, %v10399_v10  ;;  %v10440_v33 = vpop.f32.mrf.mxu1  ;;  %v5585_v60 = vrot.slane %v9607_v20, 1  ;;  %v5583_v34 = vrot.slane %v9606_v49, 1  ;;  %v11661_v54 = vld [vmem:[%s15456_s3 + $0x9c0] sm:$0xff]   ;;  %v14292_v3 = vld [vmem:[%s14262_s13 + $0x10] sm:$0xff]  ;;  %v11668_v14 = vld [vmem:[%s15456_s3 + $0xa78] sm:$0xff]  }
 0x15d   : > { %10914 = vmatpush3.bf16.msra.mxu1 %v11653_v35  ;;  %v10441_v43 = vadd.f32 %v10440_v33, %v10439_v53  ;;  %v10402_v41 = vpop.f32.mrf.mxu0  ;;  %10874 = vmatpush3.bf16.msra.mxu0 %v11652_v48  ;;  %v5310_v62 = vrot.slane %v5308_v58, 1  ;;  %v5302_v2 = vrot.slane %v5300_v8, 1  ;;  %v11663_v10 = vld [vmem:[%s15456_s3 + $0x980] sm:$0xff]   ;;  %v14295_v53 = vld [vmem:[%s14262_s13 + $0x18] sm:$0xff] }
 0x15e   : > { %10915 = vmatprep.subr.bf16.mxu1 %v11657_v27  ;;  %v2584_v40 = vadd.f32 %v10401_v47, %v14098_v50  ;;  %v10442_v1 = vpop.f32.mrf.mxu1  ;;  %v5586_v26 = vsel %vm1291_vm11, %v14197_v30, %v5585_v60  ;;  %v5584_v42 = vsel %vm1291_vm11, %v14199_v7, %v5583_v34  ;;  %10875 = vmatprep.subr.bf16.mxu0 %v11656_v44  ;;  %v5764_v11 = vld [vmem:[%s14262_s13] sm:$0xff]  ;;  %v11669_v33 = vld [vmem:[%s15456_s3 + $0xaf8] sm:$0xff]  }
 0x15f   : > { %v10403_v39 = vpop.f32.mrf.mxu0  ;;  %v5311_v50 = vsel %vm15561_vm4, %v5306_v29, %v5310_v62  ;;  %5747 = vmatprep.mubr.bf16.mxu1 %v5586_v26  ;;  %v5303_v63 = vsel %vm15562_vm6, %v5298_v13, %v5302_v2  ;;  %v5772_v44 = vsel %vm12087_vm7, %v5764_v11, 0  ;;  %v5773_v13 = vsel %vm12103_vm9, %v14287_v6, 0  ;;  %vm15564_vm6 = vmmov %vm15561_vm4 }
 0x160   : > { %v14276_v30 = vadd.f32 %v10441_v43, %v2584_v40  ;;  %v10404_v7 = vadd.f32 %v10403_v39, %v10402_v41  ;;  %v10443_v48 = vpop.f32.mrf.mxu1  ;;  %5472 = vmatprep.mubr.bf16.mxu0 %v5311_v50  ;;  %5748 = vmatmul.mubr.bf16.gmra.mxu1 %v5584_v42  ;;  %v9713_v49 = vcombine.high %v5764_v11, %v14287_v6 }
 0x161   : > { %v10444_v35 = vadd.f32 %v10443_v48, %v10442_v1  ;;  %v10405_v61 = vpop.f32.mrf.mxu0  ;;  %5473 = vmatmul.mubr.bf16.gmra.mxu0 %v5303_v63  ;;  %10916 = vmatpush3.bf16.msra.mxu1 %v11659_v37  ;;  %v14304_v27 = vcombine.high %v14292_v3, %v14295_v53  ;;  %v9656_v58 = vcombine.low %v5772_v44, %v5773_v13  ;;  %v11670_v1 = vld [vmem:[%s15456_s3 + $0xa38] sm:$0xff]  }
 0x162   : > { %v2585_v19 = vadd.f32 %v10404_v7, %v14114_v21  ;;  %10876 = vmatpush3.bf16.msra.mxu0 %v11658_v25  ;;  %10917 = vmatprep.subr.bf16.mxu1 %v11661_v54  ;;  %v10445_v29 = vpop.f32.mrf.mxu1  ;;  %v9712_v21 = vcombine.low %v5764_v11, %v14287_v6  ;;  %v9657_v8 = vcombine.high %v5772_v44, %v5773_v13  ;;  %v6114_v41 = vshrl.u32 %v9713_v49, 16  ;;  %v11672_v44 = vld [vmem:[%s15456_s3 + $0xa70] sm:$0xff]  }
 0x163   : > { %v10406_v20 = vpop.f32.mrf.mxu0  ;;  %10877 = vmatprep.subr.bf16.mxu0 %v11660_v31  ;;  %v14311_v47 = vcombine.low %v14292_v3, %v14295_v53  ;;  %v6116_v62 = vshll.u32 %v9713_v49, 16  ;;  %v6121_v2 = vshll.u32 %v14304_v27, 16  ;;  %v5775_v13 = vsel %vm12155_vm14, %v14295_v53, 0 }
 0x164   : > { %v14316_v60 = vadd.f32 %v10444_v35, %v2585_v19  ;;  %v10446_v34 = vpop.f32.mrf.mxu1  ;;  %v6102_v37 = vshrl.u32 %v9712_v21, 16  ;;  %v6104_v43 = vshll.u32 %v9712_v21, 16  ;;  %5981 = vmatprep.mubr.bf16.mxu0 %v9657_v8  ;;  %v10407_v26 = vadd.f32 %v10406_v20, %v10405_v61 }
 0x165   : > { %v10408_v25 = vpop.f32.mrf.mxu0  ;;  %10918 = vmatpush3.bf16.msra.mxu1 %v11663_v10  ;;  %v6109_v40 = vshll.u32 %v14311_v47, 16  ;;  %v10447_v42 = vadd.f32 %v10446_v34, %v10445_v29  ;;  %v6118_v63 = vrot.slane %v6116_v62, 1  ;;  %v6123_v7 = vrot.slane %v6121_v2, 1 }
 0x166   : > { %10878 = vmatpush3.bf16.msra.mxu0 %v11662_v23  ;;  %v10448_v31 = vpop.f32.mrf.mxu1  ;;  %v6106_v50 = vrot.slane %v6104_v43, 1  ;;  %10983 = vmatprep.subr.bf16.mxu1 %v11669_v33  ;;  %v11671_v23 = vld [vmem:[%s15456_s3 + $0xab8] sm:$0xff]   ;;  %v2586_v35 = vadd.f32 %v10407_v26, %v14130_v0  ;;  %v5774_v29 = vsel %vm12146_vm13, %v14292_v3, 0  ;;  %v11673_v0 = vld [vmem:[%s15456_s3 + $0xaf0] sm:$0xff]   ;;  %v14354_v43 = vld [vmem:[%s14262_s13 + $0x28] sm:$0xff]  ;;  %v6125_v62 = vshrl.u32 %v14311_v47, 16 }
 0x167   : > { %v10409_v39 = vpop.f32.mrf.mxu0  ;;  %10943 = vmatprep.subr.bf16.mxu0 %v11668_v14  ;;  %v6111_v48 = vrot.slane %v6109_v40, 1  ;;  %v6119_v19 = vor.u32 %v6118_v63, %v6114_v41  ;;  %v9659_v33 = vcombine.high %v5774_v29, %v5775_v13  ;;  %v6133_v41 = vshrl.u32 %v14304_v27, 16  ;;  %v11678_v27 = vld [vmem:[%s15456_s3 + $0xa68] sm:$0xff]  }
 0x168   : > { %v10410_v54 = vadd.f32 %v10409_v39, %v10408_v25  ;;  %v10449_v10 = vpop.f32.mrf.mxu1  ;;  %v6107_v61 = vor.u32 %v6106_v50, %v6102_v37  ;;  %v14340_v21 = vadd.f32 %v10447_v42, %v2586_v35  ;;  %v11675_v25 = vld [vmem:[%s15456_s3 + $0xab0] sm:$0xff]   ;;  %v14351_v37 = vld [vmem:[%s14262_s13 + $0x20] sm:$0xff]  ;;  %v9658_v26 = vcombine.low %v5774_v29, %v5775_v13  ;;  %v11679_v50 = vld [vmem:[%s15456_s3 + $0xae8] sm:$0xff]  }
 0x169   : > { %v10411_v11 = vpop.f32.mrf.mxu0  ;;  %5982 = vmatmul.mubr.bf16.vlgmr.msra.gmra.mxu0 %v9656_v58  ;;  %v10450_v49 = vadd.f32 %v10449_v10, %v10448_v31  ;;  %v6124_v58 = vsel %vm15563_vm12, %v6119_v19, %v6123_v7  ;;  %v14362_v42 = vcombine.high %v14351_v37, %v14354_v43  ;;  %v14366_v31 = vcombine.low %v14351_v37, %v14354_v43  ;;  %vm15565_vm12 = vmmov %vm15561_vm4 }
 0x16a   : > { %v2587_v20 = vadd.f32 %v10410_v54, %v14153_v36  ;;  %10944 = vmatpush3.bf16.msra.mxu0 %v11670_v1  ;;  %v6112_v8 = vsel %vm15561_vm4, %v6107_v61, %v6111_v48  ;;  %v11674_v36 = vld [vmem:[%s15456_s3 + $0xa30] sm:$0xff]   ;;  %v10451_v34 = vpop.f32.mrf.mxu1  ;;  %6309 = vmatprep.mubr.bf16.mxu1 %v6124_v58  ;;  %v14374_v47 = vsel %vm12269_vm5, %v14351_v37, 0  ;;  %v14382_v63 = vsel %vm12275_vm8, %v14354_v43, 0 }
 0x16b   : > { %v10412_v14 = vpop.f32.mrf.mxu0  ;;  %10945 = vmatprep.subr.bf16.mxu0 %v11672_v44  ;;  %6310 = vmatmul.mubr.bf16.vlgmr.msra.gmra.mxu1 %v6112_v8  ;;  %v6135_v10 = vor.u32 %v6133_v41, %v6123_v7  ;;  %v6127_v19 = vor.u32 %v6125_v62, %v6111_v48  ;;  %v11680_v44 = vld [vmem:[%s15456_s3 + $0xa28] sm:$0xff]   ;;  %v9661_v29 = vcombine.high %v14374_v47, %v14382_v63  ;;  %v11683_v62 = vld [vmem:[%s15456_s3 + $0xae0] sm:$0xff]   ;;  %vm15566_vm4 = vcmp.ne.s16.totalorder %v12406_v9, 0 }
 0x16c   : > { %v14358_v2 = vadd.f32 %v10450_v49, %v2587_v20  ;;  %v10413_v40 = vadd.f32 %v10412_v14, %v10411_v11  ;;  %5989 = vmatprep.mubr.bf16.mxu0 %v9659_v33  ;;  %v10452_v39 = vpop.f32.mrf.mxu1  ;;  %10984 = vmatpush3.bf16.msra.mxu1 %v11671_v23  ;;  %v6137_v11 = vshll.u32 %v14362_v42, 16  ;;  %v6129_v23 = vshll.u32 %v14366_v31, 16  ;;  %v11681_v48 = vld [vmem:[%s15456_s3 + $0xaa8] sm:$0xff]  }
 0x16d   : > { %v10414_v1 = vpop.f32.mrf.mxu0  ;;  %10985 = vmatprep.subr.bf16.mxu1 %v11673_v0  ;;  %v10453_v20 = vadd.f32 %v10452_v39, %v10451_v34  ;;  %v11682_v0 = vld [vmem:[%s15456_s3 + $0xa60] sm:$0xff]  }
 0x16e   : > { %10946 = vmatpush3.bf16.msra.mxu0 %v11674_v36  ;;  %v2588_v54 = vadd.f32 %v10413_v40, %v14175_v32  ;;  %v10454_v61 = vpop.f32.mrf.mxu1  ;;  %v6139_v49 = vrot.slane %v6137_v11, 1  ;;  %v6131_v7 = vrot.slane %v6129_v23, 1  ;;  %v14432_v11 = vsel %vm1206_vm10, %v14295_v53, 0 }
 0x16f   : > { %v10415_v35 = vpop.f32.mrf.mxu0  ;;  %10947 = vmatprep.subr.bf16.mxu0 %v11678_v27 }
 0x170   : > { %v10416_v13 = vadd.f32 %v10415_v35, %v10414_v1  ;;  %v10455_v14 = vpop.f32.mrf.mxu1  ;;  %10986 = vmatpush3.bf16.msra.mxu1 %v11675_v25  ;;  %v14398_v58 = vadd.f32 %v10453_v20, %v2588_v54  ;;  %v6140_v34 = vsel %vm15564_vm6, %v6135_v10, %v6139_v49  ;;  %v6132_v41 = vsel %vm15565_vm12, %v6127_v19, %v6131_v7  ;;  %v14419_v54 = vld [vmem:[%s14262_s13 + $0x30] sm:$0xff]  ;;  %v14422_v35 = vld [vmem:[%s14262_s13 + $0x38] sm:$0xff]  ;;  %vm15567_vm12 = vmmov %vm15564_vm6 }
 0x171   : > { %v10417_v32 = vpop.f32.mrf.mxu0  ;;  %5990 = vmatmul.mubr.bf16.gmra.mxu0 %v9658_v26  ;;  %v10456_v36 = vadd.f32 %v10455_v14, %v10454_v61  ;;  %10987 = vmatprep.subr.bf16.mxu1 %v11679_v50  ;;  %v6149_v25 = vshrl.u32 %v14362_v42, 16  ;;  %v6141_v1 = vshrl.u32 %v14366_v31, 16  ;;  %v11685_v50 = vld [vmem:[%s15456_s3 + $0xaa0] sm:$0xff]   ;;  %v9660_v42 = vcombine.low %v14374_v47, %v14382_v63  ;;  %v11688_v19 = vld [vmem:[%s15456_s3 + $0xa58] sm:$0xff]  }
 0x172   : > { %10948 = vmatpush3.bf16.msra.mxu0 %v11680_v44  ;;  %v2589_v8 = vadd.f32 %v10416_v13, %v14207_v28  ;;  %v10457_v40 = vpop.f32.mrf.mxu1  ;;  %6317 = vmatprep.mubr.bf16.mxu1 %v6140_v34  ;;  %v11684_v28 = vld [vmem:[%s15456_s3 + $0xa20] sm:$0xff]   ;;  %v14427_v31 = vsel %vm15566_vm4, %v14292_v3, 0  ;;  %v14436_v47 = vcombine.high %v14419_v54, %v14422_v35  ;;  %v14440_v63 = vcombine.low %v14419_v54, %v14422_v35  ;;  %v11689_v20 = vld [vmem:[%s15456_s3 + $0xad8] sm:$0xff]  }
 0x173   : > { %v10418_v33 = vpop.f32.mrf.mxu0  ;;  %10949 = vmatprep.subr.bf16.mxu0 %v11682_v0  ;;  %5997 = vmatprep.mubr.bf16.mxu0 %v9661_v29  ;;  %v14448_v23 = vsel %vm12345_vm2, %v14419_v54, 0  ;;  %v6151_v29 = vor.u32 %v6149_v25, %v6139_v49  ;;  %v5779_v13 = vsel %vm12351_vm3, %v14422_v35, 0  ;;  %v11690_v49 = vld [vmem:[%s15456_s3 + $0xa18] sm:$0xff]   ;;  %vm15568_vm4 = vcmp.ne.s16.totalorder %v12483_v45, 0 }
 0x174   : > { %v14411_v26 = vadd.f32 %v10456_v36, %v2589_v8  ;;  %v10419_v27 = vadd.f32 %v10418_v33, %v10417_v32  ;;  %6318 = vmatmul.mubr.bf16.gmra.mxu1 %v6132_v41  ;;  %v10458_v10 = vpop.f32.mrf.mxu1  ;;  %v6153_v14 = vshll.u32 %v14436_v47, 16  ;;  %v6143_v8 = vor.u32 %v6141_v1, %v6131_v7 }
 0x175   : > { %v10420_v39 = vpop.f32.mrf.mxu0  ;;  %10988 = vmatpush3.bf16.msra.mxu1 %v11681_v48  ;;  %v10459_v32 = vadd.f32 %v10458_v10, %v10457_v40  ;;  %v6145_v36 = vshll.u32 %v14440_v63, 16  ;;  %v11691_v40 = vld [vmem:[%s15456_s3 + $0xa98] sm:$0xff]   ;;  %v11693_v10 = vld [vmem:[%s15456_s3 + $0xad0] sm:$0xff]  }
 0x176   : > { %10950 = vmatpush3.bf16.msra.mxu0 %v11684_v28  ;;  %v2590_v61 = vadd.f32 %v10419_v27, %v14234_v55  ;;  %10989 = vmatprep.subr.bf16.mxu1 %v11683_v62  ;;  %v10460_v48 = vpop.f32.mrf.mxu1  ;;  %v9663_v55 = vcombine.high %v14448_v23, %v5779_v13  ;;  %v14469_v62 = vsel %vm1204_vm1, %v14287_v6, 0  ;;  %v6155_v7 = vrot.slane %v6153_v14, 1  ;;  %v11692_v28 = vld [vmem:[%s15456_s3 + $0xa50] sm:$0xff]   ;;  %v14496_v14 = vld [vmem:[%s14262_s13 + $0x40] sm:$0x11] }
 0x177   : > { %v10421_v44 = vpop.f32.mrf.mxu0  ;;  %10951 = vmatprep.subr.bf16.mxu0 %v11688_v19  ;;  %v6147_v25 = vrot.slane %v6145_v36, 1  ;;  %v6165_v19 = vshrl.u32 %v14436_v47, 16  ;;  %v14501_v47 = vsel %vm12087_vm7, %v14287_v6, 0  ;;  %v11698_v36 = vld [vmem:[%s15456_s3 + $0xa48] sm:$0xff]  }
 0x178   : > { %v10422_v0 = vadd.f32 %v10421_v44, %v10420_v39  ;;  %v14463_v33 = vadd.f32 %v10459_v32, %v2590_v61  ;;  %v10461_v41 = vpop.f32.mrf.mxu1  ;;  %v11694_v61 = vld [vmem:[%s15456_s3 + $0xa10] sm:$0xff]   ;;  %v9662_v44 = vcombine.low %v14448_v23, %v5779_v13  ;;  %v9720_v13 = vcombine.low %v14496_v14, %v14496_v14 }
 0x179   : > { %5998 = vmatmul.mubr.bf16.gmra.mxu0 %v9660_v42  ;;  %10990 = vmatpush3.bf16.msra.mxu1 %v11685_v50  ;;  %v10462_v1 = vadd.f32 %v10461_v41, %v10460_v48  ;;  %v10479_v27 = vpop.f32.mrf.mxu0  ;;  %v6156_v50 = vsel %vm15564_vm6, %v6151_v29, %v6155_v7  ;;  %v6148_v42 = vsel %vm15567_vm12, %v6143_v8, %v6147_v25  ;;  %v11699_v41 = vld [vmem:[%s15456_s3 + $0xac8] sm:$0xff]   ;;  %vm15569_vm12 = vmmov %vm15564_vm6 }
 0x17a   : > { %v2591_v34 = vadd.f32 %v10422_v0, %v14250_v16  ;;  %6005 = vmatprep.mubr.bf16.mxu0 %v9663_v55  ;;  %10991 = vmatprep.subr.bf16.mxu1 %v11689_v20  ;;  %v9772_v16 = vcombine.low %v14427_v31, %v14432_v11  ;;  %v10519_v39 = vpop.f32.mrf.mxu1  ;;  %v6157_v20 = vshrl.u32 %v14440_v63, 16  ;;  %v11695_v0 = vld [vmem:[%s15456_s3 + $0xa90] sm:$0xff]   ;;  %v9721_v63 = vcombine.high %v14496_v14, %v14496_v14 }
 0x17b   : > { %10952 = vmatpush3.bf16.msra.mxu0 %v11690_v49  ;;  %6325 = vmatprep.mubr.bf16.mxu1 %v6156_v50  ;;  %v10480_v29 = vpop.f32.mrf.mxu0  ;;  %v6167_v6 = vor.u32 %v6165_v19, %v6155_v7  ;;  %v11700_v7 = vld [vmem:[%s15456_s3 + $0xa08] sm:$0xff]  }
 0x17c   : > { %10953 = vmatprep.subr.bf16.mxu0 %v11692_v28  ;;  %v14490_v32 = vadd.f32 %v10462_v1, %v2591_v34  ;;  %v10520_v48 = vpop.f32.mrf.mxu1  ;;  %6326 = vmatmul.mubr.bf16.gmra.mxu1 %v6148_v42  ;;  %v10481_v8 = vadd.f32 %v10480_v29, %v10479_v27  ;;  %v14510_v55 = vrot.slane %v9772_v16, 1  ;;  %v6169_v1 = vshll.u32 %v9721_v63, 16  ;;  %v11703_v29 = vld [vmem:[%s15456_s3 + $0xac0] sm:$0xff]  }
 0x17d   : > { %v10521_v23 = vadd.f32 %v10520_v48, %v10519_v39  ;;  %10992 = vmatpush3.bf16.msra.mxu1 %v11691_v40  ;;  %v10482_v49 = vpop.f32.mrf.mxu0  ;;  %v14518_v40 = vsel %vm12103_vm9, %v14292_v3, 0  ;;  %v6159_v27 = vor.u32 %v6157_v20, %v6147_v25  ;;  %v6161_v16 = vshll.u32 %v9720_v13, 16  ;;  %v11702_v20 = vld [vmem:[%s15456_s3 + $0xa40] sm:$0xff]  }
 0x17e   : > { %v10522_v34 = vpop.f32.mrf.mxu1  ;;  %10993 = vmatprep.subr.bf16.mxu1 %v11693_v10  ;;  %v3187_v28 = vadd.f32 %v10481_v8, %v14276_v30  ;;  %v14527_v42 = vsel %vm15568_vm4, %v14351_v37, 0  ;;  %v11701_v30 = vld [vmem:[%s15456_s3 + $0xa88] sm:$0xff]   ;;  %v9773_v3 = vcombine.high %v14427_v31, %v14432_v11  ;;  %v9829_v31 = vcombine.high %v14501_v47, %v14518_v40  ;;  %v11704_v63 = vld [vmem:[%s15456_s3 + $0xa00] sm:$0xff]  }
 0x17f   : > { %10954 = vmatpush3.bf16.msra.mxu0 %v11694_v61  ;;  %v10483_v39 = vpop.f32.mrf.mxu0  ;;  %v6171_v61 = vrot.slane %v6169_v1, 1  ;;  %vm15570_vm4 = vcmp.ne.s16.totalorder %v12495_v57, 0 }
 0x180   : > { %10955 = vmatprep.subr.bf16.mxu0 %v11698_v36  ;;  %v10523_v50 = vpop.f32.mrf.mxu1  ;;  %v14534_v25 = vadd.f32 %v10521_v23, %v3187_v28  ;;  %v10484_v10 = vadd.f32 %v10483_v39, %v10482_v49  ;;  %v6356_v13 = vsel %vm15570_vm4, %v14354_v43, 0 }
 0x181   : > { %6006 = vmatmul.mubr.bf16.gmra.mxu0 %v9662_v44  ;;  %v10524_v19 = vadd.f32 %v10523_v50, %v10522_v34  ;;  %10994 = vmatpush3.bf16.msra.mxu1 %v11695_v0  ;;  %v6163_v44 = vrot.slane %v6161_v16, 1  ;;  %v10485_v48 = vpop.f32.mrf.mxu0  ;;  %v6172_v0 = vsel %vm15564_vm6, %v6167_v6, %v6171_v61  ;;  %v6350_v34 = vld [vmem:[%s14262_s13] sm:$0xee]  ;;  %v6434_v6 = vrot.slane %v9773_v3, 1 }
 0x182   : > { %v10525_v8 = vpop.f32.mrf.mxu1  ;;  %10995 = vmatprep.subr.bf16.mxu1 %v11699_v41  ;;  %v3188_v11 = vadd.f32 %v10484_v10, %v14316_v60  ;;  %6333 = vmatprep.mubr.bf16.mxu1 %v6172_v0  ;;  %v11705_v60 = vld [vmem:[%s15456_s3 + $0xa80] sm:$0xff]   ;;  %v9775_v28 = vcombine.high %v14527_v42, %v6356_v13  ;;  %v6351_v1 = vsel %vm12415_vm0, %v6350_v34, 0  ;;  %v14573_v61 = vsel %vm12146_vm13, %v14295_v53, 0  ;;  %v11709_v53 = vld [vmem:[%s15456_s3 + $0xbb8] sm:$0xff]  }
 0x183   : > { %10956 = vmatpush3.bf16.msra.mxu0 %v11700_v7  ;;  %v6164_v23 = vsel %vm15569_vm12, %v6159_v27, %v6163_v44  ;;  %v10486_v36 = vpop.f32.mrf.mxu0  ;;  %v11706_v27 = vld [vmem:[%s15456_s3 + $0xb78] sm:$0xff]   ;;  %v9770_v3 = vcombine.low %v6351_v1, %v14469_v62  ;;  %v9771_v10 = vcombine.high %v6351_v1, %v14469_v62  ;;  %v9774_v0 = vcombine.low %v14527_v42, %v6356_v13  ;;  %v11711_v13 = vld [vmem:[%s15456_s3 + $0xbf0] sm:$0xff]  }
 0x184   : > { %10957 = vmatprep.subr.bf16.mxu0 %v11702_v20  ;;  %v10526_v49 = vpop.f32.mrf.mxu1  ;;  %v14557_v41 = vadd.f32 %v10524_v19, %v3188_v11  ;;  %6334 = vmatmul.mubr.bf16.gmra.mxu1 %v6164_v23  ;;  %v10487_v16 = vadd.f32 %v10486_v36, %v10485_v48  ;;  %v11707_v19 = vld [vmem:[%s15456_s3 + $0xbf8] sm:$0xff]   ;;  %v14578_v44 = vrot.slane %v9775_v28, 1  ;;  %v9828_v11 = vcombine.low %v14501_v47, %v14518_v40  ;;  %v11710_v40 = vld [vmem:[%s15456_s3 + $0xb70] sm:$0xff]  }
 0x185   : > { %v10527_v7 = vadd.f32 %v10526_v49, %v10525_v8  ;;  %v10488_v39 = vpop.f32.mrf.mxu0  ;;  %10996 = vmatpush3.bf16.msra.mxu1 %v11701_v30  ;;  %6835 = vmatprep.mubr.bf16.mxu1 %v9829_v31  ;;  %v11708_v30 = vld [vmem:[%s15456_s3 + $0xb38] sm:$0xff]   ;;  %v6430_v8 = vrot.slane %v9770_v3, 1  ;;  %v6433_v31 = vrot.slane %v9771_v10, 1  ;;  %vm15571_vm6 = vcmp.ne.s16.totalorder %v12534_v51, 0  ;;  %v11713_v3 = vld [vmem:[%s15456_s3 + $0xbb0] sm:$0xff]  }
 0x186   : > { %v10528_v50 = vpop.f32.mrf.mxu1  ;;  %10997 = vmatprep.subr.bf16.mxu1 %v11703_v29  ;;  %v3189_v62 = vadd.f32 %v10487_v16, %v14340_v21  ;;  %v14589_v29 = vsel %vm12155_vm14, %v14351_v37, 0  ;;  %v14603_v42 = vsel %vm15571_vm6, %v14419_v54, 0  ;;  %vm15572_vm12 = vcmp.ne.s16.totalorder %v12540_v4, 0  ;;  %v11712_v16 = vld [vmem:[%s15456_s3 + $0xb30] sm:$0xff]  }
 0x187   : > { %10958 = vmatpush3.bf16.msra.mxu0 %v11704_v63  ;;  %v10489_v20 = vpop.f32.mrf.mxu0  ;;  %v6435_v49 = vsel %vm1291_vm11, %v6433_v31, %v6434_v6  ;;  %v6432_v47 = vsel %vm1291_vm11, %v6430_v8, %v14510_v55  ;;  %v6358_v28 = vsel %vm15572_vm12, %v14422_v35, 0  ;;  %v14623_v10 = vrot.slane %v9774_v0, 1  ;;  %v11715_v31 = vld [vmem:[%s15456_s3 + $0xbe8] sm:$0xff]  }
 0x188   : > { %11023 = vmatprep.subr.bf16.mxu0 %v11706_v27  ;;  %v10529_v48 = vpop.f32.mrf.mxu1  ;;  %v14592_v23 = vadd.f32 %v10527_v7, %v3189_v62  ;;  %v10490_v21 = vadd.f32 %v10489_v20, %v10488_v39  ;;  %6584 = vmatprep.mubr.bf16.mxu0 %v6435_v49  ;;  %v6439_v7 = vsel %vm1291_vm11, %v6434_v6, %v14578_v44  ;;  %v11714_v6 = vld [vmem:[%s15456_s3 + $0xb68] sm:$0xff]   ;;  %vm15573_vm6 = vcmp.ne.s16.totalorder %v12406_v9, 0 }
 0x189   : > { %v10491_v63 = vpop.f32.mrf.mxu0  ;;  %10998 = vmatpush3.bf16.msra.mxu1 %v11705_v60  ;;  %v10530_v34 = vadd.f32 %v10529_v48, %v10528_v50  ;;  %v9831_v39 = vcombine.high %v14573_v61, %v14589_v29  ;;  %v9777_v50 = vcombine.high %v14603_v42, %v6358_v28  ;;  %v9830_v49 = vcombine.low %v14573_v61, %v14589_v29  ;;  %v11718_v61 = vld [vmem:[%s15456_s3 + $0xb60] sm:$0xff]  }
 0x18a   : > { %v10531_v36 = vpop.f32.mrf.mxu1  ;;  %11063 = vmatprep.subr.bf16.mxu1 %v11707_v19  ;;  %v3190_v60 = vadd.f32 %v10490_v21, %v14358_v2  ;;  %6585 = vmatmul.mubr.bf16.vlgmr.msra.gmra.mxu0 %v6432_v47  ;;  %v11716_v21 = vld [vmem:[%s15456_s3 + $0xb28] sm:$0xff]   ;;  %v6437_v47 = vsel %vm1291_vm11, %v14510_v55, %v14623_v10  ;;  %v11719_v29 = vld [vmem:[%s15456_s3 + $0xbe0] sm:$0xff]   ;;  %vm15574_vm12 = vsmask.f32 7424 }
 0x18b   : > { %v10492_v1 = vpop.f32.mrf.mxu0  ;;  %11024 = vmatpush3.bf16.msra.mxu0 %v11708_v30  ;;  %v14633_v30 = vsel %vm12269_vm5, %v14354_v43, 0  ;;  %6592 = vmatprep.mubr.bf16.mxu0 %v6439_v7  ;;  %v14647_v43 = vsel %vm12275_vm8, %v14419_v54, 0 }
 0x18c   : > { %v10532_v27 = vpop.f32.mrf.mxu1  ;;  %v10493_v2 = vadd.f32 %v10492_v1, %v10491_v63  ;;  %6836 = vmatmul.mubr.bf16.vlgmr.msra.gmra.mxu1 %v9828_v11  ;;  %v14625_v19 = vadd.f32 %v10530_v34, %v3190_v60  ;;  %11025 = vmatprep.subr.bf16.mxu0 %v11710_v40  ;;  %v14639_v11 = vrot.slane %v9777_v50, 1  ;;  %v11717_v40 = vld [vmem:[%s15456_s3 + $0xba8] sm:$0xff]   ;;  %v9776_v34 = vcombine.low %v14603_v42, %v6358_v28 }
 0x18d   : > { %v10533_v62 = vadd.f32 %v10532_v27, %v10531_v36  ;;  %v10494_v20 = vpop.f32.mrf.mxu0  ;;  %11064 = vmatpush3.bf16.msra.mxu1 %v11709_v53  ;;  %6843 = vmatprep.mubr.bf16.mxu1 %v9831_v39  ;;  %v9833_v42 = vcombine.high %v14633_v30, %v14647_v43 }
 0x18e   : > { %v10534_v48 = vpop.f32.mrf.mxu1  ;;  %v3191_v8 = vadd.f32 %v10493_v2, %v14398_v58  ;;  %11065 = vmatprep.subr.bf16.mxu1 %v11711_v13  ;;  %v14663_v13 = vsel %vm1211_vm15, %v14496_v14, 0  ;;  %v6443_v14 = vsel %vm1291_vm11, %v14578_v44, %v14639_v11  ;;  %v11721_v44 = vld [vmem:[%s15456_s3 + $0xba0] sm:$0xff]   ;;  %v6440_v2 = vrot.slane %v9776_v34, 1 }
 0x18f   : > { %v10495_v53 = vpop.f32.mrf.mxu0  ;;  %11026 = vmatpush3.bf16.msra.mxu0 %v11712_v16  ;;  %v11720_v16 = vld [vmem:[%s15456_s3 + $0xb20] sm:$0xff]   ;;  %v9779_v7 = vcombine.high %v14663_v13, %v14663_v13 }
 0x190   : > { %v10535_v0 = vpop.f32.mrf.mxu1  ;;  %v14649_v58 = vadd.f32 %v10533_v62, %v3191_v8  ;;  %v10496_v63 = vadd.f32 %v10495_v53, %v10494_v20  ;;  %11027 = vmatprep.subr.bf16.mxu0 %v11714_v6  ;;  %v11722_v20 = vld [vmem:[%s15456_s3 + $0xb58] sm:$0xff]  }
 0x191   : > { %v10536_v36 = vadd.f32 %v10535_v0, %v10534_v48  ;;  %v10497_v60 = vpop.f32.mrf.mxu0  ;;  %11066 = vmatpush3.bf16.msra.mxu1 %v11713_v3  ;;  %v11723_v6 = vld [vmem:[%s15456_s3 + $0xbd8] sm:$0xff]   ;;  %v6446_v0 = vrot.slane %v9779_v7, 1 }
 0x192   : > { %v10537_v1 = vpop.f32.mrf.mxu1  ;;  %v3192_v55 = vadd.f32 %v10496_v63, %v14411_v26  ;;  %11067 = vmatprep.subr.bf16.mxu1 %v11715_v31  ;;  %6593 = vmatmul.mubr.bf16.gmra.mxu0 %v6437_v47  ;;  %v11724_v53 = vld [vmem:[%s15456_s3 + $0xb18] sm:$0xff]  }
 0x193   : > { %v10498_v28 = vpop.f32.mrf.mxu0  ;;  %11028 = vmatpush3.bf16.msra.mxu0 %v11716_v21  ;;  %6600 = vmatprep.mubr.bf16.mxu0 %v6443_v14  ;;  %v11725_v47 = vld [vmem:[%s15456_s3 + $0xb98] sm:$0xff]   ;;  %v14729_v14 = vld [vmem:[%s14262_s13 + $0x40] sm:$0xff] }
 0x194   : > { %v10538_v27 = vpop.f32.mrf.mxu1  ;;  %v14680_v26 = vadd.f32 %v10536_v36, %v3192_v55  ;;  %v10499_v39 = vadd.f32 %v10498_v28, %v10497_v60  ;;  %6844 = vmatmul.mubr.bf16.gmra.mxu1 %v9830_v49  ;;  %11029 = vmatprep.subr.bf16.mxu0 %v11718_v61  ;;  %v6441_v49 = vsel %vm1291_vm11, %v14623_v10, %v6440_v2  ;;  %v11726_v60 = vld [vmem:[%s15456_s3 + $0xb50] sm:$0xff]   ;;  %v6632_v61 = vsel %vm12345_vm2, %v14422_v35, 0 }
 0x195   : > { %v10539_v50 = vadd.f32 %v10538_v27, %v10537_v1  ;;  %v10500_v3 = vpop.f32.mrf.mxu0  ;;  %11068 = vmatpush3.bf16.msra.mxu1 %v11717_v40  ;;  %6851 = vmatprep.mubr.bf16.mxu1 %v9833_v42  ;;  %v9778_v40 = vcombine.low %v14663_v13, %v14663_v13  ;;  %v11727_v10 = vld [vmem:[%s15456_s3 + $0xbd0] sm:$0xff]   ;;  %v6447_v1 = vsel %vm1291_vm11, %v14639_v11, %v6446_v0  ;;  %v6633_v35 = vsel %vm12351_vm3, %v14729_v14, 0  ;;  %v11730_v11 = vld [vmem:[%s15456_s3 + $0xb48] sm:$0xff]  }
 0x196   : > { %v10540_v62 = vpop.f32.mrf.mxu1  ;;  %v3193_v48 = vadd.f32 %v10499_v39, %v14463_v33  ;;  %11069 = vmatprep.subr.bf16.mxu1 %v11719_v29  ;;  %v9832_v33 = vcombine.low %v14633_v30, %v14647_v43  ;;  %v11728_v13 = vld [vmem:[%s15456_s3 + $0xb10] sm:$0xff]   ;;  %v9835_v7 = vcombine.high %v6632_v61, %v6633_v35  ;;  %v11731_v39 = vld [vmem:[%s15456_s3 + $0xbc8] sm:$0xff]  }
 0x197   : > { %v10501_v8 = vpop.f32.mrf.mxu0  ;;  %11030 = vmatpush3.bf16.msra.mxu0 %v11720_v16  ;;  %v11729_v29 = vld [vmem:[%s15456_s3 + $0xb90] sm:$0xff]   ;;  %v6444_v42 = vrot.slane %v9778_v40, 1 }
 0x198   : > { %v10541_v31 = vpop.f32.mrf.mxu1  ;;  %v14697_v21 = vadd.f32 %v10539_v50, %v3193_v48  ;;  %v10502_v63 = vadd.f32 %v10501_v8, %v10500_v3  ;;  %11031 = vmatprep.subr.bf16.mxu0 %v11722_v20  ;;  %v11732_v3 = vld [vmem:[%s15456_s3 + $0xb08] sm:$0xff]   ;;  %v9834_v48 = vcombine.low %v6632_v61, %v6633_v35 }
 0x199   : > { %v10542_v36 = vadd.f32 %v10541_v31, %v10540_v62  ;;  %v10559_v34 = vpop.f32.mrf.mxu0  ;;  %11070 = vmatpush3.bf16.msra.mxu1 %v11721_v44 }
 0x19a   : > { %v3194_v30 = vadd.f32 %v10502_v63, %v14490_v32  ;;  %11071 = vmatprep.subr.bf16.mxu1 %v11723_v6  ;;  %6601 = vmatmul.mubr.bf16.gmra.mxu0 %v6441_v49  ;;  %v10599_v28 = vpop.f32.mrf.mxu1  ;;  %v11733_v6 = vld [vmem:[%s15456_s3 + $0xb88] sm:$0xff]   ;;  %v11736_v49 = vld [vmem:[%s15456_s3 + $0xb00] sm:$0xff]  }
 0x19b   : > { %v10560_v43 = vpop.f32.mrf.mxu0  ;;  %11032 = vmatpush3.bf16.msra.mxu0 %v11724_v53  ;;  %6608 = vmatprep.mubr.bf16.mxu0 %v6447_v1  ;;  %v11734_v53 = vld [vmem:[%s15456_s3 + $0xb40] sm:$0xff]   ;;  %v7208_v1 = vsel %vm1206_vm10, %v14351_v37, 0 }
 0x19c   : > { %v14723_v55 = vadd.f32 %v10542_v36, %v3194_v30  ;;  %v10561_v32 = vadd.f32 %v10560_v43, %v10559_v34  ;;  %6852 = vmatmul.mubr.bf16.gmra.mxu1 %v9832_v33  ;;  %11033 = vmatprep.subr.bf16.mxu0 %v11726_v60  ;;  %v10600_v50 = vpop.f32.mrf.mxu1  ;;  %v6876_v34 = vld [vmem:[%s14262_s13 + $0x8] sm:$0xff]  ;;  %v14768_v43 = vld [vmem:[%s14262_s13 + $0x18] sm:$0xff] }
 0x19d   : > { %v10562_v27 = vpop.f32.mrf.mxu0  ;;  %11072 = vmatpush3.bf16.msra.mxu1 %v11725_v47  ;;  %v10601_v62 = vadd.f32 %v10600_v50, %v10599_v28  ;;  %6859 = vmatprep.mubr.bf16.mxu1 %v9835_v7  ;;  %v9886_v50 = vcombine.low %v14768_v43, %v14351_v37 }
 0x19e   : > { %v3773_v16 = vadd.f32 %v10561_v32, %v14534_v25  ;;  %11073 = vmatprep.subr.bf16.mxu1 %v11727_v10  ;;  %v6445_v25 = vsel %vm1291_vm11, %v6440_v2, %v6444_v42  ;;  %v10602_v8 = vpop.f32.mrf.mxu1  ;;  %v11735_v2 = vld [vmem:[%s15456_s3 + $0xbc0] sm:$0xff]   ;;  %v14765_v10 = vld [vmem:[%s14262_s13 + $0x10] sm:$0xff]  ;;  %v14779_v32 = vsel %vm15570_vm4, %v14419_v54, 0  ;;  %vm15575_vm4 = vmmov %vm15574_vm12 }
 0x19f   : > { %v10563_v44 = vpop.f32.mrf.mxu0  ;;  %11034 = vmatpush3.bf16.msra.mxu0 %v11728_v13  ;;  %v7204_v13 = vld [vmem:[%s14262_s13 + $0x8] sm:$0xee]  ;;  %v9884_v42 = vcombine.low %v6876_v34, %v14765_v10  ;;  %v9885_v28 = vcombine.high %v6876_v34, %v14765_v10 }
 0x1a0   : > { %v10564_v20 = vadd.f32 %v10563_v44, %v10562_v27  ;;  %11035 = vmatprep.subr.bf16.mxu0 %v11730_v11  ;;  %v14751_v0 = vadd.f32 %v10601_v62, %v3773_v16  ;;  %v10603_v36 = vpop.f32.mrf.mxu1  ;;  %v9887_v27 = vcombine.high %v14768_v43, %v14351_v37  ;;  %v7205_v35 = vsel %vm12415_vm0, %v7204_v13, 0  ;;  %v11742_v11 = vld [vmem:[%s15456_s3 + $0xc78] sm:$0xff]  }
 0x1a1   : > { %v10565_v31 = vpop.f32.mrf.mxu0  ;;  %11074 = vmatpush3.bf16.msra.mxu1 %v11729_v29  ;;  %v10604_v47 = vadd.f32 %v10603_v36, %v10602_v8  ;;  %v6958_v62 = vshll.u32 %v9884_v42, 16 }
 0x1a2   : > { %v3774_v63 = vadd.f32 %v10564_v20, %v14557_v41  ;;  %11075 = vmatprep.subr.bf16.mxu1 %v11731_v39  ;;  %6609 = vmatmul.mubr.bf16.gmra.mxu0 %v6445_v25  ;;  %v11737_v41 = vld [vmem:[%s15456_s3 + $0xb80] sm:$0xff]   ;;  %v10605_v60 = vpop.f32.mrf.mxu1  ;;  %v7207_v39 = vsel %vm15573_vm6, %v14768_v43, 0  ;;  %v6968_v20 = vshrl.u32 %v9885_v28, 16  ;;  %v11743_v25 = vld [vmem:[%s15456_s3 + $0xcf8] sm:$0xff]   ;;  %vm15576_vm6 = vcmp.ne.s16.totalorder %v12540_v4, 0 }
 0x1a3   : > { %v10566_v33 = vpop.f32.mrf.mxu0  ;;  %11036 = vmatpush3.bf16.msra.mxu0 %v11732_v3  ;;  %v6956_v3 = vshrl.u32 %v9884_v42, 16  ;;  %v6960_v36 = vrot.slane %v6958_v62, 1 }
 0x1a4   : > { %v10567_v40 = vadd.f32 %v10566_v33, %v10565_v31  ;;  %6860 = vmatmul.mubr.bf16.gmra.mxu1 %v9834_v48  ;;  %11037 = vmatprep.subr.bf16.mxu0 %v11734_v53  ;;  %v14774_v61 = vadd.f32 %v10604_v47, %v3774_v63  ;;  %v10606_v16 = vpop.f32.mrf.mxu1  ;;  %v6970_v48 = vshll.u32 %v9885_v28, 16  ;;  %v6975_v31 = vshll.u32 %v9887_v27, 16  ;;  %v11745_v28 = vld [vmem:[%s15456_s3 + $0xcb8] sm:$0xff]  }
 0x1a5   : > { %v10568_v30 = vpop.f32.mrf.mxu0  ;;  %11076 = vmatpush3.bf16.msra.mxu1 %v11733_v6  ;;  %v10607_v44 = vadd.f32 %v10606_v16, %v10605_v60  ;;  %v9945_v33 = vcombine.high %v7207_v39, %v7208_v1 }
 0x1a6   : > { %v3775_v29 = vadd.f32 %v10567_v40, %v14592_v23  ;;  %11077 = vmatprep.subr.bf16.mxu1 %v11735_v2  ;;  %v7206_v23 = vsel %vm1204_vm1, %v14765_v10, 0  ;;  %v10608_v6 = vpop.f32.mrf.mxu1  ;;  %v9944_v2 = vcombine.low %v7207_v39, %v7208_v1  ;;  %v6972_v37 = vrot.slane %v6970_v48, 1  ;;  %v11746_v48 = vld [vmem:[%s15456_s3 + $0xc70] sm:$0xff]  }
 0x1a7   : > { %v10569_v7 = vpop.f32.mrf.mxu0  ;;  %11038 = vmatpush3.bf16.msra.mxu0 %v11736_v49  ;;  %v9942_v53 = vcombine.low %v7205_v35, %v7206_v23  ;;  %v9943_v63 = vcombine.high %v7205_v35, %v7206_v23  ;;  %v6963_v49 = vshll.u32 %v9886_v50, 16  ;;  %v6977_v34 = vrot.slane %v6975_v31, 1 }
 0x1a8   : > { %11103 = vmatprep.subr.bf16.mxu0 %v11742_v11  ;;  %v10609_v47 = vpop.f32.mrf.mxu1  ;;  %v14802_v13 = vrot.slane %v9944_v2, 1  ;;  %v6973_v35 = vor.u32 %v6972_v37, %v6968_v20  ;;  %v14810_v11 = vrot.slane %v9945_v33, 1  ;;  %v6961_v1 = vor.u32 %v6960_v36, %v6956_v3  ;;  %v11747_v2 = vld [vmem:[%s15456_s3 + $0xcf0] sm:$0xff]  }
 0x1a9   : > { %v10571_v8 = vpop.f32.mrf.mxu0  ;;  %11078 = vmatpush3.bf16.msra.mxu1 %v11737_v41  ;;  %v7284_v60 = vrot.slane %v9942_v53, 1  ;;  %v7287_v42 = vrot.slane %v9943_v63, 1  ;;  %v11744_v41 = vld [vmem:[%s15456_s3 + $0xc38] sm:$0xff]   ;;  %v6965_v16 = vrot.slane %v6963_v49, 1  ;;  %v14817_v31 = vadd.f32 %v10607_v44, %v3775_v29  ;;  %v11749_v29 = vld [vmem:[%s15456_s3 + $0xcb0] sm:$0xff]  }
 0x1aa   : > { %11143 = vmatprep.subr.bf16.mxu1 %v11743_v25  ;;  %v10611_v23 = vpop.f32.mrf.mxu1  ;;  %v6987_v25 = vshrl.u32 %v9887_v27, 16  ;;  %v10570_v53 = vadd.f32 %v10569_v7, %v10568_v30  ;;  %v6978_v63 = vsel %vm15574_vm12, %v6973_v35, %v6977_v34  ;;  %v6979_v36 = vshrl.u32 %v9886_v50, 16  ;;  %v11748_v30 = vld [vmem:[%s15456_s3 + $0xc30] sm:$0xff]   ;;  %v14839_v50 = vld [vmem:[%s14262_s13 + $0x28] sm:$0xff] }
 0x1ab   : > { %v10572_v40 = vpop.f32.mrf.mxu0  ;;  %v7286_v62 = vsel %vm1291_vm11, %v7284_v60, %v14802_v13  ;;  %v7289_v3 = vsel %vm1291_vm11, %v7287_v42, %v14810_v11  ;;  %v6966_v20 = vsel %vm15575_vm4, %v6961_v1, %v6965_v16  ;;  %7163 = vmatprep.mubr.bf16.mxu0 %v6978_v63  ;;  %v10610_v44 = vadd.f32 %v10609_v47, %v10608_v6  ;;  %v11752_v47 = vld [vmem:[%s15456_s3 + $0xc68] sm:$0xff]  }
 0x1ac   : > { %v10612_v37 = vpop.f32.mrf.mxu1  ;;  %7438 = vmatprep.mubr.bf16.mxu1 %v7289_v3  ;;  %v6989_v27 = vor.u32 %v6987_v25, %v6977_v34  ;;  %v3776_v7 = vadd.f32 %v10570_v53, %v14625_v19  ;;  %v14836_v33 = vsel %vm15576_vm6, %v14729_v14, 0  ;;  %7164 = vmatmul.mubr.bf16.vlgmr.msra.gmra.mxu0 %v6966_v20  ;;  %v6981_v49 = vor.u32 %v6979_v36, %v6965_v16  ;;  %v11757_v36 = vld [vmem:[%s15456_s3 + $0xce0] sm:$0xff]  }
 0x1ad   : > { %v10574_v39 = vpop.f32.mrf.mxu0  ;;  %7439 = vmatmul.mubr.bf16.vlgmr.msra.gmra.mxu1 %v7286_v62  ;;  %v10573_v60 = vadd.f32 %v10572_v40, %v10571_v8  ;;  %v10613_v42 = vadd.f32 %v10612_v37, %v10611_v23  ;;  %v14844_v34 = vsel %vm12087_vm7, %v14765_v10, 0  ;;  %11104 = vmatpush3.bf16.msra.mxu0 %v11744_v41  ;;  %v9889_v19 = vcombine.high %v14839_v50, %v14419_v54  ;;  %vm15578_vm7 = vmmov %vm15575_vm4 }
 0x1ae   : > { %v10614_v35 = vpop.f32.mrf.mxu1  ;;  %11144 = vmatpush3.bf16.msra.mxu1 %v11745_v28  ;;  %vm15577_vm12 = vcmp.ne.s16.totalorder %v12483_v45, 0  ;;  %v9888_v8 = vcombine.low %v14839_v50, %v14419_v54  ;;  %v14856_v40 = vadd.f32 %v10610_v44, %v3776_v7  ;;  %11105 = vmatprep.subr.bf16.mxu0 %v11746_v48  ;;  %v11753_v28 = vld [vmem:[%s15456_s3 + $0xce8] sm:$0xff]   ;;  %v14867_v54 = vsel %vm12103_vm9, %v14768_v43, 0  ;;  %vm15579_vm9 = vmmov %vm15575_vm4 }
 0x1af   : > { %v10575_v1 = vpop.f32.mrf.mxu0  ;;  %v7209_v6 = vsel %vm15577_vm12, %v14839_v50, 0  ;;  %11145 = vmatprep.subr.bf16.mxu1 %v11747_v2  ;;  %v3777_v16 = vadd.f32 %v10573_v60, %v14649_v58  ;;  %v6991_v62 = vshll.u32 %v9889_v19, 16  ;;  %vm15580_vm4 = vcmp.ne.s16.totalorder %v12534_v51, 0  ;;  %vm15581_vm6 = vmmov %vm15578_vm7 }
 0x1b0   : > { %v9947_v52 = vcombine.high %v7209_v6, %v14779_v32  ;;  %v9946_v41 = vcombine.low %v7209_v6, %v14779_v32  ;;  %v10615_v23 = vpop.f32.mrf.mxu1  ;;  %v6983_v25 = vshll.u32 %v9888_v8, 16  ;;  %v10576_v48 = vadd.f32 %v10575_v1, %v10574_v39  ;;  %v11754_v32 = vld [vmem:[%s15456_s3 + $0xc28] sm:$0xff]   ;;  %v14905_v6 = vld [vmem:[%s14262_s13 + $0x38] sm:$0xff]  ;;  %vm15582_vm12 = vmmov %vm15581_vm6 }
 0x1b1   : > { %v10616_v53 = vadd.f32 %v10615_v23, %v10614_v35  ;;  %v14876_v20 = vadd.f32 %v10613_v42, %v3777_v16  ;;  %11106 = vmatpush3.bf16.msra.mxu0 %v11748_v30  ;;  %v6993_v56 = vrot.slane %v6991_v62, 1  ;;  %v11755_v39 = vld [vmem:[%s15456_s3 + $0xca8] sm:$0xff]   ;;  %v7003_v35 = vshrl.u32 %v9889_v19, 16  ;;  %v11762_v62 = vld [vmem:[%s15456_s3 + $0xc58] sm:$0xff]  }
 0x1b2   : > { %v14869_v63 = vrot.slane %v9947_v52, 1  ;;  %v14871_v3 = vrot.slane %v9946_v41, 1  ;;  %11146 = vmatpush3.bf16.msra.mxu1 %v11749_v29  ;;  %v6985_v2 = vrot.slane %v6983_v25, 1  ;;  %v3778_v37 = vadd.f32 %v10576_v48, %v14680_v26  ;;  %11107 = vmatprep.subr.bf16.mxu0 %v11752_v47  ;;  %v11756_v26 = vld [vmem:[%s15456_s3 + $0xc60] sm:$0xff]  }
 0x1b3   : > { %11147 = vmatprep.subr.bf16.mxu1 %v11753_v28  ;;  %v6994_v60 = vsel %vm15578_vm7, %v6989_v27, %v6993_v56  ;;  %v11759_v27 = vld [vmem:[%s15456_s3 + $0xca0] sm:$0xff]   ;;  %v14909_v19 = vcombine.low %v14765_v10, %v14768_v43  ;;  %v9891_v28 = vcombine.high %v14905_v6, %v14729_v14  ;;  %v7005_v16 = vor.u32 %v7003_v35, %v6993_v56  ;;  %v11763_v56 = vld [vmem:[%s15456_s3 + $0xcd8] sm:$0xff]   ;;  %vm15583_vm7 = vmmov %vm15581_vm6 }
 0x1b4   : > { %v7293_v44 = vsel %vm1291_vm11, %v14810_v11, %v14869_v63  ;;  %v7291_v30 = vsel %vm1291_vm11, %v14802_v13, %v14871_v3  ;;  %v6986_v42 = vsel %vm15579_vm9, %v6981_v49, %v6985_v2  ;;  %v14896_v1 = vadd.f32 %v10616_v53, %v3778_v37  ;;  %7171 = vmatprep.mubr.bf16.mxu0 %v6994_v60  ;;  %v11758_v13 = vld [vmem:[%s15456_s3 + $0xc20] sm:$0xff]   ;;  %vm15584_vm9 = vmmov %vm15581_vm6 }
 0x1b5   : > { %7446 = vmatprep.mubr.bf16.mxu1 %v7293_v44  ;;  %v6995_v49 = vshrl.u32 %v9888_v8, 16  ;;  %7172 = vmatmul.mubr.bf16.gmra.mxu0 %v6986_v42  ;;  %v7211_v23 = vsel %vm15580_vm4, %v14905_v6, 0  ;;  %v9890_v8 = vcombine.low %v14905_v6, %v14729_v14  ;;  %v7810_v37 = vshrl.u32 %v14909_v19, 16 }
 0x1b6   : > { %7447 = vmatmul.mubr.bf16.gmra.mxu1 %v7291_v30  ;;  %11108 = vmatpush3.bf16.msra.mxu0 %v11754_v32  ;;  %v9949_v48 = vcombine.high %v7211_v23, %v14836_v33  ;;  %v15051_v15 = vsel %vm12155_vm14, %v14839_v50, 0  ;;  %vm15586_vm14 = vmmov %vm15581_vm6 }
 0x1b7   : > { %11148 = vmatpush3.bf16.msra.mxu1 %v11755_v39  ;;  %v6997_v53 = vor.u32 %v6995_v49, %v6985_v2  ;;  %11109 = vmatprep.subr.bf16.mxu0 %v11756_v26  ;;  %v6999_v44 = vshll.u32 %v9890_v8, 16  ;;  %v11765_v2 = vld [vmem:[%s15456_s3 + $0xc98] sm:$0xff]   ;;  %v14942_v49 = vcombine.high %v14765_v10, %v14768_v43 }
 0x1b8   : > { %11149 = vmatprep.subr.bf16.mxu1 %v11757_v36  ;;  %v14928_v36 = vrot.slane %v9949_v48, 1 }
 0x1ba   : > { %11110 = vmatpush3.bf16.msra.mxu0 %v11758_v13 }
 0x1bb   : > { %11150 = vmatpush3.bf16.msra.mxu1 %v11759_v27  ;;  %v11766_v27 = vld [vmem:[%s15456_s3 + $0xc50] sm:$0xff]   ;;  %11111 = vmatprep.subr.bf16.mxu0 %v11762_v62  ;;  %v6884_v62 = vld [vmem:[%s14262_s13 + $0x48] sm:$0x11] }
 0x1bc   : > { %11151 = vmatprep.subr.bf16.mxu1 %v11763_v56 }
 0x1be   : > { %v10617_v58 = vpop.f32.mrf.mxu1 }
 0x1bf   : > { %v10577_v7 = vpop.f32.mrf.mxu0  ;;  %11152 = vmatpush3.bf16.msra.mxu1 %v11765_v2  ;;  %v11772_v2 = vld [vmem:[%s15456_s3 + $0xc48] sm:$0xff]  }
 0x1c0   : > { %v10618_v29 = vpop.f32.mrf.mxu1 }
 0x1c1   : > { %v10578_v11 = vpop.f32.mrf.mxu0  ;;  %v10619_v52 = vadd.f32 %v10618_v29, %v10617_v58  ;;  %v9948_v58 = vcombine.low %v7211_v23, %v14836_v33  ;;  %v11764_v33 = vld [vmem:[%s15456_s3 + $0xc18] sm:$0xff]  }
 0x1c2   : > { %v10579_v47 = vadd.f32 %v10578_v11, %v10577_v7  ;;  %v10620_v41 = vpop.f32.mrf.mxu1  ;;  %v7007_v7 = vshll.u32 %v9891_v28, 16  ;;  %v7001_v11 = vrot.slane %v6999_v44, 1  ;;  %11112 = vmatpush3.bf16.msra.mxu0 %v11764_v33  ;;  %v11773_v33 = vld [vmem:[%s15456_s3 + $0xcc8] sm:$0xff]  }
 0x1c3   : > { %v10580_v25 = vpop.f32.mrf.mxu0  ;;  %v14930_v60 = vrot.slane %v9948_v58, 1  ;;  %11113 = vmatprep.subr.bf16.mxu0 %v11766_v27  ;;  %v11774_v27 = vld [vmem:[%s15456_s3 + $0xc08] sm:$0xff]  }
 0x1c4   : > { %v10621_v39 = vpop.f32.mrf.mxu1  ;;  %v3779_v30 = vadd.f32 %v10579_v47, %v14697_v21  ;;  %v7009_v35 = vrot.slane %v7007_v7, 1  ;;  %v7002_v13 = vsel %vm15582_vm12, %v6997_v53, %v7001_v11 }
 0x1c5   : > { %v10581_v29 = vpop.f32.mrf.mxu0  ;;  %v10622_v32 = vadd.f32 %v10621_v39, %v10620_v41  ;;  %v7297_v41 = vsel %vm1291_vm11, %v14869_v63, %v14928_v36  ;;  %v7295_v23 = vsel %vm1291_vm11, %v14871_v3, %v14930_v60  ;;  %v11767_v63 = vld [vmem:[%s15456_s3 + $0xcd0] sm:$0xff]   ;;  %v7011_v3 = vshrl.u32 %v9890_v8, 16 }
 0x1c6   : > { %v10582_v42 = vadd.f32 %v10581_v29, %v10580_v25  ;;  %v10679_v26 = vpop.f32.mrf.mxu1  ;;  %v14938_v21 = vadd.f32 %v10619_v52, %v3779_v30  ;;  %v7019_v52 = vshrl.u32 %v9891_v28, 16  ;;  %v7010_v48 = vsel %vm15581_vm6, %v7005_v16, %v7009_v35  ;;  %7454 = vmatprep.mubr.bf16.mxu1 %v7297_v41  ;;  %v11769_v8 = vld [vmem:[%s15456_s3 + $0xc90] sm:$0xff]   ;;  %11153 = vmatprep.subr.bf16.mxu1 %v11767_v63 }
 0x1c7   : > { %v10639_v47 = vpop.f32.mrf.mxu0  ;;  %7179 = vmatprep.mubr.bf16.mxu0 %v7010_v48  ;;  %7455 = vmatmul.mubr.bf16.gmra.mxu1 %v7295_v23  ;;  %v7812_v16 = vshll.u32 %v14909_v19, 16  ;;  %v7013_v44 = vor.u32 %v7011_v3, %v7001_v11  ;;  %v7822_v30 = vshrl.u32 %v14942_v49, 16 }
 0x1c8   : > { %v3780_v25 = vadd.f32 %v10582_v42, %v14723_v55  ;;  %v10680_v10 = vpop.f32.mrf.mxu1  ;;  %v11768_v55 = vld [vmem:[%s15456_s3 + $0xc10] sm:$0xff]   ;;  %7180 = vmatmul.mubr.bf16.gmra.mxu0 %v7002_v13  ;;  %v7021_v7 = vor.u32 %v7019_v52, %v7009_v35  ;;  %v7213_v42 = vsel %vm1211_vm15, %v6884_v62, 0  ;;  %11154 = vmatpush3.bf16.msra.mxu1 %v11769_v8 }
 0x1c9   : > { %v10640_v58 = vpop.f32.mrf.mxu0  ;;  %v10681_v56 = vadd.f32 %v10680_v10, %v10679_v26  ;;  %v9892_v26 = vcombine.low %v6884_v62, %v6884_v62  ;;  %v9951_v35 = vcombine.high %v7213_v42, %v7213_v42  ;;  %v9950_v11 = vcombine.low %v7213_v42, %v7213_v42  ;;  %11114 = vmatpush3.bf16.msra.mxu0 %v11768_v55  ;;  %v11776_v55 = vld [vmem:[%s15456_s3 + $0xc40] sm:$0xff]  }
 0x1ca   : > { %v14962_v28 = vadd.f32 %v10622_v32, %v3780_v25  ;;  %v10641_v53 = vadd.f32 %v10640_v58, %v10639_v47  ;;  %v10682_v39 = vpop.f32.mrf.mxu1  ;;  %v9893_v32 = vcombine.high %v6884_v62, %v6884_v62  ;;  %v14979_v23 = vrot.slane %v7812_v16, 1  ;;  %v11775_v16 = vld [vmem:[%s15456_s3 + $0xc88] sm:$0xff]   ;;  %11155 = vmatprep.subr.bf16.mxu1 %v11773_v33  ;;  %11115 = vmatprep.subr.bf16.mxu0 %v11772_v2  ;;  %v11778_v33 = vld [vmem:[%s15456_s3 + $0xc00] sm:$0xff]  }
 0x1cb   : > { %v10642_v29 = vpop.f32.mrf.mxu0  ;;  %v7015_v48 = vshll.u32 %v9892_v26, 16  ;;  %v7298_v58 = vrot.slane %v9950_v11, 1  ;;  %v7824_v26 = vshll.u32 %v14942_v49, 16 }
 0x1cc   : > { %v4299_v47 = vadd.f32 %v10641_v53, %v14751_v0  ;;  %v10683_v41 = vpop.f32.mrf.mxu1  ;;  %v7023_v10 = vshll.u32 %v9893_v32, 16  ;;  %v7300_v0 = vrot.slane %v9951_v35, 1  ;;  %11156 = vmatpush3.bf16.msra.mxu1 %v11775_v16  ;;  %v11784_v16 = vld [vmem:[%s15456_s3 + $0xd78] sm:$0xff]   ;;  %v7815_v18 = vor.u32 %v14979_v23, %v7810_v37 }
 0x1cd   : > { %v10643_v52 = vpop.f32.mrf.mxu0  ;;  %v10684_v25 = vadd.f32 %v10683_v41, %v10682_v39  ;;  %v7017_v62 = vrot.slane %v7015_v48, 1  ;;  %v7299_v42 = vsel %vm1291_vm11, %v14930_v60, %v7298_v58  ;;  %11116 = vmatpush3.bf16.msra.mxu0 %v11774_v27  ;;  %v11785_v37 = vld [vmem:[%s15456_s3 + $0xd38] sm:$0xff]  }
 0x1ce   : > { %v14981_v13 = vadd.f32 %v10681_v56, %v4299_v47  ;;  %v10644_v63 = vadd.f32 %v10643_v52, %v10642_v29  ;;  %v10685_v3 = vpop.f32.mrf.mxu1  ;;  %v7025_v39 = vrot.slane %v7023_v10, 1  ;;  %v10001_v56 = vcombine.high %v14844_v34, %v14867_v54  ;;  %v15014_v10 = vld [vmem:[%s14262_s13 + $0x20] sm:$0xff]  ;;  %11117 = vmatprep.subr.bf16.mxu0 %v11776_v55 }
 0x1cf   : > { %v10645_v53 = vpop.f32.mrf.mxu0  ;;  %v7301_v32 = vsel %vm1291_vm11, %v14928_v36, %v7300_v0  ;;  %v11777_v36 = vld [vmem:[%s15456_s3 + $0xcc0] sm:$0xff]   ;;  %v7826_v52 = vrot.slane %v7824_v26, 1  ;;  %v10058_v0 = vcombine.low %v15014_v10, %v14839_v50  ;;  %v10059_v58 = vcombine.high %v15014_v10, %v14839_v50 }
 0x1d0   : > { %v4300_v8 = vadd.f32 %v10644_v63, %v14774_v61  ;;  %v10686_v29 = vpop.f32.mrf.mxu1  ;;  %v7026_v35 = vsel %vm15583_vm7, %v7021_v7, %v7025_v39  ;;  %7462 = vmatprep.mubr.bf16.mxu1 %v7301_v32  ;;  %v7018_v61 = vsel %vm15584_vm9, %v7013_v44, %v7017_v62  ;;  %v11779_v44 = vld [vmem:[%s15456_s3 + $0xc80] sm:$0xff]   ;;  %11157 = vmatprep.subr.bf16.mxu1 %v11777_v36  ;;  %v11816_v39 = vld [vmem:[%s14262_s13 + $0x30] sm:$0xff] }
 0x1d1   : > { %v10646_v47 = vpop.f32.mrf.mxu0  ;;  %v10687_v41 = vadd.f32 %v10686_v29, %v10685_v3  ;;  %7187 = vmatprep.mubr.bf16.mxu0 %v7026_v35  ;;  %7463 = vmatmul.mubr.bf16.gmra.mxu1 %v7299_v42  ;;  %v15032_v12 = vsel %vm12269_vm5, %v11816_v39, 0  ;;  %v7827_v29 = vor.u32 %v7826_v52, %v7822_v30  ;;  %v7829_v32 = vshll.u32 %v10059_v58, 16  ;;  %vm15587_vm5 = vmmov %vm15581_vm6 }
 0x1d2   : > { %v15005_v60 = vadd.f32 %v10684_v25, %v4300_v8  ;;  %v10647_v2 = vadd.f32 %v10646_v47, %v10645_v53  ;;  %v10688_v11 = vpop.f32.mrf.mxu1  ;;  %7188 = vmatmul.mubr.bf16.gmra.mxu0 %v7018_v61  ;;  %v11815_v25 = vld [vmem:[%s14262_s13 + $0x20] sm:$0xff]  ;;  %v15039_v8 = vsel %vm12345_vm2, %v14729_v14, 0  ;;  %v7817_v42 = vshll.u32 %v10058_v0, 16  ;;  %11158 = vmatpush3.bf16.msra.mxu1 %v11779_v44  ;;  %v11787_v44 = vld [vmem:[%s15456_s3 + $0xd30] sm:$0xff]   ;;  %vm15588_vm2 = vmmov %vm15587_vm5 }
 0x1d3   : > { %v10648_v7 = vpop.f32.mrf.mxu0  ;;  %v15019_v48 = vsel %vm12146_vm13, %v11815_v25, 0  ;;  %7689 = vmatprep.mubr.bf16.mxu0 %v10001_v56  ;;  %v10000_v55 = vcombine.low %v14844_v34, %v14867_v54  ;;  %v7841_v26 = vshrl.u32 %v10059_v58, 16  ;;  %11118 = vmatpush3.bf16.msra.mxu0 %v11778_v33  ;;  %v7831_v19 = vrot.slane %v7829_v32, 1  ;;  %v11786_v34 = vld [vmem:[%s15456_s3 + $0xd70] sm:$0xff]   ;;  %vm15585_vm13 = vmmov %vm15581_vm6 }
 0x1d4   : > { %v4301_v63 = vadd.f32 %v10647_v2, %v14817_v31  ;;  %v10689_v3 = vpop.f32.mrf.mxu1  ;;  %v7819_v47 = vrot.slane %v7817_v42, 1  ;;  %11223 = vmatprep.subr.bf16.mxu1 %v11784_v16  ;;  %v15061_v54 = vld [vmem:[%s14262_s13 + $0x30] sm:$0xff]  ;;  %v7833_v17 = vshrl.u32 %v10058_v0, 16  ;;  %11183 = vmatprep.subr.bf16.mxu0 %v11784_v16  ;;  %v10003_v33 = vcombine.high %v15019_v48, %v15051_v15  ;;  %vm15592_vm6 = vmmov %vm15588_vm2 }
 0x1d5   : > { %v10649_v53 = vpop.f32.mrf.mxu0  ;;  %v10690_v62 = vadd.f32 %v10689_v3, %v10688_v11  ;;  %v7832_v2 = vsel %vm15585_vm13, %v7827_v29, %v7831_v19  ;;  %v7843_v52 = vor.u32 %v7841_v26, %v7831_v19  ;;  %v11790_v3 = vld [vmem:[%s15456_s3 + $0xd68] sm:$0xff]   ;;  %v15099_v19 = vsel %vm12275_vm8, %v14905_v6, 0  ;;  %vm15589_vm8 = vmmov %vm15580_vm4 }
 0x1d6   : > { %v15034_v31 = vadd.f32 %v10687_v41, %v4301_v63  ;;  %v10650_v27 = vadd.f32 %v10649_v53, %v10648_v7  ;;  %v10691_v30 = vpop.f32.mrf.mxu1  ;;  %v10060_v41 = vcombine.low %v15061_v54, %v14905_v6  ;;  %v7820_v11 = vsel %vm15586_vm14, %v7815_v18, %v7819_v47  ;;  %8017 = vmatprep.mubr.bf16.mxu1 %v7832_v2  ;;  %v15112_v2 = vld [vmem:[%s14262_s13 + $0x50] sm:$0x11]  ;;  %vm15590_vm4 = vmmov %vm15588_vm2 }
 0x1d7   : > { %v10651_v56 = vpop.f32.mrf.mxu0  ;;  %v10002_v53 = vcombine.low %v15019_v48, %v15051_v15  ;;  %v7835_v39 = vor.u32 %v7833_v17, %v7819_v47  ;;  %v10064_v5 = vcombine.low %v15112_v2, %v15112_v2  ;;  %vm15596_vm12 = vmmov %vm15588_vm2 }
 0x1d8   : > { %v4302_v49 = vadd.f32 %v10650_v27, %v14856_v40  ;;  %v10061_v40 = vcombine.high %v15061_v54, %v14905_v6  ;;  %v10692_v36 = vpop.f32.mrf.mxu1  ;;  %v7837_v63 = vshll.u32 %v10060_v41, 16  ;;  %v15083_v27 = vld [vmem:[%s14262_s13 + $0x48] sm:$0xff]  ;;  %v7849_v48 = vshrl.u32 %v10060_v41, 16  ;;  %vm15597_vm7 = vmmov %vm15588_vm2 }
 0x1d9   : > { %v10652_v23 = vpop.f32.mrf.mxu0  ;;  %v10693_v58 = vadd.f32 %v10692_v36, %v10691_v30  ;;  %8018 = vmatmul.mubr.bf16.vlgmr.msra.gmra.mxu1 %v7820_v11  ;;  %v15087_v42 = vcombine.high %v14729_v14, %v15083_v27  ;;  %v7869_v38 = vshll.u32 %v10064_v5, 16 }
 0x1da   : > { %v15067_v35 = vadd.f32 %v10690_v62, %v4302_v49  ;;  %v10653_v61 = vadd.f32 %v10652_v23, %v10651_v56  ;;  %7690 = vmatmul.mubr.bf16.vlgmr.msra.gmra.mxu0 %v10000_v55  ;;  %v7845_v25 = vshll.u32 %v10061_v40, 16  ;;  %v10694_v16 = vpop.f32.mrf.mxu1  ;;  %v7857_v62 = vshrl.u32 %v10061_v40, 16  ;;  %11231 = vmatpush3.bf16.msra.mxu1 %v11785_v37 }
 0x1db   : > { %v10654_v7 = vpop.f32.mrf.mxu0  ;;  %11184 = vmatpush3.bf16.msra.mxu0 %v11785_v37  ;;  %v7839_v18 = vrot.slane %v7837_v63, 1  ;;  %11224 = vmatprep.subr.bf16.mxu1 %v11786_v34  ;;  %v7861_v37 = vshll.u32 %v15087_v42, 16  ;;  %v15126_v63 = vsel %vm1204_vm1, %v14768_v43, 0  ;;  %vm15591_vm1 = vcmp.ne.s16.totalorder %v12406_v9, 0 }
 0x1dc   : > { %v4303_v0 = vadd.f32 %v10653_v61, %v14876_v20  ;;  %11185 = vmatprep.subr.bf16.mxu0 %v11786_v34  ;;  %v7847_v32 = vrot.slane %v7845_v25, 1  ;;  %v15091_v20 = vcombine.low %v14729_v14, %v15083_v27  ;;  %v10695_v56 = vpop.f32.mrf.mxu1  ;;  %7697 = vmatprep.mubr.bf16.mxu0 %v10003_v33  ;;  %v11791_v34 = vld [vmem:[%s15456_s3 + $0xd28] sm:$0xff]   ;;  %v11792_v61 = vld [vmem:[%s15456_s3 + $0xd60] sm:$0xff]   ;;  %v15117_v33 = vsel %vm15589_vm8, %v14729_v14, 0 }
 0x1dd   : > { %v10655_v29 = vpop.f32.mrf.mxu0  ;;  %v10696_v26 = vadd.f32 %v10695_v56, %v10694_v16  ;;  %v7840_v24 = vsel %vm15588_vm2, %v7835_v39, %v7839_v18  ;;  %v7863_v36 = vrot.slane %v7861_v37, 1  ;;  %v10065_v14 = vcombine.high %v15112_v2, %v15112_v2  ;;  %v8058_v56 = vld [vmem:[%s14262_s13 + $0x10] sm:$0xee] }
 0x1de   : > { %v15093_v55 = vadd.f32 %v10693_v58, %v4303_v0  ;;  %v10656_v15 = vadd.f32 %v10655_v29, %v10654_v7  ;;  %v7848_v30 = vsel %vm15587_vm5, %v7843_v52, %v7847_v32  ;;  %v7859_v47 = vor.u32 %v7857_v62, %v7847_v32  ;;  %11232 = vmatpush3.bf16.msra.mxu1 %v11787_v44  ;;  %v11793_v58 = vld [vmem:[%s15456_s3 + $0xd20] sm:$0xff]   ;;  %v11796_v29 = vld [vmem:[%s15456_s3 + $0xd58] sm:$0xff]  }
 0x1df   : > { %v10657_v49 = vpop.f32.mrf.mxu0  ;;  %11186 = vmatpush3.bf16.msra.mxu0 %v11787_v44  ;;  %8025 = vmatprep.mubr.bf16.mxu1 %v7848_v30  ;;  %v7853_v17 = vshll.u32 %v15091_v20, 16  ;;  %v10697_v40 = vpop.f32.mrf.mxu1  ;;  %v7851_v52 = vor.u32 %v7849_v48, %v7839_v18  ;;  %v15143_v62 = vsel %vm15591_vm1, %v15014_v10, 0  ;;  %v7877_v32 = vshll.u32 %v10065_v14, 16  ;;  %v11797_v30 = vld [vmem:[%s15456_s3 + $0xd18] sm:$0xff]  }
 0x1e0   : > { %v4304_v23 = vadd.f32 %v10656_v15, %v14896_v1  ;;  %11187 = vmatprep.subr.bf16.mxu0 %v11790_v3  ;;  %11225 = vmatprep.subr.bf16.mxu1 %v11790_v3  ;;  %v10005_v1 = vcombine.high %v15032_v12, %v15099_v19  ;;  %v7864_v0 = vsel %vm15590_vm4, %v7859_v47, %v7863_v36  ;;  %v7873_v3 = vshrl.u32 %v15087_v42, 16 }
 0x1e1   : > { %v10658_v41 = vpop.f32.mrf.mxu0  ;;  %v10698_v44 = vpop.f32.mrf.mxu1  ;;  %v15129_v51 = vrot.slane %v7853_v17, 1  ;;  %8026 = vmatmul.mubr.bf16.gmra.mxu1 %v7840_v24  ;;  %v15153_v42 = vsel %vm12351_vm3, %v15083_v27, 0  ;;  %v15161_v48 = vsel %vm1206_vm10, %v14839_v50, 0  ;;  %v7865_v47 = vshrl.u32 %v15091_v20, 16 }
 0x1e2   : > { %v10659_v11 = vadd.f32 %v10658_v41, %v10657_v49  ;;  %v15121_v7 = vadd.f32 %v10696_v26, %v4304_v23  ;;  %7698 = vmatmul.mubr.bf16.gmra.mxu0 %v10002_v53  ;;  %v10699_v16 = vadd.f32 %v10698_v44, %v10697_v40  ;;  %11233 = vmatpush3.bf16.msra.mxu1 %v11791_v34  ;;  %v15172_v50 = vsel %vm12415_vm0, %v8058_v56, 0  ;;  %v11802_v44 = vld [vmem:[%s15456_s3 + $0xd48] sm:$0xff]  }
 0x1e3   : > { %v10660_v25 = vpop.f32.mrf.mxu0  ;;  %11188 = vmatpush3.bf16.msra.mxu0 %v11791_v34  ;;  %v10700_v53 = vpop.f32.mrf.mxu1  ;;  %11226 = vmatprep.subr.bf16.mxu1 %v11792_v61  ;;  %v7856_v15 = vsel %vm15592_vm6, %v7851_v52, %v15129_v51  ;;  %vm15593_vm3 = vcmp.ne.s16.totalorder %v12483_v45, 0  ;;  %vm15594_vm10 = vcmp.ne.s16.totalorder %v12495_v57, 0  ;;  %vm15595_vm0 = vcmp.ne.s16.totalorder %v12540_v4, 0  ;;  %v11799_v4 = vld [vmem:[%s15456_s3 + $0xd10] sm:$0xff]  }
 0x1e4   : > { %v4305_v43 = vadd.f32 %v10659_v11, %v14938_v21  ;;  %11189 = vmatprep.subr.bf16.mxu0 %v11792_v61  ;;  %v10004_v21 = vcombine.low %v15032_v12, %v15099_v19  ;;  %7705 = vmatprep.mubr.bf16.mxu0 %v10005_v1  ;;  %v7875_v12 = vor.u32 %v7873_v3, %v7863_v36  ;;  %v7879_v19 = vrot.slane %v7877_v32, 1 }
 0x1e5   : > { %v10661_v39 = vpop.f32.mrf.mxu0  ;;  %v10701_v10 = vpop.f32.mrf.mxu1  ;;  %8033 = vmatprep.mubr.bf16.mxu1 %v7864_v0  ;;  %v15182_v17 = vsel %vm15593_vm3, %v15061_v54, 0  ;;  %v15187_v59 = vsel %vm15594_vm10, %v14905_v6, 0  ;;  %v15192_v20 = vsel %vm15595_vm0, %v15083_v27, 0  ;;  %v10007_v40 = vcombine.high %v15039_v8, %v15153_v42 }
 0x1e6   : > { %v10662_v18 = vadd.f32 %v10661_v39, %v10660_v25  ;;  %v15155_v9 = vadd.f32 %v10699_v16, %v4305_v43  ;;  %v10702_v49 = vadd.f32 %v10701_v10, %v10700_v53  ;;  %11234 = vmatpush3.bf16.msra.mxu1 %v11793_v58  ;;  %v10117_v45 = vcombine.high %v15143_v62, %v15161_v48 }
 0x1e7   : > { %v10719_v22 = vpop.f32.mrf.mxu0  ;;  %11190 = vmatpush3.bf16.msra.mxu0 %v11793_v58  ;;  %v10759_v37 = vpop.f32.mrf.mxu1  ;;  %11227 = vmatprep.subr.bf16.mxu1 %v11796_v29  ;;  %v10115_v57 = vcombine.high %v15172_v50, %v15126_v63  ;;  %v7880_v27 = vsel %vm15596_vm12, %v7875_v12, %v7879_v19  ;;  %v10119_v61 = vcombine.high %v15182_v17, %v15187_v59  ;;  %v7871_v52 = vrot.slane %v7869_v38, 1 }
 0x1e8   : > { %v4306_v26 = vadd.f32 %v10662_v18, %v14962_v28  ;;  %11191 = vmatprep.subr.bf16.mxu0 %v11796_v29  ;;  %v11798_v28 = vld [vmem:[%s15456_s3 + $0xd50] sm:$0xff]   ;;  %v10121_v36 = vcombine.high %v15117_v33, %v15192_v20  ;;  %v7867_v1 = vor.u32 %v7865_v47, %v15129_v51  ;;  %v10006_v14 = vcombine.low %v15039_v8, %v15153_v42  ;;  %v11803_v8 = vld [vmem:[%s15456_s3 + $0xd08] sm:$0xff]  }
 0x1e9   : > { %v10720_v23 = vpop.f32.mrf.mxu0  ;;  %v10760_v54 = vpop.f32.mrf.mxu1  ;;  %8034 = vmatmul.mubr.bf16.gmra.mxu1 %v7856_v15  ;;  %v10116_v3 = vcombine.low %v15143_v62, %v15161_v48  ;;  %v8142_v58 = vrot.slane %v10117_v45, 1  ;;  %v8141_v51 = vrot.slane %v10115_v57, 1  ;;  %v10114_v62 = vcombine.low %v15172_v50, %v15126_v63 }
 0x1ea   : > { %v15177_v34 = vadd.f32 %v10702_v49, %v4306_v26  ;;  %7706 = vmatmul.mubr.bf16.gmra.mxu0 %v10004_v21  ;;  %v10721_v6 = vadd.f32 %v10720_v23, %v10719_v22  ;;  %v10761_v41 = vadd.f32 %v10760_v54, %v10759_v37  ;;  %11235 = vmatpush3.bf16.msra.mxu1 %v11797_v30  ;;  %v8146_v29 = vrot.slane %v10119_v61, 1 }
 0x1eb   : > { %v10722_v24 = vpop.f32.mrf.mxu0  ;;  %11192 = vmatpush3.bf16.msra.mxu0 %v11797_v30  ;;  %v10762_v11 = vpop.f32.mrf.mxu1  ;;  %11228 = vmatprep.subr.bf16.mxu1 %v11798_v28  ;;  %v8150_v32 = vrot.slane %v10121_v36, 1  ;;  %v7872_v42 = vsel %vm15597_vm7, %v7867_v1, %v7871_v52  ;;  %v10120_v10 = vcombine.low %v15117_v33, %v15192_v20  ;;  %v8143_v12 = vsel %vm1291_vm11, %v8141_v51, %v8142_v58  ;;  %v11805_v33 = vld [vmem:[%s15456_s3 + $0xd00] sm:$0xff]  }
 0x1ec   : > { %11193 = vmatprep.subr.bf16.mxu0 %v11798_v28  ;;  %v4902_v25 = vadd.f32 %v10721_v6, %v14981_v13  ;;  %7713 = vmatprep.mubr.bf16.mxu0 %v10007_v40  ;;  %v15222_v13 = vsel %vm1211_vm15, %v15112_v2, 0  ;;  %v10118_v2 = vcombine.low %v15182_v17, %v15187_v59  ;;  %v8138_v22 = vrot.slane %v10114_v62, 1 }
 0x1ed   : > { %v10723_v0 = vpop.f32.mrf.mxu0  ;;  %v10763_v43 = vpop.f32.mrf.mxu1  ;;  %8041 = vmatprep.mubr.bf16.mxu1 %v7880_v27  ;;  %v8139_v30 = vrot.slane %v10116_v3, 1  ;;  %v8151_v19 = vsel %vm1291_vm11, %v8146_v29, %v8150_v32  ;;  %v8148_v37 = vrot.slane %v10120_v10, 1 }
 0x1ee   : > { %v10724_v5 = vadd.f32 %v10723_v0, %v10722_v24  ;;  %v15217_v16 = vadd.f32 %v10761_v41, %v4902_v25  ;;  %v10764_v53 = vadd.f32 %v10763_v43, %v10762_v11  ;;  %11236 = vmatpush3.bf16.msra.mxu1 %v11799_v4  ;;  %v8144_v50 = vrot.slane %v10118_v2, 1 }
 0x1ef   : > { %v10725_v39 = vpop.f32.mrf.mxu0  ;;  %11194 = vmatpush3.bf16.msra.mxu0 %v11799_v4  ;;  %v10765_v21 = vpop.f32.mrf.mxu1  ;;  %11229 = vmatprep.subr.bf16.mxu1 %v11802_v44  ;;  %v8140_v54 = vsel %vm1291_vm11, %v8138_v22, %v8139_v30  ;;  %v8147_v41 = vsel %vm1291_vm11, %v8142_v58, %v8146_v29  ;;  %v10122_v24 = vcombine.low %v15222_v13, %v15222_v13 }
 0x1f0   : > { %v4903_v18 = vadd.f32 %v10724_v5, %v15005_v60  ;;  %11195 = vmatprep.subr.bf16.mxu0 %v11802_v44  ;;  %v10123_v60 = vcombine.high %v15222_v13, %v15222_v13  ;;  %v8149_v6 = vsel %vm1291_vm11, %v8144_v50, %v8148_v37  ;;  %v8145_v51 = vsel %vm1291_vm11, %v8139_v30, %v8144_v50 }
 0x1f1   : > { %v10726_v63 = vpop.f32.mrf.mxu0  ;;  %v10766_v15 = vpop.f32.mrf.mxu1  ;;  %8042 = vmatmul.mubr.bf16.gmra.mxu1 %v7872_v42  ;;  %v8152_v25 = vrot.slane %v10122_v24, 1 }
 0x1f2   : > { %v15238_v56 = vadd.f32 %v10764_v53, %v4903_v18  ;;  %v10727_v48 = vadd.f32 %v10726_v63, %v10725_v39  ;;  %7714 = vmatmul.mubr.bf16.gmra.mxu0 %v10006_v14  ;;  %v10767_v26 = vadd.f32 %v10766_v15, %v10765_v21  ;;  %11237 = vmatpush3.bf16.msra.mxu1 %v11803_v8  ;;  %v8154_v17 = vrot.slane %v10123_v60, 1 }
 0x1f3   : > { %v10728_v49 = vpop.f32.mrf.mxu0  ;;  %11196 = vmatpush3.bf16.msra.mxu0 %v11803_v8  ;;  %v10768_v38 = vpop.f32.mrf.mxu1  ;;  %11230 = vmatprep.subr.bf16.mxu1 %v11804_v46  ;;  %v8153_v39 = vsel %vm1291_vm11, %v8148_v37, %v8152_v25 }
 0x1f4   : > { %v4904_v47 = vadd.f32 %v10727_v48, %v15034_v31  ;;  %11197 = vmatprep.subr.bf16.mxu0 %v11804_v46  ;;  %8292 = vmatprep.mubr.bf16.mxu0 %v8143_v12  ;;  %v8155_v27 = vsel %vm1291_vm11, %v8150_v32, %v8154_v17 }
 0x1f5   : > { %v10729_v28 = vpop.f32.mrf.mxu0  ;;  %v10769_v23 = vpop.f32.mrf.mxu1  ;;  %8308 = vmatprep.mubr.bf16.mxu1 %v8151_v19 }
 0x1f6   : > { %v15248_v59 = vadd.f32 %v10767_v26, %v4904_v47  ;;  %v10730_v20 = vadd.f32 %v10729_v28, %v10728_v49  ;;  %v10770_v40 = vadd.f32 %v10769_v23, %v10768_v38  ;;  %11238 = vmatpush3.bf16.msra.mxu1 %v11805_v33 }
 0x1f7   : > { %v10731_v45 = vpop.f32.mrf.mxu0  ;;  %11198 = vmatpush3.bf16.msra.mxu0 %v11805_v33  ;;  %v10771_v57 = vpop.f32.mrf.mxu1 }
 0x1f8   : > { %v4905_v31 = vadd.f32 %v10730_v20, %v15067_v35 }
 0x1f9   : > { %v10732_v4 = vpop.f32.mrf.mxu0  ;;  %v10772_v11 = vpop.f32.mrf.mxu1  ;;  %8309 = vmatmul.mubr.bf16.vlgmr.msra.gmra.mxu1 %v8149_v6 }
 0x1fa   : > { %v15257_v61 = vadd.f32 %v10770_v40, %v4905_v31  ;;  %v10733_v36 = vadd.f32 %v10732_v4, %v10731_v45  ;;  %8293 = vmatmul.mubr.bf16.vlgmr.msra.gmra.mxu0 %v8140_v54  ;;  %v10773_v1 = vadd.f32 %v10772_v11, %v10771_v57  ;;  %8316 = vmatprep.mubr.bf16.mxu1 %v8155_v27 }
 0x1fb   : > { %v10734_v52 = vpop.f32.mrf.mxu0  ;;  %8300 = vmatprep.mubr.bf16.mxu0 %v8147_v41  ;;  %v10774_v44 = vpop.f32.mrf.mxu1 }
 0x1fc   : > { %v4906_v35 = vadd.f32 %v10733_v36, %v15093_v55 }
 0x1fd   : > { %v10735_v0 = vpop.f32.mrf.mxu0  ;;  %v10775_v58 = vpop.f32.mrf.mxu1 }
 0x1fe   : > { %v15260_v14 = vadd.f32 %v10773_v1, %v4906_v35  ;;  %v10736_v3 = vadd.f32 %v10735_v0, %v10734_v52  ;;  %v10776_v5 = vadd.f32 %v10775_v58, %v10774_v44 }
 0x1ff   : > { %v10737_v43 = vpop.f32.mrf.mxu0  ;;  %v10777_v13 = vpop.f32.mrf.mxu1 }
 0x200   : > { %v4907_v53 = vadd.f32 %v10736_v3, %v15121_v7 }
 0x201   : > { %v10738_v8 = vpop.f32.mrf.mxu0  ;;  %v10778_v29 = vpop.f32.mrf.mxu1  ;;  %8317 = vmatmul.mubr.bf16.gmra.mxu1 %v8153_v39 }
 0x202   : > { %v15265_v62 = vadd.f32 %v10776_v5, %v4907_v53  ;;  %v10739_v55 = vadd.f32 %v10738_v8, %v10737_v43  ;;  %8301 = vmatmul.mubr.bf16.gmra.mxu0 %v8145_v51  ;;  %v10779_v32 = vadd.f32 %v10778_v29, %v10777_v13 }
 0x203   : > { %v10740_v18 = vpop.f32.mrf.mxu0  ;;  %v10780_v42 = vpop.f32.mrf.mxu1 }
 0x204   : > { %v4908_v21 = vadd.f32 %v10739_v55, %v15155_v9 }
 0x205   : > { %v10741_v46 = vpop.f32.mrf.mxu0  ;;  %v10781_v63 = vpop.f32.mrf.mxu1 }
 0x206   : > { %v5159_v2 = vadd.f32 %v10779_v32, %v4908_v21  ;;  %v10742_v10 = vadd.f32 %v10741_v46, %v10740_v18  ;;  %v10782_v7 = vadd.f32 %v10781_v63, %v10780_v42 }
 0x207   : > { %v10799_v15 = vpop.f32.mrf.mxu0 }
 0x208   : > { %v4909_v60 = vadd.f32 %v10742_v10, %v15177_v34  ;;  %v10839_v12 = vpop.f32.mrf.mxu1 }
 0x209   : > { %v10800_v26 = vpop.f32.mrf.mxu0 }
 0x20a   : > { %v15269_v48 = vadd.f32 %v10782_v7, %v4909_v60  ;;  %v10840_v49 = vpop.f32.mrf.mxu1  ;;  %v10801_v33 = vadd.f32 %v10800_v26, %v10799_v15 }
 0x20b   : > { %v10841_v22 = vadd.f32 %v10840_v49, %v10839_v12  ;;  %v10802_v30 = vpop.f32.mrf.mxu0 }
 0x20c   : > { %v10842_v19 = vpop.f32.mrf.mxu1  ;;  %v5481_v9 = vadd.f32 %v10801_v33, %v15217_v16 }
 0x20d   : > { %v10803_v47 = vpop.f32.mrf.mxu0 }
 0x20e   : > { %v10843_v38 = vpop.f32.mrf.mxu1  ;;  %v5756_v50 = vadd.f32 %v10841_v22, %v5481_v9  ;;  %v10804_v37 = vadd.f32 %v10803_v47, %v10802_v30 }
 0x20f   : > { %v10844_v28 = vadd.f32 %v10843_v38, %v10842_v19 }
 0x210   : > { %v5482_v17 = vadd.f32 %v10804_v37, %v15238_v56  ;;  %v10845_v34 = vpop.f32.mrf.mxu1  ;;  %v10805_v20 = vpop.f32.mrf.mxu0 }
 0x212   : > { %v5757_v23 = vadd.f32 %v10844_v28, %v5482_v17  ;;  %v10846_v40 = vpop.f32.mrf.mxu1  ;;  %v10806_v45 = vpop.f32.mrf.mxu0 }
 0x213   : > { %v10847_v54 = vadd.f32 %v10846_v40, %v10845_v34  ;;  %v10807_v31 = vadd.f32 %v10806_v45, %v10805_v20 }
 0x214   : > { %v10848_v57 = vpop.f32.mrf.mxu1  ;;  %v10808_v6 = vpop.f32.mrf.mxu0 }
 0x215   : > { %v5483_v41 = vadd.f32 %v10807_v31, %v15248_v59 }
 0x216   : > { %v10849_v24 = vpop.f32.mrf.mxu1  ;;  %v10809_v16 = vpop.f32.mrf.mxu0 }
 0x217   : > { %v10850_v4 = vadd.f32 %v10849_v24, %v10848_v57  ;;  %v5758_v27 = vadd.f32 %v10847_v54, %v5483_v41  ;;  %v10810_v36 = vadd.f32 %v10809_v16, %v10808_v6 }
 0x218   : > { %v10851_v11 = vpop.f32.mrf.mxu1  ;;  %v10811_v1 = vpop.f32.mrf.mxu0 }
 0x219   : > { %v5484_v56 = vadd.f32 %v10810_v36, %v15257_v61 }
 0x21a   : > { %v10852_v52 = vpop.f32.mrf.mxu1  ;;  %v10812_v35 = vpop.f32.mrf.mxu0 }
 0x21b   : > { %v10853_v44 = vadd.f32 %v10852_v52, %v10851_v11  ;;  %v5759_v25 = vadd.f32 %v10850_v4, %v5484_v56  ;;  %v10813_v0 = vadd.f32 %v10812_v35, %v10811_v1 }
 0x21c   : > { %v10854_v3 = vpop.f32.mrf.mxu1  ;;  %v10814_v58 = vpop.f32.mrf.mxu0 }
 0x21d   : > { %v5485_v5 = vadd.f32 %v10813_v0, %v15260_v14 }
 0x21e   : > { %v10855_v43 = vpop.f32.mrf.mxu1  ;;  %v10815_v59 = vpop.f32.mrf.mxu0 }
 0x21f   : > { %v10856_v51 = vadd.f32 %v10855_v43, %v10854_v3  ;;  %v5760_v53 = vadd.f32 %v10853_v44, %v5485_v5  ;;  %v10816_v13 = vadd.f32 %v10815_v59, %v10814_v58 }
 0x220   : > { %v10857_v39 = vpop.f32.mrf.mxu1 }
 0x221   : > { %v5486_v8 = vadd.f32 %v10816_v13, %v15265_v62  ;;  %v10817_v55 = vpop.f32.mrf.mxu0 }
 0x222   : > { %v10858_v29 = vpop.f32.mrf.mxu1 }
 0x223   : > { %v5761_v61 = vadd.f32 %v10856_v51, %v5486_v8  ;;  %v10818_v32 = vpop.f32.mrf.mxu0  ;;  %v10859_v18 = vadd.f32 %v10858_v29, %v10857_v39 }
 0x224   : > { %v10819_v21 = vadd.f32 %v10818_v32, %v10817_v55  ;;  %v10860_v42 = vpop.f32.mrf.mxu1 }
 0x225   : > { %v10820_v46 = vpop.f32.mrf.mxu0 }
 0x226   : > { %v5487_v10 = vadd.f32 %v10819_v21, %v5159_v2  ;;  %v10861_v63 = vpop.f32.mrf.mxu1 }
 0x227   : > { %v10821_v7 = vpop.f32.mrf.mxu0  ;;  %v10862_v14 = vadd.f32 %v10861_v63, %v10860_v42 }
 0x228   : > { %v5762_v60 = vadd.f32 %v10859_v18, %v5487_v10  ;;  %v10822_v15 = vadd.f32 %v10821_v7, %v10820_v46 }
 0x229   : > { %v10879_v12 = vpop.f32.mrf.mxu0 }
 0x22a   : > { %v5488_v26 = vadd.f32 %v10822_v15, %v15269_v48 }
 0x22b   : > { %v10880_v49 = vpop.f32.mrf.mxu0  ;;  %v10919_v22 = vpop.f32.mrf.mxu1 }
 0x22c   : > { %v5763_v33 = vadd.f32 %v10862_v14, %v5488_v26  ;;  %v10881_v62 = vadd.f32 %v10880_v49, %v10879_v12 }
 0x22d   : > { %v10882_v30 = vpop.f32.mrf.mxu0  ;;  %v10920_v9 = vpop.f32.mrf.mxu1 }
 0x22e   : > { %v6014_v19 = vadd.f32 %v10881_v62, %v5756_v50  ;;  %v10921_v38 = vadd.f32 %v10920_v9, %v10919_v22 }
 0x22f   : > { %v10883_v47 = vpop.f32.mrf.mxu0  ;;  %v10922_v28 = vpop.f32.mrf.mxu1 }
 0x230   : > { %v10884_v37 = vadd.f32 %v10883_v47, %v10882_v30  ;;  %v6342_v17 = vadd.f32 %v10921_v38, %v6014_v19 }
 0x231   : > { %v10885_v2 = vpop.f32.mrf.mxu0  ;;  %v10923_v20 = vpop.f32.mrf.mxu1 }
 0x232   : > { %v6015_v34 = vadd.f32 %v10884_v37, %v5757_v23  ;;  %v10924_v45 = vadd.f32 %v10923_v20, %v10922_v28 }
 0x233   : > { %v10886_v40 = vpop.f32.mrf.mxu0 }
 0x234   : > { %v10887_v54 = vadd.f32 %v10886_v40, %v10885_v2  ;;  %v10925_v31 = vpop.f32.mrf.mxu1  ;;  %v6343_v57 = vadd.f32 %v10924_v45, %v6015_v34 }
 0x235   : > { %v10888_v48 = vpop.f32.mrf.mxu0 }
 0x236   : > { %v6016_v6 = vadd.f32 %v10887_v54, %v5758_v27  ;;  %v10926_v41 = vpop.f32.mrf.mxu1 }
 0x237   : > { %v10889_v24 = vpop.f32.mrf.mxu0  ;;  %v10927_v16 = vadd.f32 %v10926_v41, %v10925_v31 }
 0x238   : > { %v10890_v50 = vadd.f32 %v10889_v24, %v10888_v48  ;;  %v10928_v4 = vpop.f32.mrf.mxu1 }
 0x239   : > { %v10891_v36 = vpop.f32.mrf.mxu0  ;;  %v6344_v11 = vadd.f32 %v10927_v16, %v6016_v6 }
 0x23a   : > { %v6017_v1 = vadd.f32 %v10890_v50, %v5759_v25  ;;  %v10929_v56 = vpop.f32.mrf.mxu1 }
 0x23b   : > { %v10892_v52 = vpop.f32.mrf.mxu0  ;;  %v10930_v35 = vadd.f32 %v10929_v56, %v10928_v4 }
 0x23c   : > { %v10893_v23 = vadd.f32 %v10892_v52, %v10891_v36  ;;  %v10931_v3 = vpop.f32.mrf.mxu1 }
 0x23d   : > { %v10894_v44 = vpop.f32.mrf.mxu0  ;;  %v6345_v0 = vadd.f32 %v10930_v35, %v6017_v1 }
 0x23e   : > { %v6018_v58 = vadd.f32 %v10893_v23, %v5760_v53  ;;  %v10932_v43 = vpop.f32.mrf.mxu1 }
 0x23f   : > { %v10895_v5 = vpop.f32.mrf.mxu0  ;;  %v10933_v27 = vadd.f32 %v10932_v43, %v10931_v3 }
 0x240   : > { %v10896_v59 = vadd.f32 %v10895_v5, %v10894_v44  ;;  %v10934_v13 = vpop.f32.mrf.mxu1 }
 0x241   : > { %v10897_v51 = vpop.f32.mrf.mxu0  ;;  %v6346_v8 = vadd.f32 %v10933_v27, %v6018_v58 }
 0x242   : > { %v6019_v39 = vadd.f32 %v10896_v59, %v5761_v61  ;;  %v10935_v29 = vpop.f32.mrf.mxu1 }
 0x243   : > { %v10898_v55 = vpop.f32.mrf.mxu0  ;;  %v10936_v25 = vadd.f32 %v10935_v29, %v10934_v13 }
 0x244   : > { %v10899_v32 = vadd.f32 %v10898_v55, %v10897_v51  ;;  %v10937_v46 = vpop.f32.mrf.mxu1 }
 0x245   : > { %v10900_v18 = vpop.f32.mrf.mxu0  ;;  %v6347_v42 = vadd.f32 %v10936_v25, %v6019_v39 }
 0x246   : > { %v6020_v21 = vadd.f32 %v10899_v32, %v5762_v60  ;;  %v10938_v7 = vpop.f32.mrf.mxu1 }
 0x247   : > { %v10901_v10 = vpop.f32.mrf.mxu0  ;;  %v10939_v53 = vadd.f32 %v10938_v7, %v10937_v46 }
 0x248   : > { %v10902_v63 = vadd.f32 %v10901_v10, %v10900_v18  ;;  %v10940_v15 = vpop.f32.mrf.mxu1 }
 0x249   : > { %v6348_v12 = vadd.f32 %v10939_v53, %v6020_v21 }
 0x24a   : > { %v6021_v14 = vadd.f32 %v10902_v63, %v5763_v33  ;;  %v10941_v26 = vpop.f32.mrf.mxu1  ;;  %v10959_v62 = vpop.f32.mrf.mxu0 }
 0x24b   : > { %v10942_v49 = vadd.f32 %v10941_v26, %v10940_v15 }
 0x24c   : > { %v10999_v61 = vpop.f32.mrf.mxu1  ;;  %v10960_v30 = vpop.f32.mrf.mxu0 }
 0x24d   : > { %v6349_v22 = vadd.f32 %v10942_v49, %v6021_v14  ;;  %v10961_v19 = vadd.f32 %v10960_v30, %v10959_v62 }
 0x24e   : > { %v11000_v9 = vpop.f32.mrf.mxu1  ;;  %v10962_v38 = vpop.f32.mrf.mxu0 }
 0x24f   : > { %v11001_v47 = vadd.f32 %v11000_v9, %v10999_v61  ;;  %v6617_v60 = vadd.f32 %v10961_v19, %v6342_v17 }
 0x250   : > { %v11002_v37 = vpop.f32.mrf.mxu1  ;;  %v10963_v28 = vpop.f32.mrf.mxu0 }
 0x251   : > { %v15278_v2 = vadd.f32 %v11001_v47, %v6617_v60  ;;  %v10964_v34 = vadd.f32 %v10963_v28, %v10962_v38 }
 0x252   : > { %v11003_v20 = vpop.f32.mrf.mxu1  ;;  %v10965_v40 = vpop.f32.mrf.mxu0 }
 0x253   : > { %v11004_v33 = vadd.f32 %v11003_v20, %v11002_v37  ;;  %v6618_v45 = vadd.f32 %v10964_v34, %v6343_v57 }
 0x254   : > { %v11005_v54 = vpop.f32.mrf.mxu1  ;;  %v10966_v31 = vpop.f32.mrf.mxu0 }
 0x255   : > { %v15280_v48 = vadd.f32 %v11004_v33, %v6618_v45  ;;  %v10967_v6 = vadd.f32 %v10966_v31, %v10965_v40 }
 0x256   : > { %v11006_v41 = vpop.f32.mrf.mxu1  ;;  %v10968_v16 = vpop.f32.mrf.mxu0 }
 0x257   : > { %v11007_v24 = vadd.f32 %v11006_v41, %v11005_v54  ;;  %v6619_v50 = vadd.f32 %v10967_v6, %v6344_v11 }
 0x258   : > { %v11008_v4 = vpop.f32.mrf.mxu1  ;;  %v10969_v17 = vpop.f32.mrf.mxu0 }
 0x259   : > { %v15282_v36 = vadd.f32 %v11007_v24, %v6619_v50  ;;  %v10970_v1 = vadd.f32 %v10969_v17, %v10968_v16 }
 0x25a   : > { %v11009_v56 = vpop.f32.mrf.mxu1  ;;  %v10971_v35 = vpop.f32.mrf.mxu0 }
 0x25b   : > { %v11010_v52 = vadd.f32 %v11009_v56, %v11008_v4  ;;  %v6620_v23 = vadd.f32 %v10970_v1, %v6345_v0 }
 0x25c   : > { %v11011_v44 = vpop.f32.mrf.mxu1  ;;  %v10972_v57 = vpop.f32.mrf.mxu0 }
 0x25d   : > { %v15284_v3 = vadd.f32 %v11010_v52, %v6620_v23  ;;  %v10973_v58 = vadd.f32 %v10972_v57, %v10971_v35 }
 0x25e   : > { %v11012_v5 = vpop.f32.mrf.mxu1  ;;  %v10974_v59 = vpop.f32.mrf.mxu0 }
 0x25f   : > { %v11013_v43 = vadd.f32 %v11012_v5, %v11011_v44  ;;  %v6621_v27 = vadd.f32 %v10973_v58, %v6346_v8 }
 0x260   : > { %v11014_v51 = vpop.f32.mrf.mxu1  ;;  %v10975_v11 = vpop.f32.mrf.mxu0 }
 0x261   : > { %v15286_v13 = vadd.f32 %v11013_v43, %v6621_v27  ;;  %v10976_v39 = vadd.f32 %v10975_v11, %v10974_v59 }
 0x262   : > { %v11015_v55 = vpop.f32.mrf.mxu1  ;;  %v10977_v32 = vpop.f32.mrf.mxu0 }
 0x263   : > { %v11016_v29 = vadd.f32 %v11015_v55, %v11014_v51  ;;  %v6622_v25 = vadd.f32 %v10976_v39, %v6347_v42 }
 0x264   : > { %v11017_v18 = vpop.f32.mrf.mxu1  ;;  %v10978_v0 = vpop.f32.mrf.mxu0 }
 0x265   : > { %v15288_v21 = vadd.f32 %v11016_v29, %v6622_v25  ;;  %v10979_v46 = vadd.f32 %v10978_v0, %v10977_v32 }
 0x266   : > { %v11018_v10 = vpop.f32.mrf.mxu1  ;;  %v10980_v7 = vpop.f32.mrf.mxu0 }
 0x267   : > { %v11019_v63 = vadd.f32 %v11018_v10, %v11017_v18  ;;  %v6623_v53 = vadd.f32 %v10979_v46, %v6348_v12 }
 0x268   : > { %v11020_v14 = vpop.f32.mrf.mxu1  ;;  %v10981_v8 = vpop.f32.mrf.mxu0 }
 0x269   : > { %v15290_v15 = vadd.f32 %v11019_v63, %v6623_v53  ;;  %v10982_v26 = vadd.f32 %v10981_v8, %v10980_v7 }
 0x26a   : > { %v11021_v49 = vpop.f32.mrf.mxu1 }
 0x26b   : > { %v11022_v62 = vadd.f32 %v11021_v49, %v11020_v14  ;;  %v6624_v61 = vadd.f32 %v10982_v26, %v6349_v22 }
 0x26c   : > { %v11039_v42 = vpop.f32.mrf.mxu0 }
 0x26d   : > { %v15292_v30 = vadd.f32 %v11022_v62, %v6624_v61  ;;  %v11079_v19 = vpop.f32.mrf.mxu1 }
 0x26e   : > { %v11040_v9 = vpop.f32.mrf.mxu0 }
 0x26f   : > { %15598 = vst [vmem:[#allocation2_spill] sm:$0xff] %v15292_v30  ;;  %v11080_v47 = vpop.f32.mrf.mxu1  ;;  %v11041_v26 = vadd.f32 %v11040_v9, %v11039_v42 }
 0x270   : > { %v11042_v38 = vpop.f32.mrf.mxu0  ;;  %v11081_v30 = vadd.f32 %v11080_v47, %v11079_v19 }
 0x271   : > { %v15294_v60 = vpop.f32.mrf.mxu1 }
 0x272   : > { %v11043_v37 = vpop.f32.mrf.mxu0 }
 0x273   : > { %v15296_v28 = vpop.f32.mrf.mxu1 }
 0x275   : > { %v11045_v34 = vpop.f32.mrf.mxu0 }
 0x276   : > { %v15298_v12 = vpop.f32.mrf.mxu1 }
 0x277   : > { %v11046_v33 = vpop.f32.mrf.mxu0 }
 0x278   : > { %v15300_v20 = vpop.f32.mrf.mxu1 }
 0x279   : > { %v15304_v22 = vpop.f32.mrf.mxu0 }
 0x27a   : > { %v15302_v40 = vpop.f32.mrf.mxu1 }
 0x27b   : > { %v15308_v54 = vpop.f32.mrf.mxu0 }
 0x27c   : > { %v15306_v45 = vpop.f32.mrf.mxu1 }
 0x287   : > { %v11091_v31 = vpop.f32.mrf.mxu1 }
 0x288   : > { %v11051_v6 = vpop.f32.mrf.mxu0 }
 0x289   : > { %v11092_v41 = vpop.f32.mrf.mxu1 }
 0x28a   : > { %v11052_v24 = vpop.f32.mrf.mxu0  ;;  %v11093_v42 = vadd.f32 %v11092_v41, %v11091_v31 }
 0x28b   : > { %v15310_v16 = vpop.f32.mrf.mxu1  ;;  %v11053_v61 = vadd.f32 %v11052_v24, %v11051_v6 }
 0x28c   : > { %v11054_v50 = vpop.f32.mrf.mxu0 }
 0x28d   : > { %v15312_v4 = vpop.f32.mrf.mxu1 }
 0x28e   : > { %v11055_v17 = vpop.f32.mrf.mxu0 }
 0x28f   : > { %v11056_v9 = vadd.f32 %v11055_v17, %v11054_v50 }
 0x291   : > { %v15314_v1 = vpop.f32.mrf.mxu1 }
 0x292   : > { %v11057_v56 = vpop.f32.mrf.mxu0 }
 0x293   : > { %v15316_v52 = vpop.f32.mrf.mxu1 }
 0x294   : > { %v11058_v35 = vpop.f32.mrf.mxu0 }
 0x295   : > { %v15318_v23 = vpop.f32.mrf.mxu1  ;;  %v11059_v31 = vadd.f32 %v11058_v35, %v11057_v56  ;;  %v11099_v35 = vadd.f32 %v15316_v52, %v15314_v1 }
 0x296   : > { %15599 = vst [vmem:[#allocation3_spill] sm:$0xff] %v15318_v23  ;;  %v15320_v44 = vpop.f32.mrf.mxu0  ;;  %v7200_v23 = vadd.f32 %v11053_v61, %v15286_v13  ;;  %v11087_v13 = vadd.f32 %v15300_v20, %v15298_v12  ;;  %v11090_v12 = vadd.f32 %v15306_v45, %v15302_v40 }
 0x297   : > { %v15322_v57 = vpop.f32.mrf.mxu1 }
 0x298   : > { %15600 = vst [vmem:[#allocation4_spill] sm:$0xff] %v15322_v57  ;;  %v15324_v58 = vpop.f32.mrf.mxu0  ;;  %v11047_v57 = vadd.f32 %v11046_v33, %v11045_v34 }
 0x299   : > { %v11159_v43 = vpop.f32.mrf.mxu1 }
 0x29a   : > { %v11119_v5 = vpop.f32.mrf.mxu0  ;;  %v7198_v33 = vadd.f32 %v11047_v57, %v15282_v36 }
 0x29b   : > { %v11160_v27 = vpop.f32.mrf.mxu1 }
 0x29c   : > { %v11120_v59 = vpop.f32.mrf.mxu0  ;;  %v11161_v17 = vadd.f32 %v11160_v27, %v11159_v43 }
 0x29d   : > { %v15326_v11 = vpop.f32.mrf.mxu1  ;;  %v15608_v27 = vld [vmem:[#allocation3_spill] sm:$0xff] }
 0x29e   : > { %v11122_v51 = vpop.f32.mrf.mxu0 }
 0x29f   : > { %v15328_v55 = vpop.f32.mrf.mxu1 }
 0x2a0   : > { %v11123_v39 = vpop.f32.mrf.mxu0  ;;  %v11164_v45 = vadd.f32 %v15328_v55, %v15326_v11 }
 0x2a1   : > { %v15332_v32 = vpop.f32.mrf.mxu1  ;;  %v11124_v41 = vadd.f32 %v11123_v39, %v11122_v51  ;;  %v15609_v51 = vld [vmem:[#allocation4_spill] sm:$0xff] }
 0x2a2   : > { %v15330_v29 = vpop.f32.mrf.mxu0  ;;  %15601 = vst [vmem:[#allocation5_spill] sm:$0xff] %v15332_v32  ;;  %v11044_v32 = vadd.f32 %v11043_v37, %v11042_v38  ;;  %v11084_v38 = vadd.f32 %v15296_v28, %v15294_v60  ;;  %v7475_v60 = vadd.f32 %v11093_v42, %v7200_v23  ;;  %v11096_v28 = vadd.f32 %v15312_v4, %v15310_v16 }
 0x2a3   : > { %v15336_v18 = vpop.f32.mrf.mxu1  ;;  %v11062_v16 = vadd.f32 %v15324_v58, %v15320_v44  ;;  %v11102_v39 = vadd.f32 %v15609_v51, %v15608_v27 }
 0x2a4   : > { %v15334_v25 = vpop.f32.mrf.mxu0  ;;  %15602 = vst [vmem:[#allocation6_spill] sm:$0xff] %v15336_v18  ;;  %v7197_v6 = vadd.f32 %v11044_v32, %v15280_v48  ;;  %v11050_v48 = vadd.f32 %v15308_v54, %v15304_v22 }
 0x2a5   : > { %v15340_v46 = vpop.f32.mrf.mxu1  ;;  %v11127_v43 = vadd.f32 %v15334_v25, %v15330_v29 }
 0x2a6   : > { %v15338_v0 = vpop.f32.mrf.mxu0  ;;  %15604 = vst [vmem:[#allocation8_spill] sm:$0xff] %v15340_v46  ;;  %v7196_v46 = vadd.f32 %v11041_v26, %v15278_v2  ;;  %v11121_v2 = vadd.f32 %v11120_v59, %v11119_v5  ;;  %v7472_v36 = vadd.f32 %v11084_v38, %v7197_v6  ;;  %v7473_v5 = vadd.f32 %v11087_v13, %v7198_v33 }
 0x2a7   : > { %15603 = vst [vmem:[#allocation7_spill] sm:$0xff] %v15338_v0  ;;  %v15344_v63 = vpop.f32.mrf.mxu1  ;;  %v7199_v1 = vadd.f32 %v11050_v48, %v15284_v3  ;;  %v15396_v3 = vld [vmem:[%s15457_s4] ss:$0 sm:$0xff] }
 0x2a8   : > { %v15342_v10 = vpop.f32.mrf.mxu0  ;;  %15606 = vst [vmem:[#allocation10_spill] sm:$0xff] %v15344_v63  ;;  %v7471_v47 = vadd.f32 %v11081_v30, %v7196_v46  ;;  %v7201_v30 = vadd.f32 %v11056_v9, %v15288_v21  ;;  %v7202_v21 = vadd.f32 %v11059_v31, %v15290_v15  ;;  %v7723_v40 = vadd.f32 %v11124_v41, %v7472_v36 }
 0x2a9   : > { %15605 = vst [vmem:[#allocation9_spill] sm:$0xff] %v15342_v10  ;;  %v11171_v53 = vpop.f32.mrf.mxu1  ;;  %v7474_v36 = vadd.f32 %v11090_v12, %v7199_v1 }
 0x2aa   : > { %v11131_v7 = vpop.f32.mrf.mxu0  ;;  %v7722_v20 = vadd.f32 %v11121_v2, %v7471_v47  ;;  %v7476_v52 = vadd.f32 %v11096_v28, %v7201_v30  ;;  %v7477_v25 = vadd.f32 %v11099_v35, %v7202_v21 }
 0x2ab   : > { %v11172_v8 = vpop.f32.mrf.mxu1  ;;  %v15613_v61 = vld [vmem:[#allocation6_spill] sm:$0xff] }
 0x2ac   : > { %v11132_v14 = vpop.f32.mrf.mxu0  ;;  %v11173_v22 = vadd.f32 %v11172_v8, %v11171_v53  ;;  %v8050_v15 = vadd.f32 %v11161_v17, %v7722_v20  ;;  %v15611_v53 = vld [vmem:[#allocation2_spill] sm:$0xff]  ;;  %v8051_v8 = vadd.f32 %v11164_v45, %v7723_v40 }
 0x2ad   : > { %v15346_v62 = vpop.f32.mrf.mxu1  ;;  %v11133_v37 = vadd.f32 %v11132_v14, %v11131_v7  ;;  %v7203_v14 = vadd.f32 %v11062_v16, %v15611_v53 }
 0x2ae   : > { %v11134_v49 = vpop.f32.mrf.mxu0  ;;  %15607 = vst [vmem:[#allocation11_spill] sm:$0xff] %v15346_v62  ;;  %v15614_v9 = vld [vmem:[#allocation7_spill] sm:$0xff] }
 0x2af   : > { %v11175_v0 = vpop.f32.mrf.mxu1  ;;  %v7726_v57 = vadd.f32 %v11133_v37, %v7475_v60  ;;  %v7478_v35 = vadd.f32 %v11102_v39, %v7203_v14 }
 0x2b0   : > { %v11135_v18 = vpop.f32.mrf.mxu0  ;;  %v15615_v6 = vld [vmem:[#allocation9_spill] sm:$0xff] }
 0x2b1   : > { %v15350_v63 = vpop.f32.mrf.mxu1  ;;  %v11136_v54 = vadd.f32 %v11135_v18, %v11134_v49  ;;  %v8054_v18 = vadd.f32 %v11173_v22, %v7726_v57  ;;  %v7724_v49 = vadd.f32 %v11127_v43, %v7473_v5  ;;  %v15616_v22 = vld [vmem:[#allocation8_spill] sm:$0xff] }
 0x2b2   : > { %v11137_v10 = vpop.f32.mrf.mxu0 }
 0x2b3   : > { %v11178_v19 = vpop.f32.mrf.mxu1  ;;  %v7727_v46 = vadd.f32 %v11136_v54, %v7476_v52 }
 0x2b4   : > { %v11138_v62 = vpop.f32.mrf.mxu0  ;;  %v11179_v37 = vadd.f32 %v11178_v19, %v15350_v63  ;;  %v15617_v63 = vld [vmem:[#allocation10_spill] sm:$0xff] }
 0x2b5   : > { %v15364_v24 = vpop.f32.mrf.mxu1  ;;  %v11139_v32 = vadd.f32 %v11138_v62, %v11137_v10  ;;  %v15610_v11 = vld [vmem:[#allocation11_spill] sm:$0xff]  ;;  %v15612_v62 = vld [vmem:[#allocation5_spill] sm:$0xff]  ;;  %v11170_v19 = vadd.f32 %v15617_v63, %v15616_v22 }
 0x2b6   : > { %v15359_v34 = vpop.f32.mrf.mxu0  ;;  %v11176_v55 = vadd.f32 %v11175_v0, %v15610_v11  ;;  %v11167_v42 = vadd.f32 %v15613_v61, %v15612_v62  ;;  %v11130_v0 = vadd.f32 %v15615_v6, %v15614_v9 }
 0x2b7   : > { %v15375_v56 = vpop.f32.mrf.mxu1  ;;  %v7728_v47 = vadd.f32 %v11139_v32, %v7477_v25 }
 0x2b8   : > { %v11141_v50 = vpop.f32.mrf.mxu0  ;;  %v8055_v41 = vadd.f32 %v11176_v55, %v7727_v46  ;;  %v8052_v57 = vadd.f32 %v11167_v42, %v7724_v49  ;;  %v7725_v21 = vadd.f32 %v11130_v0, %v7474_v36  ;;  %v11182_v45 = vadd.f32 %v15375_v56, %v15364_v24 }
 0x2b9   : > { %v11211_v4 = vpop.f32.mrf.mxu1  ;;  %v11142_v48 = vadd.f32 %v11141_v50, %v15359_v34  ;;  %v8056_v34 = vadd.f32 %v11179_v37, %v7728_v47 }
 0x2ba   : > { %v11199_v23 = vpop.f32.mrf.mxu0  ;;  %v8053_v32 = vadd.f32 %v11170_v19, %v7725_v21 }
 0x2bb   : > { %v11212_v58 = vpop.f32.mrf.mxu1  ;;  %v7729_v12 = vadd.f32 %v11142_v48, %v7478_v35 }
 0x2bc   : > { %v11200_v59 = vpop.f32.mrf.mxu0  ;;  %v11213_v7 = vadd.f32 %v11212_v58, %v11211_v4 }
 0x2bd   : > { %v11201_v44 = vadd.f32 %v11200_v59, %v11199_v23  ;;  %v11214_v10 = vpop.f32.mrf.mxu1 }
 0x2be   : > { %v11202_v29 = vpop.f32.mrf.mxu0  ;;  %v8329_v38 = vadd.f32 %v11213_v7, %v8054_v18  ;;  %v8057_v18 = vadd.f32 %v11182_v45, %v7729_v12 }
 0x2bf   : > { %v8325_v26 = vadd.f32 %v11201_v44, %v8050_v15  ;;  %v11215_v31 = vpop.f32.mrf.mxu1 }
 0x2c0   : > { %v11203_v2 = vpop.f32.mrf.mxu0  ;;  %v8344_v60 = vadd.f32 %v15396_v3, %v8329_v38  ;;  %v11216_v30 = vadd.f32 %v11215_v31, %v11214_v10 }
 0x2c1   : > { %v8340_v33 = vadd.f32 %v15396_v3, %v8325_v26  ;;  %v11204_v13 = vadd.f32 %v11203_v2, %v11202_v29  ;;  %v11217_v17 = vpop.f32.mrf.mxu1 }
 0x2c2   : > { %v11205_v28 = vpop.f32.mrf.mxu0  ;;  %8352 = vst [vmem:[%s15406_s16 + $0x20] sm:$0xff] %v8344_v60  ;;  %v8330_v54 = vadd.f32 %v11216_v30, %v8055_v41  ;;  %v8374_v49 = vmul.f32 %v8344_v60, %v8344_v60 }
 0x2c3   : > { %8348 = vst [vmem:[%s15406_s16] sm:$0xff] %v8340_v33  ;;  %v8326_v20 = vadd.f32 %v11204_v13, %v8051_v8  ;;  %v11218_v40 = vpop.f32.mrf.mxu1  ;;  %v8370_v52 = vmul.f32 %v8340_v33, %v8340_v33 }
 0x2c4   : > { %v11206_v23 = vpop.f32.mrf.mxu0  ;;  %v8345_v4 = vadd.f32 %v15396_v3, %v8330_v54  ;;  %v11219_v5 = vadd.f32 %v11218_v40, %v11217_v17 }
 0x2c5   : > { %v8341_v50 = vadd.f32 %v15396_v3, %v8326_v20  ;;  %v11207_v16 = vadd.f32 %v11206_v23, %v11205_v28  ;;  %v11220_v51 = vpop.f32.mrf.mxu1 }
 0x2c6   : > { %v11208_v1 = vpop.f32.mrf.mxu0  ;;  %8353 = vst [vmem:[%s15406_s16 + $0x28] sm:$0xff] %v8345_v4  ;;  %v8331_v39 = vadd.f32 %v11219_v5, %v8056_v34  ;;  %v8375_v42 = vmul.f32 %v8345_v4, %v8345_v4 }
 0x2c7   : > { %8349 = vst [vmem:[%s15406_s16 + $0x8] sm:$0xff] %v8341_v50  ;;  %v8356_v43 = vadd.f32 %v8341_v50, %v8340_v33  ;;  %v8371_v59 = vmul.f32 %v8341_v50, %v8341_v50  ;;  %v8327_v27 = vadd.f32 %v11207_v16, %v8052_v57  ;;  %v11221_v58 = vpop.f32.mrf.mxu1 }
 0x2c8   : > { %v11209_v15 = vpop.f32.mrf.mxu0  ;;  %v8346_v46 = vadd.f32 %v15396_v3, %v8331_v39  ;;  %v11222_v11 = vadd.f32 %v11221_v58, %v11220_v51 }
 0x2c9   : > { %v8378_v44 = vadd.f32 %v8371_v59, %v8370_v52  ;;  %v8342_v24 = vadd.f32 %v15396_v3, %v8327_v27  ;;  %v11210_v56 = vadd.f32 %v11209_v15, %v11208_v1 }
 0x2ca   : > { %8354 = vst [vmem:[%s15406_s16 + $0x30] sm:$0xff] %v8346_v46  ;;  %v8332_v25 = vadd.f32 %v11222_v11, %v8057_v18  ;;  %v8376_v0 = vmul.f32 %v8346_v46, %v8346_v46 }
 0x2cb   : > { %8350 = vst [vmem:[%s15406_s16 + $0x10] sm:$0xff] %v8342_v24  ;;  %v8357_v55 = vadd.f32 %v8356_v43, %v8342_v24  ;;  %v8372_v7 = vmul.f32 %v8342_v24, %v8342_v24  ;;  %v8328_v29 = vadd.f32 %v11210_v56, %v8053_v32 }
 0x2cc   : > { %v8347_v8 = vadd.f32 %v15396_v3, %v8332_v25 }
 0x2cd   : > { %v8379_v53 = vadd.f32 %v8378_v44, %v8372_v7  ;;  %v8343_v14 = vadd.f32 %v15396_v3, %v8328_v29 }
 0x2ce   : > { %8355 = vst [vmem:[%s15406_s16 + $0x38] sm:$0xff] %v8347_v8  ;;  %v8377_v37 = vmul.f32 %v8347_v8, %v8347_v8 }
 0x2cf   : > { %8351 = vst [vmem:[%s15406_s16 + $0x18] sm:$0xff] %v8343_v14  ;;  %v8358_v26 = vadd.f32 %v8357_v55, %v8343_v14  ;;  %v8373_v10 = vmul.f32 %v8343_v14, %v8343_v14 }
 0x2d1   : > { %v8359_v62 = vadd.f32 %v8358_v26, %v8344_v60  ;;  %v8380_v61 = vadd.f32 %v8379_v53, %v8373_v10 }
 0x2d3   : > { %v8381_v9 = vadd.f32 %v8380_v61, %v8374_v49  ;;  %v8360_v6 = vadd.f32 %v8359_v62, %v8345_v4 }
 0x2d5   : > { %v8361_v38 = vadd.f32 %v8360_v6, %v8346_v46  ;;  %v8382_v2 = vadd.f32 %v8381_v9, %v8375_v42 }
 0x2d7   : > { %v8362_v47 = vadd.f32 %v8361_v38, %v8347_v8  ;;  %v8383_v33 = vadd.f32 %v8382_v2, %v8376_v0 }
 0x2d9   : > { %v8363_v13 = vrot.slane %v8362_v47, 4  ;;  %v8384_v3 = vadd.f32 %v8383_v33, %v8377_v37 }
 0x2db   : > { %v8364_v31 = vadd.f32 %v8363_v13, %v8362_v47  ;;  %v8385_v41 = vrot.slane %v8384_v3, 4 }
 0x2dd   : > { %v8365_v48 = vrot.slane %v8364_v31, 2  ;;  %v8386_v30 = vadd.f32 %v8385_v41, %v8384_v3 }
 0x2df   : > { %v8366_v60 = vadd.f32 %v8365_v48, %v8364_v31  ;;  %v8387_v28 = vrot.slane %v8386_v30, 2 }
 0x2e1   : > { %v8367_v36 = vrot.slane %v8366_v60, 1  ;;  %v8388_v20 = vadd.f32 %v8387_v28, %v8386_v30 }
 0x2e3   : > { %v8368_v17 = vadd.f32 %v8367_v36, %v8366_v60  ;;  %v8389_v35 = vrot.slane %v8388_v20, 1 }
 0x2e5   : > { %8369 = vst [vmem:[%s426_s19] sm:$0x1] %v8368_v17  ;;  %v8390_v57 = vadd.f32 %v8389_v35, %v8388_v20 }
 0x2e7   : > { %8391 = vst [vmem:[%s433_s15] sm:$0x1] %v8390_v57 }
 0x2e8 PF: > { %s18_s28 = sadd.s32 1, %s11855_s28   ;;  %s15618_s24 = smov %s11847_s26 }
 0x2e9   : > { %p15_p10 = scmp.ge.s32.totalorder %s18_s28, 18   ;;  %s15619_s25 = smov %s11851_s27 }
 0x2ea   : > { %s15620_s26 = smov %s15623_s29  ;;  %s15621_s27 = smov %s15627_s30 }
 0x2eb   :  { %17 = sbr.rel (!%p15_p10) target bundleno = 3 (0x3), region = 126 }

</bundles_post_ra>
